<compile_context>
chip_gen: v5e
topology: v5e:2x2
jax: 0.10.0
libtpu: 0.0.40
codegen_flags: <defaults>
</compile_context>

<pallas_src>
import numpy as np

import jax
import jax.numpy as jnp
from jax import lax
from jax.experimental import pallas as pl
from jax.experimental.pallas import tpu as pltpu


# ------------------------------- fused kernel --------------------------------

def _mcnn_kernel(x_ref, w1_ref, b1_ref, m1_ref, w2_ref, b2_ref, m2_ref,
                 sel1_ref, sel2_ref, fc1w_ref, fc1b_ref, fc2w_ref, fc2b_ref,
                 o_ref,
                 pad0_ref, mx1_ref, pad1_ref, taps2_ref, mx2_ref, flat_ref):
    # x_ref:   (1, 1, 784)  raw 28x28 image, lane-dense row (h*28+w)
    # w1_ref:  (9, 32, 1)   conv1 taps (tap, Cout, 1)       b1_ref: (32, 1)
    # m1_ref:  (2, 784)     conv1 W-border masks [w!=0, w!=27]
    # w2_ref:  (64, 288)    conv2 weights, col index = tap*32 + Cin  b2_ref: (64, 1)
    # m2_ref:  (2, 196)     conv2 W-border masks [w!=0, w!=13]
    # sel1_ref:(784, 196)   pool1 0/1 column selection     sel2_ref: (196, 49) pool2 selection
    # fc1w_ref:(3136, 128)  fc1b_ref:(1, 128)  fc2w_ref:(128, 10)  fc2b_ref:(1, 10)
    # o_ref:   (1, 1, 10)   logits for this image
    # Scratches (data windows fully rewritten every grid step; only 128-aligned margin
    # regions are re-zeroed, so "parallel" core-splitting on v7x stays correct):
    #   pad0_ref (1,1024): padded input row, data @ [128,912)
    #   mx1_ref  (32,896): pool1 shift buffer, data @ [0,784)
    #   pad1_ref (32,384): padded pooled conv1, data @ [128,324)
    #   taps2_ref(288,196): conv2 im2col stack
    #   mx2_ref  (64,256): pool2 shift buffer, data @ [0,196)
    #   flat_ref (1,3136): flattened (C,H,W) features row
    f32 = jnp.float32

    # ---- conv1 (3x3, pad=1) + bias + ReLU over all 784 positions -------------
    pad0_ref[:, 0:128] = jnp.zeros((1, 128), f32)        # left margin (zero padding rows)
    pad0_ref[:, 896:1024] = jnp.zeros((1, 128), f32)     # right margin ([896,912) rewritten below)
    pad0_ref[:, 128:912] = x_ref[0]                      # (1, 784) image row

    not_l28 = m1_ref[0:1, :]
    not_r28 = m1_ref[1:2, :]
    acc1 = jnp.zeros((32, 784), f32)
    for kh in range(3):
        for kw in range(3):
            d = (kh - 1) * 28 + (kw - 1)
            a = pad0_ref[:, 128 + d:128 + d + 784]       # (1, 784) lane-shifted read
            if kw == 0:
                a = a * not_l28                          # zero w==0 columns
            elif kw == 2:
                a = a * not_r28                          # zero w==27 columns
            acc1 = acc1 + w1_ref[kh * 3 + kw] * a        # (32,1)*(1,784) broadcast MAC
    p1full = jnp.maximum(acc1 + b1_ref[...], 0.0)        # (32, 784)

    # ---- pool1: max over lane shifts {0,1,28,29}, then exact 0/1 selection ----
    mx1_ref[:, 768:896] = jnp.zeros((32, 128), f32)      # margin ([768,784) rewritten below)
    mx1_ref[:, 0:784] = p1full
    m1v = jnp.maximum(jnp.maximum(p1full, mx1_ref[:, 1:785]),
                      jnp.maximum(mx1_ref[:, 28:812], mx1_ref[:, 29:813]))
    p1 = jnp.dot(m1v, sel1_ref[...], preferred_element_type=f32)     # (32, 196)

    # ---- conv2 (3x3, pad=1) + bias + ReLU as ONE K=288 matmul -----------------
    pad1_ref[:, 0:128] = jnp.zeros((32, 128), f32)
    pad1_ref[:, 256:384] = jnp.zeros((32, 128), f32)     # [256,324) rewritten below
    pad1_ref[:, 128:324] = p1
    not_l14 = m2_ref[0:1, :]
    not_r14 = m2_ref[1:2, :]
    for kh in range(3):
        for kw in range(3):
            d = (kh - 1) * 14 + (kw - 1)
            a = pad1_ref[:, 128 + d:128 + d + 196]       # (32, 196)
            if kw == 0:
                a = a * not_l14
            elif kw == 2:
                a = a * not_r14
            t = kh * 3 + kw
            taps2_ref[t * 32:(t + 1) * 32, :] = a        # sublane-aligned stack write
    o2 = jnp.maximum(jnp.dot(w2_ref[...], taps2_ref[...],
                             preferred_element_type=f32) + b2_ref[...], 0.0)   # (64, 196)

    # ---- pool2: max over lane shifts {0,1,14,15}, then exact 0/1 selection ----
    mx2_ref[:, 128:256] = jnp.zeros((64, 128), f32)      # [128,196) rewritten below
    mx2_ref[:, 0:196] = o2
    m2v = jnp.maximum(jnp.maximum(o2, mx2_ref[:, 1:197]),
                      jnp.maximum(mx2_ref[:, 14:210], mx2_ref[:, 15:211]))
    feats = jnp.dot(m2v, sel2_ref[...], preferred_element_type=f32)   # (64, 49), (C,H,W) order

    # ---- flatten to PyTorch order + fc1 + ReLU + fc2 (fused MLP) --------------
    for c in range(64):
        flat_ref[:, c * 49:(c + 1) * 49] = feats[c:c + 1, :]
    hid = jnp.dot(flat_ref[...], fc1w_ref[...], preferred_element_type=f32)    # (1, 128)
    hid = jnp.maximum(hid + fc1b_ref[...], 0.0)
    o_ref[0] = jnp.dot(hid, fc2w_ref[...], preferred_element_type=f32) + fc2b_ref[...]


# ------------------------------- wrapper --------------------------------------

def _mcnn_constants():
    """0/1 masks and pooling selection matrices (numpy -> baked-in constants)."""
    pw28 = np.arange(784) % 28
    masks1 = np.stack([(pw28 != 0), (pw28 != 27)]).astype(np.float32)          # (2, 784)
    pw14 = np.arange(196) % 14
    masks2 = np.stack([(pw14 != 0), (pw14 != 13)]).astype(np.float32)          # (2, 196)
    q1 = np.arange(196)
    base1 = 56 * (q1 // 14) + 2 * (q1 % 14)
    sel1 = (np.arange(784)[:, None] == base1[None, :]).astype(np.float32)      # (784, 196)
    q2 = np.arange(49)
    base2 = 28 * (q2 // 7) + 2 * (q2 % 7)
    sel2 = (np.arange(196)[:, None] == base2[None, :]).astype(np.float32)      # (196, 49)
    return masks1, masks2, sel1, sel2


def mcnn_forward(x_nchw, params):
    """Pallas MCNN forward. Input NCHW like PyTorch; returns (B, 10) logits."""
    B, Cin, H, W = x_nchw.shape
    assert (Cin, H, W) == (1, 28, 28), "fc1 = Linear(64*7*7, .) fixes the input to 1x28x28"

    x_rows = x_nchw.astype(jnp.float32).reshape(B, 1, 784)                      # lane-dense rows

    w1e = params["w1"].reshape(32, 9).T.reshape(9, 32, 1).astype(jnp.float32)   # (tap, Cout, 1)
    b1c = params["b1"].reshape(32, 1).astype(jnp.float32)
    w2m = jnp.transpose(params["w2"], (0, 2, 3, 1)).reshape(64, 288)            # (Cout, tap*32+Cin)
    w2m = w2m.astype(jnp.float32)
    b2c = params["b2"].reshape(64, 1).astype(jnp.float32)
    fc1w = params["fc1_w"].astype(jnp.float32)                                  # (3136, 128)
    fc1b = params["fc1_b"].reshape(1, -1).astype(jnp.float32)
    fc2w = params["fc2_w"].astype(jnp.float32)                                  # (128, 10)
    fc2b = params["fc2_b"].reshape(1, -1).astype(jnp.float32)

    masks1, masks2, sel1, sel2 = _mcnn_constants()
    H1 = fc1w.shape[1]
    O = fc2w.shape[1]

    out = pl.pallas_call(
        _mcnn_kernel,
        out_shape=jax.ShapeDtypeStruct((B, 1, O), jnp.float32),
        grid=(B,),
        in_specs=[
            pl.BlockSpec((1, 1, 784), lambda i: (i, 0, 0)),   # per-image raw pixel row
            pl.BlockSpec((9, 32, 1), lambda i: (0, 0, 0)),    # resident weights / constants
            pl.BlockSpec((32, 1), lambda i: (0, 0)),
            pl.BlockSpec((2, 784), lambda i: (0, 0)),
            pl.BlockSpec((64, 288), lambda i: (0, 0)),
            pl.BlockSpec((64, 1), lambda i: (0, 0)),
            pl.BlockSpec((2, 196), lambda i: (0, 0)),
            pl.BlockSpec((784, 196), lambda i: (0, 0)),
            pl.BlockSpec((196, 49), lambda i: (0, 0)),
            pl.BlockSpec((3136, H1), lambda i: (0, 0)),
            pl.BlockSpec((1, H1), lambda i: (0, 0)),
            pl.BlockSpec((H1, O), lambda i: (0, 0)),
            pl.BlockSpec((1, O), lambda i: (0, 0)),
        ],
        out_specs=pl.BlockSpec((1, 1, O), lambda i: (i, 0, 0)),
        scratch_shapes=[
            pltpu.VMEM((1, 1024), jnp.float32),    # padded input row
            pltpu.VMEM((32, 896), jnp.float32),    # pool1 shift buffer
            pltpu.VMEM((32, 384), jnp.float32),    # padded pooled conv1
            pltpu.VMEM((288, 196), jnp.float32),   # conv2 im2col stack (K=288)
            pltpu.VMEM((64, 256), jnp.float32),    # pool2 shift buffer
            pltpu.VMEM((1, 3136), jnp.float32),    # flattened feature row
        ],
        # Batch axis is independent -> "parallel" (lets v7x split the two images across its
        # two TensorCores; near-zero codegen impact on single-TC v5e/v6e).
        compiler_params=pltpu.CompilerParams(dimension_semantics=("parallel",)),
    )(x_rows, w1e, b1c, masks1, w2m, b2c, masks2, sel1, sel2, fc1w, fc1b, fc2w, fc2b)
    return out.reshape(B, O)


# ------------------------- pure-JAX reference --------------------------------

def mcnn_reference(x_nchw, params):
    def conv(y, w, b):
        dn = lax.conv_dimension_numbers(y.shape, w.shape, ("NCHW", "OIHW", "NCHW"))
        y = lax.conv_general_dilated(y, w, (1, 1), ((1, 1), (1, 1)),
                                     dimension_numbers=dn,
                                     precision=lax.Precision.HIGHEST)
        return jax.nn.relu(y + b[None, :, None, None])

    def pool(y):
        return lax.reduce_window(y, -jnp.inf, lax.max,
                                 (1, 1, 2, 2), (1, 1, 2, 2), "VALID")

    y = pool(conv(x_nchw, params["w1"], params["b1"]))
    y = pool(conv(y, params["w2"], params["b2"]))
    y = y.reshape(y.shape[0], -1)
    y = jax.nn.relu(y @ params["fc1_w"] + params["fc1_b"])
    return y @ params["fc2_w"] + params["fc2_b"]


# ------------------------------ params / main ---------------------------------

def init_params(key):
    ks = jax.random.split(key, 8)

    def u(k, shape, fan_in):
        bound = float(fan_in) ** -0.5
        return jax.random.uniform(k, shape, jnp.float32, -bound, bound)

    return {
        "w1": u(ks[0], (32, 1, 3, 3), 1 * 9),    "b1": u(ks[1], (32,), 1 * 9),
        "w2": u(ks[2], (64, 32, 3, 3), 32 * 9),  "b2": u(ks[3], (64,), 32 * 9),
        "fc1_w": u(ks[4], (64 * 7 * 7, 128), 64 * 7 * 7),
        "fc1_b": u(ks[5], (128,), 64 * 7 * 7),
        "fc2_w": u(ks[6], (128, 10), 128),       "fc2_b": u(ks[7], (10,), 128),
    }


if __name__ == "__main__":
    key = jax.random.PRNGKey(0)
    k_x, k_p = jax.random.split(key)
    # fc1 = Linear(64*7*7, 128) fixes the spatial size to 28x28; batch=2.
    x = jax.random.normal(k_x, (2, 1, 28, 28), jnp.float32)
    params = init_params(k_p)

    out = jax.jit(mcnn_forward)(x, params)
    out = jax.block_until_ready(out)
    assert out.shape == (2, 10) and out.dtype == jnp.float32

    ref = jax.jit(mcnn_reference)(x, params)
    ref = jax.block_until_ready(ref)
    assert jnp.allclose(out, ref, atol=2e-3, rtol=2e-3), (
        f"mismatch: max abs err {jnp.max(jnp.abs(out - ref))}")

    print("KERNEL_OK")
</pallas_src>

<mosaic_0001>
module attributes {stable_mosaic.version = 11 : i64} {
  func.func @_mcnn_kernel(%arg0: i32, %arg1: memref<1x1x784xf32, #tpu.memory_space<vmem>>, %arg2: memref<9x32x1xf32, #tpu.memory_space<vmem>>, %arg3: memref<32x1xf32, #tpu.memory_space<vmem>>, %arg4: memref<2x784xf32, #tpu.memory_space<vmem>>, %arg5: memref<64x288xf32, #tpu.memory_space<vmem>>, %arg6: memref<64x1xf32, #tpu.memory_space<vmem>>, %arg7: memref<2x196xf32, #tpu.memory_space<vmem>>, %arg8: memref<784x196xf32, #tpu.memory_space<vmem>>, %arg9: memref<196x49xf32, #tpu.memory_space<vmem>>, %arg10: memref<3136x128xf32, #tpu.memory_space<vmem>>, %arg11: memref<1x128xf32, #tpu.memory_space<vmem>>, %arg12: memref<128x10xf32, #tpu.memory_space<vmem>>, %arg13: memref<1x10xf32, #tpu.memory_space<vmem>>, %arg14: memref<1x1x10xf32, #tpu.memory_space<vmem>>, %arg15: memref<1x1024xf32, #tpu.memory_space<vmem>>, %arg16: memref<32x896xf32, #tpu.memory_space<vmem>>, %arg17: memref<32x384xf32, #tpu.memory_space<vmem>>, %arg18: memref<288x196xf32, #tpu.memory_space<vmem>>, %arg19: memref<64x256xf32, #tpu.memory_space<vmem>>, %arg20: memref<1x3136xf32, #tpu.memory_space<vmem>>) attributes {dimension_semantics = [#tpu.dimension_semantics<parallel>], iteration_bounds = array<i64: 2>, scalar_prefetch = 0 : i64, scratch_operands = 6 : i64, tpu.core_type = #tpu.core_type<tc>, window_params = [{transform_indices = @transform_0, window_bounds = array<i64: 1, 1, 784>}, {pipeline_mode = #tpu.pipeline_mode<synchronous>, transform_indices = @transform_1, window_bounds = array<i64: 9, 32, 1>}, {pipeline_mode = #tpu.pipeline_mode<synchronous>, transform_indices = @transform_2, window_bounds = array<i64: 32, 1>}, {pipeline_mode = #tpu.pipeline_mode<synchronous>, transform_indices = @transform_3, window_bounds = array<i64: 2, 784>}, {pipeline_mode = #tpu.pipeline_mode<synchronous>, transform_indices = @transform_4, window_bounds = array<i64: 64, 288>}, {pipeline_mode = #tpu.pipeline_mode<synchronous>, transform_indices = @transform_5, window_bounds = array<i64: 64, 1>}, {pipeline_mode = #tpu.pipeline_mode<synchronous>, transform_indices = @transform_6, window_bounds = array<i64: 2, 196>}, {pipeline_mode = #tpu.pipeline_mode<synchronous>, transform_indices = @transform_7, window_bounds = array<i64: 784, 196>}, {pipeline_mode = #tpu.pipeline_mode<synchronous>, transform_indices = @transform_8, window_bounds = array<i64: 196, 49>}, {pipeline_mode = #tpu.pipeline_mode<synchronous>, transform_indices = @transform_9, window_bounds = array<i64: 3136, 128>}, {pipeline_mode = #tpu.pipeline_mode<synchronous>, transform_indices = @transform_10, window_bounds = array<i64: 1, 128>}, {pipeline_mode = #tpu.pipeline_mode<synchronous>, transform_indices = @transform_11, window_bounds = array<i64: 128, 10>}, {pipeline_mode = #tpu.pipeline_mode<synchronous>, transform_indices = @transform_12, window_bounds = array<i64: 1, 10>}, {transform_indices = @transform_13, window_bounds = array<i64: 1, 1, 10>}]} {
    %cst = arith.constant 0.000000e+00 : f32
    %0 = vector.broadcast %cst : f32 to vector<1x128xf32>
    %c0 = arith.constant 0 : index
    %c0_0 = arith.constant 0 : index
    %1 = vector.load %arg15[%c0, %c0_0] : memref<1x1024xf32, #tpu.memory_space<vmem>>, vector<1x128xf32>
    tpu.vector_store %arg15[%c0, %c0_0], %0 {strides = array<i32>} : memref<1x1024xf32, #tpu.memory_space<vmem>>, vector<1x128xf32>,
    %cst_1 = arith.constant 0.000000e+00 : f32
    %2 = vector.broadcast %cst_1 : f32 to vector<1x128xf32>
    %c0_2 = arith.constant 0 : index
    %c896 = arith.constant 896 : index
    %3 = vector.load %arg15[%c0_2, %c896] : memref<1x1024xf32, #tpu.memory_space<vmem>>, vector<1x128xf32>
    tpu.vector_store %arg15[%c0_2, %c896], %2 {strides = array<i32>} : memref<1x1024xf32, #tpu.memory_space<vmem>>, vector<1x128xf32>,
    %c0_3 = arith.constant 0 : index
    %c0_4 = arith.constant 0 : index
    %c0_5 = arith.constant 0 : index
    %4 = vector.load %arg1[%c0_3, %c0_4, %c0_5] : memref<1x1x784xf32, #tpu.memory_space<vmem>>, vector<1x1x784xf32>
    %5 = vector.shape_cast %4 : vector<1x1x784xf32> to vector<1x784xf32>
    %c0_6 = arith.constant 0 : index
    %c128 = arith.constant 128 : index
    %6 = vector.load %arg15[%c0_6, %c128] : memref<1x1024xf32, #tpu.memory_space<vmem>>, vector<1x784xf32>
    tpu.vector_store %arg15[%c0_6, %c128], %5 {strides = array<i32>} : memref<1x1024xf32, #tpu.memory_space<vmem>>, vector<1x784xf32>,
    %c0_7 = arith.constant 0 : index
    %c0_8 = arith.constant 0 : index
    %7 = vector.load %arg4[%c0_7, %c0_8] : memref<2x784xf32, #tpu.memory_space<vmem>>, vector<1x784xf32>
    %c1 = arith.constant 1 : index
    %c0_9 = arith.constant 0 : index
    %8 = vector.load %arg4[%c1, %c0_9] : memref<2x784xf32, #tpu.memory_space<vmem>>, vector<1x784xf32>
    %cst_10 = arith.constant 0.000000e+00 : f32
    %9 = vector.broadcast %cst_10 : f32 to vector<32x784xf32>
    %c0_11 = arith.constant 0 : index
    %c99 = arith.constant 99 : index
    %10 = vector.load %arg15[%c0_11, %c99] : memref<1x1024xf32, #tpu.memory_space<vmem>>, vector<1x784xf32>
    %11 = arith.mulf %10, %7 : vector<1x784xf32>
    %c0_12 = arith.constant 0 : index
    %c0_13 = arith.constant 0 : index
    %c0_14 = arith.constant 0 : index
    %12 = vector.load %arg2[%c0_12, %c0_13, %c0_14] : memref<9x32x1xf32, #tpu.memory_space<vmem>>, vector<1x32x1xf32>
    %13 = vector.shape_cast %12 : vector<1x32x1xf32> to vector<32x1xf32>
    %14 = vector.broadcast %13 : vector<32x1xf32> to vector<32x784xf32>
    %15 = vector.broadcast %11 : vector<1x784xf32> to vector<32x784xf32>
    %16 = arith.mulf %14, %15 : vector<32x784xf32>
    %17 = arith.addf %9, %16 : vector<32x784xf32>
    %c0_15 = arith.constant 0 : index
    %c100 = arith.constant 100 : index
    %18 = vector.load %arg15[%c0_15, %c100] : memref<1x1024xf32, #tpu.memory_space<vmem>>, vector<1x784xf32>
    %c1_16 = arith.constant 1 : index
    %c0_17 = arith.constant 0 : index
    %c0_18 = arith.constant 0 : index
    %19 = vector.load %arg2[%c1_16, %c0_17, %c0_18] : memref<9x32x1xf32, #tpu.memory_space<vmem>>, vector<1x32x1xf32>
    %20 = vector.shape_cast %19 : vector<1x32x1xf32> to vector<32x1xf32>
    %21 = vector.broadcast %20 : vector<32x1xf32> to vector<32x784xf32>
    %22 = vector.broadcast %18 : vector<1x784xf32> to vector<32x784xf32>
    %23 = arith.mulf %21, %22 : vector<32x784xf32>
    %24 = arith.addf %17, %23 : vector<32x784xf32>
    %c0_19 = arith.constant 0 : index
    %c101 = arith.constant 101 : index
    %25 = vector.load %arg15[%c0_19, %c101] : memref<1x1024xf32, #tpu.memory_space<vmem>>, vector<1x784xf32>
    %26 = arith.mulf %25, %8 : vector<1x784xf32>
    %c2 = arith.constant 2 : index
    %c0_20 = arith.constant 0 : index
    %c0_21 = arith.constant 0 : index
    %27 = vector.load %arg2[%c2, %c0_20, %c0_21] : memref<9x32x1xf32, #tpu.memory_space<vmem>>, vector<1x32x1xf32>
    %28 = vector.shape_cast %27 : vector<1x32x1xf32> to vector<32x1xf32>
    %29 = vector.broadcast %28 : vector<32x1xf32> to vector<32x784xf32>
    %30 = vector.broadcast %26 : vector<1x784xf32> to vector<32x784xf32>
    %31 = arith.mulf %29, %30 : vector<32x784xf32>
    %32 = arith.addf %24, %31 : vector<32x784xf32>
    %c0_22 = arith.constant 0 : index
    %c127 = arith.constant 127 : index
    %33 = vector.load %arg15[%c0_22, %c127] : memref<1x1024xf32, #tpu.memory_space<vmem>>, vector<1x784xf32>
    %34 = arith.mulf %33, %7 : vector<1x784xf32>
    %c3 = arith.constant 3 : index
    %c0_23 = arith.constant 0 : index
    %c0_24 = arith.constant 0 : index
    %35 = vector.load %arg2[%c3, %c0_23, %c0_24] : memref<9x32x1xf32, #tpu.memory_space<vmem>>, vector<1x32x1xf32>
    %36 = vector.shape_cast %35 : vector<1x32x1xf32> to vector<32x1xf32>
    %37 = vector.broadcast %36 : vector<32x1xf32> to vector<32x784xf32>
    %38 = vector.broadcast %34 : vector<1x784xf32> to vector<32x784xf32>
    %39 = arith.mulf %37, %38 : vector<32x784xf32>
    %40 = arith.addf %32, %39 : vector<32x784xf32>
    %c0_25 = arith.constant 0 : index
    %c128_26 = arith.constant 128 : index
    %41 = vector.load %arg15[%c0_25, %c128_26] : memref<1x1024xf32, #tpu.memory_space<vmem>>, vector<1x784xf32>
    %c4 = arith.constant 4 : index
    %c0_27 = arith.constant 0 : index
    %c0_28 = arith.constant 0 : index
    %42 = vector.load %arg2[%c4, %c0_27, %c0_28] : memref<9x32x1xf32, #tpu.memory_space<vmem>>, vector<1x32x1xf32>
    %43 = vector.shape_cast %42 : vector<1x32x1xf32> to vector<32x1xf32>
    %44 = vector.broadcast %43 : vector<32x1xf32> to vector<32x784xf32>
    %45 = vector.broadcast %41 : vector<1x784xf32> to vector<32x784xf32>
    %46 = arith.mulf %44, %45 : vector<32x784xf32>
    %47 = arith.addf %40, %46 : vector<32x784xf32>
    %c0_29 = arith.constant 0 : index
    %c129 = arith.constant 129 : index
    %48 = vector.load %arg15[%c0_29, %c129] : memref<1x1024xf32, #tpu.memory_space<vmem>>, vector<1x784xf32>
    %49 = arith.mulf %48, %8 : vector<1x784xf32>
    %c5 = arith.constant 5 : index
    %c0_30 = arith.constant 0 : index
    %c0_31 = arith.constant 0 : index
    %50 = vector.load %arg2[%c5, %c0_30, %c0_31] : memref<9x32x1xf32, #tpu.memory_space<vmem>>, vector<1x32x1xf32>
    %51 = vector.shape_cast %50 : vector<1x32x1xf32> to vector<32x1xf32>
    %52 = vector.broadcast %51 : vector<32x1xf32> to vector<32x784xf32>
    %53 = vector.broadcast %49 : vector<1x784xf32> to vector<32x784xf32>
    %54 = arith.mulf %52, %53 : vector<32x784xf32>
    %55 = arith.addf %47, %54 : vector<32x784xf32>
    %c0_32 = arith.constant 0 : index
    %c155 = arith.constant 155 : index
    %56 = vector.load %arg15[%c0_32, %c155] : memref<1x1024xf32, #tpu.memory_space<vmem>>, vector<1x784xf32>
    %57 = arith.mulf %56, %7 : vector<1x784xf32>
    %c6 = arith.constant 6 : index
    %c0_33 = arith.constant 0 : index
    %c0_34 = arith.constant 0 : index
    %58 = vector.load %arg2[%c6, %c0_33, %c0_34] : memref<9x32x1xf32, #tpu.memory_space<vmem>>, vector<1x32x1xf32>
    %59 = vector.shape_cast %58 : vector<1x32x1xf32> to vector<32x1xf32>
    %60 = vector.broadcast %59 : vector<32x1xf32> to vector<32x784xf32>
    %61 = vector.broadcast %57 : vector<1x784xf32> to vector<32x784xf32>
    %62 = arith.mulf %60, %61 : vector<32x784xf32>
    %63 = arith.addf %55, %62 : vector<32x784xf32>
    %c0_35 = arith.constant 0 : index
    %c156 = arith.constant 156 : index
    %64 = vector.load %arg15[%c0_35, %c156] : memref<1x1024xf32, #tpu.memory_space<vmem>>, vector<1x784xf32>
    %c7 = arith.constant 7 : index
    %c0_36 = arith.constant 0 : index
    %c0_37 = arith.constant 0 : index
    %65 = vector.load %arg2[%c7, %c0_36, %c0_37] : memref<9x32x1xf32, #tpu.memory_space<vmem>>, vector<1x32x1xf32>
    %66 = vector.shape_cast %65 : vector<1x32x1xf32> to vector<32x1xf32>
    %67 = vector.broadcast %66 : vector<32x1xf32> to vector<32x784xf32>
    %68 = vector.broadcast %64 : vector<1x784xf32> to vector<32x784xf32>
    %69 = arith.mulf %67, %68 : vector<32x784xf32>
    %70 = arith.addf %63, %69 : vector<32x784xf32>
    %c0_38 = arith.constant 0 : index
    %c157 = arith.constant 157 : index
    %71 = vector.load %arg15[%c0_38, %c157] : memref<1x1024xf32, #tpu.memory_space<vmem>>, vector<1x784xf32>
    %72 = arith.mulf %71, %8 : vector<1x784xf32>
    %c8 = arith.constant 8 : index
    %c0_39 = arith.constant 0 : index
    %c0_40 = arith.constant 0 : index
    %73 = vector.load %arg2[%c8, %c0_39, %c0_40] : memref<9x32x1xf32, #tpu.memory_space<vmem>>, vector<1x32x1xf32>
    %74 = vector.shape_cast %73 : vector<1x32x1xf32> to vector<32x1xf32>
    %75 = vector.broadcast %74 : vector<32x1xf32> to vector<32x784xf32>
    %76 = vector.broadcast %72 : vector<1x784xf32> to vector<32x784xf32>
    %77 = arith.mulf %75, %76 : vector<32x784xf32>
    %78 = arith.addf %70, %77 : vector<32x784xf32>
    %c0_41 = arith.constant 0 : index
    %c0_42 = arith.constant 0 : index
    %79 = vector.load %arg3[%c0_41, %c0_42] : memref<32x1xf32, #tpu.memory_space<vmem>>, vector<32x1xf32>
    %80 = vector.broadcast %79 : vector<32x1xf32> to vector<32x784xf32>
    %81 = arith.addf %78, %80 : vector<32x784xf32>
    %cst_43 = arith.constant 0.000000e+00 : f32
    %82 = vector.broadcast %cst_43 : f32 to vector<32x784xf32>
    %83 = arith.maximumf %81, %82 : vector<32x784xf32>
    %cst_44 = arith.constant 0.000000e+00 : f32
    %84 = vector.broadcast %cst_44 : f32 to vector<32x128xf32>
    %c0_45 = arith.constant 0 : index
    %c768 = arith.constant 768 : index
    %85 = vector.load %arg16[%c0_45, %c768] : memref<32x896xf32, #tpu.memory_space<vmem>>, vector<32x128xf32>
    tpu.vector_store %arg16[%c0_45, %c768], %84 {strides = array<i32>} : memref<32x896xf32, #tpu.memory_space<vmem>>, vector<32x128xf32>,
    %c0_46 = arith.constant 0 : index
    %c0_47 = arith.constant 0 : index
    %86 = vector.load %arg16[%c0_46, %c0_47] : memref<32x896xf32, #tpu.memory_space<vmem>>, vector<32x784xf32>
    tpu.vector_store %arg16[%c0_46, %c0_47], %83 {strides = array<i32>} : memref<32x896xf32, #tpu.memory_space<vmem>>, vector<32x784xf32>,
    %c0_48 = arith.constant 0 : index
    %c1_49 = arith.constant 1 : index
    %87 = vector.load %arg16[%c0_48, %c1_49] : memref<32x896xf32, #tpu.memory_space<vmem>>, vector<32x784xf32>
    %88 = arith.maximumf %83, %87 : vector<32x784xf32>
    %c0_50 = arith.constant 0 : index
    %c28 = arith.constant 28 : index
    %89 = vector.load %arg16[%c0_50, %c28] : memref<32x896xf32, #tpu.memory_space<vmem>>, vector<32x784xf32>
    %c0_51 = arith.constant 0 : index
    %c29 = arith.constant 29 : index
    %90 = vector.load %arg16[%c0_51, %c29] : memref<32x896xf32, #tpu.memory_space<vmem>>, vector<32x784xf32>
    %91 = arith.maximumf %89, %90 : vector<32x784xf32>
    %92 = arith.maximumf %88, %91 : vector<32x784xf32>
    %c0_52 = arith.constant 0 : index
    %c0_53 = arith.constant 0 : index
    %93 = vector.load %arg8[%c0_52, %c0_53] : memref<784x196xf32, #tpu.memory_space<vmem>>, vector<784x196xf32>
    %cst_54 = arith.constant dense<0.000000e+00> : vector<32x196xf32>
    %94 = tpu.matmul %92, %93, %cst_54 {dimension_numbers = #tpu.dot_dimension_numbers<[1], [0], [0], [1], [0, 0, 1, 1], [], []>} : vector<32x784xf32>, vector<784x196xf32>, vector<32x196xf32> -> vector<32x196xf32>
    %cst_55 = arith.constant 0.000000e+00 : f32
    %95 = vector.broadcast %cst_55 : f32 to vector<32x128xf32>
    %c0_56 = arith.constant 0 : index
    %c0_57 = arith.constant 0 : index
    %96 = vector.load %arg17[%c0_56, %c0_57] : memref<32x384xf32, #tpu.memory_space<vmem>>, vector<32x128xf32>
    tpu.vector_store %arg17[%c0_56, %c0_57], %95 {strides = array<i32>} : memref<32x384xf32, #tpu.memory_space<vmem>>, vector<32x128xf32>,
    %cst_58 = arith.constant 0.000000e+00 : f32
    %97 = vector.broadcast %cst_58 : f32 to vector<32x128xf32>
    %c0_59 = arith.constant 0 : index
    %c256 = arith.constant 256 : index
    %98 = vector.load %arg17[%c0_59, %c256] : memref<32x384xf32, #tpu.memory_space<vmem>>, vector<32x128xf32>
    tpu.vector_store %arg17[%c0_59, %c256], %97 {strides = array<i32>} : memref<32x384xf32, #tpu.memory_space<vmem>>, vector<32x128xf32>,
    %c0_60 = arith.constant 0 : index
    %c128_61 = arith.constant 128 : index
    %99 = vector.load %arg17[%c0_60, %c128_61] : memref<32x384xf32, #tpu.memory_space<vmem>>, vector<32x196xf32>
    tpu.vector_store %arg17[%c0_60, %c128_61], %94 {strides = array<i32>} : memref<32x384xf32, #tpu.memory_space<vmem>>, vector<32x196xf32>,
    %c0_62 = arith.constant 0 : index
    %c0_63 = arith.constant 0 : index
    %100 = vector.load %arg7[%c0_62, %c0_63] : memref<2x196xf32, #tpu.memory_space<vmem>>, vector<1x196xf32>
    %c1_64 = arith.constant 1 : index
    %c0_65 = arith.constant 0 : index
    %101 = vector.load %arg7[%c1_64, %c0_65] : memref<2x196xf32, #tpu.memory_space<vmem>>, vector<1x196xf32>
    %c0_66 = arith.constant 0 : index
    %c113 = arith.constant 113 : index
    %102 = vector.load %arg17[%c0_66, %c113] : memref<32x384xf32, #tpu.memory_space<vmem>>, vector<32x196xf32>
    %103 = vector.broadcast %100 : vector<1x196xf32> to vector<32x196xf32>
    %104 = arith.mulf %102, %103 : vector<32x196xf32>
    %c0_67 = arith.constant 0 : index
    %c0_68 = arith.constant 0 : index
    %105 = vector.load %arg18[%c0_67, %c0_68] : memref<288x196xf32, #tpu.memory_space<vmem>>, vector<32x196xf32>
    tpu.vector_store %arg18[%c0_67, %c0_68], %104 {strides = array<i32>} : memref<288x196xf32, #tpu.memory_space<vmem>>, vector<32x196xf32>,
    %c0_69 = arith.constant 0 : index
    %c114 = arith.constant 114 : index
    %106 = vector.load %arg17[%c0_69, %c114] : memref<32x384xf32, #tpu.memory_space<vmem>>, vector<32x196xf32>
    %c32 = arith.constant 32 : index
    %c0_70 = arith.constant 0 : index
    %107 = vector.load %arg18[%c32, %c0_70] : memref<288x196xf32, #tpu.memory_space<vmem>>, vector<32x196xf32>
    tpu.vector_store %arg18[%c32, %c0_70], %106 {strides = array<i32>} : memref<288x196xf32, #tpu.memory_space<vmem>>, vector<32x196xf32>,
    %c0_71 = arith.constant 0 : index
    %c115 = arith.constant 115 : index
    %108 = vector.load %arg17[%c0_71, %c115] : memref<32x384xf32, #tpu.memory_space<vmem>>, vector<32x196xf32>
    %109 = vector.broadcast %101 : vector<1x196xf32> to vector<32x196xf32>
    %110 = arith.mulf %108, %109 : vector<32x196xf32>
    %c64 = arith.constant 64 : index
    %c0_72 = arith.constant 0 : index
    %111 = vector.load %arg18[%c64, %c0_72] : memref<288x196xf32, #tpu.memory_space<vmem>>, vector<32x196xf32>
    tpu.vector_store %arg18[%c64, %c0_72], %110 {strides = array<i32>} : memref<288x196xf32, #tpu.memory_space<vmem>>, vector<32x196xf32>,
    %c0_73 = arith.constant 0 : index
    %c127_74 = arith.constant 127 : index
    %112 = vector.load %arg17[%c0_73, %c127_74] : memref<32x384xf32, #tpu.memory_space<vmem>>, vector<32x196xf32>
    %113 = vector.broadcast %100 : vector<1x196xf32> to vector<32x196xf32>
    %114 = arith.mulf %112, %113 : vector<32x196xf32>
    %c96 = arith.constant 96 : index
    %c0_75 = arith.constant 0 : index
    %115 = vector.load %arg18[%c96, %c0_75] : memref<288x196xf32, #tpu.memory_space<vmem>>, vector<32x196xf32>
    tpu.vector_store %arg18[%c96, %c0_75], %114 {strides = array<i32>} : memref<288x196xf32, #tpu.memory_space<vmem>>, vector<32x196xf32>,
    %c0_76 = arith.constant 0 : index
    %c128_77 = arith.constant 128 : index
    %116 = vector.load %arg17[%c0_76, %c128_77] : memref<32x384xf32, #tpu.memory_space<vmem>>, vector<32x196xf32>
    %c128_78 = arith.constant 128 : index
    %c0_79 = arith.constant 0 : index
    %117 = vector.load %arg18[%c128_78, %c0_79] : memref<288x196xf32, #tpu.memory_space<vmem>>, vector<32x196xf32>
    tpu.vector_store %arg18[%c128_78, %c0_79], %116 {strides = array<i32>} : memref<288x196xf32, #tpu.memory_space<vmem>>, vector<32x196xf32>,
    %c0_80 = arith.constant 0 : index
    %c129_81 = arith.constant 129 : index
    %118 = vector.load %arg17[%c0_80, %c129_81] : memref<32x384xf32, #tpu.memory_space<vmem>>, vector<32x196xf32>
    %119 = vector.broadcast %101 : vector<1x196xf32> to vector<32x196xf32>
    %120 = arith.mulf %118, %119 : vector<32x196xf32>
    %c160 = arith.constant 160 : index
    %c0_82 = arith.constant 0 : index
    %121 = vector.load %arg18[%c160, %c0_82] : memref<288x196xf32, #tpu.memory_space<vmem>>, vector<32x196xf32>
    tpu.vector_store %arg18[%c160, %c0_82], %120 {strides = array<i32>} : memref<288x196xf32, #tpu.memory_space<vmem>>, vector<32x196xf32>,
    %c0_83 = arith.constant 0 : index
    %c141 = arith.constant 141 : index
    %122 = vector.load %arg17[%c0_83, %c141] : memref<32x384xf32, #tpu.memory_space<vmem>>, vector<32x196xf32>
    %123 = vector.broadcast %100 : vector<1x196xf32> to vector<32x196xf32>
    %124 = arith.mulf %122, %123 : vector<32x196xf32>
    %c192 = arith.constant 192 : index
    %c0_84 = arith.constant 0 : index
    %125 = vector.load %arg18[%c192, %c0_84] : memref<288x196xf32, #tpu.memory_space<vmem>>, vector<32x196xf32>
    tpu.vector_store %arg18[%c192, %c0_84], %124 {strides = array<i32>} : memref<288x196xf32, #tpu.memory_space<vmem>>, vector<32x196xf32>,
    %c0_85 = arith.constant 0 : index
    %c142 = arith.constant 142 : index
    %126 = vector.load %arg17[%c0_85, %c142] : memref<32x384xf32, #tpu.memory_space<vmem>>, vector<32x196xf32>
    %c224 = arith.constant 224 : index
    %c0_86 = arith.constant 0 : index
    %127 = vector.load %arg18[%c224, %c0_86] : memref<288x196xf32, #tpu.memory_space<vmem>>, vector<32x196xf32>
    tpu.vector_store %arg18[%c224, %c0_86], %126 {strides = array<i32>} : memref<288x196xf32, #tpu.memory_space<vmem>>, vector<32x196xf32>,
    %c0_87 = arith.constant 0 : index
    %c143 = arith.constant 143 : index
    %128 = vector.load %arg17[%c0_87, %c143] : memref<32x384xf32, #tpu.memory_space<vmem>>, vector<32x196xf32>
    %129 = vector.broadcast %101 : vector<1x196xf32> to vector<32x196xf32>
    %130 = arith.mulf %128, %129 : vector<32x196xf32>
    %c256_88 = arith.constant 256 : index
    %c0_89 = arith.constant 0 : index
    %131 = vector.load %arg18[%c256_88, %c0_89] : memref<288x196xf32, #tpu.memory_space<vmem>>, vector<32x196xf32>
    tpu.vector_store %arg18[%c256_88, %c0_89], %130 {strides = array<i32>} : memref<288x196xf32, #tpu.memory_space<vmem>>, vector<32x196xf32>,
    %c0_90 = arith.constant 0 : index
    %c0_91 = arith.constant 0 : index
    %132 = vector.load %arg5[%c0_90, %c0_91] : memref<64x288xf32, #tpu.memory_space<vmem>>, vector<64x288xf32>
    %c0_92 = arith.constant 0 : index
    %c0_93 = arith.constant 0 : index
    %133 = vector.load %arg18[%c0_92, %c0_93] : memref<288x196xf32, #tpu.memory_space<vmem>>, vector<288x196xf32>
    %cst_94 = arith.constant dense<0.000000e+00> : vector<64x196xf32>
    %134 = tpu.matmul %132, %133, %cst_94 {dimension_numbers = #tpu.dot_dimension_numbers<[1], [0], [0], [1], [0, 0, 1, 1], [], []>} : vector<64x288xf32>, vector<288x196xf32>, vector<64x196xf32> -> vector<64x196xf32>
    %c0_95 = arith.constant 0 : index
    %c0_96 = arith.constant 0 : index
    %135 = vector.load %arg6[%c0_95, %c0_96] : memref<64x1xf32, #tpu.memory_space<vmem>>, vector<64x1xf32>
    %136 = vector.broadcast %135 : vector<64x1xf32> to vector<64x196xf32>
    %137 = arith.addf %134, %136 : vector<64x196xf32>
    %cst_97 = arith.constant 0.000000e+00 : f32
    %138 = vector.broadcast %cst_97 : f32 to vector<64x196xf32>
    %139 = arith.maximumf %137, %138 : vector<64x196xf32>
    %cst_98 = arith.constant 0.000000e+00 : f32
    %140 = vector.broadcast %cst_98 : f32 to vector<64x128xf32>
    %c0_99 = arith.constant 0 : index
    %c128_100 = arith.constant 128 : index
    %141 = vector.load %arg19[%c0_99, %c128_100] : memref<64x256xf32, #tpu.memory_space<vmem>>, vector<64x128xf32>
    tpu.vector_store %arg19[%c0_99, %c128_100], %140 {strides = array<i32>} : memref<64x256xf32, #tpu.memory_space<vmem>>, vector<64x128xf32>,
    %c0_101 = arith.constant 0 : index
    %c0_102 = arith.constant 0 : index
    %142 = vector.load %arg19[%c0_101, %c0_102] : memref<64x256xf32, #tpu.memory_space<vmem>>, vector<64x196xf32>
    tpu.vector_store %arg19[%c0_101, %c0_102], %139 {strides = array<i32>} : memref<64x256xf32, #tpu.memory_space<vmem>>, vector<64x196xf32>,
    %c0_103 = arith.constant 0 : index
    %c1_104 = arith.constant 1 : index
    %143 = vector.load %arg19[%c0_103, %c1_104] : memref<64x256xf32, #tpu.memory_space<vmem>>, vector<64x196xf32>
    %144 = arith.maximumf %139, %143 : vector<64x196xf32>
    %c0_105 = arith.constant 0 : index
    %c14 = arith.constant 14 : index
    %145 = vector.load %arg19[%c0_105, %c14] : memref<64x256xf32, #tpu.memory_space<vmem>>, vector<64x196xf32>
    %c0_106 = arith.constant 0 : index
    %c15 = arith.constant 15 : index
    %146 = vector.load %arg19[%c0_106, %c15] : memref<64x256xf32, #tpu.memory_space<vmem>>, vector<64x196xf32>
    %147 = arith.maximumf %145, %146 : vector<64x196xf32>
    %148 = arith.maximumf %144, %147 : vector<64x196xf32>
    %c0_107 = arith.constant 0 : index
    %c0_108 = arith.constant 0 : index
    %149 = vector.load %arg9[%c0_107, %c0_108] : memref<196x49xf32, #tpu.memory_space<vmem>>, vector<196x49xf32>
    %cst_109 = arith.constant dense<0.000000e+00> : vector<64x49xf32>
    %150 = tpu.matmul %148, %149, %cst_109 {dimension_numbers = #tpu.dot_dimension_numbers<[1], [0], [0], [1], [0, 0, 1, 1], [], []>} : vector<64x196xf32>, vector<196x49xf32>, vector<64x49xf32> -> vector<64x49xf32>
    %151 = vector.extract_strided_slice %150 {offsets = [0, 0], sizes = [1, 49], strides = [1, 1]} : vector<64x49xf32> to vector<1x49xf32>
    %c0_110 = arith.constant 0 : index
    %c0_111 = arith.constant 0 : index
    %152 = vector.load %arg20[%c0_110, %c0_111] : memref<1x3136xf32, #tpu.memory_space<vmem>>, vector<1x49xf32>
    tpu.vector_store %arg20[%c0_110, %c0_111], %151 {strides = array<i32>} : memref<1x3136xf32, #tpu.memory_space<vmem>>, vector<1x49xf32>,
    %153 = vector.extract_strided_slice %150 {offsets = [1, 0], sizes = [1, 49], strides = [1, 1]} : vector<64x49xf32> to vector<1x49xf32>
    %c0_112 = arith.constant 0 : index
    %c49 = arith.constant 49 : index
    %154 = vector.load %arg20[%c0_112, %c49] : memref<1x3136xf32, #tpu.memory_space<vmem>>, vector<1x49xf32>
    tpu.vector_store %arg20[%c0_112, %c49], %153 {strides = array<i32>} : memref<1x3136xf32, #tpu.memory_space<vmem>>, vector<1x49xf32>,
    %155 = vector.extract_strided_slice %150 {offsets = [2, 0], sizes = [1, 49], strides = [1, 1]} : vector<64x49xf32> to vector<1x49xf32>
    %c0_113 = arith.constant 0 : index
    %c98 = arith.constant 98 : index
    %156 = vector.load %arg20[%c0_113, %c98] : memref<1x3136xf32, #tpu.memory_space<vmem>>, vector<1x49xf32>
    tpu.vector_store %arg20[%c0_113, %c98], %155 {strides = array<i32>} : memref<1x3136xf32, #tpu.memory_space<vmem>>, vector<1x49xf32>,
    %157 = vector.extract_strided_slice %150 {offsets = [3, 0], sizes = [1, 49], strides = [1, 1]} : vector<64x49xf32> to vector<1x49xf32>
    %c0_114 = arith.constant 0 : index
    %c147 = arith.constant 147 : index
    %158 = vector.load %arg20[%c0_114, %c147] : memref<1x3136xf32, #tpu.memory_space<vmem>>, vector<1x49xf32>
    tpu.vector_store %arg20[%c0_114, %c147], %157 {strides = array<i32>} : memref<1x3136xf32, #tpu.memory_space<vmem>>, vector<1x49xf32>,
    %159 = vector.extract_strided_slice %150 {offsets = [4, 0], sizes = [1, 49], strides = [1, 1]} : vector<64x49xf32> to vector<1x49xf32>
    %c0_115 = arith.constant 0 : index
    %c196 = arith.constant 196 : index
    %160 = vector.load %arg20[%c0_115, %c196] : memref<1x3136xf32, #tpu.memory_space<vmem>>, vector<1x49xf32>
    tpu.vector_store %arg20[%c0_115, %c196], %159 {strides = array<i32>} : memref<1x3136xf32, #tpu.memory_space<vmem>>, vector<1x49xf32>,
    %161 = vector.extract_strided_slice %150 {offsets = [5, 0], sizes = [1, 49], strides = [1, 1]} : vector<64x49xf32> to vector<1x49xf32>
    %c0_116 = arith.constant 0 : index
    %c245 = arith.constant 245 : index
    %162 = vector.load %arg20[%c0_116, %c245] : memref<1x3136xf32, #tpu.memory_space<vmem>>, vector<1x49xf32>
    tpu.vector_store %arg20[%c0_116, %c245], %161 {strides = array<i32>} : memref<1x3136xf32, #tpu.memory_space<vmem>>, vector<1x49xf32>,
    %163 = vector.extract_strided_slice %150 {offsets = [6, 0], sizes = [1, 49], strides = [1, 1]} : vector<64x49xf32> to vector<1x49xf32>
    %c0_117 = arith.constant 0 : index
    %c294 = arith.constant 294 : index
    %164 = vector.load %arg20[%c0_117, %c294] : memref<1x3136xf32, #tpu.memory_space<vmem>>, vector<1x49xf32>
    tpu.vector_store %arg20[%c0_117, %c294], %163 {strides = array<i32>} : memref<1x3136xf32, #tpu.memory_space<vmem>>, vector<1x49xf32>,
    %165 = vector.extract_strided_slice %150 {offsets = [7, 0], sizes = [1, 49], strides = [1, 1]} : vector<64x49xf32> to vector<1x49xf32>
    %c0_118 = arith.constant 0 : index
    %c343 = arith.constant 343 : index
    %166 = vector.load %arg20[%c0_118, %c343] : memref<1x3136xf32, #tpu.memory_space<vmem>>, vector<1x49xf32>
    tpu.vector_store %arg20[%c0_118, %c343], %165 {strides = array<i32>} : memref<1x3136xf32, #tpu.memory_space<vmem>>, vector<1x49xf32>,
    %167 = vector.extract_strided_slice %150 {offsets = [8, 0], sizes = [1, 49], strides = [1, 1]} : vector<64x49xf32> to vector<1x49xf32>
    %c0_119 = arith.constant 0 : index
    %c392 = arith.constant 392 : index
    %168 = vector.load %arg20[%c0_119, %c392] : memref<1x3136xf32, #tpu.memory_space<vmem>>, vector<1x49xf32>
    tpu.vector_store %arg20[%c0_119, %c392], %167 {strides = array<i32>} : memref<1x3136xf32, #tpu.memory_space<vmem>>, vector<1x49xf32>,
    %169 = vector.extract_strided_slice %150 {offsets = [9, 0], sizes = [1, 49], strides = [1, 1]} : vector<64x49xf32> to vector<1x49xf32>
    %c0_120 = arith.constant 0 : index
    %c441 = arith.constant 441 : index
    %170 = vector.load %arg20[%c0_120, %c441] : memref<1x3136xf32, #tpu.memory_space<vmem>>, vector<1x49xf32>
    tpu.vector_store %arg20[%c0_120, %c441], %169 {strides = array<i32>} : memref<1x3136xf32, #tpu.memory_space<vmem>>, vector<1x49xf32>,
    %171 = vector.extract_strided_slice %150 {offsets = [10, 0], sizes = [1, 49], strides = [1, 1]} : vector<64x49xf32> to vector<1x49xf32>
    %c0_121 = arith.constant 0 : index
    %c490 = arith.constant 490 : index
    %172 = vector.load %arg20[%c0_121, %c490] : memref<1x3136xf32, #tpu.memory_space<vmem>>, vector<1x49xf32>
    tpu.vector_store %arg20[%c0_121, %c490], %171 {strides = array<i32>} : memref<1x3136xf32, #tpu.memory_space<vmem>>, vector<1x49xf32>,
    %173 = vector.extract_strided_slice %150 {offsets = [11, 0], sizes = [1, 49], strides = [1, 1]} : vector<64x49xf32> to vector<1x49xf32>
    %c0_122 = arith.constant 0 : index
    %c539 = arith.constant 539 : index
    %174 = vector.load %arg20[%c0_122, %c539] : memref<1x3136xf32, #tpu.memory_space<vmem>>, vector<1x49xf32>
    tpu.vector_store %arg20[%c0_122, %c539], %173 {strides = array<i32>} : memref<1x3136xf32, #tpu.memory_space<vmem>>, vector<1x49xf32>,
    %175 = vector.extract_strided_slice %150 {offsets = [12, 0], sizes = [1, 49], strides = [1, 1]} : vector<64x49xf32> to vector<1x49xf32>
    %c0_123 = arith.constant 0 : index
    %c588 = arith.constant 588 : index
    %176 = vector.load %arg20[%c0_123, %c588] : memref<1x3136xf32, #tpu.memory_space<vmem>>, vector<1x49xf32>
    tpu.vector_store %arg20[%c0_123, %c588], %175 {strides = array<i32>} : memref<1x3136xf32, #tpu.memory_space<vmem>>, vector<1x49xf32>,
    %177 = vector.extract_strided_slice %150 {offsets = [13, 0], sizes = [1, 49], strides = [1, 1]} : vector<64x49xf32> to vector<1x49xf32>
    %c0_124 = arith.constant 0 : index
    %c637 = arith.constant 637 : index
    %178 = vector.load %arg20[%c0_124, %c637] : memref<1x3136xf32, #tpu.memory_space<vmem>>, vector<1x49xf32>
    tpu.vector_store %arg20[%c0_124, %c637], %177 {strides = array<i32>} : memref<1x3136xf32, #tpu.memory_space<vmem>>, vector<1x49xf32>,
    %179 = vector.extract_strided_slice %150 {offsets = [14, 0], sizes = [1, 49], strides = [1, 1]} : vector<64x49xf32> to vector<1x49xf32>
    %c0_125 = arith.constant 0 : index
    %c686 = arith.constant 686 : index
    %180 = vector.load %arg20[%c0_125, %c686] : memref<1x3136xf32, #tpu.memory_space<vmem>>, vector<1x49xf32>
    tpu.vector_store %arg20[%c0_125, %c686], %179 {strides = array<i32>} : memref<1x3136xf32, #tpu.memory_space<vmem>>, vector<1x49xf32>,
    %181 = vector.extract_strided_slice %150 {offsets = [15, 0], sizes = [1, 49], strides = [1, 1]} : vector<64x49xf32> to vector<1x49xf32>
    %c0_126 = arith.constant 0 : index
    %c735 = arith.constant 735 : index
    %182 = vector.load %arg20[%c0_126, %c735] : memref<1x3136xf32, #tpu.memory_space<vmem>>, vector<1x49xf32>
    tpu.vector_store %arg20[%c0_126, %c735], %181 {strides = array<i32>} : memref<1x3136xf32, #tpu.memory_space<vmem>>, vector<1x49xf32>,
    %183 = vector.extract_strided_slice %150 {offsets = [16, 0], sizes = [1, 49], strides = [1, 1]} : vector<64x49xf32> to vector<1x49xf32>
    %c0_127 = arith.constant 0 : index
    %c784 = arith.constant 784 : index
    %184 = vector.load %arg20[%c0_127, %c784] : memref<1x3136xf32, #tpu.memory_space<vmem>>, vector<1x49xf32>
    tpu.vector_store %arg20[%c0_127, %c784], %183 {strides = array<i32>} : memref<1x3136xf32, #tpu.memory_space<vmem>>, vector<1x49xf32>,
    %185 = vector.extract_strided_slice %150 {offsets = [17, 0], sizes = [1, 49], strides = [1, 1]} : vector<64x49xf32> to vector<1x49xf32>
    %c0_128 = arith.constant 0 : index
    %c833 = arith.constant 833 : index
    %186 = vector.load %arg20[%c0_128, %c833] : memref<1x3136xf32, #tpu.memory_space<vmem>>, vector<1x49xf32>
    tpu.vector_store %arg20[%c0_128, %c833], %185 {strides = array<i32>} : memref<1x3136xf32, #tpu.memory_space<vmem>>, vector<1x49xf32>,
    %187 = vector.extract_strided_slice %150 {offsets = [18, 0], sizes = [1, 49], strides = [1, 1]} : vector<64x49xf32> to vector<1x49xf32>
    %c0_129 = arith.constant 0 : index
    %c882 = arith.constant 882 : index
    %188 = vector.load %arg20[%c0_129, %c882] : memref<1x3136xf32, #tpu.memory_space<vmem>>, vector<1x49xf32>
    tpu.vector_store %arg20[%c0_129, %c882], %187 {strides = array<i32>} : memref<1x3136xf32, #tpu.memory_space<vmem>>, vector<1x49xf32>,
    %189 = vector.extract_strided_slice %150 {offsets = [19, 0], sizes = [1, 49], strides = [1, 1]} : vector<64x49xf32> to vector<1x49xf32>
    %c0_130 = arith.constant 0 : index
    %c931 = arith.constant 931 : index
    %190 = vector.load %arg20[%c0_130, %c931] : memref<1x3136xf32, #tpu.memory_space<vmem>>, vector<1x49xf32>
    tpu.vector_store %arg20[%c0_130, %c931], %189 {strides = array<i32>} : memref<1x3136xf32, #tpu.memory_space<vmem>>, vector<1x49xf32>,
    %191 = vector.extract_strided_slice %150 {offsets = [20, 0], sizes = [1, 49], strides = [1, 1]} : vector<64x49xf32> to vector<1x49xf32>
    %c0_131 = arith.constant 0 : index
    %c980 = arith.constant 980 : index
    %192 = vector.load %arg20[%c0_131, %c980] : memref<1x3136xf32, #tpu.memory_space<vmem>>, vector<1x49xf32>
    tpu.vector_store %arg20[%c0_131, %c980], %191 {strides = array<i32>} : memref<1x3136xf32, #tpu.memory_space<vmem>>, vector<1x49xf32>,
    %193 = vector.extract_strided_slice %150 {offsets = [21, 0], sizes = [1, 49], strides = [1, 1]} : vector<64x49xf32> to vector<1x49xf32>
    %c0_132 = arith.constant 0 : index
    %c1029 = arith.constant 1029 : index
    %194 = vector.load %arg20[%c0_132, %c1029] : memref<1x3136xf32, #tpu.memory_space<vmem>>, vector<1x49xf32>
    tpu.vector_store %arg20[%c0_132, %c1029], %193 {strides = array<i32>} : memref<1x3136xf32, #tpu.memory_space<vmem>>, vector<1x49xf32>,
    %195 = vector.extract_strided_slice %150 {offsets = [22, 0], sizes = [1, 49], strides = [1, 1]} : vector<64x49xf32> to vector<1x49xf32>
    %c0_133 = arith.constant 0 : index
    %c1078 = arith.constant 1078 : index
    %196 = vector.load %arg20[%c0_133, %c1078] : memref<1x3136xf32, #tpu.memory_space<vmem>>, vector<1x49xf32>
    tpu.vector_store %arg20[%c0_133, %c1078], %195 {strides = array<i32>} : memref<1x3136xf32, #tpu.memory_space<vmem>>, vector<1x49xf32>,
    %197 = vector.extract_strided_slice %150 {offsets = [23, 0], sizes = [1, 49], strides = [1, 1]} : vector<64x49xf32> to vector<1x49xf32>
    %c0_134 = arith.constant 0 : index
    %c1127 = arith.constant 1127 : index
    %198 = vector.load %arg20[%c0_134, %c1127] : memref<1x3136xf32, #tpu.memory_space<vmem>>, vector<1x49xf32>
    tpu.vector_store %arg20[%c0_134, %c1127], %197 {strides = array<i32>} : memref<1x3136xf32, #tpu.memory_space<vmem>>, vector<1x49xf32>,
    %199 = vector.extract_strided_slice %150 {offsets = [24, 0], sizes = [1, 49], strides = [1, 1]} : vector<64x49xf32> to vector<1x49xf32>
    %c0_135 = arith.constant 0 : index
    %c1176 = arith.constant 1176 : index
    %200 = vector.load %arg20[%c0_135, %c1176] : memref<1x3136xf32, #tpu.memory_space<vmem>>, vector<1x49xf32>
    tpu.vector_store %arg20[%c0_135, %c1176], %199 {strides = array<i32>} : memref<1x3136xf32, #tpu.memory_space<vmem>>, vector<1x49xf32>,
    %201 = vector.extract_strided_slice %150 {offsets = [25, 0], sizes = [1, 49], strides = [1, 1]} : vector<64x49xf32> to vector<1x49xf32>
    %c0_136 = arith.constant 0 : index
    %c1225 = arith.constant 1225 : index
    %202 = vector.load %arg20[%c0_136, %c1225] : memref<1x3136xf32, #tpu.memory_space<vmem>>, vector<1x49xf32>
    tpu.vector_store %arg20[%c0_136, %c1225], %201 {strides = array<i32>} : memref<1x3136xf32, #tpu.memory_space<vmem>>, vector<1x49xf32>,
    %203 = vector.extract_strided_slice %150 {offsets = [26, 0], sizes = [1, 49], strides = [1, 1]} : vector<64x49xf32> to vector<1x49xf32>
    %c0_137 = arith.constant 0 : index
    %c1274 = arith.constant 1274 : index
    %204 = vector.load %arg20[%c0_137, %c1274] : memref<1x3136xf32, #tpu.memory_space<vmem>>, vector<1x49xf32>
    tpu.vector_store %arg20[%c0_137, %c1274], %203 {strides = array<i32>} : memref<1x3136xf32, #tpu.memory_space<vmem>>, vector<1x49xf32>,
    %205 = vector.extract_strided_slice %150 {offsets = [27, 0], sizes = [1, 49], strides = [1, 1]} : vector<64x49xf32> to vector<1x49xf32>
    %c0_138 = arith.constant 0 : index
    %c1323 = arith.constant 1323 : index
    %206 = vector.load %arg20[%c0_138, %c1323] : memref<1x3136xf32, #tpu.memory_space<vmem>>, vector<1x49xf32>
    tpu.vector_store %arg20[%c0_138, %c1323], %205 {strides = array<i32>} : memref<1x3136xf32, #tpu.memory_space<vmem>>, vector<1x49xf32>,
    %207 = vector.extract_strided_slice %150 {offsets = [28, 0], sizes = [1, 49], strides = [1, 1]} : vector<64x49xf32> to vector<1x49xf32>
    %c0_139 = arith.constant 0 : index
    %c1372 = arith.constant 1372 : index
    %208 = vector.load %arg20[%c0_139, %c1372] : memref<1x3136xf32, #tpu.memory_space<vmem>>, vector<1x49xf32>
    tpu.vector_store %arg20[%c0_139, %c1372], %207 {strides = array<i32>} : memref<1x3136xf32, #tpu.memory_space<vmem>>, vector<1x49xf32>,
    %209 = vector.extract_strided_slice %150 {offsets = [29, 0], sizes = [1, 49], strides = [1, 1]} : vector<64x49xf32> to vector<1x49xf32>
    %c0_140 = arith.constant 0 : index
    %c1421 = arith.constant 1421 : index
    %210 = vector.load %arg20[%c0_140, %c1421] : memref<1x3136xf32, #tpu.memory_space<vmem>>, vector<1x49xf32>
    tpu.vector_store %arg20[%c0_140, %c1421], %209 {strides = array<i32>} : memref<1x3136xf32, #tpu.memory_space<vmem>>, vector<1x49xf32>,
    %211 = vector.extract_strided_slice %150 {offsets = [30, 0], sizes = [1, 49], strides = [1, 1]} : vector<64x49xf32> to vector<1x49xf32>
    %c0_141 = arith.constant 0 : index
    %c1470 = arith.constant 1470 : index
    %212 = vector.load %arg20[%c0_141, %c1470] : memref<1x3136xf32, #tpu.memory_space<vmem>>, vector<1x49xf32>
    tpu.vector_store %arg20[%c0_141, %c1470], %211 {strides = array<i32>} : memref<1x3136xf32, #tpu.memory_space<vmem>>, vector<1x49xf32>,
    %213 = vector.extract_strided_slice %150 {offsets = [31, 0], sizes = [1, 49], strides = [1, 1]} : vector<64x49xf32> to vector<1x49xf32>
    %c0_142 = arith.constant 0 : index
    %c1519 = arith.constant 1519 : index
    %214 = vector.load %arg20[%c0_142, %c1519] : memref<1x3136xf32, #tpu.memory_space<vmem>>, vector<1x49xf32>
    tpu.vector_store %arg20[%c0_142, %c1519], %213 {strides = array<i32>} : memref<1x3136xf32, #tpu.memory_space<vmem>>, vector<1x49xf32>,
    %215 = vector.extract_strided_slice %150 {offsets = [32, 0], sizes = [1, 49], strides = [1, 1]} : vector<64x49xf32> to vector<1x49xf32>
    %c0_143 = arith.constant 0 : index
    %c1568 = arith.constant 1568 : index
    %216 = vector.load %arg20[%c0_143, %c1568] : memref<1x3136xf32, #tpu.memory_space<vmem>>, vector<1x49xf32>
    tpu.vector_store %arg20[%c0_143, %c1568], %215 {strides = array<i32>} : memref<1x3136xf32, #tpu.memory_space<vmem>>, vector<1x49xf32>,
    %217 = vector.extract_strided_slice %150 {offsets = [33, 0], sizes = [1, 49], strides = [1, 1]} : vector<64x49xf32> to vector<1x49xf32>
    %c0_144 = arith.constant 0 : index
    %c1617 = arith.constant 1617 : index
    %218 = vector.load %arg20[%c0_144, %c1617] : memref<1x3136xf32, #tpu.memory_space<vmem>>, vector<1x49xf32>
    tpu.vector_store %arg20[%c0_144, %c1617], %217 {strides = array<i32>} : memref<1x3136xf32, #tpu.memory_space<vmem>>, vector<1x49xf32>,
    %219 = vector.extract_strided_slice %150 {offsets = [34, 0], sizes = [1, 49], strides = [1, 1]} : vector<64x49xf32> to vector<1x49xf32>
    %c0_145 = arith.constant 0 : index
    %c1666 = arith.constant 1666 : index
    %220 = vector.load %arg20[%c0_145, %c1666] : memref<1x3136xf32, #tpu.memory_space<vmem>>, vector<1x49xf32>
    tpu.vector_store %arg20[%c0_145, %c1666], %219 {strides = array<i32>} : memref<1x3136xf32, #tpu.memory_space<vmem>>, vector<1x49xf32>,
    %221 = vector.extract_strided_slice %150 {offsets = [35, 0], sizes = [1, 49], strides = [1, 1]} : vector<64x49xf32> to vector<1x49xf32>
    %c0_146 = arith.constant 0 : index
    %c1715 = arith.constant 1715 : index
    %222 = vector.load %arg20[%c0_146, %c1715] : memref<1x3136xf32, #tpu.memory_space<vmem>>, vector<1x49xf32>
    tpu.vector_store %arg20[%c0_146, %c1715], %221 {strides = array<i32>} : memref<1x3136xf32, #tpu.memory_space<vmem>>, vector<1x49xf32>,
    %223 = vector.extract_strided_slice %150 {offsets = [36, 0], sizes = [1, 49], strides = [1, 1]} : vector<64x49xf32> to vector<1x49xf32>
    %c0_147 = arith.constant 0 : index
    %c1764 = arith.constant 1764 : index
    %224 = vector.load %arg20[%c0_147, %c1764] : memref<1x3136xf32, #tpu.memory_space<vmem>>, vector<1x49xf32>
    tpu.vector_store %arg20[%c0_147, %c1764], %223 {strides = array<i32>} : memref<1x3136xf32, #tpu.memory_space<vmem>>, vector<1x49xf32>,
    %225 = vector.extract_strided_slice %150 {offsets = [37, 0], sizes = [1, 49], strides = [1, 1]} : vector<64x49xf32> to vector<1x49xf32>
    %c0_148 = arith.constant 0 : index
    %c1813 = arith.constant 1813 : index
    %226 = vector.load %arg20[%c0_148, %c1813] : memref<1x3136xf32, #tpu.memory_space<vmem>>, vector<1x49xf32>
    tpu.vector_store %arg20[%c0_148, %c1813], %225 {strides = array<i32>} : memref<1x3136xf32, #tpu.memory_space<vmem>>, vector<1x49xf32>,
    %227 = vector.extract_strided_slice %150 {offsets = [38, 0], sizes = [1, 49], strides = [1, 1]} : vector<64x49xf32> to vector<1x49xf32>
    %c0_149 = arith.constant 0 : index
    %c1862 = arith.constant 1862 : index
    %228 = vector.load %arg20[%c0_149, %c1862] : memref<1x3136xf32, #tpu.memory_space<vmem>>, vector<1x49xf32>
    tpu.vector_store %arg20[%c0_149, %c1862], %227 {strides = array<i32>} : memref<1x3136xf32, #tpu.memory_space<vmem>>, vector<1x49xf32>,
    %229 = vector.extract_strided_slice %150 {offsets = [39, 0], sizes = [1, 49], strides = [1, 1]} : vector<64x49xf32> to vector<1x49xf32>
    %c0_150 = arith.constant 0 : index
    %c1911 = arith.constant 1911 : index
    %230 = vector.load %arg20[%c0_150, %c1911] : memref<1x3136xf32, #tpu.memory_space<vmem>>, vector<1x49xf32>
    tpu.vector_store %arg20[%c0_150, %c1911], %229 {strides = array<i32>} : memref<1x3136xf32, #tpu.memory_space<vmem>>, vector<1x49xf32>,
    %231 = vector.extract_strided_slice %150 {offsets = [40, 0], sizes = [1, 49], strides = [1, 1]} : vector<64x49xf32> to vector<1x49xf32>
    %c0_151 = arith.constant 0 : index
    %c1960 = arith.constant 1960 : index
    %232 = vector.load %arg20[%c0_151, %c1960] : memref<1x3136xf32, #tpu.memory_space<vmem>>, vector<1x49xf32>
    tpu.vector_store %arg20[%c0_151, %c1960], %231 {strides = array<i32>} : memref<1x3136xf32, #tpu.memory_space<vmem>>, vector<1x49xf32>,
    %233 = vector.extract_strided_slice %150 {offsets = [41, 0], sizes = [1, 49], strides = [1, 1]} : vector<64x49xf32> to vector<1x49xf32>
    %c0_152 = arith.constant 0 : index
    %c2009 = arith.constant 2009 : index
    %234 = vector.load %arg20[%c0_152, %c2009] : memref<1x3136xf32, #tpu.memory_space<vmem>>, vector<1x49xf32>
    tpu.vector_store %arg20[%c0_152, %c2009], %233 {strides = array<i32>} : memref<1x3136xf32, #tpu.memory_space<vmem>>, vector<1x49xf32>,
    %235 = vector.extract_strided_slice %150 {offsets = [42, 0], sizes = [1, 49], strides = [1, 1]} : vector<64x49xf32> to vector<1x49xf32>
    %c0_153 = arith.constant 0 : index
    %c2058 = arith.constant 2058 : index
    %236 = vector.load %arg20[%c0_153, %c2058] : memref<1x3136xf32, #tpu.memory_space<vmem>>, vector<1x49xf32>
    tpu.vector_store %arg20[%c0_153, %c2058], %235 {strides = array<i32>} : memref<1x3136xf32, #tpu.memory_space<vmem>>, vector<1x49xf32>,
    %237 = vector.extract_strided_slice %150 {offsets = [43, 0], sizes = [1, 49], strides = [1, 1]} : vector<64x49xf32> to vector<1x49xf32>
    %c0_154 = arith.constant 0 : index
    %c2107 = arith.constant 2107 : index
    %238 = vector.load %arg20[%c0_154, %c2107] : memref<1x3136xf32, #tpu.memory_space<vmem>>, vector<1x49xf32>
    tpu.vector_store %arg20[%c0_154, %c2107], %237 {strides = array<i32>} : memref<1x3136xf32, #tpu.memory_space<vmem>>, vector<1x49xf32>,
    %239 = vector.extract_strided_slice %150 {offsets = [44, 0], sizes = [1, 49], strides = [1, 1]} : vector<64x49xf32> to vector<1x49xf32>
    %c0_155 = arith.constant 0 : index
    %c2156 = arith.constant 2156 : index
    %240 = vector.load %arg20[%c0_155, %c2156] : memref<1x3136xf32, #tpu.memory_space<vmem>>, vector<1x49xf32>
    tpu.vector_store %arg20[%c0_155, %c2156], %239 {strides = array<i32>} : memref<1x3136xf32, #tpu.memory_space<vmem>>, vector<1x49xf32>,
    %241 = vector.extract_strided_slice %150 {offsets = [45, 0], sizes = [1, 49], strides = [1, 1]} : vector<64x49xf32> to vector<1x49xf32>
    %c0_156 = arith.constant 0 : index
    %c2205 = arith.constant 2205 : index
    %242 = vector.load %arg20[%c0_156, %c2205] : memref<1x3136xf32, #tpu.memory_space<vmem>>, vector<1x49xf32>
    tpu.vector_store %arg20[%c0_156, %c2205], %241 {strides = array<i32>} : memref<1x3136xf32, #tpu.memory_space<vmem>>, vector<1x49xf32>,
    %243 = vector.extract_strided_slice %150 {offsets = [46, 0], sizes = [1, 49], strides = [1, 1]} : vector<64x49xf32> to vector<1x49xf32>
    %c0_157 = arith.constant 0 : index
    %c2254 = arith.constant 2254 : index
    %244 = vector.load %arg20[%c0_157, %c2254] : memref<1x3136xf32, #tpu.memory_space<vmem>>, vector<1x49xf32>
    tpu.vector_store %arg20[%c0_157, %c2254], %243 {strides = array<i32>} : memref<1x3136xf32, #tpu.memory_space<vmem>>, vector<1x49xf32>,
    %245 = vector.extract_strided_slice %150 {offsets = [47, 0], sizes = [1, 49], strides = [1, 1]} : vector<64x49xf32> to vector<1x49xf32>
    %c0_158 = arith.constant 0 : index
    %c2303 = arith.constant 2303 : index
    %246 = vector.load %arg20[%c0_158, %c2303] : memref<1x3136xf32, #tpu.memory_space<vmem>>, vector<1x49xf32>
    tpu.vector_store %arg20[%c0_158, %c2303], %245 {strides = array<i32>} : memref<1x3136xf32, #tpu.memory_space<vmem>>, vector<1x49xf32>,
    %247 = vector.extract_strided_slice %150 {offsets = [48, 0], sizes = [1, 49], strides = [1, 1]} : vector<64x49xf32> to vector<1x49xf32>
    %c0_159 = arith.constant 0 : index
    %c2352 = arith.constant 2352 : index
    %248 = vector.load %arg20[%c0_159, %c2352] : memref<1x3136xf32, #tpu.memory_space<vmem>>, vector<1x49xf32>
    tpu.vector_store %arg20[%c0_159, %c2352], %247 {strides = array<i32>} : memref<1x3136xf32, #tpu.memory_space<vmem>>, vector<1x49xf32>,
    %249 = vector.extract_strided_slice %150 {offsets = [49, 0], sizes = [1, 49], strides = [1, 1]} : vector<64x49xf32> to vector<1x49xf32>
    %c0_160 = arith.constant 0 : index
    %c2401 = arith.constant 2401 : index
    %250 = vector.load %arg20[%c0_160, %c2401] : memref<1x3136xf32, #tpu.memory_space<vmem>>, vector<1x49xf32>
    tpu.vector_store %arg20[%c0_160, %c2401], %249 {strides = array<i32>} : memref<1x3136xf32, #tpu.memory_space<vmem>>, vector<1x49xf32>,
    %251 = vector.extract_strided_slice %150 {offsets = [50, 0], sizes = [1, 49], strides = [1, 1]} : vector<64x49xf32> to vector<1x49xf32>
    %c0_161 = arith.constant 0 : index
    %c2450 = arith.constant 2450 : index
    %252 = vector.load %arg20[%c0_161, %c2450] : memref<1x3136xf32, #tpu.memory_space<vmem>>, vector<1x49xf32>
    tpu.vector_store %arg20[%c0_161, %c2450], %251 {strides = array<i32>} : memref<1x3136xf32, #tpu.memory_space<vmem>>, vector<1x49xf32>,
    %253 = vector.extract_strided_slice %150 {offsets = [51, 0], sizes = [1, 49], strides = [1, 1]} : vector<64x49xf32> to vector<1x49xf32>
    %c0_162 = arith.constant 0 : index
    %c2499 = arith.constant 2499 : index
    %254 = vector.load %arg20[%c0_162, %c2499] : memref<1x3136xf32, #tpu.memory_space<vmem>>, vector<1x49xf32>
    tpu.vector_store %arg20[%c0_162, %c2499], %253 {strides = array<i32>} : memref<1x3136xf32, #tpu.memory_space<vmem>>, vector<1x49xf32>,
    %255 = vector.extract_strided_slice %150 {offsets = [52, 0], sizes = [1, 49], strides = [1, 1]} : vector<64x49xf32> to vector<1x49xf32>
    %c0_163 = arith.constant 0 : index
    %c2548 = arith.constant 2548 : index
    %256 = vector.load %arg20[%c0_163, %c2548] : memref<1x3136xf32, #tpu.memory_space<vmem>>, vector<1x49xf32>
    tpu.vector_store %arg20[%c0_163, %c2548], %255 {strides = array<i32>} : memref<1x3136xf32, #tpu.memory_space<vmem>>, vector<1x49xf32>,
    %257 = vector.extract_strided_slice %150 {offsets = [53, 0], sizes = [1, 49], strides = [1, 1]} : vector<64x49xf32> to vector<1x49xf32>
    %c0_164 = arith.constant 0 : index
    %c2597 = arith.constant 2597 : index
    %258 = vector.load %arg20[%c0_164, %c2597] : memref<1x3136xf32, #tpu.memory_space<vmem>>, vector<1x49xf32>
    tpu.vector_store %arg20[%c0_164, %c2597], %257 {strides = array<i32>} : memref<1x3136xf32, #tpu.memory_space<vmem>>, vector<1x49xf32>,
    %259 = vector.extract_strided_slice %150 {offsets = [54, 0], sizes = [1, 49], strides = [1, 1]} : vector<64x49xf32> to vector<1x49xf32>
    %c0_165 = arith.constant 0 : index
    %c2646 = arith.constant 2646 : index
    %260 = vector.load %arg20[%c0_165, %c2646] : memref<1x3136xf32, #tpu.memory_space<vmem>>, vector<1x49xf32>
    tpu.vector_store %arg20[%c0_165, %c2646], %259 {strides = array<i32>} : memref<1x3136xf32, #tpu.memory_space<vmem>>, vector<1x49xf32>,
    %261 = vector.extract_strided_slice %150 {offsets = [55, 0], sizes = [1, 49], strides = [1, 1]} : vector<64x49xf32> to vector<1x49xf32>
    %c0_166 = arith.constant 0 : index
    %c2695 = arith.constant 2695 : index
    %262 = vector.load %arg20[%c0_166, %c2695] : memref<1x3136xf32, #tpu.memory_space<vmem>>, vector<1x49xf32>
    tpu.vector_store %arg20[%c0_166, %c2695], %261 {strides = array<i32>} : memref<1x3136xf32, #tpu.memory_space<vmem>>, vector<1x49xf32>,
    %263 = vector.extract_strided_slice %150 {offsets = [56, 0], sizes = [1, 49], strides = [1, 1]} : vector<64x49xf32> to vector<1x49xf32>
    %c0_167 = arith.constant 0 : index
    %c2744 = arith.constant 2744 : index
    %264 = vector.load %arg20[%c0_167, %c2744] : memref<1x3136xf32, #tpu.memory_space<vmem>>, vector<1x49xf32>
    tpu.vector_store %arg20[%c0_167, %c2744], %263 {strides = array<i32>} : memref<1x3136xf32, #tpu.memory_space<vmem>>, vector<1x49xf32>,
    %265 = vector.extract_strided_slice %150 {offsets = [57, 0], sizes = [1, 49], strides = [1, 1]} : vector<64x49xf32> to vector<1x49xf32>
    %c0_168 = arith.constant 0 : index
    %c2793 = arith.constant 2793 : index
    %266 = vector.load %arg20[%c0_168, %c2793] : memref<1x3136xf32, #tpu.memory_space<vmem>>, vector<1x49xf32>
    tpu.vector_store %arg20[%c0_168, %c2793], %265 {strides = array<i32>} : memref<1x3136xf32, #tpu.memory_space<vmem>>, vector<1x49xf32>,
    %267 = vector.extract_strided_slice %150 {offsets = [58, 0], sizes = [1, 49], strides = [1, 1]} : vector<64x49xf32> to vector<1x49xf32>
    %c0_169 = arith.constant 0 : index
    %c2842 = arith.constant 2842 : index
    %268 = vector.load %arg20[%c0_169, %c2842] : memref<1x3136xf32, #tpu.memory_space<vmem>>, vector<1x49xf32>
    tpu.vector_store %arg20[%c0_169, %c2842], %267 {strides = array<i32>} : memref<1x3136xf32, #tpu.memory_space<vmem>>, vector<1x49xf32>,
    %269 = vector.extract_strided_slice %150 {offsets = [59, 0], sizes = [1, 49], strides = [1, 1]} : vector<64x49xf32> to vector<1x49xf32>
    %c0_170 = arith.constant 0 : index
    %c2891 = arith.constant 2891 : index
    %270 = vector.load %arg20[%c0_170, %c2891] : memref<1x3136xf32, #tpu.memory_space<vmem>>, vector<1x49xf32>
    tpu.vector_store %arg20[%c0_170, %c2891], %269 {strides = array<i32>} : memref<1x3136xf32, #tpu.memory_space<vmem>>, vector<1x49xf32>,
    %271 = vector.extract_strided_slice %150 {offsets = [60, 0], sizes = [1, 49], strides = [1, 1]} : vector<64x49xf32> to vector<1x49xf32>
    %c0_171 = arith.constant 0 : index
    %c2940 = arith.constant 2940 : index
    %272 = vector.load %arg20[%c0_171, %c2940] : memref<1x3136xf32, #tpu.memory_space<vmem>>, vector<1x49xf32>
    tpu.vector_store %arg20[%c0_171, %c2940], %271 {strides = array<i32>} : memref<1x3136xf32, #tpu.memory_space<vmem>>, vector<1x49xf32>,
    %273 = vector.extract_strided_slice %150 {offsets = [61, 0], sizes = [1, 49], strides = [1, 1]} : vector<64x49xf32> to vector<1x49xf32>
    %c0_172 = arith.constant 0 : index
    %c2989 = arith.constant 2989 : index
    %274 = vector.load %arg20[%c0_172, %c2989] : memref<1x3136xf32, #tpu.memory_space<vmem>>, vector<1x49xf32>
    tpu.vector_store %arg20[%c0_172, %c2989], %273 {strides = array<i32>} : memref<1x3136xf32, #tpu.memory_space<vmem>>, vector<1x49xf32>,
    %275 = vector.extract_strided_slice %150 {offsets = [62, 0], sizes = [1, 49], strides = [1, 1]} : vector<64x49xf32> to vector<1x49xf32>
    %c0_173 = arith.constant 0 : index
    %c3038 = arith.constant 3038 : index
    %276 = vector.load %arg20[%c0_173, %c3038] : memref<1x3136xf32, #tpu.memory_space<vmem>>, vector<1x49xf32>
    tpu.vector_store %arg20[%c0_173, %c3038], %275 {strides = array<i32>} : memref<1x3136xf32, #tpu.memory_space<vmem>>, vector<1x49xf32>,
    %277 = vector.extract_strided_slice %150 {offsets = [63, 0], sizes = [1, 49], strides = [1, 1]} : vector<64x49xf32> to vector<1x49xf32>
    %c0_174 = arith.constant 0 : index
    %c3087 = arith.constant 3087 : index
    %278 = vector.load %arg20[%c0_174, %c3087] : memref<1x3136xf32, #tpu.memory_space<vmem>>, vector<1x49xf32>
    tpu.vector_store %arg20[%c0_174, %c3087], %277 {strides = array<i32>} : memref<1x3136xf32, #tpu.memory_space<vmem>>, vector<1x49xf32>,
    %c0_175 = arith.constant 0 : index
    %c0_176 = arith.constant 0 : index
    %279 = vector.load %arg20[%c0_175, %c0_176] : memref<1x3136xf32, #tpu.memory_space<vmem>>, vector<1x3136xf32>
    %c0_177 = arith.constant 0 : index
    %c0_178 = arith.constant 0 : index
    %280 = vector.load %arg10[%c0_177, %c0_178] : memref<3136x128xf32, #tpu.memory_space<vmem>>, vector<3136x128xf32>
    %cst_179 = arith.constant dense<0.000000e+00> : vector<1x128xf32>
    %281 = tpu.matmul %279, %280, %cst_179 {dimension_numbers = #tpu.dot_dimension_numbers<[1], [0], [0], [1], [0, 0, 1, 1], [], []>} : vector<1x3136xf32>, vector<3136x128xf32>, vector<1x128xf32> -> vector<1x128xf32>
    %c0_180 = arith.constant 0 : index
    %c0_181 = arith.constant 0 : index
    %282 = vector.load %arg11[%c0_180, %c0_181] : memref<1x128xf32, #tpu.memory_space<vmem>>, vector<1x128xf32>
    %283 = arith.addf %281, %282 : vector<1x128xf32>
    %cst_182 = arith.constant 0.000000e+00 : f32
    %284 = vector.broadcast %cst_182 : f32 to vector<1x128xf32>
    %285 = arith.maximumf %283, %284 : vector<1x128xf32>
    %c0_183 = arith.constant 0 : index
    %c0_184 = arith.constant 0 : index
    %286 = vector.load %arg12[%c0_183, %c0_184] : memref<128x10xf32, #tpu.memory_space<vmem>>, vector<128x10xf32>
    %cst_185 = arith.constant dense<0.000000e+00> : vector<1x10xf32>
    %287 = tpu.matmul %285, %286, %cst_185 {dimension_numbers = #tpu.dot_dimension_numbers<[1], [0], [0], [1], [0, 0, 1, 1], [], []>} : vector<1x128xf32>, vector<128x10xf32>, vector<1x10xf32> -> vector<1x10xf32>
    %c0_186 = arith.constant 0 : index
    %c0_187 = arith.constant 0 : index
    %288 = vector.load %arg13[%c0_186, %c0_187] : memref<1x10xf32, #tpu.memory_space<vmem>>, vector<1x10xf32>
    %289 = arith.addf %287, %288 : vector<1x10xf32>
    %c0_188 = arith.constant 0 : index
    %c0_189 = arith.constant 0 : index
    %c0_190 = arith.constant 0 : index
    %290 = vector.load %arg14[%c0_188, %c0_189, %c0_190] : memref<1x1x10xf32, #tpu.memory_space<vmem>>, vector<1x1x10xf32>
    %291 = vector.shape_cast %290 : vector<1x1x10xf32> to vector<1x10xf32>
    %292 = vector.shape_cast %289 : vector<1x10xf32> to vector<1x1x10xf32>
    tpu.vector_store %arg14[%c0_188, %c0_189, %c0_190], %292 {strides = array<i32>} : memref<1x1x10xf32, #tpu.memory_space<vmem>>, vector<1x1x10xf32>,
    return
  }
  func.func @transform_0(%arg0: i32) -> (i32, i32, i32) {
    %c0_i32 = arith.constant 0 : i32
    %c0_i32_0 = arith.constant 0 : i32
    %c0_i32_1 = arith.constant 0 : i32
    return %arg0, %c0_i32, %c0_i32_0 : i32, i32, i32
  }
  func.func @transform_1(%arg0: i32) -> (i32, i32, i32) {
    %c0_i32 = arith.constant 0 : i32
    %c0_i32_0 = arith.constant 0 : i32
    %c0_i32_1 = arith.constant 0 : i32
    %c0_i32_2 = arith.constant 0 : i32
    return %c0_i32, %c0_i32_0, %c0_i32_1 : i32, i32, i32
  }
  func.func @transform_2(%arg0: i32) -> (i32, i32) {
    %c0_i32 = arith.constant 0 : i32
    %c0_i32_0 = arith.constant 0 : i32
    %c0_i32_1 = arith.constant 0 : i32
    return %c0_i32, %c0_i32_0 : i32, i32
  }
  func.func @transform_3(%arg0: i32) -> (i32, i32) {
    %c0_i32 = arith.constant 0 : i32
    %c0_i32_0 = arith.constant 0 : i32
    %c0_i32_1 = arith.constant 0 : i32
    return %c0_i32, %c0_i32_0 : i32, i32
  }
  func.func @transform_4(%arg0: i32) -> (i32, i32) {
    %c0_i32 = arith.constant 0 : i32
    %c0_i32_0 = arith.constant 0 : i32
    %c0_i32_1 = arith.constant 0 : i32
    return %c0_i32, %c0_i32_0 : i32, i32
  }
  func.func @transform_5(%arg0: i32) -> (i32, i32) {
    %c0_i32 = arith.constant 0 : i32
    %c0_i32_0 = arith.constant 0 : i32
    %c0_i32_1 = arith.constant 0 : i32
    return %c0_i32, %c0_i32_0 : i32, i32
  }
  func.func @transform_6(%arg0: i32) -> (i32, i32) {
    %c0_i32 = arith.constant 0 : i32
    %c0_i32_0 = arith.constant 0 : i32
    %c0_i32_1 = arith.constant 0 : i32
    return %c0_i32, %c0_i32_0 : i32, i32
  }
  func.func @transform_7(%arg0: i32) -> (i32, i32) {
    %c0_i32 = arith.constant 0 : i32
    %c0_i32_0 = arith.constant 0 : i32
    %c0_i32_1 = arith.constant 0 : i32
    return %c0_i32, %c0_i32_0 : i32, i32
  }
  func.func @transform_8(%arg0: i32) -> (i32, i32) {
    %c0_i32 = arith.constant 0 : i32
    %c0_i32_0 = arith.constant 0 : i32
    %c0_i32_1 = arith.constant 0 : i32
    return %c0_i32, %c0_i32_0 : i32, i32
  }
  func.func @transform_9(%arg0: i32) -> (i32, i32) {
    %c0_i32 = arith.constant 0 : i32
    %c0_i32_0 = arith.constant 0 : i32
    %c0_i32_1 = arith.constant 0 : i32
    return %c0_i32, %c0_i32_0 : i32, i32
  }
  func.func @transform_10(%arg0: i32) -> (i32, i32) {
    %c0_i32 = arith.constant 0 : i32
    %c0_i32_0 = arith.constant 0 : i32
    %c0_i32_1 = arith.constant 0 : i32
    return %c0_i32, %c0_i32_0 : i32, i32
  }
  func.func @transform_11(%arg0: i32) -> (i32, i32) {
    %c0_i32 = arith.constant 0 : i32
    %c0_i32_0 = arith.constant 0 : i32
    %c0_i32_1 = arith.constant 0 : i32
    return %c0_i32, %c0_i32_0 : i32, i32
  }
  func.func @transform_12(%arg0: i32) -> (i32, i32) {
    %c0_i32 = arith.constant 0 : i32
    %c0_i32_0 = arith.constant 0 : i32
    %c0_i32_1 = arith.constant 0 : i32
    return %c0_i32, %c0_i32_0 : i32, i32
  }
  func.func @transform_13(%arg0: i32) -> (i32, i32, i32) {
    %c0_i32 = arith.constant 0 : i32
    %c0_i32_0 = arith.constant 0 : i32
    %c0_i32_1 = arith.constant 0 : i32
    return %arg0, %c0_i32, %c0_i32_0 : i32, i32, i32
  }
}

</mosaic_0001>

<bundles_post_ra>
// kernel: mcnn_forward.1
= control target key start
LH: loop header
LB: loop body
LE: loop exit
PB: predicated region body
PF: predicated region fallthrough
CT: control target
= control target key end

     0   :  { %s13617_s0 = inlined_call_operand.vmem [shape: f32[2,1,784], index: 0, kind: input, shape index: {}]   ;;  %s13618_s1 = inlined_call_operand.vmem [shape: f32[9,32,1], index: 1, kind: input, shape index: {}]   ;;  %s13619_s2 = inlined_call_operand.vmem [shape: f32[32,1], index: 2, kind: input, shape index: {}]   ;;  %s13620_s3 = inlined_call_operand.hbm [shape: f32[2,784], index: 3, kind: input, shape index: {}]   ;;  %s13621_s4 = inlined_call_operand.vmem [shape: f32[64,288], index: 4, kind: input, shape index: {}]   ;;  %s13622_s5 = inlined_call_operand.vmem [shape: f32[64,1], index: 5, kind: input, shape index: {}]   ;;  %s13623_s6 = inlined_call_operand.hbm [shape: f32[2,196], index: 6, kind: input, shape index: {}]   ;;  %s13624_s7 = inlined_call_operand.hbm [shape: f32[784,196], index: 7, kind: input, shape index: {}]   ;;  %s13625_s8 = inlined_call_operand.hbm [shape: f32[196,49], index: 8, kind: input, shape index: {}]   ;;  %s13626_s9 = inlined_call_operand.hbm [shape: f32[3136,128], index: 9, kind: input, shape index: {}]   ;;  %s13627_s10 = inlined_call_operand.hbm [shape: f32[1,128], index: 10, kind: input, shape index: {}]   ;;  %s13628_s11 = inlined_call_operand.vmem [shape: f32[128,10], index: 11, kind: input, shape index: {}]   ;;  %s13629_s12 = inlined_call_operand.hbm [shape: f32[1,10], index: 12, kind: input, shape index: {}]   ;;  %s13630_s13 = inlined_call_operand.hbm [shape: f32[2,1,10], index: 13, kind: output, shape index: {}]  }
   0x1   :  { %13872 = sst [smem:[#allocation207_spill]] %s13623_s6 }
   0x2   :  { %13873 = sst [smem:[#allocation208_spill]] %s13625_s8 }
   0x3   :  { %18 = vsyncpa [#allocation9], 0 }
   0x4   :  { %19 = vsyncpa [#allocation12], 0 }
   0x5   :  { %20 = vsyncpa [#allocation15], 0 }
   0x6   :  { %21 = vsyncpa [#allocation18], 0 }
   0x7   :  { %22 = vsyncpa [#allocation10], 0 }
   0x8   :  { %24 = vsyncpa [#allocation10 + $0x1], 0  ;;  %s8246_s25 = smov 0   ;;  %s8248_s26 = smov 0  }
   0x9   :  { %s8250_s27 = smov 0   ;;  %s8252_s28 = smov 0  }
   0xa LB: > { %13874 = sst [smem:[#allocation26_spill]] %s8077_s25  ;;  %s8267_s29 = sadd.s32 4294967295, %s8089_s28   ;;  %s8089_s28 = sphi %s8252_s28, %s14619_s28   ;;  %s8085_s27 = sphi %s8250_s27, %s14621_s27   ;;  %s8081_s26 = sphi %s8248_s26, %s14623_s26   ;;  %s8077_s25 = sphi %s8246_s25, %s14622_s25  }
   0xb   : > { %13875 = sst [smem:[#allocation27_spill]] %s8085_s27  ;;  %s7315_s30 = sadd.s32 4294967294, %s8089_s28  }
   0xc   : > { %13876 = sst [smem:[#allocation28_spill]] %s8089_s28  ;;  %s8271_s14 = sadd.s32 1, %s8089_s28  }
   0xd   : > { %13877 = sst [smem:[#allocation29_spill]] %s8271_s14  ;;  %s315_s15 = sadd.s32 1, %s8085_s27 }
   0xe   : > { %s312_s16 = ssub.s32 %s8089_s28, %s8271_s14  ;;  %p325_p0 = scmp.ne.s32.totalorder %s8085_s27, %s8081_s26 }
   0xf   : > { %p313_p1 = scmp.eq.s32.totalorder %s312_s16, 0  ;;  %p326_p2 = scmp.eq.s32.totalorder %s8267_s29, 1 }
  0x10   : > { %p331_p3 = scmp.ne.s32.totalorder %s8081_s26, %s8077_s25  ;;  %p332_p4 = scmp.eq.s32.totalorder %s7315_s30, 1 }
  0x11   : > { %s8282_s17 = scalar_select %p313_p1, %s8085_s27, %s315_s15  }
  0x12   : > { %p8284_p5 = por %p326_p2, %p325_p0  ;;  %p8288_p6 = por %p332_p4, %p331_p3 }
  0x13   : > { %13878 = sst [smem:[#allocation30_spill]] %s8282_s17  ;;  %p7316_p7 = scmp.ge.s32.totalorder %s8089_s28, 1 }
  0x14   : > { %s13879_s18 = scalar_select %p8284_p5, 1, 0 }
  0x15   : > { %s13881_s19 = scalar_select %p8288_p6, 1, 0 }
  0x16   : > { %13880 = sst [smem:[#allocation31_spill]] %s13879_s18  ;;  %p339_p8 = scmp.lt.s32.totalorder %s8089_s28, 3 }
  0x17   : > { %13882 = sst [smem:[#allocation32_spill]] %s13881_s19  ;;  %p7458_p9 = scmp.eq.s32.totalorder %s8267_s29, 0 }
  0x18   : > { %p8295_p10 = pnand %p7316_p7, %p339_p8  ;;  %s13884_s6 = sld [smem:[#allocation207_spill]] }
  0x19   : > { %s8091_s24 = smov [#allocation11]   ;;  %s13885_s8 = sld [smem:[#allocation208_spill]] }
  0x1a   : > { %p7432_p11 = pneg %p8295_p10  ;;  %s377_s30 = sshll.u32 %s8091_s24, 4  ;;  %s378_s30 = int_to_ptr.vmem [resolvable:$true] %s377_s30 }
  0x1b   : > { %s8092_s21 = smov [#allocation14]   ;;  %s13639_s24 = smov 128  }
  0x1c   : > { %p8309_p12 = pnand %p7458_p9, %p7432_p11  ;;  %s402_s22 = sshll.u32 %s8092_s21, 4  ;;  %s403_s22 = int_to_ptr.vmem [resolvable:$true] %s402_s22 }
  0x1d   : > { %s8095_s14 = smov [#allocation17]   ;;  %s8099_s21 = smov 16  }
  0x1e   : > { %s375_s23 = sshll.u32 %s13884_s6, 4  ;;  %s13640_s6 = smov 8   ;;  %s376_s23 = int_to_ptr.hbm [resolvable:$true] %s375_s23 }
  0x1f   : > { %s400_s17 = sshll.u32 %s13885_s8, 4  ;;  %s429_s8 = sshll.u32 %s13627_s10, 4  ;;  %s401_s17 = int_to_ptr.hbm [resolvable:$true] %s400_s17  ;;  %s430_s8 = int_to_ptr.hbm [resolvable:$true] %s429_s8 }
  0x20   : > { %7438 = dma.hbm_to_vmem [thread:$0]  (!%p8309_p12), %s376_s23, 64, %s378_s30, [#allocation12]  }
  0x21   : > { %7444 = dma.hbm_to_vmem [thread:$0]  (!%p8309_p12), %s401_s17, 3200, %s403_s22, [#allocation15], %s13639_s24, %s13639_s24, %s13640_s6  }
  0x22   : > { %s431_s19 = sshll.u32 %s8095_s14, 4  ;;  %s357_s23 = sshll.u32 %s13620_s3, 4  ;;  %s432_s19 = int_to_ptr.vmem [resolvable:$true] %s431_s19  ;;  %s358_s23 = int_to_ptr.hbm [resolvable:$true] %s357_s23 }
  0x23   : > { %7450 = dma.hbm_to_vmem [thread:$0]  (!%p8309_p12), %s430_s8, 16, %s432_s19, [#allocation18]  }
  0x24   : > { %s8096_s30 = smov [#allocation8]   ;;  %s386_s22 = sshll.u32 %s13624_s7, 4  ;;  %s387_s22 = int_to_ptr.hbm [resolvable:$true] %s386_s22 }
  0x25   : > { %s359_s28 = sshll.u32 %s8096_s30, 4  ;;  %s8097_s14 = smov [#allocation13]   ;;  %s360_s28 = int_to_ptr.vmem [resolvable:$true] %s359_s28 }
  0x26   : > { %7435 = dma.hbm_to_vmem [thread:$0]  (!%p8309_p12), %s358_s23, 224, %s360_s28, [#allocation9]  }
  0x27   : > { %s388_s15 = sshll.u32 %s8097_s14, 4  ;;  %s414_s8 = sshll.u32 %s13626_s9, 4  ;;  %s389_s15 = int_to_ptr.vmem [resolvable:$true] %s388_s15  ;;  %s415_s8 = int_to_ptr.hbm [resolvable:$true] %s414_s8 }
  0x28   : > { %s8098_s19 = smov 256   ;;  %s8100_s18 = smov [#allocation16]  }
  0x29   : > { %7441 = dma.hbm_to_vmem [thread:$0]  (!%p8309_p12), %s387_s22, 25088, %s389_s15, [#allocation12], %s8098_s19, %s8098_s19, %s8099_s21  }
  0x2a   : > { %s416_s30 = sshll.u32 %s8100_s18, 4  ;;  %s444_s6 = sshll.u32 %s13629_s12, 4  ;;  %s417_s30 = int_to_ptr.vmem [resolvable:$true] %s416_s30  ;;  %s445_s6 = int_to_ptr.hbm [resolvable:$true] %s444_s6 }
  0x2b   : > { %s13887_s28 = smov 8   ;;  %s13888_s23 = smov 128  }
  0x2c   : > { %7447 = dma.hbm_to_vmem [thread:$0]  (!%p8309_p12), %s415_s8, 50176, %s417_s30, [#allocation15], %s13888_s23, %s13888_s23, %s13887_s28  }
  0x2d   : > { %s8101_s14 = smov [#allocation19]   ;;  %466 = sbr.rel (%p8295_p10) target bundleno = 4054 (0xfd6), region = 72 }
  0x2e   : > { %s446_s25 = sshll.u32 %s8101_s14, 4  ;;  %s447_s25 = int_to_ptr.vmem [resolvable:$true] %s446_s25 }
  0x2f   : > { %7453 = dma.hbm_to_vmem [thread:$0]  (!%p8309_p12), %s445_s6, 16, %s447_s25, [#allocation18]  }
  0x32   : > { %8056 = dma.done.wait (%p7458_p9), [#allocation9], 224  }
  0x33   : > { %8058 = vsyncadd (%p7458_p9), [#allocation9], 4294967072 }
  0x34   : > { %8060 = dma.done.wait (%p7458_p9), [#allocation12], 25152  }
  0x35   : > { %8062 = vsyncadd (%p7458_p9), [#allocation12], 4294942144 }
  0x36   : > { %8064 = dma.done.wait (%p7458_p9), [#allocation15], 53376  }
  0x37   : > { %8066 = vsyncadd (%p7458_p9), [#allocation15], 4294913920 }
  0x38   : > { %8068 = dma.done.wait (%p7458_p9), [#allocation18], 32  }
  0x39   : > { %8070 = vsyncadd (%p7458_p9), [#allocation18], 4294967264  ;;  %v8102_v0 = vmov 0   ;;  %v568_v1 = vld [vmem:[%s13618_s1 + $0x18] sm:$0xff]  ;;  %v566_v2 = vld [vmem:[%s13618_s1 + $0x8] sm:$0xff]  ;;  %s8103_s22 = smov 99   ;;  %v13641_v17 = vlaneseq }
  0x3a   : > { %7592 = vset.pattern.permute.xlu2 %v8102_v0  ;;  %7591 = vset.pattern.permute.xlu1 %v8102_v0  ;;  %v553_v3 = vld [vmem:[#allocation8] ss:$2 sm:$0x7f]  ;;  %v7333_v4 = vld [vmem:[%s13618_s1 + $0x20] sm:$0xff]  ;;  %v7336_v9 = vld [vmem:[%s13618_s1 + $0x38] sm:$0xff]  ;;  %s8104_s15 = smov 101  }
  0x3b   : > { %7590 = vset.pattern.permute.xlu0 %v8102_v0  ;;  %586 = vperm.xlu2 %7592, %v568_v1   ;;  %v567_v5 = vld [vmem:[%s13618_s1 + $0x10] sm:$0xff]  ;;  %v565_v6 = vld [vmem:[%s13618_s1] sm:$0xff]  ;;  %v7334_v8 = vld [vmem:[%s13618_s1 + $0x28] sm:$0xff]  ;;  %s8105_s18 = smov 127   ;;  %s8106_s28 = smov 1   ;;  %vm545_vm0 = vcmp.lt.s32.totalorder %v13641_v17, 128 }
  0x3c   : > { %576 = vperm.xlu1 %7591, %v566_v2   ;;  %558 = vrot.lane.b32.xlu0 %v553_v3, %s8103_s22  ;;  %v7335_v7 = vld [vmem:[%s13618_s1 + $0x30] sm:$0xff]  ;;  %v7338_v10 = vld [vmem:[%s13618_s1 + $0x48] sm:$0xff]  ;;  %v7337_v12 = vld [vmem:[%s13618_s1 + $0x40] sm:$0xff]  ;;  %s8107_s23 = smov 27   ;;  %p539_p13 = scmp.lt.s32.totalorder %s8267_s29, 1  ;;  %v8108_v18 = vmov 0.0  }
  0x3d   : > { %v8394_v11 = vld [vmem:[#allocation8 + $0x1] ss:$2 sm:$0x7f]  ;;  %v7340_v14 = vld [vmem:[%s13618_s1 + $0x58] sm:$0xff]  ;;  %v7341_v15 = vld [vmem:[%s13618_s1 + $0x60] sm:$0xff]  ;;  %vm550_vm1 = vcmp.lt.s32.totalorder %v13641_v17, 784 }
  0x3e   : > { %v7339_v13 = vld [vmem:[%s13618_s1 + $0x50] sm:$0xff]  ;;  %v7345_v16 = vld [vmem:[%s13618_s1 + $0x80] sm:$0xff]  ;;  %s540_s6 = scalar_select %p539_p13, %s8267_s29, 1  ;;  %547 = vst.msk [vmem:[#allocation2] sm:$0x1] %vm545_vm0, %v8108_v18  ;;  %vm897_vm2 = vcmask 826368  }
  0x3f   : > { %548 = vst.msk [vmem:[#allocation2 + $0x7] sm:$0x1] %vm545_vm0, %v8108_v18  ;;  %s8109_s30 = smov 29   ;;  %vm13869_vm3 = vcmask 1039360   ;;  %s8111_s20 = smov 100   ;;  %vm1632_vm4 = vcmask 7168  }
  0x40   : > { %s7401_s27 = smul.u32 7, %s540_s6  ;;  %2647 = vst [vmem:[#allocation3 + $0x30] sm:$0xff] %v8108_v18  ;;  %s8112_s24 = smov 98   ;;  %vm1872_vm5 = vcmask 220160   ;;  %vm2330_vm6 = vcmask 236544   ;;  %vm561_vm7 = vcmask 809984  }
  0x41   : > { %2648 = vst [vmem:[#allocation3 + $0x68] sm:$0xff] %v8108_v18  ;;  %s8114_s16 = smov 71   ;;  %s8115_s8 = smov 70   ;;  %vm1053_vm8 = vcmask 1031168   ;;  %vm13870_vm9 = vcmask 818176   ;;  %vm1788_vm10 = vcmask 801792  }
  0x42   : > { %2649 = vst [vmem:[#allocation3 + $0xa0] sm:$0xff] %v8108_v18  ;;  %vm2028_vm11 = vcmask 588800   ;;  %vm2246_vm12 = vcmask 580608   ;;  %vm2486_vm13 = vcmask 572416   ;;  %vm2793_vm14 = vcmask 130048   ;;  %s8120_s17 = smov 14  }
  0x43   : > { %667 = vperm.xlu2 %7592, %v7333_v4   ;;  %2650 = vst [vmem:[#allocation3 + $0xd8] sm:$0xff] %v8108_v18  ;;  %vm4059_vm15 = vcmask 556032   ;;  %vm4259_vm0 = vcmask 941056   ;;  %s8121_s14 = smov 15   ;;  %s8122_s25 = smov 19  }
  0x44   : > { %581 = vperm.xlu1 %7591, %v567_v5   ;;  %571 = vperm.xlu0 %7590, %v565_v6   ;;  %4050 = vst [vmem:[#allocation4] sm:$0xff] %v8108_v18  ;;  %v7349_v5 = vld [vmem:[%s13618_s1 + $0xa0] sm:$0xff]  ;;  %s8123_s6 = smov 24   ;;  %s8124_s19 = smov 38  }
  0x45   : > { %4054 = vst [vmem:[#allocation4 + $0x10] sm:$0xff] %v8108_v18  ;;  %s8126_s21 = smov 32  }
  0x46   : > { %4055 = vst [vmem:[#allocation4 + $0x28] sm:$0xff] %v8108_v18 }
  0x47   : > { %4056 = vst [vmem:[#allocation4 + $0x40] sm:$0xff] %v8108_v18 }
  0x48   : > { %4057 = vst [vmem:[#allocation4 + $0x58] sm:$0xff] %v8108_v18 }
  0x49   : > { %5130 = vst [vmem:[#allocation6 + $0x8] sm:$0xff] %v8108_v18 }
  0x4a   : > { %5131 = vst [vmem:[#allocation6 + $0x18] sm:$0xff] %v8108_v18 }
  0x4b   : > { %677 = vperm.xlu2 %7592, %v7335_v7   ;;  %5132 = vst [vmem:[#allocation6 + $0x28] sm:$0xff] %v8108_v18  ;;  %v7342_v7 = vld [vmem:[%s13618_s1 + $0x68] sm:$0xff] }
  0x4c   : > { %672 = vperm.xlu1 %7591, %v7334_v8   ;;  %682 = vperm.xlu0 %7590, %v7336_v9   ;;  %5133 = vst [vmem:[#allocation6 + $0x38] sm:$0xff] %v8108_v18  ;;  %v7346_v8 = vld [vmem:[%s13618_s1 + $0x88] sm:$0xff]  ;;  %v7357_v9 = vld [vmem:[%s13618_s1 + $0xe0] sm:$0xff] }
  0x4d   : > { %5134 = vst [vmem:[#allocation6 + $0x48] sm:$0xff] %v8108_v18 }
  0x4e   : > { %5135 = vst [vmem:[#allocation6 + $0x58] sm:$0xff] %v8108_v18 }
  0x4f   : > { %5136 = vst [vmem:[#allocation6 + $0x68] sm:$0xff] %v8108_v18 }
  0x50   : > { %5137 = vst [vmem:[#allocation6 + $0x78] sm:$0xff] %v8108_v18  ;;  %v7343_v18 = vld [vmem:[%s13618_s1 + $0x70] sm:$0xff] }
  0x53   : > { %894 = vrot.lane.b32.xlu2 %v8394_v11, %s8104_s15  ;;  %s542_s15 = scalar_lea.vmem %s13617_s0, %s7401_s27  ;;  %s8110_s27 = smov 126  }
  0x54   : > { %913 = vperm.xlu1 %7591, %v7338_v10   ;;  %908 = vperm.xlu0 %7590, %v7337_v12   ;;  %v549_v19 = vld [vmem:[%s542_s15] sm:$0x7f]  ;;  %s8113_s15 = smov 72  }
  0x55   : > { %552 = vst.msk [vmem:[#allocation2 + $0x1] sm:$0x7f] %vm550_vm1, %v549_v19  ;;  %v7347_v19 = vld [vmem:[%s13618_s1 + $0x90] sm:$0xff]  ;;  %vm4312_vm1 = vcmask 105472  }
  0x5b   : > { %918 = vperm.xlu2 %7592, %v7339_v13   ;;  %v7361_v13 = vld [vmem:[%s13618_s1 + $0x100] sm:$0xff] }
  0x5c   : > { %1135 = vrot.lane.b32.xlu1 %v553_v3, %s8105_s18  ;;  %923 = vperm.xlu0 %7590, %v7340_v14   ;;  %v8425_v21 = vld [vmem:[#allocation2] sm:$0x7f] }
  0x5d   : > { %v688_v22 = vperm.slane %v8425_v21, 2  ;;  %v687_v23 = vperm.slane %v8425_v21, 1  ;;  %v686_v24 = vperm.slane %v8425_v21, 0  ;;  %v691_v29 = vperm.slane %v8425_v21, 5  ;;  %v7354_v14 = vld [vmem:[%s13618_s1 + $0xc8] sm:$0xff] }
  0x5e   : > { %v690_v30 = vperm.slane %v8425_v21, 4  ;;  %v689_v31 = vperm.slane %v8425_v21, 3  ;;  %v692_v35 = vperm.slane %v8425_v21, 6 }
  0x63   : > { %1629 = vrot.lane.b32.xlu2 %v8394_v11, %s8106_s28 }
  0x64   : > { %1148 = vperm.xlu1 %7591, %v7341_v15   ;;  %1869 = vrot.lane.b32.xlu0 %v553_v3, %s8107_s23  ;;  %v7353_v3 = vld [vmem:[%s13618_s1 + $0xc0] sm:$0xff]  ;;  %v7350_v15 = vld [vmem:[%s13618_s1 + $0xa8] sm:$0xff] }
  0x6b   : > { %1404 = vperm.xlu2 %7592, %v7345_v16  }
  0x95   : > { %v8423_v20 = vpop.permute.xlu2 %586 }
  0x96   : > { %13889 = vst [vmem:[#allocation33_spill] sm:$0xff] %v8423_v20 }
  0x9d   : > { %v668_v25 = vpop.permute.xlu2 %667 }
  0x9e   : > { %v702_v26 = vmul.f32 %v688_v22, %v668_v25  ;;  %v701_v27 = vmul.f32 %v687_v23, %v668_v25  ;;  %v700_v28 = vmul.f32 %v686_v24, %v668_v25  ;;  %v705_v32 = vmul.f32 %v691_v29, %v668_v25 }
  0x9f   : > { %v704_v33 = vmul.f32 %v690_v30, %v668_v25  ;;  %v703_v34 = vmul.f32 %v689_v31, %v668_v25  ;;  %v706_v37 = vmul.f32 %v692_v35, %v668_v25 }
  0xa0   : > { %760 = vrot.lane.b32.xlu0 %v702_v26, %s8105_s18  ;;  %758 = vrot.lane.b32.xlu2 %v701_v27, %s8105_s18  ;;  %v7362_v26 = vld [vmem:[%s13618_s1 + $0x108] sm:$0xff]  ;;  %v7355_v27 = vld [vmem:[%s13618_s1 + $0xd0] sm:$0xff] }
  0xa1   : > { %756 = vrot.lane.b32.xlu1 %v700_v28, %s8105_s18 }
  0xa5   : > { %v678_v46 = vpop.permute.xlu2 %677 }
  0xa6   : > { %v714_v48 = vmul.f32 %v686_v24, %v678_v46  ;;  %v715_v50 = vmul.f32 %v687_v23, %v678_v46  ;;  %v717_v52 = vmul.f32 %v689_v31, %v678_v46  ;;  %v716_v53 = vmul.f32 %v688_v22, %v678_v46 }
  0xa7   : > { %v718_v54 = vmul.f32 %v690_v30, %v678_v46  ;;  %v720_v56 = vmul.f32 %v692_v35, %v678_v46  ;;  %v719_v57 = vmul.f32 %v691_v29, %v678_v46 }
  0xa8   : > { %766 = vrot.lane.b32.xlu0 %v705_v32, %s8105_s18  ;;  %764 = vrot.lane.b32.xlu2 %v704_v33, %s8105_s18  ;;  %v7344_v32 = vld [vmem:[%s13618_s1 + $0x78] sm:$0xff] }
  0xa9   : > { %762 = vrot.lane.b32.xlu1 %v703_v34, %s8105_s18  ;;  %v7348_v33 = vld [vmem:[%s13618_s1 + $0x98] sm:$0xff]  ;;  %v7359_v34 = vld [vmem:[%s13618_s1 + $0xf0] sm:$0xff] }
  0xad   : > { %v8464_v59 = vpop.permute.xlu2 %894 }
  0xae   : > { %v8440_v36 = vpop.permute.xlu1 %576  ;;  %v8451_v47 = vpop.permute.xlu0 %558 }
  0xaf   : > { %13890 = vst [vmem:[#allocation34_spill] sm:$0xff] %v8440_v36 }
  0xb0   : > { %13892 = vst [vmem:[#allocation36_spill] sm:$0xff] %v8451_v47 }
  0xb1   : > { %768 = vrot.lane.b32.xlu1 %v706_v37, %s8105_s18  ;;  %v896_v37 = vrot.slane %v8464_v59, 7 }
  0xb5   : > { %v8469_v63 = vpop.permute.xlu2 %918 }
  0xb6   : > { %v8443_v38 = vpop.permute.xlu1 %581  ;;  %v8456_v51 = vpop.permute.xlu0 %571 }
  0xb7   : > { %13891 = vst [vmem:[#allocation35_spill] sm:$0xff] %v8443_v38 }
  0xb8   : > { %13893 = vst [vmem:[#allocation37_spill] sm:$0xff] %v8456_v51 }
  0xbd   : > { %v8477_v4 = vpop.permute.xlu2 %1629 }
  0xbe   : > { %v673_v39 = vpop.permute.xlu1 %672  ;;  %v683_v55 = vpop.permute.xlu0 %682 }
  0xbf   : > { %v708_v40 = vmul.f32 %v687_v23, %v673_v39  ;;  %v707_v41 = vmul.f32 %v686_v24, %v673_v39  ;;  %v709_v42 = vmul.f32 %v688_v22, %v673_v39  ;;  %v711_v43 = vmul.f32 %v690_v30, %v673_v39 }
  0xc0   : > { %v710_v44 = vmul.f32 %v689_v31, %v673_v39  ;;  %v712_v45 = vmul.f32 %v691_v29, %v673_v39  ;;  %v713_v49 = vmul.f32 %v692_v35, %v673_v39  ;;  %v721_v58 = vmul.f32 %v686_v24, %v683_v55 }
  0xc1   : > { %772 = vrot.lane.b32.xlu0 %v708_v40, %s8105_s18  ;;  %770 = vrot.lane.b32.xlu2 %v707_v41, %s8105_s18  ;;  %v723_v60 = vmul.f32 %v688_v22, %v683_v55  ;;  %v722_v61 = vmul.f32 %v687_v23, %v683_v55  ;;  %v724_v62 = vmul.f32 %v689_v31, %v683_v55  ;;  %v7358_v23 = vld [vmem:[%s13618_s1 + $0xe8] sm:$0xff] }
  0xc2   : > { %774 = vrot.lane.b32.xlu1 %v709_v42, %s8105_s18  ;;  %v726_v0 = vmul.f32 %v691_v29, %v683_v55  ;;  %v725_v1 = vmul.f32 %v690_v30, %v683_v55  ;;  %v727_v2 = vmul.f32 %v692_v35, %v683_v55  ;;  %v7351_v29 = vld [vmem:[%s13618_s1 + $0xb0] sm:$0xff]  ;;  %v898_v41 = vsel %vm897_vm2, %v896_v37, %v8464_v59  ;;  %v8657_v37 = vld [vmem:[#allocation2 + $0x1] sm:$0x7f] }
  0xc3   : > { %v7363_v42 = vld [vmem:[%s13618_s1 + $0x110] sm:$0xff]  ;;  %vm4611_vm2 = vcmask 932864  }
  0xc5   : > { %v8495_v10 = vpop.permute.xlu2 %1404 }
  0xc6   : > { %v8484_v6 = vpop.permute.xlu1 %913 }
  0xc9   : > { %778 = vrot.lane.b32.xlu0 %v711_v43, %s8105_s18  ;;  %776 = vrot.lane.b32.xlu2 %v710_v44, %s8105_s18  ;;  %v7356_v43 = vld [vmem:[%s13618_s1 + $0xd8] sm:$0xff] }
  0xca   : > { %780 = vrot.lane.b32.xlu1 %v712_v45, %s8105_s18  ;;  %v7352_v44 = vld [vmem:[%s13618_s1 + $0xb8] sm:$0xff]  ;;  %v8567_v45 = vmul.f32 %v898_v41, %v8425_v21 }
  0xce   : > { %v1136_v12 = vpop.permute.xlu1 %1135 }
  0xd1   : > { %784 = vrot.lane.b32.xlu0 %v714_v48, %s8105_s18  ;;  %782 = vrot.lane.b32.xlu2 %v713_v49, %s8105_s18 }
  0xd2   : > { %786 = vrot.lane.b32.xlu1 %v715_v50, %s8105_s18  ;;  %v8576_v50 = vperm.slane %v8567_v45, 0 }
  0xd6   : > { %v8521_v24 = vpop.permute.xlu1 %1148 }
  0xd9   : > { %790 = vrot.lane.b32.xlu0 %v717_v52, %s8105_s18  ;;  %788 = vrot.lane.b32.xlu2 %v716_v53, %s8105_s18  ;;  %v7360_v52 = vld [vmem:[%s13618_s1 + $0xf8] sm:$0xff] }
  0xda   : > { %792 = vrot.lane.b32.xlu1 %v718_v54, %s8105_s18  ;;  %v7364_v53 = vld [vmem:[%s13618_s1 + $0x118] sm:$0xff]  ;;  %v1137_v54 = vrot.slane %v1136_v12, 7 }
  0xe1   : > { %796 = vrot.lane.b32.xlu0 %v720_v56, %s8105_s18  ;;  %794 = vrot.lane.b32.xlu2 %v719_v57, %s8105_s18  ;;  %v1134_v57 = vld [vmem:[#allocation2] sm:$0xff] }
  0xe2   : > { %798 = vrot.lane.b32.xlu1 %v721_v58, %s8105_s18  ;;  %v1138_v58 = vsel %vm13869_vm3, %v1137_v54, %v1136_v12  ;;  %v8624_v12 = vperm.slane %v8567_v45, 4 }
  0xe9   : > { %802 = vrot.lane.b32.xlu0 %v723_v60, %s8105_s18  ;;  %800 = vrot.lane.b32.xlu2 %v722_v61, %s8105_s18  ;;  %v8595_v60 = vperm.slane %v8567_v45, 1  ;;  %v8598_v61 = vperm.slane %v8567_v45, 3 }
  0xea   : > { %804 = vrot.lane.b32.xlu1 %v724_v62, %s8105_s18  ;;  %v8601_v62 = vperm.slane %v8567_v45, 2 }
  0xf1   : > { %808 = vrot.lane.b32.xlu0 %v726_v0, %s8105_s18  ;;  %806 = vrot.lane.b32.xlu2 %v725_v1, %s8105_s18  ;;  %v8603_v0 = vmul.f32 %v1138_v58, %v1134_v57 }
  0xf2   : > { %810 = vrot.lane.b32.xlu1 %v727_v2, %s8105_s18 }
  0xf9   : > { %2327 = vrot.lane.b32.xlu0 %v8394_v11, %s8109_s30  ;;  %1883 = vperm.xlu2 %7592, %v7353_v3   ;;  %v8497_v11 = vpop.permute.xlu0 %908 }
  0xfa   : > { %1643 = vperm.xlu1 %7591, %v7349_v5   ;;  %v8508_v16 = vpop.permute.xlu2 %758  ;;  %v941_v21 = vmul.f32 %v8576_v50, %v8497_v11  ;;  %v942_v1 = vmul.f32 %v8595_v60, %v8497_v11  ;;  %v944_v2 = vmul.f32 %v8598_v61, %v8497_v11  ;;  %v943_v3 = vmul.f32 %v8601_v62, %v8497_v11 }
  0xfb   : > { %13894 = vst [vmem:[#allocation38_spill] sm:$0xff] %v8508_v16 }
 0x101   : > { %1153 = vperm.xlu0 %7590, %v7342_v7   ;;  %1409 = vperm.xlu2 %7592, %v7346_v8   ;;  %v8516_v22 = vpop.permute.xlu0 %923  ;;  %v8619_v8 = vperm.slane %v8603_v0, 0 }
 0x102   : > { %2116 = vperm.xlu1 %7591, %v7357_v9   ;;  %v8523_v25 = vpop.permute.xlu2 %764 }
 0x103   : > { %13895 = vst [vmem:[#allocation39_spill] sm:$0xff] %v8523_v25 }
 0x109   : > { %2341 = vperm.xlu0 %7590, %v7361_v13   ;;  %1888 = vperm.xlu2 %7592, %v7354_v14   ;;  %v8531_v28 = vpop.permute.xlu0 %1869  ;;  %v8627_v13 = vperm.slane %v8567_v45, 5  ;;  %v945_v14 = vmul.f32 %v8624_v12, %v8497_v11 }
 0x10a   : > { %1648 = vperm.xlu1 %7591, %v7350_v15   ;;  %v1183_v15 = vmul.f32 %v8619_v8, %v8521_v24 }
 0x111   : > { %1158 = vperm.xlu0 %7590, %v7343_v18   ;;  %1414 = vperm.xlu2 %7592, %v7347_v19   ;;  %v946_v18 = vmul.f32 %v8627_v13, %v8497_v11 }
 0x112   : > { %2121 = vperm.xlu1 %7591, %v7358_v23   ;;  %v8549_v35 = vpop.permute.xlu0 %760 }
 0x113   : > { %v8536_v30 = vpop.permute.xlu1 %756  ;;  %13898 = vst [vmem:[#allocation42_spill] sm:$0xff] %v8549_v35 }
 0x114   : > { %13896 = vst [vmem:[#allocation40_spill] sm:$0xff] %v8536_v30  ;;  %v953_v30 = vmul.f32 %v8627_v13, %v8484_v6 }
 0x119   : > { %2346 = vperm.xlu0 %7590, %v7362_v26   ;;  %1893 = vperm.xlu2 %7592, %v7355_v27   ;;  %v8643_v26 = vperm.slane %v8603_v0, 1  ;;  %v8646_v27 = vperm.slane %v8603_v0, 3 }
 0x11a   : > { %1653 = vperm.xlu1 %7591, %v7351_v29   ;;  %v8569_v46 = vpop.permute.xlu0 %766 }
 0x11b   : > { %v8538_v31 = vpop.permute.xlu2 %770  ;;  %v8552_v39 = vpop.permute.xlu1 %762  ;;  %13901 = vst [vmem:[#allocation45_spill] sm:$0xff] %v8569_v46 }
 0x11c   : > { %13897 = vst [vmem:[#allocation41_spill] sm:$0xff] %v8538_v31 }
 0x11d   : > { %13899 = vst [vmem:[#allocation43_spill] sm:$0xff] %v8552_v39 }
 0x121   : > { %1163 = vperm.xlu0 %7590, %v7344_v32   ;;  %1419 = vperm.xlu2 %7592, %v7348_v33   ;;  %v8651_v32 = vperm.slane %v8603_v0, 2  ;;  %v1184_v33 = vmul.f32 %v8643_v26, %v8521_v24 }
 0x122   : > { %2126 = vperm.xlu1 %7591, %v7359_v34   ;;  %v1186_v34 = vmul.f32 %v8646_v27, %v8521_v24 }
 0x123   : > { %v8554_v40 = vpop.permute.xlu2 %776  ;;  %v8573_v49 = vpop.permute.xlu1 %768  ;;  %v1185_v41 = vmul.f32 %v8651_v32, %v8521_v24 }
 0x124   : > { %13900 = vst [vmem:[#allocation44_spill] sm:$0xff] %v8554_v40 }
 0x125   : > { %13903 = vst [vmem:[#allocation47_spill] sm:$0xff] %v8573_v49 }
 0x129   : > { %2351 = vperm.xlu0 %7590, %v7363_v42   ;;  %1898 = vperm.xlu2 %7592, %v7356_v43  }
 0x12a   : > { %1658 = vperm.xlu1 %7591, %v7352_v44   ;;  %v8669_v44 = vperm.slane %v8603_v0, 4 }
 0x12b   : > { %v8571_v48 = vpop.permute.xlu2 %782 }
 0x12c   : > { %13902 = vst [vmem:[#allocation46_spill] sm:$0xff] %v8571_v48  ;;  %v1187_v54 = vmul.f32 %v8669_v44, %v8521_v24  ;;  %v948_v48 = vmul.f32 %v8576_v50, %v8484_v6 }
 0x131   : > { %2131 = vperm.xlu0 %7590, %v7360_v52   ;;  %997 = vrot.lane.b32.xlu2 %v941_v21, %s8110_s27  ;;  %v8672_v52 = vperm.slane %v8657_v37, 0 }
 0x132   : > { %2356 = vperm.xlu1 %7591, %v7364_v53   ;;  %v8677_v53 = vperm.slane %v8603_v0, 5 }
 0x133   : > { %v8587_v55 = vpop.permute.xlu0 %772  ;;  %v8589_v56 = vpop.permute.xlu2 %788  ;;  %v1437_v57 = vmul.f32 %v8672_v52, %v8495_v10 }
 0x134   : > { %13904 = vst [vmem:[#allocation48_spill] sm:$0xff] %v8587_v55  ;;  %v8592_v59 = vpop.permute.xlu1 %774  ;;  %v1188_v58 = vmul.f32 %v8677_v53, %v8521_v24 }
 0x135   : > { %13905 = vst [vmem:[#allocation49_spill] sm:$0xff] %v8589_v56 }
 0x136   : > { %13906 = vst [vmem:[#allocation50_spill] sm:$0xff] %v8592_v59  ;;  %v952_v59 = vmul.f32 %v8624_v12, %v8484_v6 }
 0x139   : > { %999 = vrot.lane.b32.xlu0 %v942_v1, %s8110_s27  ;;  %1003 = vrot.lane.b32.xlu2 %v944_v2, %s8110_s27 }
 0x13a   : > { %1001 = vrot.lane.b32.xlu1 %v943_v3, %s8110_s27  ;;  %v8693_v3 = vperm.slane %v8657_v37, 1 }
 0x13b   : > { %v8614_v5 = vpop.permute.xlu0 %778  ;;  %v8616_v7 = vpop.permute.xlu2 %794 }
 0x13c   : > { %13907 = vst [vmem:[#allocation51_spill] sm:$0xff] %v8614_v5  ;;  %v8621_v9 = vpop.permute.xlu1 %780 }
 0x13d   : > { %13908 = vst [vmem:[#allocation52_spill] sm:$0xff] %v8616_v7 }
 0x13e   : > { %13909 = vst [vmem:[#allocation53_spill] sm:$0xff] %v8621_v9 }
 0x141   : > { %1005 = vrot.lane.b32.xlu0 %v945_v14, %s8110_s27  ;;  %1247 = vrot.lane.b32.xlu2 %v1183_v15, %s8111_s20  ;;  %v8696_v14 = vperm.slane %v8657_v37, 3 }
 0x142   : > { %1007 = vrot.lane.b32.xlu1 %v946_v18, %s8110_s27  ;;  %v8701_v18 = vperm.slane %v8657_v37, 2 }
 0x143   : > { %v8638_v19 = vpop.permute.xlu0 %784  ;;  %v8640_v23 = vpop.permute.xlu2 %800 }
 0x144   : > { %13910 = vst [vmem:[#allocation54_spill] sm:$0xff] %v8638_v19  ;;  %v8648_v29 = vpop.permute.xlu1 %786 }
 0x145   : > { %13911 = vst [vmem:[#allocation55_spill] sm:$0xff] %v8640_v23 }
 0x146   : > { %13912 = vst [vmem:[#allocation56_spill] sm:$0xff] %v8648_v29  ;;  %v949_v29 = vmul.f32 %v8595_v60, %v8484_v6 }
 0x149   : > { %1249 = vrot.lane.b32.xlu0 %v1184_v33, %s8111_s20  ;;  %1253 = vrot.lane.b32.xlu2 %v1186_v34, %s8111_s20  ;;  %v1438_v33 = vmul.f32 %v8693_v3, %v8495_v10  ;;  %v1440_v34 = vmul.f32 %v8696_v14, %v8495_v10 }
 0x14a   : > { %1251 = vrot.lane.b32.xlu1 %v1185_v41, %s8111_s20  ;;  %v1439_v41 = vmul.f32 %v8701_v18, %v8495_v10 }
 0x14b   : > { %v8664_v42 = vpop.permute.xlu0 %790  ;;  %v8666_v43 = vpop.permute.xlu2 %806 }
 0x14c   : > { %13913 = vst [vmem:[#allocation57_spill] sm:$0xff] %v8664_v42  ;;  %v8674_v21 = vpop.permute.xlu1 %792 }
 0x14d   : > { %13914 = vst [vmem:[#allocation58_spill] sm:$0xff] %v8666_v43  ;;  %v1631_v43 = vrot.slane %v8477_v4, 7 }
 0x14e   : > { %13915 = vst [vmem:[#allocation59_spill] sm:$0xff] %v8674_v21 }
 0x151   : > { %1255 = vrot.lane.b32.xlu0 %v1187_v54, %s8111_s20  ;;  %1493 = vrot.lane.b32.xlu2 %v1437_v57, %s8103_s22 }
 0x152   : > { %1257 = vrot.lane.b32.xlu1 %v1188_v58, %s8111_s20  ;;  %v8717_v58 = vperm.slane %v8657_v37, 4 }
 0x153   : > { %v8688_v1 = vpop.permute.xlu0 %796  ;;  %v8690_v2 = vpop.permute.xlu2 %1883 }
 0x154   : > { %13916 = vst [vmem:[#allocation60_spill] sm:$0xff] %v8688_v1  ;;  %v8698_v15 = vpop.permute.xlu1 %798  ;;  %v1441_v1 = vmul.f32 %v8717_v58, %v8495_v10 }
 0x155   : > { %13917 = vst [vmem:[#allocation61_spill] sm:$0xff] %v8690_v2 }
 0x156   : > { %13918 = vst [vmem:[#allocation62_spill] sm:$0xff] %v8698_v15 }
 0x159   : > { %1495 = vrot.lane.b32.xlu0 %v1438_v33, %s8103_s22  ;;  %1499 = vrot.lane.b32.xlu2 %v1440_v34, %s8103_s22 }
 0x15a   : > { %1497 = vrot.lane.b32.xlu1 %v1439_v41, %s8103_s22  ;;  %v1633_v41 = vsel %vm1632_vm4, %v1631_v43, %v8477_v4 }
 0x15b   : > { %v8712_v54 = vpop.permute.xlu0 %802  ;;  %v8714_v57 = vpop.permute.xlu2 %1409  ;;  %v8734_v15 = vmul.f32 %v1633_v41, %v8657_v37 }
 0x15c   : > { %13919 = vst [vmem:[#allocation63_spill] sm:$0xff] %v8712_v54  ;;  %v8719_v17 = vpop.permute.xlu1 %804 }
 0x15d   : > { %13920 = vst [vmem:[#allocation64_spill] sm:$0xff] %v8714_v57  ;;  %v8741_v7 = vperm.slane %v8734_v15, 2  ;;  %v8767_v19 = vperm.slane %v8734_v15, 3  ;;  %v8809_v49 = vperm.slane %v8734_v15, 4 }
 0x15e   : > { %13921 = vst [vmem:[#allocation65_spill] sm:$0xff] %v8719_v17 }
 0x161   : > { %1501 = vrot.lane.b32.xlu0 %v1441_v1, %s8103_s22  ;;  %v8744_v1 = vperm.slane %v8734_v15, 1 }
 0x163   : > { %v8725_v33 = vpop.permute.xlu0 %808  ;;  %v8727_v34 = vpop.permute.xlu2 %1888 }
 0x164   : > { %13922 = vst [vmem:[#allocation66_spill] sm:$0xff] %v8725_v33  ;;  %v8731_v54 = vpop.permute.xlu1 %810  ;;  %v8747_v33 = vperm.slane %v8734_v15, 0 }
 0x165   : > { %13923 = vst [vmem:[#allocation67_spill] sm:$0xff] %v8731_v54 }
 0x16b   : > { %v8736_v17 = vpop.permute.xlu0 %2327  ;;  %v8738_v23 = vpop.permute.xlu2 %1414 }
 0x16c   : > { %v8749_v21 = vpop.permute.xlu1 %1643 }
 0x16d   : > { %v1678_v4 = vmul.f32 %v8741_v7, %v8749_v21  ;;  %v1677_v43 = vmul.f32 %v8744_v1, %v8749_v21  ;;  %v1676_v41 = vmul.f32 %v8747_v33, %v8749_v21 }
 0x16f   : > { %1736 = vrot.lane.b32.xlu0 %v1678_v4, %s8112_s24  ;;  %1734 = vrot.lane.b32.xlu2 %v1677_v43, %s8112_s24  ;;  %v1679_v4 = vmul.f32 %v8767_v19, %v8749_v21  ;;  %v1871_v43 = vrot.slane %v8531_v28, 7 }
 0x170   : > { %1732 = vrot.lane.b32.xlu1 %v1676_v41, %s8112_s24 }
 0x171   : > { %v1873_v5 = vsel %vm1872_vm5, %v1871_v43, %v8531_v28  ;;  %vm4089_vm5 = vcmask 924672  }
 0x173   : > { %v8760_v54 = vpop.permute.xlu0 %1153  ;;  %v8762_v42 = vpop.permute.xlu2 %1893 }
 0x174   : > { %13924 = vst [vmem:[#allocation68_spill] sm:$0xff] %v8760_v54  ;;  %v8764_v56 = vpop.permute.xlu1 %2116  ;;  %v1193_v38 = vmul.f32 %v8651_v32, %v8760_v54  ;;  %v1192_v51 = vmul.f32 %v8643_v26, %v8760_v54  ;;  %v1191_v36 = vmul.f32 %v8619_v8, %v8760_v54  ;;  %v1195_v47 = vmul.f32 %v8669_v44, %v8760_v54 }
 0x175   : > { %13925 = vst [vmem:[#allocation69_spill] sm:$0xff] %v8764_v56 }
 0x177   : > { %1013 = vrot.lane.b32.xlu0 %v949_v29, %s8110_s27  ;;  %1011 = vrot.lane.b32.xlu2 %v948_v48, %s8110_s27  ;;  %v951_v29 = vmul.f32 %v8598_v61, %v8484_v6  ;;  %v950_v48 = vmul.f32 %v8601_v62, %v8484_v6 }
 0x178   : > { %1738 = vrot.lane.b32.xlu1 %v1679_v4, %s8112_s24  ;;  %v8793_v4 = vmul.f32 %v1873_v5, %v8657_v37 }
 0x17a   : > { %13927 = vst [vmem:[#allocation71_spill] sm:$0xff] %v8793_v4  ;;  %v8801_v43 = vperm.slane %v8793_v4, 1  ;;  %v8804_v31 = vperm.slane %v8793_v4, 0  ;;  %v8825_v20 = vperm.slane %v8793_v4, 3  ;;  %v8830_v46 = vperm.slane %v8793_v4, 2 }
 0x17b   : > { %v8779_v41 = vpop.permute.xlu0 %2341  ;;  %v8781_v9 = vpop.permute.xlu2 %1419 }
 0x17c   : > { %13926 = vst [vmem:[#allocation70_spill] sm:$0xff] %v8779_v41  ;;  %v8784_v40 = vpop.permute.xlu1 %1648 }
 0x17f   : > { %1019 = vrot.lane.b32.xlu0 %v952_v59, %s8110_s27  ;;  %1017 = vrot.lane.b32.xlu2 %v951_v29, %s8110_s27  ;;  %v1917_v59 = vmul.f32 %v8801_v43, %v8690_v2  ;;  %v1916_v29 = vmul.f32 %v8804_v31, %v8690_v2 }
 0x180   : > { %1015 = vrot.lane.b32.xlu1 %v950_v48, %s8110_s27  ;;  %v1680_v48 = vmul.f32 %v8809_v49, %v8749_v21 }
 0x183   : > { %v8798_v28 = vpop.permute.xlu0 %1158  ;;  %v8811_v5 = vpop.permute.xlu2 %1898 }
 0x184   : > { %v8806_v55 = vpop.permute.xlu1 %2121  ;;  %13928 = vst [vmem:[#allocation72_spill] sm:$0xff] %v8811_v5 }
 0x187   : > { %1974 = vrot.lane.b32.xlu0 %v1917_v59, %s8113_s15  ;;  %1972 = vrot.lane.b32.xlu2 %v1916_v29, %s8113_s15  ;;  %v1919_v59 = vmul.f32 %v8825_v20, %v8690_v2  ;;  %v1918_v29 = vmul.f32 %v8830_v46, %v8690_v2 }
 0x188   : > { %1740 = vrot.lane.b32.xlu1 %v1680_v48, %s8112_s24 }
 0x18b   : > { %v8822_v39 = vpop.permute.xlu0 %2346  ;;  %v8838_v48 = vpop.permute.xlu2 %997 }
 0x18c   : > { %v8827_v25 = vpop.permute.xlu1 %1653  ;;  %13929 = vst [vmem:[#allocation73_spill] sm:$0xff] %v8838_v48 }
 0x18f   : > { %1021 = vrot.lane.b32.xlu0 %v953_v30, %s8110_s27  ;;  %1978 = vrot.lane.b32.xlu2 %v1919_v59, %s8113_s15 }
 0x190   : > { %1976 = vrot.lane.b32.xlu1 %v1918_v29, %s8113_s15  ;;  %v8861_v29 = vperm.slane %v8793_v4, 4  ;;  %v2134_v4 = vmul.f32 %v8764_v56, %v8672_v52 }
 0x192   : > { %v1920_v48 = vmul.f32 %v8861_v29, %v8690_v2  ;;  %v2135_v2 = vmul.f32 %v8764_v56, %v8693_v3 }
 0x193   : > { %v8843_v16 = vpop.permute.xlu0 %1163  ;;  %v8856_v30 = vpop.permute.xlu2 %1003 }
 0x194   : > { %v8845_v35 = vpop.permute.xlu1 %2126  ;;  %13930 = vst [vmem:[#allocation74_spill] sm:$0xff] %v8856_v30  ;;  %v2136_v30 = vmul.f32 %v8764_v56, %v8701_v18 }
 0x197   : > { %1267 = vrot.lane.b32.xlu0 %v1193_v38, %s8111_s20  ;;  %1265 = vrot.lane.b32.xlu2 %v1192_v51, %s8111_s20  ;;  %v1194_v38 = vmul.f32 %v8646_v27, %v8760_v54 }
 0x198   : > { %1263 = vrot.lane.b32.xlu1 %v1191_v36, %s8111_s20 }
 0x19b   : > { %v8858_v59 = vpop.permute.xlu0 %2351  ;;  %v8874_v36 = vpop.permute.xlu2 %1247 }
 0x19c   : > { %v8867_v5 = vpop.permute.xlu1 %1658  ;;  %13932 = vst [vmem:[#allocation76_spill] sm:$0xff] %v8874_v36  ;;  %v1444_v36 = vmul.f32 %v8672_v52, %v8714_v57 }
 0x19d   : > { %13931 = vst [vmem:[#allocation75_spill] sm:$0xff] %v8867_v5  ;;  %v2137_v5 = vmul.f32 %v8764_v56, %v8696_v14 }
 0x19f   : > { %1980 = vrot.lane.b32.xlu0 %v1920_v48, %s8113_s15  ;;  %1271 = vrot.lane.b32.xlu2 %v1195_v47, %s8111_s20 }
 0x1a0   : > { %1269 = vrot.lane.b32.xlu1 %v1194_v38, %s8111_s20 }
 0x1a3   : > { %v8876_v51 = vpop.permute.xlu0 %2131  ;;  %v8891_v38 = vpop.permute.xlu2 %1253 }
 0x1a4   : > { %13933 = vst [vmem:[#allocation77_spill] sm:$0xff] %v8876_v51  ;;  %v8886_v47 = vpop.permute.xlu1 %2356  ;;  %v1196_v51 = vmul.f32 %v8677_v53, %v8760_v54 }
 0x1a5   : > { %13934 = vst [vmem:[#allocation78_spill] sm:$0xff] %v8886_v47 }
 0x1a6   : > { %13936 = vst [vmem:[#allocation80_spill] sm:$0xff] %v8891_v38 }
 0x1a7   : > { %2194 = vrot.lane.b32.xlu0 %v2136_v30, %s8114_s16  ;;  %2192 = vrot.lane.b32.xlu2 %v2135_v2, %s8114_s16  ;;  %v2329_v2 = vrot.slane %v8736_v17, 7 }
 0x1a8   : > { %2190 = vrot.lane.b32.xlu1 %v2134_v4, %s8114_s16 }
 0x1a9   : > { %v2331_v38 = vsel %vm2330_vm6, %v2329_v2, %v8736_v17 }
 0x1aa   : > { %v8916_v47 = vmul.f32 %v2331_v38, %v8657_v37 }
 0x1ab   : > { %v8889_v48 = vpop.permute.xlu0 %999 }
 0x1ac   : > { %13935 = vst [vmem:[#allocation79_spill] sm:$0xff] %v8889_v48  ;;  %v8903_v4 = vpop.permute.xlu1 %1001  ;;  %v1447_v48 = vmul.f32 %v8696_v14, %v8714_v57  ;;  %v8926_v2 = vperm.slane %v8916_v47, 1 }
 0x1ad   : > { %13937 = vst [vmem:[#allocation81_spill] sm:$0xff] %v8903_v4 }
 0x1ae   : > { %13939 = vst [vmem:[#allocation83_spill] sm:$0xff] %v8916_v47  ;;  %v2375_v38 = vmul.f32 %v8926_v2, %v8779_v41 }
 0x1af   : > { %1507 = vrot.lane.b32.xlu0 %v1444_v36, %s8103_s22  ;;  %1273 = vrot.lane.b32.xlu2 %v1196_v51, %s8111_s20  ;;  %v1446_v36 = vmul.f32 %v8701_v18, %v8714_v57  ;;  %v1445_v51 = vmul.f32 %v8693_v3, %v8714_v57 }
 0x1b0   : > { %2196 = vrot.lane.b32.xlu1 %v2137_v5, %s8114_s16  ;;  %v8918_v5 = vpop.permute.xlu2 %1493 }
 0x1b1   : > { %13940 = vst [vmem:[#allocation84_spill] sm:$0xff] %v8918_v5  ;;  %v8945_v5 = vperm.slane %v8916_v47, 3 }
 0x1b3   : > { %v8905_v30 = vpop.permute.xlu0 %1005 }
 0x1b4   : > { %13938 = vst [vmem:[#allocation82_spill] sm:$0xff] %v8905_v30  ;;  %v8929_v30 = vperm.slane %v8916_v47, 0  ;;  %v8931_v4 = vpop.permute.xlu1 %1007 }
 0x1b5   : > { %13942 = vst [vmem:[#allocation86_spill] sm:$0xff] %v8931_v4  ;;  %v8948_v4 = vperm.slane %v8916_v47, 2 }
 0x1b7   : > { %1513 = vrot.lane.b32.xlu0 %v1447_v48, %s8103_s22  ;;  %1511 = vrot.lane.b32.xlu2 %v1446_v36, %s8103_s22  ;;  %v2374_v48 = vmul.f32 %v8929_v30, %v8779_v41  ;;  %v2138_v36 = vmul.f32 %v8764_v56, %v8717_v58  ;;  %v1448_v56 = vmul.f32 %v8717_v58, %v8714_v57 }
 0x1b8   : > { %1509 = vrot.lane.b32.xlu1 %v1445_v51, %s8103_s22  ;;  %v8942_v51 = vpop.permute.xlu2 %1499 }
 0x1b9   : > { %13943 = vst [vmem:[#allocation87_spill] sm:$0xff] %v8942_v51  ;;  %v1685_v51 = vmul.f32 %v8741_v7, %v8784_v40 }
 0x1bb   : > { %v8923_v17 = vpop.permute.xlu0 %1249 }
 0x1bc   : > { %13941 = vst [vmem:[#allocation85_spill] sm:$0xff] %v8923_v17  ;;  %v8956_v54 = vpop.permute.xlu1 %1251 }
 0x1bd   : > { %13945 = vst [vmem:[#allocation89_spill] sm:$0xff] %v8956_v54  ;;  %v1683_v54 = vmul.f32 %v8747_v33, %v8784_v40 }
 0x1bf   : > { %2432 = vrot.lane.b32.xlu0 %v2375_v38, %s8115_s8  ;;  %2430 = vrot.lane.b32.xlu2 %v2374_v48, %s8115_s8  ;;  %v2377_v38 = vmul.f32 %v8945_v5, %v8779_v41  ;;  %v2376_v48 = vmul.f32 %v8948_v4, %v8779_v41 }
 0x1c0   : > { %2198 = vrot.lane.b32.xlu1 %v2138_v36, %s8114_s16 }
 0x1c3   : > { %v8950_v17 = vpop.permute.xlu0 %1255 }
 0x1c4   : > { %13944 = vst [vmem:[#allocation88_spill] sm:$0xff] %v8950_v17  ;;  %v1684_v17 = vmul.f32 %v8744_v1, %v8784_v40 }
 0x1c7   : > { %1515 = vrot.lane.b32.xlu0 %v1448_v56, %s8103_s22  ;;  %2436 = vrot.lane.b32.xlu2 %v2377_v38, %s8115_s8  ;;  %v8975_v56 = vpop.permute.xlu1 %1257 }
 0x1c8   : > { %2434 = vrot.lane.b32.xlu1 %v2376_v48, %s8115_s8  ;;  %13948 = vst [vmem:[#allocation92_spill] sm:$0xff] %v8975_v56  ;;  %v8981_v48 = vperm.slane %v8916_v47, 4  ;;  %v957_v56 = vmul.f32 %v8601_v62, %v8469_v63  ;;  %v955_v47 = vmul.f32 %v8576_v50, %v8469_v63 }
 0x1c9   : > { %v8963_v36 = vpop.permute.xlu2 %1734 }
 0x1ca   : > { %13946 = vst [vmem:[#allocation90_spill] sm:$0xff] %v8963_v36  ;;  %v2567_v36 = vld [vmem:[%s13619_s2] sm:$0xff] }
 0x1cb   : > { %v8971_v57 = vpop.permute.xlu0 %1495 }
 0x1cc   : > { %13947 = vst [vmem:[#allocation91_spill] sm:$0xff] %v8971_v57  ;;  %v2378_v57 = vmul.f32 %v8981_v48, %v8779_v41  ;;  %v956_v41 = vmul.f32 %v8595_v60, %v8469_v63 }
 0x1cf   : > { %1750 = vrot.lane.b32.xlu0 %v1685_v51, %s8112_s24  ;;  %1748 = vrot.lane.b32.xlu2 %v1684_v17, %s8112_s24  ;;  %v1686_v51 = vmul.f32 %v8767_v19, %v8784_v40 }
 0x1d0   : > { %1746 = vrot.lane.b32.xlu1 %v1683_v54, %s8112_s24 }
 0x1d1   : > { %v8978_v38 = vpop.permute.xlu2 %1011 }
 0x1d2   : > { %13949 = vst [vmem:[#allocation93_spill] sm:$0xff] %v8978_v38  ;;  %v8996_v38 = vpop.permute.xlu1 %1497 }
 0x1d3   : > { %v8992_v54 = vpop.permute.xlu0 %1501  ;;  %13952 = vst [vmem:[#allocation96_spill] sm:$0xff] %v8996_v38  ;;  %v958_v38 = vmul.f32 %v8598_v61, %v8469_v63 }
 0x1d4   : > { %13950 = vst [vmem:[#allocation94_spill] sm:$0xff] %v8992_v54  ;;  %v959_v54 = vmul.f32 %v8624_v12, %v8469_v63 }
 0x1d7   : > { %2573 = vperm.xlu0 %7590, %v2567_v36   ;;  %2438 = vrot.lane.b32.xlu2 %v2378_v57, %s8115_s8 }
 0x1d8   : > { %1752 = vrot.lane.b32.xlu1 %v1686_v51, %s8112_s24 }
 0x1d9   : > { %v8994_v17 = vpop.permute.xlu2 %1017 }
 0x1da   : > { %13951 = vst [vmem:[#allocation95_spill] sm:$0xff] %v8994_v17  ;;  %v1687_v17 = vmul.f32 %v8809_v49, %v8784_v40 }
 0x1df   : > { %1029 = vrot.lane.b32.xlu0 %v957_v56, %s8110_s27  ;;  %1027 = vrot.lane.b32.xlu2 %v956_v41, %s8110_s27 }
 0x1e0   : > { %1025 = vrot.lane.b32.xlu1 %v955_v47, %s8110_s27 }
 0x1e1   : > { %v9007_v57 = vpop.permute.xlu0 %1736  ;;  %v9009_v36 = vpop.permute.xlu2 %1972 }
 0x1e2   : > { %13953 = vst [vmem:[#allocation97_spill] sm:$0xff] %v9007_v57  ;;  %v9011_v51 = vpop.permute.xlu1 %1732  ;;  %v1923_v57 = vmul.f32 %v8804_v31, %v8727_v34 }
 0x1e3   : > { %13954 = vst [vmem:[#allocation98_spill] sm:$0xff] %v9009_v36  ;;  %v1925_v36 = vmul.f32 %v8830_v46, %v8727_v34 }
 0x1e4   : > { %13955 = vst [vmem:[#allocation99_spill] sm:$0xff] %v9011_v51  ;;  %v1924_v51 = vmul.f32 %v8801_v43, %v8727_v34 }
 0x1e7   : > { %1754 = vrot.lane.b32.xlu0 %v1687_v17, %s8112_s24  ;;  %1033 = vrot.lane.b32.xlu2 %v959_v54, %s8110_s27 }
 0x1e8   : > { %1031 = vrot.lane.b32.xlu1 %v958_v38, %s8110_s27 }
 0x1e9   : > { %v9022_v41 = vpop.permute.xlu0 %1013  ;;  %v9024_v47 = vpop.permute.xlu2 %1978 }
 0x1ea   : > { %13956 = vst [vmem:[#allocation100_spill] sm:$0xff] %v9022_v41  ;;  %v9026_v56 = vpop.permute.xlu1 %1738  ;;  %v1926_v41 = vmul.f32 %v8825_v20, %v8727_v34 }
 0x1eb   : > { %13957 = vst [vmem:[#allocation101_spill] sm:$0xff] %v9024_v47  ;;  %v1199_v47 = vmul.f32 %v8619_v8, %v8798_v28 }
 0x1ec   : > { %13958 = vst [vmem:[#allocation102_spill] sm:$0xff] %v9026_v56  ;;  %v960_v56 = vmul.f32 %v8627_v13, %v8469_v63 }
 0x1ef   : > { %1990 = vrot.lane.b32.xlu0 %v1925_v36, %s8113_s15  ;;  %1988 = vrot.lane.b32.xlu2 %v1924_v51, %s8113_s15 }
 0x1f0   : > { %1986 = vrot.lane.b32.xlu1 %v1923_v57, %s8113_s15 }
 0x1f1   : > { %v9037_v38 = vpop.permute.xlu0 %1019  ;;  %v9039_v54 = vpop.permute.xlu2 %1265 }
 0x1f2   : > { %13959 = vst [vmem:[#allocation103_spill] sm:$0xff] %v9037_v38  ;;  %v9041_v17 = vpop.permute.xlu1 %1015  ;;  %v1200_v38 = vmul.f32 %v8643_v26, %v8798_v28 }
 0x1f3   : > { %13960 = vst [vmem:[#allocation104_spill] sm:$0xff] %v9039_v54  ;;  %v1202_v54 = vmul.f32 %v8646_v27, %v8798_v28 }
 0x1f4   : > { %13961 = vst [vmem:[#allocation105_spill] sm:$0xff] %v9041_v17  ;;  %v1201_v17 = vmul.f32 %v8651_v32, %v8798_v28 }
 0x1f7   : > { %1279 = vrot.lane.b32.xlu0 %v1199_v47, %s8111_s20  ;;  %1035 = vrot.lane.b32.xlu2 %v960_v56, %s8110_s27 }
 0x1f8   : > { %1992 = vrot.lane.b32.xlu1 %v1926_v41, %s8113_s15 }
 0x1f9   : > { %v9052_v57 = vpop.permute.xlu0 %1974  ;;  %v9054_v36 = vpop.permute.xlu2 %1271 }
 0x1fa   : > { %13962 = vst [vmem:[#allocation106_spill] sm:$0xff] %v9052_v57  ;;  %v9056_v51 = vpop.permute.xlu1 %1740  ;;  %v1203_v57 = vmul.f32 %v8669_v44, %v8798_v28 }
 0x1fb   : > { %13963 = vst [vmem:[#allocation107_spill] sm:$0xff] %v9054_v36  ;;  %v1927_v36 = vmul.f32 %v8861_v29, %v8727_v34 }
 0x1fc   : > { %13964 = vst [vmem:[#allocation108_spill] sm:$0xff] %v9056_v51  ;;  %v2141_v51 = vmul.f32 %v8806_v55, %v8672_v52 }
 0x1ff   : > { %1285 = vrot.lane.b32.xlu0 %v1202_v54, %s8111_s20  ;;  %1283 = vrot.lane.b32.xlu2 %v1201_v17, %s8111_s20 }
 0x200   : > { %1281 = vrot.lane.b32.xlu1 %v1200_v38, %s8111_s20 }
 0x201   : > { %v9067_v41 = vpop.permute.xlu0 %1021  ;;  %v9069_v47 = vpop.permute.xlu2 %2192 }
 0x202   : > { %13965 = vst [vmem:[#allocation109_spill] sm:$0xff] %v9067_v41  ;;  %v9071_v56 = vpop.permute.xlu1 %1976  ;;  %v2142_v41 = vmul.f32 %v8806_v55, %v8693_v3 }
 0x203   : > { %13966 = vst [vmem:[#allocation110_spill] sm:$0xff] %v9069_v47  ;;  %v2143_v47 = vmul.f32 %v8806_v55, %v8701_v18 }
 0x204   : > { %13967 = vst [vmem:[#allocation111_spill] sm:$0xff] %v9071_v56  ;;  %v2144_v56 = vmul.f32 %v8806_v55, %v8696_v14 }
 0x207   : > { %1994 = vrot.lane.b32.xlu2 %v1927_v36, %s8113_s15  ;;  %2204 = vrot.lane.b32.xlu0 %v2141_v51, %s8114_s16 }
 0x208   : > { %1287 = vrot.lane.b32.xlu1 %v1203_v57, %s8111_s20 }
 0x209   : > { %v9082_v38 = vpop.permute.xlu0 %1267  ;;  %v9084_v54 = vpop.permute.xlu2 %1273 }
 0x20a   : > { %13968 = vst [vmem:[#allocation112_spill] sm:$0xff] %v9082_v38  ;;  %v9086_v17 = vpop.permute.xlu1 %1263  ;;  %v1204_v38 = vmul.f32 %v8677_v53, %v8798_v28 }
 0x20b   : > { %13969 = vst [vmem:[#allocation113_spill] sm:$0xff] %v9084_v54  ;;  %v1452_v54 = vmul.f32 %v8693_v3, %v8738_v23 }
 0x20c   : > { %13970 = vst [vmem:[#allocation114_spill] sm:$0xff] %v9086_v17  ;;  %v1451_v17 = vmul.f32 %v8672_v52, %v8738_v23 }
 0x20f   : > { %2208 = vrot.lane.b32.xlu2 %v2143_v47, %s8114_s16  ;;  %2210 = vrot.lane.b32.xlu0 %v2144_v56, %s8114_s16 }
 0x210   : > { %2206 = vrot.lane.b32.xlu1 %v2142_v41, %s8114_s16 }
 0x211   : > { %v9097_v57 = vpop.permute.xlu0 %1980  ;;  %v9099_v36 = vpop.permute.xlu2 %1511 }
 0x212   : > { %13971 = vst [vmem:[#allocation115_spill] sm:$0xff] %v9097_v57  ;;  %v9101_v51 = vpop.permute.xlu1 %1269  ;;  %v1453_v57 = vmul.f32 %v8701_v18, %v8738_v23 }
 0x213   : > { %13972 = vst [vmem:[#allocation116_spill] sm:$0xff] %v9099_v36  ;;  %v1454_v36 = vmul.f32 %v8696_v14, %v8738_v23 }
 0x214   : > { %13973 = vst [vmem:[#allocation117_spill] sm:$0xff] %v9101_v51  ;;  %v2145_v51 = vmul.f32 %v8806_v55, %v8717_v58 }
 0x217   : > { %1521 = vrot.lane.b32.xlu2 %v1451_v17, %s8103_s22  ;;  %1523 = vrot.lane.b32.xlu0 %v1452_v54, %s8103_s22 }
 0x218   : > { %1289 = vrot.lane.b32.xlu1 %v1204_v38, %s8111_s20 }
 0x219   : > { %v9112_v41 = vpop.permute.xlu0 %2194  ;;  %v9114_v47 = vpop.permute.xlu2 %2430 }
 0x21a   : > { %13974 = vst [vmem:[#allocation118_spill] sm:$0xff] %v9112_v41  ;;  %v9116_v56 = vpop.permute.xlu1 %2190  ;;  %v2381_v41 = vmul.f32 %v8929_v30, %v8822_v39 }
 0x21b   : > { %13975 = vst [vmem:[#allocation119_spill] sm:$0xff] %v9114_v47  ;;  %v2382_v47 = vmul.f32 %v8926_v2, %v8822_v39 }
 0x21c   : > { %13976 = vst [vmem:[#allocation120_spill] sm:$0xff] %v9116_v56  ;;  %v2383_v56 = vmul.f32 %v8948_v4, %v8822_v39 }
 0x21f   : > { %1527 = vrot.lane.b32.xlu2 %v1454_v36, %s8103_s22  ;;  %2212 = vrot.lane.b32.xlu0 %v2145_v51, %s8114_s16 }
 0x220   : > { %1525 = vrot.lane.b32.xlu1 %v1453_v57, %s8103_s22 }
 0x221   : > { %v9127_v38 = vpop.permute.xlu0 %1507  ;;  %v9129_v54 = vpop.permute.xlu2 %2436 }
 0x222   : > { %13977 = vst [vmem:[#allocation121_spill] sm:$0xff] %v9127_v38  ;;  %v9131_v17 = vpop.permute.xlu1 %2196 }
 0x223   : > { %13978 = vst [vmem:[#allocation122_spill] sm:$0xff] %v9129_v54  ;;  %v9149_v54 = vperm.slane %v8567_v45, 6 }
 0x224   : > { %13979 = vst [vmem:[#allocation123_spill] sm:$0xff] %v9131_v17  ;;  %v1455_v17 = vmul.f32 %v8717_v58, %v8738_v23 }
 0x225   : > { %v947_v38 = vmul.f32 %v9149_v54, %v8497_v11  ;;  %v1692_v11 = vmul.f32 %v8741_v7, %v8827_v25 }
 0x227   : > { %2446 = vrot.lane.b32.xlu2 %v2382_v47, %s8115_s8  ;;  %2448 = vrot.lane.b32.xlu0 %v2383_v56, %s8115_s8  ;;  %v2384_v47 = vmul.f32 %v8945_v5, %v8822_v39 }
 0x228   : > { %2444 = vrot.lane.b32.xlu1 %v2381_v41, %s8115_s8 }
 0x229   : > { %v9142_v57 = vpop.permute.xlu0 %1513  ;;  %v9144_v36 = vpop.permute.xlu2 %1748 }
 0x22a   : > { %13980 = vst [vmem:[#allocation124_spill] sm:$0xff] %v9142_v57  ;;  %v9146_v51 = vpop.permute.xlu1 %1509  ;;  %v962_v57 = vmul.f32 %v8576_v50, %v8516_v22  ;;  %v966_v50 = vmul.f32 %v8624_v12, %v8516_v22  ;;  %v1930_v12 = vmul.f32 %v8804_v31, %v8762_v42 }
 0x22b   : > { %13981 = vst [vmem:[#allocation125_spill] sm:$0xff] %v9144_v36  ;;  %v1691_v36 = vmul.f32 %v8744_v1, %v8827_v25 }
 0x22c   : > { %13982 = vst [vmem:[#allocation126_spill] sm:$0xff] %v9146_v51  ;;  %v1690_v51 = vmul.f32 %v8747_v33, %v8827_v25 }
 0x22f   : > { %1009 = vrot.lane.b32.xlu2 %v947_v38, %s8110_s27  ;;  %1529 = vrot.lane.b32.xlu0 %v1455_v17, %s8103_s22 }
 0x230   : > { %2450 = vrot.lane.b32.xlu1 %v2384_v47, %s8115_s8 }
 0x231   : > { %v9160_v41 = vpop.permute.xlu0 %2432  ;;  %v9162_v56 = vpop.permute.xlu2 %2438 }
 0x232   : > { %13983 = vst [vmem:[#allocation127_spill] sm:$0xff] %v9160_v41  ;;  %v9164_v45 = vpop.permute.xlu1 %2198  ;;  %v2385_v41 = vmul.f32 %v8981_v48, %v8822_v39 }
 0x233   : > { %13984 = vst [vmem:[#allocation128_spill] sm:$0xff] %v9162_v56  ;;  %v2568_v56 = vld [vmem:[%s13619_s2 + $0x8] sm:$0xff] }
 0x234   : > { %13985 = vst [vmem:[#allocation129_spill] sm:$0xff] %v9164_v45  ;;  %v14099_v45 = vld [vmem:[#allocation43_spill] sm:$0xff] }
 0x237   : > { %1764 = vrot.lane.b32.xlu0 %v1692_v11, %s8112_s24  ;;  %1762 = vrot.lane.b32.xlu2 %v1691_v36, %s8112_s24  ;;  %v1693_v11 = vmul.f32 %v8767_v19, %v8827_v25 }
 0x238   : > { %1760 = vrot.lane.b32.xlu1 %v1690_v51, %s8112_s24 }
 0x239   : > { %v9175_v38 = vpop.permute.xlu0 %1515  ;;  %v9177_v17 = vpop.permute.xlu2 %1027 }
 0x23a   : > { %13986 = vst [vmem:[#allocation130_spill] sm:$0xff] %v9175_v38  ;;  %v9179_v47 = vpop.permute.xlu1 %2434  ;;  %v964_v38 = vmul.f32 %v8601_v62, %v8516_v22 }
 0x23b   : > { %13987 = vst [vmem:[#allocation131_spill] sm:$0xff] %v9177_v17 }
 0x23c   : > { %13988 = vst [vmem:[#allocation132_spill] sm:$0xff] %v9179_v47  ;;  %v963_v47 = vmul.f32 %v8595_v60, %v8516_v22 }
 0x23f   : > { %2578 = vperm.xlu0 %7590, %v2568_v56   ;;  %2452 = vrot.lane.b32.xlu2 %v2385_v41, %s8115_s8 }
 0x240   : > { %1766 = vrot.lane.b32.xlu1 %v1693_v11, %s8112_s24  ;;  %v9210_v11 = vperm.slane %v8603_v0, 6 }
 0x241   : > { %v9190_v36 = vpop.permute.xlu0 %1750  ;;  %v9192_v51 = vpop.permute.xlu2 %1033 }
 0x242   : > { %13989 = vst [vmem:[#allocation133_spill] sm:$0xff] %v9190_v36  ;;  %v9194_v17 = vpop.permute.xlu1 %1746  ;;  %v1189_v60 = vmul.f32 %v9210_v11, %v8521_v24 }
 0x243   : > { %13990 = vst [vmem:[#allocation134_spill] sm:$0xff] %v9192_v51  ;;  %v1931_v51 = vmul.f32 %v8801_v43, %v8762_v42 }
 0x244   : > { %13991 = vst [vmem:[#allocation135_spill] sm:$0xff] %v9194_v17 }
 0x247   : > { %1043 = vrot.lane.b32.xlu0 %v964_v38, %s8110_s27  ;;  %1041 = vrot.lane.b32.xlu2 %v963_v47, %s8110_s27  ;;  %v965_v38 = vmul.f32 %v8598_v61, %v8516_v22  ;;  %v1694_v61 = vmul.f32 %v8809_v49, %v8827_v25 }
 0x248   : > { %1039 = vrot.lane.b32.xlu1 %v962_v57, %s8110_s27 }
 0x249   : > { %v9205_v41 = vpop.permute.xlu0 %2573  ;;  %v9207_v56 = vpop.permute.xlu2 %1988 }
 0x24a   : > { %13992 = vst [vmem:[#allocation136_spill] sm:$0xff] %v9205_v41  ;;  %v9212_v62 = vpop.permute.xlu1 %1752 }
 0x24b   : > { %13993 = vst [vmem:[#allocation137_spill] sm:$0xff] %v9207_v56 }
 0x24c   : > { %13994 = vst [vmem:[#allocation138_spill] sm:$0xff] %v9212_v62 }
 0x24f   : > { %1259 = vrot.lane.b32.xlu0 %v1189_v60, %s8111_s20  ;;  %1047 = vrot.lane.b32.xlu2 %v966_v50, %s8110_s27 }
 0x250   : > { %1045 = vrot.lane.b32.xlu1 %v965_v38, %s8110_s27 }
 0x251   : > { %v9223_v57 = vpop.permute.xlu0 %1029  ;;  %v9225_v47 = vpop.permute.xlu2 %1035 }
 0x252   : > { %13995 = vst [vmem:[#allocation139_spill] sm:$0xff] %v9223_v57  ;;  %v9227_v56 = vpop.permute.xlu1 %1025  ;;  %v1932_v57 = vmul.f32 %v8830_v46, %v8762_v42 }
 0x253   : > { %13996 = vst [vmem:[#allocation140_spill] sm:$0xff] %v9225_v47  ;;  %v1933_v47 = vmul.f32 %v8825_v20, %v8762_v42 }
 0x254   : > { %13997 = vst [vmem:[#allocation141_spill] sm:$0xff] %v9227_v56  ;;  %v967_v56 = vmul.f32 %v8627_v13, %v8516_v22  ;;  %v9260_v13 = vperm.slane %v8603_v0, 7 }
 0x257   : > { %2002 = vrot.lane.b32.xlu0 %v1931_v51, %s8113_s15  ;;  %2000 = vrot.lane.b32.xlu2 %v1930_v12, %s8113_s15 }
 0x258   : > { %1768 = vrot.lane.b32.xlu1 %v1694_v61, %s8112_s24 }
 0x259   : > { %v9238_v60 = vpop.permute.xlu0 %1754  ;;  %v9240_v50 = vpop.permute.xlu2 %1283 }
 0x25a   : > { %13998 = vst [vmem:[#allocation142_spill] sm:$0xff] %v9238_v60  ;;  %v9242_v38 = vpop.permute.xlu1 %1031 }
 0x25b   : > { %13999 = vst [vmem:[#allocation143_spill] sm:$0xff] %v9240_v50  ;;  %v1208_v50 = vmul.f32 %v8643_v26, %v8843_v16  ;;  %v1211_v26 = vmul.f32 %v8669_v44, %v8843_v16  ;;  %v9293_v44 = vperm.slane %v8657_v37, 5 }
 0x25c   : > { %14000 = vst [vmem:[#allocation144_spill] sm:$0xff] %v9242_v38  ;;  %v1207_v38 = vmul.f32 %v8619_v8, %v8843_v16  ;;  %v1210_v8 = vmul.f32 %v8646_v27, %v8843_v16  ;;  %v1934_v27 = vmul.f32 %v8861_v29, %v8762_v42 }
 0x25f   : > { %1049 = vrot.lane.b32.xlu0 %v967_v56, %s8110_s27  ;;  %2006 = vrot.lane.b32.xlu2 %v1933_v47, %s8113_s15  ;;  %v1190_v56 = vmul.f32 %v9260_v13, %v8521_v24  ;;  %v1209_v24 = vmul.f32 %v8651_v32, %v8843_v16  ;;  %v2148_v32 = vmul.f32 %v8845_v35, %v8672_v52 }
 0x260   : > { %2004 = vrot.lane.b32.xlu1 %v1932_v57, %s8113_s15 }
 0x261   : > { %v9253_v51 = vpop.permute.xlu0 %1990  ;;  %v9255_v12 = vpop.permute.xlu2 %1994 }
 0x262   : > { %14001 = vst [vmem:[#allocation145_spill] sm:$0xff] %v9253_v51  ;;  %v9257_v61 = vpop.permute.xlu1 %1986  ;;  %v14096_v51 = vld [vmem:[#allocation45_spill] sm:$0xff] }
 0x263   : > { %14002 = vst [vmem:[#allocation146_spill] sm:$0xff] %v9255_v12  ;;  %v2149_v12 = vmul.f32 %v8845_v35, %v8693_v3 }
 0x264   : > { %14003 = vst [vmem:[#allocation147_spill] sm:$0xff] %v9257_v61 }
 0x267   : > { %1297 = vrot.lane.b32.xlu0 %v1208_v50, %s8111_s20  ;;  %1295 = vrot.lane.b32.xlu2 %v1207_v38, %s8111_s20 }
 0x268   : > { %1261 = vrot.lane.b32.xlu1 %v1190_v56, %s8111_s20 }
 0x269   : > { %v9271_v57 = vpop.permute.xlu0 %1279  ;;  %v9273_v47 = vpop.permute.xlu2 %2208 }
 0x26a   : > { %14004 = vst [vmem:[#allocation148_spill] sm:$0xff] %v9271_v57  ;;  %v9275_v0 = vpop.permute.xlu1 %1992  ;;  %v14097_v57 = vld [vmem:[#allocation39_spill] sm:$0xff] }
 0x26b   : > { %14005 = vst [vmem:[#allocation149_spill] sm:$0xff] %v9273_v47  ;;  %v2150_v47 = vmul.f32 %v8845_v35, %v8701_v18 }
 0x26c   : > { %14006 = vst [vmem:[#allocation150_spill] sm:$0xff] %v9275_v0 }
 0x26f   : > { %1303 = vrot.lane.b32.xlu0 %v1211_v26, %s8111_s20  ;;  %1301 = vrot.lane.b32.xlu2 %v1210_v8, %s8111_s20  ;;  %v1442_v26 = vmul.f32 %v9293_v44, %v8495_v10 }
 0x270   : > { %1299 = vrot.lane.b32.xlu1 %v1209_v24, %s8111_s20 }
 0x271   : > { %v9286_v50 = vpop.permute.xlu0 %1285  ;;  %v9288_v38 = vpop.permute.xlu2 %1521 }
 0x272   : > { %14007 = vst [vmem:[#allocation151_spill] sm:$0xff] %v9286_v50  ;;  %v9290_v56 = vpop.permute.xlu1 %1281  ;;  %v2151_v50 = vmul.f32 %v8845_v35, %v8696_v14 }
 0x273   : > { %14008 = vst [vmem:[#allocation152_spill] sm:$0xff] %v9288_v38 }
 0x274   : > { %14009 = vst [vmem:[#allocation153_spill] sm:$0xff] %v9290_v56  ;;  %v14098_v56 = vld [vmem:[#allocation33_spill] sm:$0xff] }
 0x277   : > { %2008 = vrot.lane.b32.xlu2 %v1934_v27, %s8113_s15  ;;  %2218 = vrot.lane.b32.xlu0 %v2148_v32, %s8114_s16 }
 0x278   : > { %1503 = vrot.lane.b32.xlu1 %v1442_v26, %s8103_s22  ;;  %v9324_v26 = vperm.slane %v8657_v37, 6 }
 0x279   : > { %v9304_v8 = vpop.permute.xlu2 %1527  ;;  %v9306_v24 = vpop.permute.xlu0 %2204 }
 0x27a   : > { %14010 = vst [vmem:[#allocation154_spill] sm:$0xff] %v9304_v8  ;;  %v9308_v38 = vpop.permute.xlu1 %1287 }
 0x27b   : > { %14011 = vst [vmem:[#allocation155_spill] sm:$0xff] %v9306_v24  ;;  %v1443_v24 = vmul.f32 %v9324_v26, %v8495_v10  ;;  %v1460_v10 = vmul.f32 %v8701_v18, %v8781_v9 }
 0x27c   : > { %14012 = vst [vmem:[#allocation156_spill] sm:$0xff] %v9308_v38  ;;  %v1458_v38 = vmul.f32 %v8672_v52, %v8781_v9 }
 0x27f   : > { %2222 = vrot.lane.b32.xlu2 %v2150_v47, %s8114_s16  ;;  %2224 = vrot.lane.b32.xlu0 %v2151_v50, %s8114_s16  ;;  %v1212_v47 = vmul.f32 %v8677_v53, %v8843_v16  ;;  %v1459_v53 = vmul.f32 %v8693_v3, %v8781_v9 }
 0x280   : > { %2220 = vrot.lane.b32.xlu1 %v2149_v12, %s8114_s16 }
 0x281   : > { %v9319_v27 = vpop.permute.xlu2 %2446  ;;  %v9321_v32 = vpop.permute.xlu0 %2210 }
 0x282   : > { %14013 = vst [vmem:[#allocation157_spill] sm:$0xff] %v9319_v27  ;;  %v9326_v8 = vpop.permute.xlu1 %2206  ;;  %v1461_v27 = vmul.f32 %v8696_v14, %v8781_v9 }
 0x283   : > { %14014 = vst [vmem:[#allocation158_spill] sm:$0xff] %v9321_v32  ;;  %v14092_v32 = vld [vmem:[#allocation42_spill] sm:$0xff] }
 0x284   : > { %14015 = vst [vmem:[#allocation159_spill] sm:$0xff] %v9326_v8  ;;  %v2389_v8 = vmul.f32 %v8926_v2, %v8858_v59 }
 0x287   : > { %1505 = vrot.lane.b32.xlu2 %v1443_v24, %s8103_s22  ;;  %1535 = vrot.lane.b32.xlu0 %v1458_v38, %s8103_s22 }
 0x288   : > { %1305 = vrot.lane.b32.xlu1 %v1212_v47, %s8111_s20 }
 0x289   : > { %v9337_v12 = vpop.permute.xlu2 %1009  ;;  %v9339_v37 = vpop.permute.xlu0 %1523 }
 0x28a   : > { %14016 = vst [vmem:[#allocation160_spill] sm:$0xff] %v9337_v12  ;;  %v9341_v50 = vpop.permute.xlu1 %1289  ;;  %v9359_v12 = vperm.slane %v8734_v15, 5 }
 0x28b   : > { %14017 = vst [vmem:[#allocation161_spill] sm:$0xff] %v9339_v37  ;;  %v2388_v37 = vmul.f32 %v8929_v30, %v8858_v59 }
 0x28c   : > { %14018 = vst [vmem:[#allocation162_spill] sm:$0xff] %v9341_v50  ;;  %v2152_v50 = vmul.f32 %v8845_v35, %v8717_v58 }
 0x28f   : > { %1539 = vrot.lane.b32.xlu2 %v1460_v10, %s8103_s22  ;;  %1541 = vrot.lane.b32.xlu0 %v1461_v27, %s8103_s22  ;;  %v1681_v27 = vmul.f32 %v9359_v12, %v8749_v21 }
 0x290   : > { %1537 = vrot.lane.b32.xlu1 %v1459_v53, %s8103_s22 }
 0x291   : > { %v9352_v38 = vpop.permute.xlu0 %2212  ;;  %v9354_v24 = vpop.permute.xlu2 %1762 }
 0x292   : > { %14019 = vst [vmem:[#allocation163_spill] sm:$0xff] %v9352_v38  ;;  %v9356_v47 = vpop.permute.xlu1 %1525  ;;  %v2391_v38 = vmul.f32 %v8945_v5, %v8858_v59 }
 0x293   : > { %14020 = vst [vmem:[#allocation164_spill] sm:$0xff] %v9354_v24 }
 0x294   : > { %14021 = vst [vmem:[#allocation165_spill] sm:$0xff] %v9356_v47  ;;  %v2390_v47 = vmul.f32 %v8948_v4, %v8858_v59 }
 0x297   : > { %2226 = vrot.lane.b32.xlu2 %v2152_v50, %s8114_s16  ;;  %2458 = vrot.lane.b32.xlu0 %v2388_v37, %s8115_s8 }
 0x298   : > { %1742 = vrot.lane.b32.xlu1 %v1681_v27, %s8112_s24 }
 0x299   : > { %v9370_v10 = vpop.permute.xlu0 %2448  ;;  %v9372_v53 = vpop.permute.xlu2 %2452 }
 0x29a   : > { %14022 = vst [vmem:[#allocation166_spill] sm:$0xff] %v9370_v10  ;;  %v9374_v24 = vpop.permute.xlu1 %2444 }
 0x29b   : > { %14023 = vst [vmem:[#allocation167_spill] sm:$0xff] %v9372_v53  ;;  %v9392_v53 = vperm.slane %v8734_v15, 6 }
 0x29c   : > { %14024 = vst [vmem:[#allocation168_spill] sm:$0xff] %v9374_v24  ;;  %v1462_v24 = vmul.f32 %v8717_v58, %v8781_v9 }
 0x29d   : > { %v1682_v10 = vmul.f32 %v9392_v53, %v8749_v21 }
 0x29f   : > { %2462 = vrot.lane.b32.xlu2 %v2390_v47, %s8115_s8  ;;  %2464 = vrot.lane.b32.xlu0 %v2391_v38, %s8115_s8  ;;  %v954_v38 = vmul.f32 %v9149_v54, %v8484_v6 }
 0x2a0   : > { %2460 = vrot.lane.b32.xlu1 %v2389_v8, %s8115_s8 }
 0x2a1   : > { %v9385_v37 = vpop.permute.xlu0 %1529  ;;  %v9387_v50 = vpop.permute.xlu2 %1041 }
 0x2a2   : > { %14025 = vst [vmem:[#allocation169_spill] sm:$0xff] %v9385_v37  ;;  %v9389_v27 = vpop.permute.xlu1 %2450 }
 0x2a3   : > { %14026 = vst [vmem:[#allocation170_spill] sm:$0xff] %v9387_v50  ;;  %v14031_v50 = vld [vmem:[#allocation75_spill] sm:$0xff] }
 0x2a4   : > { %14027 = vst [vmem:[#allocation171_spill] sm:$0xff] %v9389_v27  ;;  %v1699_v37 = vmul.f32 %v8741_v7, %v14031_v50  ;;  %v1698_v21 = vmul.f32 %v8744_v1, %v14031_v50  ;;  %v1697_v6 = vmul.f32 %v8747_v33, %v14031_v50  ;;  %v2392_v1 = vmul.f32 %v8981_v48, %v8858_v59 }
 0x2a7   : > { %1543 = vrot.lane.b32.xlu2 %v1462_v24, %s8103_s22  ;;  %1744 = vrot.lane.b32.xlu0 %v1682_v10, %s8112_s24 }
 0x2a8   : > { %1023 = vrot.lane.b32.xlu1 %v954_v38, %s8110_s27 }
 0x2a9   : > { %v9403_v8 = vpop.permute.xlu0 %1764  ;;  %v9405_v47 = vpop.permute.xlu2 %1047 }
 0x2aa   : > { %14028 = vst [vmem:[#allocation172_spill] sm:$0xff] %v9403_v8  ;;  %v9407_v15 = vpop.permute.xlu1 %1760 }
 0x2ab   : > { %14029 = vst [vmem:[#allocation173_spill] sm:$0xff] %v9405_v47  ;;  %v14035_v47 = vld [vmem:[#allocation71_spill] sm:$0xff] }
 0x2ac   : > { %14030 = vst [vmem:[#allocation174_spill] sm:$0xff] %v9407_v15  ;;  %v9425_v7 = vperm.slane %v14035_v47, 5  ;;  %v14036_v15 = vld [vmem:[#allocation61_spill] sm:$0xff] }
 0x2ae   : > { %v1921_v33 = vmul.f32 %v9425_v7, %v14036_v15 }
 0x2af   : > { %1778 = vrot.lane.b32.xlu0 %v1699_v37, %s8112_s24  ;;  %1776 = vrot.lane.b32.xlu2 %v1698_v21, %s8112_s24  ;;  %v1700_v37 = vmul.f32 %v8767_v19, %v14031_v50  ;;  %v2569_v19 = vld [vmem:[%s13619_s2 + $0x10] sm:$0xff] }
 0x2b0   : > { %1774 = vrot.lane.b32.xlu1 %v1697_v6, %s8112_s24 }
 0x2b1   : > { %v9418_v24 = vpop.permute.xlu0 %2578  ;;  %v9420_v10 = vpop.permute.xlu2 %2000 }
 0x2b2   : > { %14032 = vst [vmem:[#allocation75_spill] sm:$0xff] %v9418_v24  ;;  %v9422_v38 = vpop.permute.xlu1 %1766  ;;  %v14040_v24 = vld [vmem:[#allocation68_spill] sm:$0xff] }
 0x2b3   : > { %14033 = vst [vmem:[#allocation175_spill] sm:$0xff] %v9420_v10  ;;  %v1197_v8 = vmul.f32 %v9210_v11, %v14040_v24 }
 0x2b4   : > { %14034 = vst [vmem:[#allocation176_spill] sm:$0xff] %v9422_v38  ;;  %v1701_v38 = vmul.f32 %v8809_v49, %v14031_v50  ;;  %v9458_v49 = vperm.slane %v14035_v47, 6 }
 0x2b7   : > { %2466 = vrot.lane.b32.xlu0 %v2392_v1, %s8115_s8  ;;  %1982 = vrot.lane.b32.xlu2 %v1921_v33, %s8113_s15 }
 0x2b8   : > { %1780 = vrot.lane.b32.xlu1 %v1700_v37, %s8112_s24 }
 0x2b9   : > { %v9436_v21 = vpop.permute.xlu0 %1043  ;;  %v9438_v6 = vpop.permute.xlu2 %2006 }
 0x2ba   : > { %14037 = vst [vmem:[#allocation71_spill] sm:$0xff] %v9436_v21  ;;  %v9440_v10 = vpop.permute.xlu1 %1039 }
 0x2bb   : > { %14038 = vst [vmem:[#allocation61_spill] sm:$0xff] %v9438_v6  ;;  %v14044_v6 = vld [vmem:[#allocation72_spill] sm:$0xff] }
 0x2bc   : > { %14039 = vst [vmem:[#allocation177_spill] sm:$0xff] %v9440_v10  ;;  %v1938_v10 = vmul.f32 %v8801_v43, %v14044_v6  ;;  %v1937_v21 = vmul.f32 %v8804_v31, %v14044_v6  ;;  %v14048_v43 = vld [vmem:[#allocation69_spill] sm:$0xff]  ;;  %v1940_v31 = vmul.f32 %v8825_v20, %v14044_v6 }
 0x2bf   : > { %1782 = vrot.lane.b32.xlu0 %v1701_v38, %s8112_s24  ;;  %1275 = vrot.lane.b32.xlu2 %v1197_v8, %s8111_s20  ;;  %v1922_v38 = vmul.f32 %v9458_v49, %v14036_v15  ;;  %v1939_v15 = vmul.f32 %v8830_v46, %v14044_v6  ;;  %v1198_v46 = vmul.f32 %v9260_v13, %v14040_v24 }
 0x2c0   : > { %2583 = vperm.xlu1 %7591, %v2569_v19   ;;  %v2140_v24 = vmul.f32 %v14048_v43, %v9324_v26 }
 0x2c1   : > { %v9451_v1 = vpop.permute.xlu0 %1259  ;;  %v9453_v33 = vpop.permute.xlu2 %1295 }
 0x2c2   : > { %14041 = vst [vmem:[#allocation68_spill] sm:$0xff] %v9451_v1  ;;  %v9455_v37 = vpop.permute.xlu1 %1045 }
 0x2c3   : > { %14042 = vst [vmem:[#allocation178_spill] sm:$0xff] %v9453_v33  ;;  %v2139_v33 = vmul.f32 %v14048_v43, %v9293_v44 }
 0x2c4   : > { %14043 = vst [vmem:[#allocation179_spill] sm:$0xff] %v9455_v37  ;;  %v14089_v37 = vld [vmem:[#allocation35_spill] sm:$0xff] }
 0x2c7   : > { %2016 = vrot.lane.b32.xlu0 %v1938_v10, %s8113_s15  ;;  %2014 = vrot.lane.b32.xlu2 %v1937_v21, %s8113_s15 }
 0x2c8   : > { %1984 = vrot.lane.b32.xlu1 %v1922_v38, %s8113_s15 }
 0x2c9   : > { %v9469_v8 = vpop.permute.xlu0 %2002  ;;  %v9471_v19 = vpop.permute.xlu2 %1301 }
 0x2ca   : > { %14045 = vst [vmem:[#allocation72_spill] sm:$0xff] %v9469_v8  ;;  %v9473_v47 = vpop.permute.xlu1 %1768  ;;  %v14052_v8 = vld [vmem:[#allocation64_spill] sm:$0xff] }
 0x2cb   : > { %14046 = vst [vmem:[#allocation180_spill] sm:$0xff] %v9471_v19  ;;  %v1941_v19 = vmul.f32 %v8861_v29, %v14044_v6  ;;  %v1449_v20 = vmul.f32 %v9293_v44, %v14052_v8  ;;  %v14056_v29 = vld [vmem:[#allocation77_spill] sm:$0xff] }
 0x2cc   : > { %14047 = vst [vmem:[#allocation181_spill] sm:$0xff] %v9473_v47  ;;  %v2158_v43 = vmul.f32 %v14056_v29, %v8696_v14  ;;  %v1688_v14 = vmul.f32 %v9359_v12, %v8784_v40 }
 0x2cf   : > { %2200 = vrot.lane.b32.xlu0 %v2139_v33, %s8114_s16  ;;  %2020 = vrot.lane.b32.xlu2 %v1940_v31, %s8113_s15 }
 0x2d0   : > { %2018 = vrot.lane.b32.xlu1 %v1939_v15, %s8113_s15 }
 0x2d1   : > { %v9484_v10 = vpop.permute.xlu0 %1049  ;;  %v9486_v21 = vpop.permute.xlu2 %2008 }
 0x2d2   : > { %14049 = vst [vmem:[#allocation69_spill] sm:$0xff] %v9484_v10  ;;  %v9488_v38 = vpop.permute.xlu1 %2004 }
 0x2d3   : > { %14050 = vst [vmem:[#allocation182_spill] sm:$0xff] %v9486_v21  ;;  %v2155_v21 = vmul.f32 %v14056_v29, %v8672_v52 }
 0x2d4   : > { %14051 = vst [vmem:[#allocation183_spill] sm:$0xff] %v9488_v38  ;;  %v2156_v38 = vmul.f32 %v14056_v29, %v8693_v3 }
 0x2d7   : > { %2022 = vrot.lane.b32.xlu0 %v1941_v19, %s8113_s15  ;;  %1517 = vrot.lane.b32.xlu2 %v1449_v20, %s8103_s22 }
 0x2d8   : > { %1277 = vrot.lane.b32.xlu1 %v1198_v46, %s8111_s20 }
 0x2d9   : > { %v9499_v33 = vpop.permute.xlu0 %1297  ;;  %v9501_v31 = vpop.permute.xlu2 %2222 }
 0x2da   : > { %14053 = vst [vmem:[#allocation64_spill] sm:$0xff] %v9499_v33  ;;  %v9503_v15 = vpop.permute.xlu1 %1261 }
 0x2db   : > { %14054 = vst [vmem:[#allocation184_spill] sm:$0xff] %v9501_v31  ;;  %v14060_v31 = vld [vmem:[#allocation83_spill] sm:$0xff] }
 0x2dc   : > { %14055 = vst [vmem:[#allocation185_spill] sm:$0xff] %v9503_v15  ;;  %v9521_v3 = vperm.slane %v14060_v31, 5  ;;  %v14061_v15 = vld [vmem:[#allocation70_spill] sm:$0xff] }
 0x2de   : > { %v2379_v52 = vmul.f32 %v9521_v3, %v14061_v15 }
 0x2df   : > { %2234 = vrot.lane.b32.xlu0 %v2156_v38, %s8114_s16  ;;  %2232 = vrot.lane.b32.xlu2 %v2155_v21, %s8114_s16  ;;  %v2157_v21 = vmul.f32 %v14056_v29, %v8701_v18  ;;  %v1450_v18 = vmul.f32 %v9324_v26, %v14052_v8 }
 0x2e0   : > { %2202 = vrot.lane.b32.xlu1 %v2140_v24, %s8114_s16 }
 0x2e1   : > { %v9514_v19 = vpop.permute.xlu0 %1303  ;;  %v9516_v20 = vpop.permute.xlu2 %1505 }
 0x2e2   : > { %14057 = vst [vmem:[#allocation77_spill] sm:$0xff] %v9514_v19  ;;  %v9518_v46 = vpop.permute.xlu1 %1299 }
 0x2e3   : > { %14058 = vst [vmem:[#allocation186_spill] sm:$0xff] %v9516_v20 }
 0x2e4   : > { %14059 = vst [vmem:[#allocation187_spill] sm:$0xff] %v9518_v46  ;;  %v2159_v46 = vmul.f32 %v14056_v29, %v8717_v58  ;;  %v9554_v58 = vperm.slane %v14060_v31, 6 }
 0x2e7   : > { %2440 = vrot.lane.b32.xlu0 %v2379_v52, %s8115_s8  ;;  %2238 = vrot.lane.b32.xlu2 %v2158_v43, %s8114_s16 }
 0x2e8   : > { %2236 = vrot.lane.b32.xlu1 %v2157_v21, %s8114_s16 }
 0x2e9   : > { %v9532_v38 = vpop.permute.xlu2 %1539  ;;  %v9534_v24 = vpop.permute.xlu0 %2218 }
 0x2ea   : > { %14062 = vst [vmem:[#allocation83_spill] sm:$0xff] %v9532_v38  ;;  %v9536_v20 = vpop.permute.xlu1 %1503  ;;  %v14068_v38 = vld [vmem:[#allocation78_spill] sm:$0xff] }
 0x2eb   : > { %14063 = vst [vmem:[#allocation70_spill] sm:$0xff] %v9534_v24  ;;  %v2395_v8 = vmul.f32 %v8929_v30, %v14068_v38  ;;  %v2398_v30 = vmul.f32 %v8945_v5, %v14068_v38  ;;  %v1928_v5 = vmul.f32 %v9425_v7, %v8727_v34 }
 0x2ec   : > { %14064 = vst [vmem:[#allocation188_spill] sm:$0xff] %v9536_v20  ;;  %v2396_v20 = vmul.f32 %v8926_v2, %v14068_v38  ;;  %v961_v2 = vmul.f32 %v9149_v54, %v8469_v63  ;;  %v2399_v63 = vmul.f32 %v8981_v48, %v14068_v38  ;;  %v1929_v48 = vmul.f32 %v9458_v49, %v8727_v34 }
 0x2ef   : > { %2240 = vrot.lane.b32.xlu0 %v2159_v46, %s8114_s16  ;;  %1756 = vrot.lane.b32.xlu2 %v1688_v14, %s8112_s24  ;;  %v2380_v46 = vmul.f32 %v9554_v58, %v14061_v15  ;;  %v2397_v15 = vmul.f32 %v8948_v4, %v14068_v38  ;;  %v1689_v4 = vmul.f32 %v9392_v53, %v8784_v40  ;;  %v2570_v40 = vld [vmem:[%s13619_s2 + $0x18] sm:$0xff] }
 0x2f0   : > { %1519 = vrot.lane.b32.xlu1 %v1450_v18, %s8103_s22 }
 0x2f1   : > { %v9547_v52 = vpop.permute.xlu2 %2226  ;;  %v9549_v43 = vpop.permute.xlu0 %2224 }
 0x2f2   : > { %14065 = vst [vmem:[#allocation189_spill] sm:$0xff] %v9547_v52  ;;  %v9551_v21 = vpop.permute.xlu1 %2220 }
 0x2f3   : > { %14066 = vst [vmem:[#allocation190_spill] sm:$0xff] %v9549_v43 }
 0x2f4   : > { %14067 = vst [vmem:[#allocation191_spill] sm:$0xff] %v9551_v21 }
 0x2f7   : > { %2474 = vrot.lane.b32.xlu0 %v2396_v20, %s8115_s8  ;;  %2472 = vrot.lane.b32.xlu2 %v2395_v8, %s8115_s8 }
 0x2f8   : > { %2442 = vrot.lane.b32.xlu1 %v2380_v46, %s8115_s8 }
 0x2f9   : > { %v9565_v14 = vpop.permute.xlu2 %2462  ;;  %v9567_v18 = vpop.permute.xlu0 %1535 }
 0x2fa   : > { %14069 = vst [vmem:[#allocation78_spill] sm:$0xff] %v9565_v14  ;;  %v9569_v31 = vpop.permute.xlu1 %1305 }
 0x2fb   : > { %14070 = vst [vmem:[#allocation192_spill] sm:$0xff] %v9567_v18 }
 0x2fc   : > { %14071 = vst [vmem:[#allocation193_spill] sm:$0xff] %v9569_v31 }
 0x2ff   : > { %1037 = vrot.lane.b32.xlu0 %v961_v2, %s8110_s27  ;;  %2478 = vrot.lane.b32.xlu2 %v2398_v30, %s8115_s8 }
 0x300   : > { %2476 = vrot.lane.b32.xlu1 %v2397_v15, %s8115_s8 }
 0x301   : > { %v9580_v20 = vpop.permute.xlu2 %1543  ;;  %v9582_v8 = vpop.permute.xlu0 %1541 }
 0x302   : > { %14072 = vst [vmem:[#allocation194_spill] sm:$0xff] %v9580_v20  ;;  %v9584_v46 = vpop.permute.xlu1 %1537 }
 0x303   : > { %14073 = vst [vmem:[#allocation195_spill] sm:$0xff] %v9582_v8  ;;  %v7799_v8 = vld [vmem:[#allocation2] sm:$0x7f] }
 0x304   : > { %14074 = vst [vmem:[#allocation196_spill] sm:$0xff] %v9584_v46  ;;  %v1205_v46 = vmul.f32 %v9210_v11, %v8798_v28 }
 0x307   : > { %2480 = vrot.lane.b32.xlu0 %v2399_v63, %s8115_s8  ;;  %1996 = vrot.lane.b32.xlu2 %v1928_v5, %s8113_s15  ;;  %v14078_v63 = vld [vmem:[#allocation36_spill] sm:$0xff] }
 0x308   : > { %1758 = vrot.lane.b32.xlu1 %v1689_v4, %s8112_s24  ;;  %v560_v5 = vrot.slane %v14078_v63, 7 }
 0x309   : > { %v9595_v2 = vpop.permute.xlu0 %2458  ;;  %v9597_v30 = vpop.permute.xlu2 %1776 }
 0x30a   : > { %14075 = vst [vmem:[#allocation197_spill] sm:$0xff] %v9595_v2  ;;  %v9599_v15 = vpop.permute.xlu1 %1742  ;;  %v562_v34 = vsel %vm561_vm7, %v560_v5, %v14078_v63 }
 0x30b   : > { %14076 = vst [vmem:[#allocation198_spill] sm:$0xff] %v9597_v30  ;;  %v564_v14 = vmul.f32 %v7799_v8, %v562_v34 }
 0x30c   : > { %14077 = vst [vmem:[#allocation199_spill] sm:$0xff] %v9599_v15  ;;  %v1456_v15 = vmul.f32 %v9293_v44, %v8738_v23 }
 0x30d   : > { %v590_v63 = vperm.slane %v564_v14, 0  ;;  %v594_v34 = vperm.slane %v564_v14, 4  ;;  %v9636_v18 = vperm.slane %v564_v14, 6 }
 0x30f   : > { %1998 = vrot.lane.b32.xlu0 %v1929_v48, %s8113_s15  ;;  %1291 = vrot.lane.b32.xlu2 %v1205_v46, %s8111_s20  ;;  %v1206_v48 = vmul.f32 %v9260_v13, %v8798_v28  ;;  %v2146_v46 = vmul.f32 %v8806_v55, %v9293_v44  ;;  %v593_v28 = vperm.slane %v564_v14, 3  ;;  %14086 = vst [vmem:[#allocation206_spill] sm:$0xff] %v9636_v18 }
 0x310   : > { %2588 = vperm.xlu1 %7591, %v2570_v40   ;;  %v591_v40 = vperm.slane %v564_v14, 1  ;;  %v625_v60 = vmul.f32 %v590_v63, %v14098_v56 }
 0x311   : > { %v9611_v4 = vpop.permute.xlu0 %2464  ;;  %v9613_v30 = vpop.permute.xlu2 %1982 }
 0x312   : > { %14079 = vst [vmem:[#allocation36_spill] sm:$0xff] %v9611_v4  ;;  %v9617_v20 = vpop.permute.xlu1 %2460  ;;  %v9634_v4 = vperm.slane %v564_v14, 5  ;;  %v619_v1 = vmul.f32 %v591_v40, %v14089_v37  ;;  %v626_v62 = vmul.f32 %v591_v40, %v14098_v56 }
 0x313   : > { %14080 = vst [vmem:[#allocation200_spill] sm:$0xff] %v9613_v30  ;;  %v592_v30 = vperm.slane %v564_v14, 2  ;;  %v2147_v14 = vmul.f32 %v8806_v55, %v9324_v26 }
 0x314   : > { %14081 = vst [vmem:[#allocation201_spill] sm:$0xff] %v9617_v20 }
 0x315   : > { %14085 = vst [vmem:[#allocation205_spill] sm:$0xff] %v9634_v4  ;;  %v620_v61 = vmul.f32 %v592_v30, %v14089_v37  ;;  %v627_v41 = vmul.f32 %v592_v30, %v14098_v56 }
 0x317   : > { %1531 = vrot.lane.b32.xlu0 %v1456_v15, %s8103_s22  ;;  %1293 = vrot.lane.b32.xlu2 %v1206_v48, %s8111_s20  ;;  %v14087_v15 = vld [vmem:[#allocation34_spill] sm:$0xff] }
 0x318   : > { %2214 = vrot.lane.b32.xlu1 %v2146_v46, %s8114_s16  ;;  %v611_v31 = vmul.f32 %v590_v63, %v14087_v15  ;;  %v612_v48 = vmul.f32 %v591_v40, %v14087_v15  ;;  %v1457_v46 = vmul.f32 %v9324_v26, %v8738_v23  ;;  %v613_v2 = vmul.f32 %v592_v30, %v14087_v15 }
 0x319   : > { %v9628_v5 = vpop.permute.xlu0 %1744  ;;  %v9630_v8 = vpop.permute.xlu2 %1275  ;;  %v617_v55 = vmul.f32 %v9636_v18, %v14087_v15  ;;  %v614_v10 = vmul.f32 %v593_v28, %v14087_v15 }
 0x31a   : > { %14082 = vst [vmem:[#allocation202_spill] sm:$0xff] %v9628_v5  ;;  %v9632_v20 = vpop.permute.xlu1 %1023  ;;  %v2386_v5 = vmul.f32 %v9521_v3, %v8822_v39 }
 0x31b   : > { %14083 = vst [vmem:[#allocation203_spill] sm:$0xff] %v9630_v8  ;;  %v14088_v8 = vld [vmem:[#allocation37_spill] sm:$0xff] }
 0x31c   : > { %14084 = vst [vmem:[#allocation204_spill] sm:$0xff] %v9632_v20  ;;  %v605_v21 = vmul.f32 %v591_v40, %v14088_v8  ;;  %v615_v20 = vmul.f32 %v594_v34, %v14087_v15  ;;  %v604_v52 = vmul.f32 %v590_v63, %v14088_v8  ;;  %v608_v43 = vmul.f32 %v594_v34, %v14088_v8 }
 0x31d   : > { %v606_v24 = vmul.f32 %v592_v30, %v14088_v8  ;;  %v607_v23 = vmul.f32 %v593_v28, %v14088_v8  ;;  %v609_v19 = vmul.f32 %v9634_v4, %v14088_v8  ;;  %v610_v33 = vmul.f32 %v9636_v18, %v14088_v8  ;;  %v14093_v8 = vld [vmem:[#allocation38_spill] sm:$0xff]  ;;  %v14094_v18 = vld [vmem:[#allocation40_spill] sm:$0xff] }
 0x31e   : > { %v814_v0 = vsel %vm13869_vm3, %v14093_v8, %v14092_v32  ;;  %v2387_v40 = vmul.f32 %v9554_v58, %v8822_v39 }
 0x31f   : > { %1533 = vrot.lane.b32.xlu0 %v1457_v46, %s8103_s22  ;;  %2454 = vrot.lane.b32.xlu2 %v2386_v5, %s8115_s8  ;;  %v616_v46 = vmul.f32 %v9634_v4, %v14087_v15  ;;  %v618_v5 = vmul.f32 %v590_v63, %v14089_v37  ;;  %v621_v15 = vmul.f32 %v593_v28, %v14089_v37 }
 0x320   : > { %2216 = vrot.lane.b32.xlu1 %v2147_v14, %s8114_s16  ;;  %v813_v14 = vsel %vm13869_vm3, %v14094_v18, %v14093_v8  ;;  %v628_v18 = vmul.f32 %v593_v28, %v14098_v56  ;;  %v9690_v8 = vmul.f32 %v594_v34, %v14098_v56  ;;  %v9694_v17 = vadd.f32 %v814_v0, %v605_v21  ;;  %v14101_v28 = vld [vmem:[#allocation47_spill] sm:$0xff]  ;;  %v14102_v0 = vld [vmem:[#allocation48_spill] sm:$0xff]  ;;  %v14104_v21 = vld [vmem:[#allocation50_spill] sm:$0xff] }
 0x321   : > { %v9667_v47 = vpop.permute.xlu0 %1778  ;;  %v9669_v27 = vpop.permute.xlu2 %2014  ;;  %v9696_v36 = vadd.f32 %v813_v14, %v604_v52  ;;  %v815_v63 = vsel %vm13869_vm3, %v14092_v32, %v14099_v45  ;;  %v14103_v52 = vld [vmem:[#allocation41_spill] sm:$0xff]  ;;  %v820_v39 = vsel %vm13869_vm3, %v14102_v0, %v14104_v21  ;;  %v14108_v56 = vld [vmem:[#allocation46_spill] sm:$0xff] }
 0x322   : > { %14090 = vst [vmem:[#allocation34_spill] sm:$0xff] %v9667_v47  ;;  %v9679_v4 = vpop.permute.xlu1 %1774  ;;  %v817_v47 = vsel %vm13869_vm3, %v14097_v57, %v14096_v51  ;;  %v819_v32 = vsel %vm13869_vm3, %v14103_v52, %v14102_v0  ;;  %v14107_v14 = vld [vmem:[#allocation53_spill] sm:$0xff] }
 0x323   : > { %14091 = vst [vmem:[#allocation37_spill] sm:$0xff] %v9669_v27  ;;  %v622_v27 = vmul.f32 %v594_v34, %v14089_v37  ;;  %v9703_v30 = vadd.f32 %v817_v47, %v608_v43  ;;  %v816_v34 = vsel %vm13869_vm3, %v14099_v45, %v14097_v57  ;;  %v14105_v47 = vld [vmem:[#allocation44_spill] sm:$0xff]  ;;  %v9724_v45 = vadd.f32 %v815_v63, %v606_v24 }
 0x324   : > { %14095 = vst [vmem:[#allocation42_spill] sm:$0xff] %v9679_v4  ;;  %v968_v4 = vmul.f32 %v9149_v54, %v8516_v22  ;;  %v818_v22 = vsel %vm13869_vm3, %v14096_v51, %v14101_v28  ;;  %v1695_v54 = vmul.f32 %v9359_v12, %v8827_v25  ;;  %v821_v43 = vsel %vm13869_vm3, %v14104_v21, %v14105_v47  ;;  %v14106_v51 = vld [vmem:[#allocation51_spill] sm:$0xff]  ;;  %v14109_v63 = vld [vmem:[#allocation56_spill] sm:$0xff] }
 0x325   : > { %14100 = vst [vmem:[#allocation38_spill] sm:$0xff] %v9703_v30  ;;  %v822_v57 = vsel %vm13869_vm3, %v14105_v47, %v14106_v51  ;;  %v823_v52 = vsel %vm13869_vm3, %v14106_v51, %v14107_v14  ;;  %v824_v0 = vsel %vm13869_vm3, %v14107_v14, %v14108_v56  ;;  %v9736_v21 = vadd.f32 %v816_v34, %v607_v23 }
 0x326   : > { %v9741_v24 = vadd.f32 %v14101_v28, %v610_v33  ;;  %v9751_v30 = vadd.f32 %v14108_v56, %v617_v55  ;;  %v9753_v14 = vadd.f32 %v819_v32, %v611_v31  ;;  %v9755_v23 = vadd.f32 %v820_v39, %v612_v48  ;;  %v14117_v31 = vld [vmem:[#allocation57_spill] sm:$0xff]  ;;  %v14121_v32 = vld [vmem:[#allocation62_spill] sm:$0xff] }
 0x327   : > { %1051 = vrot.lane.b32.xlu0 %v968_v4, %s8110_s27  ;;  %2456 = vrot.lane.b32.xlu2 %v2387_v40, %s8115_s8  ;;  %v9738_v4 = vadd.f32 %v818_v22, %v609_v19  ;;  %v14110_v40 = vld [vmem:[#allocation54_spill] sm:$0xff]  ;;  %v9757_v19 = vadd.f32 %v821_v43, %v613_v2  ;;  %v9761_v33 = vadd.f32 %v822_v57, %v614_v10  ;;  %v14118_v2 = vld [vmem:[#allocation59_spill] sm:$0xff]  ;;  %v14119_v10 = vld [vmem:[#allocation52_spill] sm:$0xff]  ;;  %s8117_s27 = smov 13  }
 0x328   : > { %1770 = vrot.lane.b32.xlu1 %v1695_v54, %s8112_s24  ;;  %v825_v47 = vsel %vm13869_vm3, %v14110_v40, %v14109_v63  ;;  %14113 = vst [vmem:[#allocation39_spill] sm:$0xff] %v9751_v30  ;;  %v9763_v28 = vadd.f32 %v823_v52, %v615_v20  ;;  %v9765_v22 = vadd.f32 %v824_v0, %v616_v46  ;;  %v14116_v54 = vld [vmem:[#allocation49_spill] sm:$0xff]  ;;  %v14120_v46 = vld [vmem:[#allocation55_spill] sm:$0xff] }
 0x329   : > { %v9746_v37 = vpop.permute.xlu0 %2466  ;;  %v9748_v51 = vpop.permute.xlu2 %2020  ;;  %v826_v40 = vsel %vm13869_vm3, %v14109_v63, %v14116_v54  ;;  %v9770_v56 = vadd.f32 %v825_v47, %v618_v5  ;;  %v827_v48 = vsel %vm13869_vm3, %v14116_v54, %v14117_v31  ;;  %v828_v55 = vsel %vm13869_vm3, %v14117_v31, %v14118_v2  ;;  %v14122_v43 = vld [vmem:[#allocation63_spill] sm:$0xff]  ;;  %v14123_v0 = vld [vmem:[#allocation65_spill] sm:$0xff]  ;;  %v14124_v47 = vld [vmem:[#allocation58_spill] sm:$0xff] }
 0x32a   : > { %14111 = vst [vmem:[#allocation40_spill] sm:$0xff] %v9746_v37  ;;  %v9759_v34 = vpop.permute.xlu1 %1780  ;;  %v829_v20 = vsel %vm13869_vm3, %v14118_v2, %v14119_v10  ;;  %v831_v39 = vsel %vm13869_vm3, %v14121_v32, %v14120_v46  ;;  %v832_v5 = vsel %vm13869_vm3, %v14120_v46, %v14122_v43  ;;  %v1213_v57 = vmul.f32 %v9210_v11, %v8843_v16  ;;  %v14125_v11 = vld [vmem:[#allocation66_spill] sm:$0xff] }
 0x32b   : > { %14112 = vst [vmem:[#allocation45_spill] sm:$0xff] %v9748_v51  ;;  %v1935_v52 = vmul.f32 %v9425_v7, %v8762_v42  ;;  %v833_v63 = vsel %vm13869_vm3, %v14122_v43, %v14123_v0  ;;  %v834_v54 = vsel %vm13869_vm3, %v14123_v0, %v14124_v47  ;;  %v1696_v31 = vmul.f32 %v9392_v53, %v8827_v25  ;;  %v14147_v51 = vld [vmem:[#allocation94_spill] sm:$0xff] }
 0x32c   : > { %14114 = vst [vmem:[#allocation43_spill] sm:$0xff] %v9759_v34  ;;  %v9799_v2 = vadd.f32 %v826_v40, %v619_v1  ;;  %v9801_v46 = vadd.f32 %v827_v48, %v620_v61  ;;  %v835_v32 = vsel %vm13869_vm3, %v14124_v47, %v14125_v11  ;;  %v9808_v43 = vadd.f32 %v828_v55, %v621_v15  ;;  %v14126_v40 = vld [vmem:[#allocation79_spill] sm:$0xff]  ;;  %v14127_v48 = vld [vmem:[#allocation73_spill] sm:$0xff] }
 0x32d   : > { %14115 = vst [vmem:[#allocation47_spill] sm:$0xff] %v9765_v22  ;;  %v9810_v10 = vadd.f32 %v829_v20, %v622_v27  ;;  %v9812_v0 = vadd.f32 %v831_v39, %v625_v60  ;;  %v9815_v25 = vadd.f32 %v832_v5, %v626_v62  ;;  %v9817_v61 = vadd.f32 %v833_v63, %v627_v41  ;;  %v14130_v55 = vld [vmem:[#allocation85_spill] sm:$0xff]  ;;  %v14131_v20 = vld [vmem:[#allocation76_spill] sm:$0xff]  ;;  %v14146_v11 = vld [vmem:[#allocation87_spill] sm:$0xff] }
 0x32e   : > { %v9819_v1 = vadd.f32 %v834_v54, %v628_v18  ;;  %v9829_v60 = vadd.f32 %v835_v32, %v9690_v8  ;;  %v1936_v62 = vmul.f32 %v9458_v49, %v8762_v42  ;;  %v9837_v41 = vmul.f32 %v9293_v44, %v8781_v9  ;;  %v14171_v22 = vld [vmem:[#allocation117_spill] sm:$0xff] }
 0x32f   : > { %1307 = vrot.lane.b32.xlu0 %v1213_v57, %s8111_s20  ;;  %2010 = vrot.lane.b32.xlu2 %v1935_v52, %s8113_s15  ;;  %v1054_v57 = vsel %vm1053_vm8, %v14127_v48, %v14126_v40  ;;  %v9841_v18 = vmul.f32 %v9324_v26, %v8781_v9  ;;  %v1312_v39 = vsel %vm13870_vm9, %v14131_v20, %v14130_v55  ;;  %v14136_v20 = vld [vmem:[#allocation89_spill] sm:$0xff] }
 0x330   : > { %1772 = vrot.lane.b32.xlu1 %v1696_v31, %s8112_s24  ;;  %v1214_v8 = vmul.f32 %v9260_v13, %v8843_v16  ;;  %v9850_v5 = vmul.f32 %v9458_v49, %v14044_v6  ;;  %v9854_v42 = vmul.f32 %v9425_v7, %v14044_v6  ;;  %v1106_v63 = vadd.f32 %v1054_v57, %v9696_v36  ;;  %v14132_v16 = vld [vmem:[#allocation81_spill] sm:$0xff]  ;;  %v14133_v6 = vld [vmem:[#allocation74_spill] sm:$0xff] }
 0x331   : > { %v9824_v52 = vpop.permute.xlu0 %1782  ;;  %v9826_v15 = vpop.permute.xlu2 %1517  ;;  %v2153_v9 = vmul.f32 %v8845_v35, %v9293_v44  ;;  %v2393_v47 = vmul.f32 %v9521_v3, %v8858_v59  ;;  %v2154_v54 = vmul.f32 %v8845_v35, %v9324_v26  ;;  %v1055_v13 = vsel %vm1053_vm8, %v14126_v40, %v14132_v16  ;;  %v14134_v31 = vld [vmem:[#allocation82_spill] sm:$0xff] }
 0x332   : > { %14128 = vst [vmem:[#allocation48_spill] sm:$0xff] %v9824_v52  ;;  %v9831_v27 = vpop.permute.xlu1 %2583  ;;  %v9868_v49 = vmul.f32 %v9554_v58, %v8858_v59  ;;  %v9872_v36 = vmul.f32 %v9359_v12, %v14031_v50  ;;  %v9876_v7 = vmul.f32 %v9392_v53, %v14031_v50  ;;  %v1056_v35 = vsel %vm1053_vm8, %v14132_v16, %v14133_v6  ;;  %v14142_v16 = vld [vmem:[#allocation91_spill] sm:$0xff] }
 0x333   : > { %14129 = vst [vmem:[#allocation41_spill] sm:$0xff] %v9826_v15  ;;  %v1057_v32 = vsel %vm1053_vm8, %v14133_v6, %v14134_v31  ;;  %v1368_v40 = vadd.f32 %v1312_v39, %v1106_v63  ;;  %v9886_v59 = vmul.f32 %v9521_v3, %v14068_v38  ;;  %v9892_v12 = vmul.f32 %v14056_v29, %v9324_v26  ;;  %v14135_v3 = vld [vmem:[#allocation86_spill] sm:$0xff]  ;;  %v14137_v26 = vld [vmem:[#allocation80_spill] sm:$0xff] }
 0x334   : > { %v9896_v53 = vmul.f32 %v14056_v29, %v9293_v44  ;;  %v9900_v50 = vmul.f32 %v9554_v58, %v14068_v38  ;;  %v1107_v48 = vadd.f32 %v1055_v13, %v9694_v17  ;;  %v1058_v57 = vsel %vm1053_vm8, %v14134_v31, %v14135_v3  ;;  %v14138_v38 = vld [vmem:[#allocation88_spill] sm:$0xff]  ;;  %v14145_v31 = vld [vmem:[#allocation38_spill] sm:$0xff] }
 0x335   : > { %v1313_v39 = vsel %vm13870_vm9, %v14130_v55, %v14136_v20  ;;  %v1108_v44 = vadd.f32 %v1056_v35, %v9724_v45  ;;  %v1109_v29 = vadd.f32 %v1057_v32, %v9736_v21  ;;  %v1315_v17 = vsel %vm13870_vm9, %v14137_v26, %v14138_v38  ;;  %v14141_v55 = vld [vmem:[#allocation92_spill] sm:$0xff]  ;;  %v14149_v15 = vld [vmem:[#allocation90_spill] sm:$0xff] }
 0x336   : > { %v14143_v13 = vld [vmem:[#allocation84_spill] sm:$0xff]  ;;  %v1110_v32 = vadd.f32 %v1058_v57, %v14145_v31  ;;  %v1552_v52 = vsel %vm561_vm7, %v14146_v11, %v14147_v51 }
 0x337   : > { %1309 = vrot.lane.b32.xlu0 %v1214_v8, %s8111_s20  ;;  %2228 = vrot.lane.b32.xlu2 %v2153_v9, %s8114_s16  ;;  %v1314_v8 = vsel %vm13870_vm9, %v14136_v20, %v14137_v26  ;;  %v1316_v9 = vsel %vm13870_vm9, %v14138_v38, %v14141_v55  ;;  %v14144_v45 = vld [vmem:[#allocation96_spill] sm:$0xff]  ;;  %v1601_v6 = vadd.f32 %v14143_v13, %v1368_v40  ;;  %v14150_v40 = vld [vmem:[#allocation99_spill] sm:$0xff] }
 0x338   : > { %2012 = vrot.lane.b32.xlu1 %v1936_v62, %s8113_s15  ;;  %v1549_v62 = vsel %vm561_vm7, %v14143_v13, %v14142_v16  ;;  %v1550_v21 = vsel %vm561_vm7, %v14142_v16, %v14144_v45  ;;  %v1369_v20 = vadd.f32 %v1313_v39, %v1107_v48  ;;  %v1370_v26 = vadd.f32 %v1314_v8, %v1108_v44  ;;  %v14151_v8 = vld [vmem:[#allocation100_spill] sm:$0xff]  ;;  %v14152_v44 = vld [vmem:[#allocation93_spill] sm:$0xff] }
 0x339   : > { %v9918_v58 = vpop.permute.xlu0 %2016  ;;  %v9920_v63 = vpop.permute.xlu2 %2232  ;;  %v1551_v38 = vsel %vm561_vm7, %v14144_v45, %v14146_v11  ;;  %v1371_v30 = vadd.f32 %v1315_v17, %v1109_v29  ;;  %v1841_v13 = vadd.f32 %v14150_v40, %v1601_v6  ;;  %v1789_v48 = vsel %vm1788_vm10, %v14150_v40, %v14149_v15  ;;  %v14153_v17 = vld [vmem:[#allocation102_spill] sm:$0xff]  ;;  %v14154_v6 = vld [vmem:[#allocation103_spill] sm:$0xff] }
 0x33a   : > { %14139 = vst [vmem:[#allocation50_spill] sm:$0xff] %v9918_v58  ;;  %v9932_v35 = vpop.permute.xlu1 %1984  ;;  %v1372_v58 = vadd.f32 %v1316_v9, %v1110_v32  ;;  %v1602_v34 = vadd.f32 %v1549_v62, %v1369_v20  ;;  %v1603_v57 = vadd.f32 %v1550_v21, %v1370_v26  ;;  %v1060_v29 = vsel %vm1053_vm8, %v14152_v44, %v14151_v8  ;;  %v14155_v9 = vld [vmem:[#allocation95_spill] sm:$0xff]  ;;  %v14157_v32 = vld [vmem:[#allocation98_spill] sm:$0xff] }
 0x33b   : > { %14140 = vst [vmem:[#allocation44_spill] sm:$0xff] %v9920_v63  ;;  %v14148_v63 = vld [vmem:[#allocation97_spill] sm:$0xff]  ;;  %v1604_v39 = vadd.f32 %v1551_v38, %v1371_v30  ;;  %v1063_v62 = vsel %vm1053_vm8, %v14155_v9, %v14154_v6 }
 0x33c   : > { %v1790_v16 = vsel %vm1788_vm10, %v14149_v15, %v14148_v63  ;;  %v1791_v11 = vsel %vm1788_vm10, %v14148_v63, %v14153_v17  ;;  %v1605_v45 = vadd.f32 %v1552_v52, %v1372_v58  ;;  %v1842_v30 = vadd.f32 %v1789_v48, %v1602_v34  ;;  %v14156_v15 = vld [vmem:[#allocation105_spill] sm:$0xff] }
 0x33d   : > { %v1843_v31 = vadd.f32 %v1790_v16, %v1603_v57  ;;  %v1061_v21 = vsel %vm1053_vm8, %v14151_v8, %v14156_v15  ;;  %v1062_v63 = vsel %vm1053_vm8, %v14156_v15, %v14155_v9  ;;  %v2081_v52 = vadd.f32 %v14157_v32, %v1841_v13  ;;  %v14161_v13 = vld [vmem:[#allocation108_spill] sm:$0xff]  ;;  %v14163_v48 = vld [vmem:[#allocation101_spill] sm:$0xff] }
 0x33e   : > { %v1113_v58 = vadd.f32 %v1060_v29, %v9753_v14  ;;  %v1844_v20 = vadd.f32 %v1791_v11, %v1604_v39  ;;  %v1116_v40 = vadd.f32 %v1063_v62, %v9761_v33  ;;  %v14162_v14 = vld [vmem:[#allocation111_spill] sm:$0xff]  ;;  %v1114_v44 = vadd.f32 %v1061_v21, %v9755_v23  ;;  %v14165_v11 = vld [vmem:[#allocation112_spill] sm:$0xff]  ;;  %v14167_v9 = vld [vmem:[#allocation113_spill] sm:$0xff] }
 0x33f   : > { %2468 = vrot.lane.b32.xlu0 %v2393_v47, %s8115_s8  ;;  %2230 = vrot.lane.b32.xlu2 %v2154_v54, %s8114_s16  ;;  %v14158_v47 = vld [vmem:[#allocation106_spill] sm:$0xff]  ;;  %v14159_v54 = vld [vmem:[#allocation109_spill] sm:$0xff]  ;;  %v2031_v39 = vsel %vm2028_vm11, %v14162_v14, %v14163_v48  ;;  %v1115_v29 = vadd.f32 %v1062_v63, %v9757_v19  ;;  %v14166_v33 = vld [vmem:[#allocation104_spill] sm:$0xff] }
 0x340   : > { %1545 = vrot.lane.b32.xlu1 %v9837_v41, %s8103_s22  ;;  %v2029_v34 = vsel %vm2028_vm11, %v14157_v32, %v14158_v47  ;;  %v1064_v26 = vsel %vm1053_vm8, %v14154_v6, %v14159_v54  ;;  %v1792_v41 = vsel %vm1788_vm10, %v14153_v17, %v14161_v13  ;;  %v2030_v57 = vsel %vm2028_vm11, %v14158_v47, %v14162_v14  ;;  %v14168_v17 = vld [vmem:[#allocation107_spill] sm:$0xff]  ;;  %v14169_v47 = vld [vmem:[#allocation114_spill] sm:$0xff] }
 0x341   : > { %v9975_v38 = vpop.permute.xlu0 %2200  ;;  %v9977_v16 = vpop.permute.xlu2 %2238  ;;  %v1320_v6 = vsel %vm13870_vm9, %v14166_v33, %v14165_v11  ;;  %v1323_v62 = vsel %vm13870_vm9, %v14168_v17, %v14167_v9  ;;  %v2082_v15 = vadd.f32 %v2029_v34, %v1842_v30  ;;  %v1117_v32 = vadd.f32 %v1064_v26, %v9763_v28  ;;  %v14170_v19 = vld [vmem:[#allocation115_spill] sm:$0xff]  ;;  %v14172_v26 = vld [vmem:[#allocation118_spill] sm:$0xff] }
 0x342   : > { %14160 = vst [vmem:[#allocation51_spill] sm:$0xff] %v9977_v16  ;;  %v9989_v8 = vpop.permute.xlu1 %2018  ;;  %v1319_v14 = vsel %vm13870_vm9, %v14169_v47, %v14166_v33  ;;  %v1845_v16 = vadd.f32 %v1792_v41, %v1605_v45  ;;  %v2083_v23 = vadd.f32 %v2030_v57, %v1843_v31  ;;  %v2084_v21 = vadd.f32 %v2031_v39, %v1844_v20  ;;  %v14173_v33 = vld [vmem:[#allocation110_spill] sm:$0xff]  ;;  %v14174_v31 = vld [vmem:[#allocation120_spill] sm:$0xff] }
 0x343   : > { %14164 = vst [vmem:[#allocation53_spill] sm:$0xff] %v9989_v8  ;;  %v2032_v63 = vsel %vm2028_vm11, %v14163_v48, %v14170_v19  ;;  %v1376_v8 = vadd.f32 %v1320_v6, %v1114_v44  ;;  %v1379_v37 = vadd.f32 %v1323_v62, %v1117_v32  ;;  %v1321_v30 = vsel %vm13870_vm9, %v14165_v11, %v14171_v22  ;;  %v14181_v62 = vld [vmem:[#allocation126_spill] sm:$0xff]  ;;  %v14182_v32 = vld [vmem:[#allocation121_spill] sm:$0xff] }
 0x344   : > { %v1322_v28 = vsel %vm13870_vm9, %v14171_v22, %v14168_v17  ;;  %v1375_v34 = vadd.f32 %v1319_v14, %v1113_v58  ;;  %v2248_v45 = vsel %vm2246_vm12, %v14173_v33, %v14172_v26  ;;  %v2299_v20 = vadd.f32 %v14174_v31, %v2081_v52  ;;  %v14175_v22 = vld [vmem:[#allocation129_spill] sm:$0xff]  ;;  %v14176_v58 = vld [vmem:[#allocation123_spill] sm:$0xff]  ;;  %v14188_v9 = vld [vmem:[#allocation122_spill] sm:$0xff] }
 0x345   : > { %v2085_v41 = vadd.f32 %v2032_v63, %v1845_v16  ;;  %v2247_v57 = vsel %vm2246_vm12, %v14174_v31, %v14173_v33  ;;  %v2250_v48 = vsel %vm2246_vm12, %v14176_v58, %v14175_v22  ;;  %v1377_v52 = vadd.f32 %v1321_v30, %v1115_v29  ;;  %v14178_v16 = vld [vmem:[#allocation116_spill] sm:$0xff]  ;;  %v14184_v29 = vld [vmem:[#allocation127_spill] sm:$0xff] }
 0x346   : > { %v1378_v39 = vadd.f32 %v1322_v28, %v1116_v40  ;;  %v2301_v17 = vadd.f32 %v2248_v45, %v2083_v23  ;;  %v1555_v47 = vsel %vm561_vm7, %v14182_v32, %v14181_v62  ;;  %v14183_v40 = vld [vmem:[#allocation132_spill] sm:$0xff]  ;;  %v2300_v30 = vadd.f32 %v2247_v57, %v2082_v15  ;;  %v14186_v28 = vld [vmem:[#allocation119_spill] sm:$0xff] }
 0x347   : > { %2470 = vrot.lane.b32.xlu0 %v9868_v49, %s8115_s8  ;;  %1784 = vrot.lane.b32.xlu2 %v9872_v36, %s8112_s24  ;;  %v2249_v49 = vsel %vm2246_vm12, %v14172_v26, %v14176_v58  ;;  %v14177_v36 = vld [vmem:[#allocation124_spill] sm:$0xff]  ;;  %v2488_v14 = vsel %vm2486_vm13, %v14184_v29, %v14183_v40  ;;  %v2539_v26 = vadd.f32 %v14186_v28, %v2299_v20 }
 0x348   : > { %1547 = vrot.lane.b32.xlu1 %v9841_v18, %s8103_s22  ;;  %v1557_v44 = vsel %vm561_vm7, %v14178_v16, %v14177_v36  ;;  %v1556_v18 = vsel %vm561_vm7, %v14181_v62, %v14178_v16  ;;  %v2487_v23 = vsel %vm2486_vm13, %v14186_v28, %v14184_v29  ;;  %v2303_v33 = vadd.f32 %v2250_v48, %v2085_v41  ;;  %v14190_v48 = vld [vmem:[#allocation133_spill] sm:$0xff]  ;;  %v14199_v29 = vld [vmem:[#allocation131_spill] sm:$0xff]  ;;  %s8116_s22 = smov 115  }
 0x349   : > { %v10034_v11 = vpop.permute.xlu0 %2022  ;;  %v10036_v6 = vpop.permute.xlu2 %1756  ;;  %v1608_v45 = vadd.f32 %v14182_v32, %v1375_v34  ;;  %v2302_v31 = vadd.f32 %v2249_v49, %v2084_v21  ;;  %v1611_v58 = vadd.f32 %v1557_v44, %v1378_v39  ;;  %v1609_v62 = vadd.f32 %v1555_v47, %v1376_v8  ;;  %v14191_v34 = vld [vmem:[#allocation125_spill] sm:$0xff]  ;;  %v14192_v39 = vld [vmem:[#allocation135_spill] sm:$0xff] }
 0x34a   : > { %14179 = vst [vmem:[#allocation46_spill] sm:$0xff] %v10034_v11  ;;  %v10047_v63 = vpop.permute.xlu1 %1277  ;;  %v14187_v11 = vld [vmem:[#allocation130_spill] sm:$0xff]  ;;  %v2489_v15 = vsel %vm2486_vm13, %v14183_v40, %v14188_v9  ;;  %v2541_v20 = vadd.f32 %v2488_v14, %v2301_v17  ;;  %v2540_v57 = vadd.f32 %v2487_v23, %v2300_v30  ;;  %v1796_v21 = vsel %vm1788_vm10, %v14191_v34, %v14190_v48  ;;  %v14198_v40 = vld [vmem:[#allocation139_spill] sm:$0xff]  ;;  %v14200_v23 = vld [vmem:[#allocation140_spill] sm:$0xff] }
 0x34b   : > { %14180 = vst [vmem:[#allocation56_spill] sm:$0xff] %v10036_v6  ;;  %v1558_v16 = vsel %vm561_vm7, %v14177_v36, %v14187_v11  ;;  %v1610_v6 = vadd.f32 %v1556_v18, %v1377_v52  ;;  %v1795_v49 = vsel %vm1788_vm10, %v14192_v39, %v14191_v34  ;;  %v14193_v36 = vld [vmem:[#allocation136_spill] sm:$0xff]  ;;  %v14195_v17 = vld [vmem:[#allocation138_spill] sm:$0xff]  ;;  %v1067_v14 = vsel %vm1053_vm8, %v14199_v29, %v14198_v40 }
 0x34c   : > { %14185 = vst [vmem:[#allocation54_spill] sm:$0xff] %v10047_v63  ;;  %v14189_v63 = vld [vmem:[#allocation128_spill] sm:$0xff]  ;;  %v1612_v52 = vadd.f32 %v1558_v16, %v1379_v37  ;;  %v10074_v44 = vadd.f32 %v14193_v36, %v2541_v20  ;;  %v1797_v32 = vsel %vm1788_vm10, %v14190_v48, %v14195_v17  ;;  %v10082_v47 = vadd.f32 %v14193_v36, %v2540_v57 }
 0x34d   : > { %v2490_v41 = vsel %vm2486_vm13, %v14188_v9, %v14189_v63  ;;  %v2542_v9 = vadd.f32 %v2489_v15, %v2302_v31  ;;  %v10085_v37 = vadd.f32 %v14193_v36, %v2539_v26  ;;  %v1849_v18 = vadd.f32 %v1795_v49, %v1609_v62  ;;  %v14202_v31 = vld [vmem:[#allocation141_spill] sm:$0xff]  ;;  %v14205_v15 = vld [vmem:[#allocation142_spill] sm:$0xff]  ;;  %v14206_v57 = vld [vmem:[#allocation144_spill] sm:$0xff] }
 0x34e   : > { %v2543_v8 = vadd.f32 %v2490_v41, %v2303_v33  ;;  %14194 = vst [vmem:[#allocation49_spill] sm:$0xff] %v10074_v44  ;;  %v1066_v26 = vsel %vm1053_vm8, %v14202_v31, %v14199_v29  ;;  %v1851_v62 = vadd.f32 %v1797_v32, %v1611_v58  ;;  %v1798_v20 = vsel %vm1788_vm10, %v14195_v17, %v14205_v15  ;;  %v14210_v29 = vld [vmem:[#allocation137_spill] sm:$0xff]  ;;  %v14212_v58 = vld [vmem:[#allocation150_spill] sm:$0xff] }
 0x34f   : > { %2026 = vrot.lane.b32.xlu0 %v9850_v5, %s8113_s15  ;;  %2024 = vrot.lane.b32.xlu2 %v9854_v42, %s8113_s15  ;;  %14196 = vst [vmem:[#allocation57_spill] sm:$0xff] %v10082_v47  ;;  %v1850_v5 = vadd.f32 %v1796_v21, %v1610_v6  ;;  %v1848_v42 = vadd.f32 %v14192_v39, %v1608_v45  ;;  %v14207_v21 = vld [vmem:[#allocation153_spill] sm:$0xff]  ;;  %v14208_v39 = vld [vmem:[#allocation148_spill] sm:$0xff]  ;;  %s8118_s15 = smov 113  }
 0x350   : > { %1786 = vrot.lane.b32.xlu1 %v9876_v7, %s8112_s24  ;;  %14197 = vst [vmem:[#allocation59_spill] sm:$0xff] %v10085_v37  ;;  %v14201_v7 = vld [vmem:[#allocation134_spill] sm:$0xff]  ;;  %v10104_v45 = vadd.f32 %v14193_v36, %v2543_v8  ;;  %v10107_v16 = vadd.f32 %v14193_v36, %v2542_v9  ;;  %v1068_v41 = vsel %vm1053_vm8, %v14198_v40, %v14206_v57  ;;  %v14209_v40 = vld [vmem:[#allocation145_spill] sm:$0xff] }
 0x351   : > { %v10091_v30 = vpop.permute.xlu0 %2234  ;;  %v10093_v28 = vpop.permute.xlu2 %2472  ;;  %v1070_v33 = vsel %vm1053_vm8, %v14201_v7, %v14200_v23  ;;  %v1121_v34 = vadd.f32 %v1067_v14, %v9799_v2  ;;  %v1326_v49 = vsel %vm13870_vm9, %v14208_v39, %v14207_v21  ;;  %v1120_v17 = vadd.f32 %v1066_v26, %v9770_v56  ;;  %v14211_v39 = vld [vmem:[#allocation147_spill] sm:$0xff]  ;;  %v14213_v56 = vld [vmem:[#allocation146_spill] sm:$0xff] }
 0x352   : > { %v10101_v6 = vpop.permute.xlu1 %2202  ;;  %14203 = vst [vmem:[#allocation55_spill] sm:$0xff] %v10104_v45  ;;  %v1124_v9 = vadd.f32 %v1070_v33, %v9810_v10  ;;  %v1069_v32 = vsel %vm1053_vm8, %v14206_v57, %v14201_v7  ;;  %v2036_v2 = vsel %vm2028_vm11, %v14210_v29, %v14209_v40  ;;  %v1852_v14 = vadd.f32 %v1798_v20, %v1612_v52  ;;  %v14214_v7 = vld [vmem:[#allocation151_spill] sm:$0xff] }
 0x353   : > { %14204 = vst [vmem:[#allocation62_spill] sm:$0xff] %v10107_v16  ;;  %v1122_v31 = vadd.f32 %v1068_v41, %v9801_v46  ;;  %v2035_v8 = vsel %vm2028_vm11, %v14211_v39, %v14210_v29  ;;  %v2037_v10 = vsel %vm2028_vm11, %v14209_v40, %v14212_v58  ;;  %v2038_v33 = vsel %vm2028_vm11, %v14212_v58, %v14213_v56  ;;  %v14215_v26 = vld [vmem:[#allocation143_spill] sm:$0xff]  ;;  %v14217_v40 = vld [vmem:[#allocation158_spill] sm:$0xff]  ;;  %v14218_v29 = vld [vmem:[#allocation149_spill] sm:$0xff] }
 0x354   : > { %v1328_v57 = vsel %vm13870_vm9, %v14215_v26, %v14214_v7  ;;  %v1382_v48 = vadd.f32 %v1326_v49, %v1120_v17  ;;  %v1123_v52 = vadd.f32 %v1069_v32, %v9808_v43  ;;  %v2090_v20 = vadd.f32 %v2036_v2, %v1850_v5  ;;  %v14228_v56 = vld [vmem:[#allocation168_spill] sm:$0xff] }
 0x355   : > { %v2088_v41 = vadd.f32 %v14211_v39, %v1848_v42  ;;  %v1327_v58 = vsel %vm13870_vm9, %v14207_v21, %v14215_v26  ;;  %v2089_v49 = vadd.f32 %v2035_v8, %v1849_v18  ;;  %v2091_v17 = vadd.f32 %v2037_v10, %v1851_v62  ;;  %v14220_v21 = vld [vmem:[#allocation159_spill] sm:$0xff]  ;;  %v14223_v26 = vld [vmem:[#allocation152_spill] sm:$0xff] }
 0x356   : > { %v2255_v43 = vsel %vm2246_vm12, %v14218_v29, %v14217_v40  ;;  %v2092_v32 = vadd.f32 %v2038_v33, %v1852_v14  ;;  %v1384_v2 = vadd.f32 %v1328_v57, %v1122_v31  ;;  %v14221_v39 = vld [vmem:[#allocation155_spill] sm:$0xff]  ;;  %v2254_v18 = vsel %vm2246_vm12, %v14220_v21, %v14218_v29  ;;  %v14224_v57 = vld [vmem:[#allocation162_spill] sm:$0xff] }
 0x357   : > { %2482 = vrot.lane.b32.xlu0 %v9886_v59, %s8115_s8  ;;  %2244 = vrot.lane.b32.xlu2 %v9892_v12, %s8114_s16  ;;  %v14216_v59 = vld [vmem:[#allocation156_spill] sm:$0xff]  ;;  %v1383_v8 = vadd.f32 %v1327_v58, %v1121_v34  ;;  %v2306_v10 = vadd.f32 %v14221_v39, %v2088_v41  ;;  %v1615_v14 = vadd.f32 %v14223_v26, %v1382_v48  ;;  %v14226_v58 = vld [vmem:[#allocation166_spill] sm:$0xff]  ;;  %v14227_v41 = vld [vmem:[#allocation157_spill] sm:$0xff] }
 0x358   : > { %2242 = vrot.lane.b32.xlu1 %v9896_v53, %s8114_s16  ;;  %v1329_v12 = vsel %vm13870_vm9, %v14214_v7, %v14216_v59  ;;  %v2253_v53 = vsel %vm2246_vm12, %v14221_v39, %v14220_v21  ;;  %v14222_v7 = vld [vmem:[#allocation161_spill] sm:$0xff]  ;;  %v2309_v33 = vadd.f32 %v2255_v43, %v2091_v17  ;;  %v1330_v23 = vsel %vm13870_vm9, %v14216_v59, %v14224_v57 }
 0x359   : > { %v10161_v5 = vpop.permute.xlu0 %2440  ;;  %v10163_v42 = vpop.permute.xlu2 %2478  ;;  %v1561_v46 = vsel %vm561_vm7, %v14223_v26, %v14222_v7  ;;  %v1385_v31 = vadd.f32 %v1329_v12, %v1123_v52  ;;  %v2307_v21 = vadd.f32 %v2253_v53, %v2089_v49  ;;  %v2308_v34 = vadd.f32 %v2254_v18, %v2090_v20  ;;  %v14229_v52 = vld [vmem:[#allocation160_spill] sm:$0xff]  ;;  %v14230_v59 = vld [vmem:[#allocation165_spill] sm:$0xff]  ;;  %v14232_v49 = vld [vmem:[#allocation171_spill] sm:$0xff] }
 0x35a   : > { %14219 = vst [vmem:[#allocation63_spill] sm:$0xff] %v10163_v42  ;;  %v10171_v62 = vpop.permute.xlu1 %2236  ;;  %v14225_v42 = vld [vmem:[#allocation163_spill] sm:$0xff]  ;;  %v2494_v39 = vsel %vm2486_vm13, %v14227_v41, %v14226_v58  ;;  %v2493_v48 = vsel %vm2486_vm13, %v14228_v56, %v14227_v41  ;;  %v1059_v17 = vsel %vm1053_vm8, %v14135_v3, %v14229_v52  ;;  %v1616_v12 = vadd.f32 %v1561_v46, %v1383_v8  ;;  %v14233_v26 = vld [vmem:[#allocation154_spill] sm:$0xff]  ;;  %v14239_v46 = vld [vmem:[#allocation164_spill] sm:$0xff] }
 0x35b   : > { %v2256_v29 = vsel %vm2246_vm12, %v14217_v40, %v14225_v42  ;;  %v1562_v43 = vsel %vm561_vm7, %v14222_v7, %v14230_v59  ;;  %v14231_v40 = vld [vmem:[#allocation167_spill] sm:$0xff]  ;;  %v1386_v53 = vadd.f32 %v1330_v23, %v1124_v9  ;;  %v1563_v57 = vsel %vm561_vm7, %v14230_v59, %v14233_v26 }
 0x35c   : > { %v2496_v20 = vsel %vm2486_vm13, %v14232_v49, %v14231_v40  ;;  %v2310_v18 = vadd.f32 %v2256_v29, %v2092_v32  ;;  %v14234_v41 = vmax.f32 %v10074_v44, 0.0  ;;  %v14235_v3 = vmax.f32 %v10082_v47, 0.0  ;;  %v14237_v29 = vld [vmem:[#allocation169_spill] sm:$0xff] }
 0x35d   : > { %v2548_v8 = vadd.f32 %v2494_v39, %v2308_v34  ;;  %v2546_v7 = vadd.f32 %v14228_v56, %v2306_v10  ;;  %v2547_v40 = vadd.f32 %v2493_v48, %v2307_v21  ;;  %v2495_v23 = vsel %vm2486_vm13, %v14226_v58, %v14232_v49  ;;  %v14240_v21 = vld [vmem:[#allocation174_spill] sm:$0xff] }
 0x35e   : > { %v14236_v9 = vmax.f32 %v10085_v37, 0.0  ;;  %v1617_v32 = vadd.f32 %v1562_v43, %v1384_v2  ;;  %v1564_v59 = vsel %vm561_vm7, %v14233_v26, %v14237_v29  ;;  %v1801_v58 = vsel %vm1788_vm10, %v14240_v21, %v14239_v46  ;;  %v14241_v2 = vld [vmem:[#allocation75_spill] sm:$0xff]  ;;  %v14243_v26 = vld [vmem:[#allocation176_spill] sm:$0xff] }
 0x35f   : > { %2683 = vrot.lane.b32.xlu0 %v14234_v41, %s8109_s30  ;;  %2681 = vrot.lane.b32.xlu2 %v14235_v3, %s8109_s30  ;;  %v2550_v41 = vadd.f32 %v2496_v20, %v2310_v18  ;;  %v14238_v3 = vld [vmem:[#allocation172_spill] sm:$0xff]  ;;  %v10232_v48 = vadd.f32 %v14241_v2, %v2548_v8  ;;  %v10235_v43 = vadd.f32 %v14241_v2, %v2547_v40  ;;  %v14244_v29 = vld [vmem:[#allocation175_spill] sm:$0xff] }
 0x360   : > { %2679 = vrot.lane.b32.xlu1 %v14236_v9, %s8109_s30  ;;  %v1802_v34 = vsel %vm1788_vm10, %v14239_v46, %v14238_v3  ;;  %v10238_v49 = vadd.f32 %v14241_v2, %v2546_v7  ;;  %v2549_v20 = vadd.f32 %v2495_v23, %v2309_v33  ;;  %v1855_v18 = vadd.f32 %v14240_v21, %v1615_v14 }
 0x361   : > { %v10222_v56 = vpop.permute.xlu0 %2240  ;;  %v10224_v10 = vpop.permute.xlu2 %1996  ;;  %14242 = vst [vmem:[#allocation65_spill] sm:$0xff] %v10232_v48  ;;  %v1803_v9 = vsel %vm1788_vm10, %v14238_v3, %v14243_v26  ;;  %v10245_v46 = vadd.f32 %v14241_v2, %v2550_v41  ;;  %v1111_v44 = vadd.f32 %v1059_v17, %v9738_v4  ;;  %v1112_v8 = vadd.f32 %v14229_v52, %v9741_v24  ;;  %v14245_v4 = vld [vmem:[#allocation71_spill] sm:$0xff]  ;;  %v14246_v17 = vld [vmem:[#allocation170_spill] sm:$0xff]  ;;  %v14248_v52 = vld [vmem:[#allocation181_spill] sm:$0xff] }
 0x362   : > { %v10229_v39 = vpop.permute.xlu1 %1519  ;;  %v1618_v40 = vadd.f32 %v1563_v57, %v1385_v31  ;;  %v1619_v47 = vadd.f32 %v1564_v59, %v1386_v53  ;;  %v1857_v37 = vadd.f32 %v1802_v34, %v1617_v32  ;;  %v1856_v7 = vadd.f32 %v1801_v58, %v1616_v12  ;;  %v14247_v31 = vld [vmem:[#allocation177_spill] sm:$0xff]  ;;  %v14250_v59 = vld [vmem:[#allocation68_spill] sm:$0xff]  ;;  %v14251_v58 = vld [vmem:[#allocation179_spill] sm:$0xff] }
 0x363   : > { %v2095_v33 = vadd.f32 %v14244_v29, %v1855_v18  ;;  %v10252_v14 = vadd.f32 %v14241_v2, %v2549_v20  ;;  %v1073_v24 = vsel %vm1053_vm8, %v14246_v17, %v14245_v4  ;;  %v1072_v57 = vsel %vm1053_vm8, %v14247_v31, %v14246_v17  ;;  %v14252_v18 = vld [vmem:[#allocation173_spill] sm:$0xff]  ;;  %v14256_v31 = vld [vmem:[#allocation182_spill] sm:$0xff]  ;;  %v14258_v32 = vld [vmem:[#allocation183_spill] sm:$0xff] }
 0x364   : > { %v1858_v23 = vadd.f32 %v1803_v9, %v1618_v40  ;;  %v1804_v12 = vsel %vm1788_vm10, %v14243_v26, %v14248_v52  ;;  %v14249_v53 = vmax.f32 %v10104_v45, 0.0  ;;  %v1317_v34 = vsel %vm13870_vm9, %v14141_v55, %v14250_v59  ;;  %v14253_v9 = vld [vmem:[#allocation72_spill] sm:$0xff]  ;;  %v14255_v17 = vld [vmem:[#allocation69_spill] sm:$0xff] }
 0x365   : > { %v1074_v20 = vsel %vm1053_vm8, %v14245_v4, %v14251_v58  ;;  %v1075_v26 = vsel %vm1053_vm8, %v14251_v58, %v14252_v18  ;;  %v2041_v40 = vsel %vm2028_vm11, %v14244_v29, %v14253_v9  ;;  %v1076_v55 = vsel %vm1053_vm8, %v14252_v18, %v14255_v17  ;;  %v14260_v45 = vld [vmem:[#allocation64_spill] sm:$0xff] }
 0x366   : > { %v2042_v58 = vsel %vm2028_vm11, %v14253_v9, %v14258_v32  ;;  %v1127_v18 = vadd.f32 %v1072_v57, %v9812_v0  ;;  %v1859_v3 = vadd.f32 %v1804_v12, %v1619_v47  ;;  %v1373_v9 = vadd.f32 %v1317_v34, %v1111_v44  ;;  %v14262_v0 = vld [vmem:[#allocation185_spill] sm:$0xff]  ;;  %v14265_v44 = vld [vmem:[#allocation70_spill] sm:$0xff] }
 0x367   : > { %2687 = vrot.lane.b32.xlu0 %v14249_v53, %s8109_s30  ;;  %2484 = vrot.lane.b32.xlu2 %v9900_v50, %s8115_s8  ;;  %v14254_v50 = vmax.f32 %v10107_v16, 0.0  ;;  %v14257_v53 = vld [vmem:[#allocation61_spill] sm:$0xff]  ;;  %v14261_v16 = vld [vmem:[#allocation178_spill] sm:$0xff]  ;;  %v1129_v52 = vadd.f32 %v1074_v20, %v9817_v61  ;;  %v1131_v2 = vadd.f32 %v1076_v55, %v9829_v60  ;;  %v2097_v42 = vadd.f32 %v2042_v58, %v1857_v37  ;;  %v14266_v61 = vld [vmem:[#allocation187_spill] sm:$0xff] }
 0x368   : > { %v2044_v4 = vsel %vm2028_vm11, %v14257_v53, %v14256_v31  ;;  %v2043_v29 = vsel %vm2028_vm11, %v14258_v32, %v14257_v53  ;;  %v1333_v17 = vsel %vm13870_vm9, %v14261_v16, %v14260_v45  ;;  %v1130_v32 = vadd.f32 %v1075_v26, %v9819_v1  ;;  %v14263_v57 = vld [vmem:[#allocation77_spill] sm:$0xff]  ;;  %v14264_v16 = vld [vmem:[#allocation180_spill] sm:$0xff] }
 0x369   : > { %2685 = vrot.lane.b32.xlu1 %v14254_v50, %s8109_s30  ;;  %v10299_v21 = vpop.permute.xlu0 %2474  ;;  %v10301_v41 = vpop.permute.xlu2 %1291  ;;  %v1128_v50 = vadd.f32 %v1073_v24, %v9815_v25  ;;  %v2096_v53 = vadd.f32 %v2041_v40, %v1856_v7  ;;  %v2098_v25 = vadd.f32 %v2043_v29, %v1858_v23  ;;  %v1389_v24 = vadd.f32 %v1333_v17, %v1127_v18  ;;  %v14267_v37 = vld [vmem:[#allocation188_spill] sm:$0xff]  ;;  %v14268_v23 = vld [vmem:[#allocation186_spill] sm:$0xff]  ;;  %v14271_v26 = vld [vmem:[#allocation189_spill] sm:$0xff] }
 0x36a   : > { %14259 = vst [vmem:[#allocation58_spill] sm:$0xff] %v10301_v41  ;;  %v10308_v31 = vpop.permute.xlu1 %2442  ;;  %v2099_v41 = vadd.f32 %v2044_v4, %v1859_v3  ;;  %v1318_v47 = vsel %vm13870_vm9, %v14250_v59, %v14262_v0  ;;  %v1336_v12 = vsel %vm13870_vm9, %v14264_v16, %v14263_v57  ;;  %v2313_v34 = vadd.f32 %v14265_v44, %v2095_v33  ;;  %v14269_v59 = vld [vmem:[#allocation190_spill] sm:$0xff]  ;;  %v14270_v20 = vld [vmem:[#allocation184_spill] sm:$0xff]  ;;  %v14272_v40 = vld [vmem:[#allocation197_spill] sm:$0xff] }
 0x36b   : > { %v1334_v1 = vsel %vm13870_vm9, %v14260_v45, %v14266_v61  ;;  %v1335_v60 = vsel %vm13870_vm9, %v14266_v61, %v14264_v16  ;;  %v1553_v7 = vsel %vm561_vm7, %v14147_v51, %v14267_v37  ;;  %v1554_v3 = vsel %vm561_vm7, %v14267_v37, %v14268_v23  ;;  %v14275_v18 = vld [vmem:[#allocation191_spill] sm:$0xff]  ;;  %v14277_v23 = vld [vmem:[#allocation193_spill] sm:$0xff]  ;;  %v14280_v4 = vld [vmem:[#allocation36_spill] sm:$0xff] }
 0x36c   : > { %v2261_v33 = vsel %vm2246_vm12, %v14270_v20, %v14269_v59  ;;  %v2262_v45 = vsel %vm2246_vm12, %v14269_v59, %v14271_v26  ;;  %v2553_v17 = vadd.f32 %v14272_v40, %v2313_v34  ;;  %v14273_v55 = vmax.f32 %v10232_v48, 0.0  ;;  %v14281_v48 = vld [vmem:[#allocation78_spill] sm:$0xff] }
 0x36d   : > { %v14274_v51 = vmax.f32 %v10235_v43, 0.0  ;;  %v1374_v58 = vadd.f32 %v1318_v47, %v1112_v8  ;;  %v1392_v29 = vadd.f32 %v1336_v12, %v1130_v32  ;;  %v2259_v0 = vsel %vm2246_vm12, %v14265_v44, %v14275_v18 }
 0x36e   : > { %v2260_v16 = vsel %vm2246_vm12, %v14275_v18, %v14270_v20  ;;  %v14276_v34 = vmax.f32 %v10238_v49, 0.0  ;;  %v10355_v61 = vadd.f32 %v1334_v1, %v1128_v50  ;;  %v1391_v37 = vadd.f32 %v1335_v60, %v1129_v52  ;;  %v14278_v52 = vld [vmem:[#allocation192_spill] sm:$0xff]  ;;  %v14279_v18 = vld [vmem:[#allocation199_spill] sm:$0xff] }
 0x36f   : > { %2697 = vrot.lane.b32.xlu0 %v14273_v55, %s8109_s30  ;;  %2695 = vrot.lane.b32.xlu2 %v14274_v51, %s8109_s30  ;;  %v1337_v8 = vsel %vm13870_vm9, %v14263_v57, %v14277_v23  ;;  %v10365_v12 = vadd.f32 %v9831_v27, %v2553_v17  ;;  %v1606_v44 = vadd.f32 %v1553_v7, %v1373_v9  ;;  %v14282_v9 = vld [vmem:[#allocation201_spill] sm:$0xff]  ;;  %v14285_v7 = vld [vmem:[#allocation83_spill] sm:$0xff] }
 0x370   : > { %v1607_v59 = vadd.f32 %v1554_v3, %v1374_v58  ;;  %v2316_v20 = vadd.f32 %v2261_v33, %v2098_v25  ;;  %v2317_v55 = vadd.f32 %v2262_v45, %v2099_v41  ;;  %v2314_v50 = vadd.f32 %v2259_v0, %v2096_v53  ;;  %v14283_v41 = vld [vmem:[#allocation202_spill] sm:$0xff]  ;;  %v14288_v0 = vld [vmem:[#allocation200_spill] sm:$0xff] }
 0x371   : > { %2693 = vrot.lane.b32.xlu1 %v14276_v34, %s8109_s30  ;;  %v10360_v32 = vpop.permute.xlu0 %1037  ;;  %v10362_v47 = vpop.permute.xlu2 %1293  ;;  %v2315_v1 = vadd.f32 %v2260_v16, %v2097_v42  ;;  %v1622_v60 = vadd.f32 %v14278_v52, %v1389_v24  ;;  %v1793_v57 = vsel %vm1788_vm10, %v14161_v13, %v14279_v18  ;;  %v1393_v34 = vadd.f32 %v1337_v8, %v1131_v2  ;;  %v14284_v42 = vld [vmem:[#allocation195_spill] sm:$0xff]  ;;  %v14286_v3 = vld [vmem:[#allocation194_spill] sm:$0xff] }
 0x372   : > { %v10367_v51 = vpop.permute.xlu1 %2476  ;;  %v2501_v17 = vsel %vm2486_vm13, %v14281_v48, %v14280_v4  ;;  %v2500_v25 = vsel %vm2486_vm13, %v14282_v9, %v14281_v48  ;;  %v1794_v53 = vsel %vm1788_vm10, %v14279_v18, %v14283_v41  ;;  %v1569_v24 = vsel %vm561_vm7, %v14285_v7, %v14284_v42  ;;  %v14287_v48 = vld [vmem:[#allocation196_spill] sm:$0xff] }
 0x373   : > { %v1570_v13 = vsel %vm561_vm7, %v14284_v42, %v14286_v3  ;;  %v2499_v2 = vsel %vm2486_vm13, %v14272_v40, %v14282_v9  ;;  %v13865_v33 = vmax.f32 %v10365_v12, 0.0  ;;  %v1568_v45 = vsel %vm561_vm7, %v14287_v48, %v14285_v7 }
 0x374   : > { %v1846_v58 = vadd.f32 %v1793_v57, %v1606_v44  ;;  %v2033_v16 = vsel %vm2028_vm11, %v14170_v19, %v14288_v0  ;;  %v2034_v8 = vsel %vm2028_vm11, %v14288_v0, %v9932_v35  ;;  %v2556_v18 = vadd.f32 %v2501_v17, %v2316_v20  ;;  %v14290_v57 = vld [vmem:[#allocation204_spill] sm:$0xff] }
 0x375   : > { %v2555_v41 = vadd.f32 %v2500_v25, %v2315_v1  ;;  %v1847_v42 = vadd.f32 %v1794_v53, %v1607_v59  ;;  %v14289_v40 = vmax.f32 %v10245_v46, 0.0  ;;  %v2554_v44 = vadd.f32 %v2499_v2, %v2314_v50 }
 0x376   : > { %v1065_v19 = vsel %vm1053_vm8, %v14159_v54, %v14290_v57  ;;  %v2251_v35 = vsel %vm2246_vm12, %v14175_v22, %v9975_v38  ;;  %v2252_v59 = vsel %vm2246_vm12, %v9975_v38, %v10101_v6  ;;  %v14291_v20 = vmax.f32 %v10252_v14, 0.0 }
 0x377   : > { %2701 = vrot.lane.b32.xlu2 %v14289_v40, %s8109_s30  ;;  %2707 = vrot.lane.b32.xlu0 %v13865_v33, %s8109_s30  ;;  %v2086_v1 = vadd.f32 %v2033_v16, %v1846_v58  ;;  %v2087_v17 = vadd.f32 %v2034_v8, %v1847_v42  ;;  %v10424_v54 = vadd.f32 %v9831_v27, %v2555_v41  ;;  %v14292_v58 = vld [vmem:[#allocation47_spill] sm:$0xff] }
 0x378   : > { %v10427_v25 = vadd.f32 %v9831_v27, %v2556_v18  ;;  %v1625_v22 = vadd.f32 %v1569_v24, %v1392_v29  ;;  %v2491_v38 = vsel %vm2486_vm13, %v14189_v63, %v10161_v5  ;;  %v2492_v6 = vsel %vm2486_vm13, %v10161_v5, %v10308_v31  ;;  %v14293_v63 = vld [vmem:[#allocation34_spill] sm:$0xff]  ;;  %v14295_v5 = vld [vmem:[#allocation40_spill] sm:$0xff] }
 0x379   : > { %2699 = vrot.lane.b32.xlu1 %v14291_v20, %s8109_s30  ;;  %v10419_v9 = vpop.permute.xlu0 %2480  ;;  %v10421_v50 = vpop.permute.xlu2 %2454  ;;  %v10438_v7 = vadd.f32 %v9831_v27, %v2554_v44  ;;  %v1626_v2 = vadd.f32 %v1570_v13, %v1393_v34  ;;  %v1118_v0 = vadd.f32 %v1065_v19, %v14292_v58  ;;  %v2304_v16 = vadd.f32 %v2251_v35, %v2086_v1  ;;  %v14294_v18 = vld [vmem:[#allocation198_spill] sm:$0xff]  ;;  %v14296_v44 = vld [vmem:[#allocation203_spill] sm:$0xff]  ;;  %v14297_v19 = vld [vmem:[#allocation113_spill] sm:$0xff] }
 0x37a   : > { %v10435_v53 = vpop.permute.xlu1 %1758  ;;  %v2305_v8 = vadd.f32 %v2252_v59, %v2087_v17  ;;  %v1567_v29 = vsel %vm561_vm7, %v14278_v52, %v14287_v48  ;;  %v1624_v24 = vadd.f32 %v1568_v45, %v1391_v37  ;;  %v1808_v41 = vsel %vm1788_vm10, %v14294_v18, %v14293_v63  ;;  %v14298_v37 = vld [vmem:[#allocation42_spill] sm:$0xff]  ;;  %v14299_v17 = vld [vmem:[#allocation43_spill] sm:$0xff] }
 0x37b   : > { %v2502_v31 = vsel %vm2486_vm13, %v14280_v4, %v14295_v5  ;;  %v2544_v42 = vadd.f32 %v2491_v38, %v2304_v16  ;;  %v13863_v34 = vmax.f32 %v10424_v54, 0.0  ;;  %v13848_v13 = vmax.f32 %v10427_v25, 0.0 }
 0x37c   : > { %v2545_v40 = vadd.f32 %v2492_v6, %v2305_v8  ;;  %v1324_v35 = vsel %vm13870_vm9, %v14297_v19, %v14296_v44  ;;  %v1807_v52 = vsel %vm1788_vm10, %v14298_v37, %v14294_v18  ;;  %v1862_v48 = vadd.f32 %v14298_v37, %v1622_v60  ;;  %v14300_v60 = vld [vmem:[#allocation50_spill] sm:$0xff]  ;;  %v14301_v6 = vld [vmem:[#allocation37_spill] sm:$0xff] }
 0x37d   : > { %v13864_v45 = vmax.f32 %v10438_v7, 0.0  ;;  %v1623_v4 = vadd.f32 %v1567_v29, %v10355_v61  ;;  %v1864_v59 = vadd.f32 %v1808_v41, %v1624_v24  ;;  %v1380_v20 = vadd.f32 %v1324_v35, %v1118_v0  ;;  %v14302_v61 = vld [vmem:[#allocation53_spill] sm:$0xff] }
 0x37e   : > { %v2557_v1 = vadd.f32 %v2502_v31, %v2317_v55  ;;  %v1809_v38 = vsel %vm1788_vm10, %v14293_v63, %v14299_v17  ;;  %v2047_v58 = vsel %vm2028_vm11, %v14301_v6, %v14300_v60  ;;  %v2048_v0 = vsel %vm2028_vm11, %v14300_v60, %v14302_v61  ;;  %v14303_v8 = vld [vmem:[#allocation41_spill] sm:$0xff]  ;;  %v14304_v31 = vld [vmem:[#allocation44_spill] sm:$0xff] }
 0x37f   : > { %2711 = vrot.lane.b32.xlu2 %v13863_v34, %s8109_s30  ;;  %2713 = vrot.lane.b32.xlu0 %v13848_v13, %s8109_s30  ;;  %v1863_v16 = vadd.f32 %v1807_v52, %v1623_v4  ;;  %v1559_v55 = vsel %vm561_vm7, %v14187_v11, %v14303_v8  ;;  %v10483_v29 = vadd.f32 %v14193_v36, %v2544_v42  ;;  %v14306_v60 = vld [vmem:[#allocation56_spill] sm:$0xff] }
 0x380   : > { %v10486_v24 = vadd.f32 %v14193_v36, %v2545_v40  ;;  %v2102_v41 = vadd.f32 %v14301_v6, %v1862_v48  ;;  %v2265_v19 = vsel %vm2246_vm12, %v14304_v31, %v10091_v30  ;;  %v2266_v35 = vsel %vm2246_vm12, %v10091_v30, %v10171_v62  ;;  %v14305_v40 = vld [vmem:[#allocation48_spill] sm:$0xff] }
 0x381   : > { %2709 = vrot.lane.b32.xlu1 %v13864_v45, %s8109_s30  ;;  %v1999_v63 = vpop.permute.xlu0 %1998  ;;  %v10488_v18 = vpop.permute.xlu2 %2456  ;;  %v10500_v42 = vadd.f32 %v9831_v27, %v2557_v1  ;;  %v1865_v36 = vadd.f32 %v1809_v38, %v1625_v22  ;;  %v1810_v37 = vsel %vm1788_vm10, %v14299_v17, %v14305_v40  ;;  %v2103_v52 = vadd.f32 %v2047_v58, %v1863_v16  ;;  %v14308_v58 = vld [vmem:[#allocation46_spill] sm:$0xff] }
 0x382   : > { %v10497_v11 = vpop.permute.xlu1 %2588  ;;  %v2104_v48 = vadd.f32 %v2048_v0, %v1864_v59  ;;  %v1613_v4 = vadd.f32 %v1559_v55, %v1380_v20  ;;  %v1799_v6 = vsel %vm1788_vm10, %v14205_v15, %v14306_v60  ;;  %v2505_v30 = vsel %vm2486_vm13, %v10093_v28, %v10299_v21  ;;  %v14307_v20 = vld [vmem:[#allocation45_spill] sm:$0xff] }
 0x383   : > { %v2506_v1 = vsel %vm2486_vm13, %v10299_v21, %v10367_v51  ;;  %v2321_v22 = vadd.f32 %v2265_v19, %v2103_v52  ;;  %v13855_v38 = vmax.f32 %v10483_v29, 0.0  ;;  %v13854_v17 = vmax.f32 %v10486_v24, 0.0  ;;  %v14309_v21 = vld [vmem:[#allocation146_spill] sm:$0xff] }
 0x384   : > { %v2322_v13 = vadd.f32 %v2266_v35, %v2104_v48  ;;  %v2320_v59 = vadd.f32 %v14304_v31, %v2102_v41  ;;  %v2049_v15 = vsel %vm2028_vm11, %v14302_v61, %v14307_v20  ;;  %v2050_v0 = vsel %vm2028_vm11, %v14307_v20, %v14308_v58  ;;  %v14310_v31 = vld [vmem:[#allocation54_spill] sm:$0xff] }
 0x385   : > { %v13849_v16 = vmax.f32 %v10500_v42, 0.0  ;;  %v2039_v55 = vsel %vm2028_vm11, %v14309_v21, %v10224_v10  ;;  %v2561_v19 = vadd.f32 %v2505_v30, %v2321_v22  ;;  %v1866_v61 = vadd.f32 %v1810_v37, %v1626_v2 }
 0x386   : > { %v2562_v35 = vadd.f32 %v2506_v1, %v2322_v13  ;;  %v1853_v41 = vadd.f32 %v1799_v6, %v1613_v4  ;;  %v1325_v52 = vsel %vm13870_vm9, %v14296_v44, %v14310_v31  ;;  %v2560_v48 = vadd.f32 %v10093_v28, %v2320_v59  ;;  %v14311_v13 = vld [vmem:[#allocation39_spill] sm:$0xff] }
 0x387   : > { %2689 = vrot.lane.b32.xlu2 %v13855_v38, %s8109_s30  ;;  %2691 = vrot.lane.b32.xlu0 %v13854_v17, %s8109_s30  ;;  %v1119_v30 = vadd.f32 %v14290_v57, %v14311_v13  ;;  %v14312_v1 = vld [vmem:[#allocation51_spill] sm:$0xff]  ;;  %v10550_v37 = vadd.f32 %v10497_v11, %v2561_v19  ;;  %v2105_v44 = vadd.f32 %v2049_v15, %v1865_v36 }
 0x388   : > { %v2268_v22 = vsel %vm2246_vm12, %v14312_v1, %v10222_v56  ;;  %v10553_v28 = vadd.f32 %v10497_v11, %v2562_v35  ;;  %v2106_v4 = vadd.f32 %v2050_v0, %v1866_v61  ;;  %v2093_v6 = vadd.f32 %v2039_v55, %v1853_v41  ;;  %v14313_v13 = vld [vmem:[#allocation163_spill] sm:$0xff] }
 0x389   : > { %2715 = vrot.lane.b32.xlu1 %v13849_v16, %s8109_s30  ;;  %v10545_v20 = vpop.permute.xlu0 %1531  ;;  %v10547_v2 = vpop.permute.xlu2 %2010  ;;  %v10556_v57 = vadd.f32 %v10497_v11, %v2560_v48  ;;  %v1381_v21 = vadd.f32 %v1325_v52, %v1119_v30  ;;  %v2267_v31 = vsel %vm2246_vm12, %v10171_v62, %v14312_v1  ;;  %v1560_v19 = vsel %vm561_vm7, %v14303_v8, %v10229_v39  ;;  %v14314_v36 = vld [vmem:[#allocation63_spill] sm:$0xff] }
 0x38a   : > { %v2215_v59 = vpop.permute.xlu1 %2214  ;;  %v2324_v16 = vadd.f32 %v2268_v22, %v2106_v4  ;;  %v2507_v15 = vsel %vm2486_vm13, %v10367_v51, %v14314_v36  ;;  %v2508_v0 = vsel %vm2486_vm13, %v14314_v36, %v10419_v9  ;;  %v14315_v61 = vld [vmem:[#allocation167_spill] sm:$0xff]  ;;  %v1800_v39 = vsel %vm1788_vm10, %v14306_v60, %v10435_v53 }
 0x38b   : > { %v2257_v35 = vsel %vm2246_vm12, %v14313_v13, %v2215_v59  ;;  %v2497_v62 = vsel %vm2486_vm13, %v14315_v61, %v10421_v50  ;;  %v13856_v8 = vmax.f32 %v10550_v37, 0.0  ;;  %v13857_v41 = vmax.f32 %v10553_v28, 0.0 }
 0x38c   : > { %v2311_v55 = vadd.f32 %v2257_v35, %v2093_v6  ;;  %v2323_v52 = vadd.f32 %v2267_v31, %v2105_v44  ;;  %v1614_v48 = vadd.f32 %v1560_v19, %v1381_v21  ;;  %v13862_v30 = vmax.f32 %v10556_v57, 0.0 }
 0x38d   : > { %v2564_v1 = vadd.f32 %v2508_v0, %v2324_v16  ;;  %v2040_v22 = vsel %vm2028_vm11, %v10224_v10, %v1999_v63  ;;  %v14316_v10 = vld [vmem:[#allocation75_spill] sm:$0xff]  ;;  %v2498_v35 = vsel %vm2486_vm13, %v10421_v50, %v10488_v18 }
 0x38e   : > { %v2551_v51 = vadd.f32 %v2497_v62, %v2311_v55  ;;  %v2563_v53 = vadd.f32 %v2507_v15, %v2323_v52  ;;  %v1854_v60 = vadd.f32 %v1800_v39, %v1614_v48  ;;  %v14317_v62 = vld [vmem:[#allocation60_spill] sm:$0xff]  ;;  %v14319_v48 = vld [vmem:[#allocation35_spill] sm:$0xff] }
 0x38f   : > { %2723 = vrot.lane.b32.xlu2 %v13856_v8, %s8109_s30  ;;  %2725 = vrot.lane.b32.xlu0 %v13857_v41, %s8109_s30  ;;  %v10593_v16 = vadd.f32 %v10497_v11, %v2564_v1  ;;  %v14318_v39 = vld [vmem:[#allocation52_spill] sm:$0xff] }
 0x390   : > { %v10596_v63 = vadd.f32 %v14316_v10, %v2551_v51  ;;  %v2094_v6 = vadd.f32 %v2040_v22, %v1854_v60  ;;  %v10599_v31 = vadd.f32 %v10497_v11, %v2563_v53  ;;  %v830_v52 = vsel %vm13869_vm3, %v14318_v39, %v14317_v62  ;;  %v14320_v51 = vld [vmem:[#allocation205_spill] sm:$0xff]  ;;  %v14321_v22 = vld [vmem:[#allocation140_spill] sm:$0xff] }
 0x391   : > { %2721 = vrot.lane.b32.xlu1 %v13862_v30, %s8109_s30  ;;  %v1534_v44 = vpop.permute.xlu0 %1533  ;;  %v2229_v4 = vpop.permute.xlu2 %2228  ;;  %v13850_v36 = vmax.f32 %v10593_v16, 0.0  ;;  %v623_v1 = vmul.f32 %v14320_v51, %v14319_v48  ;;  %v1071_v53 = vsel %vm1053_vm8, %v14321_v22, %v10360_v32 }
 0x392   : > { %v2217_v21 = vpop.permute.xlu1 %2216  ;;  %v13852_v15 = vmax.f32 %v10596_v63, 0.0  ;;  %v13851_v55 = vmax.f32 %v10599_v31, 0.0 }
 0x393   : > { %v2258_v19 = vsel %vm2246_vm12, %v2215_v59, %v2217_v21 }
 0x394   : > { %v2312_v13 = vadd.f32 %v2258_v19, %v2094_v6  ;;  %v884_v6 = vadd.f32 %v830_v52, %v623_v1  ;;  %v14326_v1 = vld [vmem:[#allocation206_spill] sm:$0xff] }
 0x396   : > { %v2552_v0 = vadd.f32 %v2498_v35, %v2312_v13  ;;  %v14322_v35 = vld [vmem:[#allocation58_spill] sm:$0xff] }
 0x397   : > { %2729 = vrot.lane.b32.xlu2 %v13850_v36, %s8109_s30  ;;  %2703 = vrot.lane.b32.xlu0 %v13852_v15, %s8109_s30  ;;  %v14324_v36 = vld [vmem:[#allocation169_spill] sm:$0xff] }
 0x398   : > { %v10620_v59 = vadd.f32 %v14316_v10, %v2552_v0  ;;  %v1125_v10 = vadd.f32 %v1071_v53, %v884_v6  ;;  %v14323_v0 = vld [vmem:[#allocation162_spill] sm:$0xff]  ;;  %v1565_v22 = vsel %vm561_vm7, %v14324_v36, %v10545_v20  ;;  %v14325_v15 = vld [vmem:[#allocation181_spill] sm:$0xff]  ;;  %v1332_v36 = vsel %vm13870_vm9, %v14322_v35, %v10362_v47 }
 0x399   : > { %2727 = vrot.lane.b32.xlu1 %v13851_v55, %s8109_s30  ;;  %v10617_v50 = vpop.permute.xlu0 %1051  ;;  %v2231_v18 = vpop.permute.xlu2 %2230  ;;  %v1331_v39 = vsel %vm13870_vm9, %v14323_v0, %v14322_v35 }
 0x39a   : > { %v1771_v61 = vpop.permute.xlu1 %1770  ;;  %v13853_v60 = vmax.f32 %v10620_v59, 0.0  ;;  %v1387_v55 = vadd.f32 %v1331_v39, %v1125_v10  ;;  %v14327_v10 = vld [vmem:[#allocation182_spill] sm:$0xff] }
 0x39b   : > { %v1805_v52 = vsel %vm1788_vm10, %v14325_v15, %v1771_v61  ;;  %v2045_v15 = vsel %vm2028_vm11, %v14327_v10, %v10547_v2 }
 0x39c   : > { %v1620_v53 = vadd.f32 %v1565_v22, %v1387_v55  ;;  %v1566_v55 = vsel %vm561_vm7, %v10545_v20, %v1534_v44 }
 0x39e   : > { %v1860_v17 = vadd.f32 %v1805_v52, %v1620_v53 }
 0x3a0   : > { %v2100_v39 = vadd.f32 %v2045_v15, %v1860_v17 }
 0x3a1   : > { %2705 = vrot.lane.b32.xlu1 %v13853_v60, %s8109_s30  ;;  %v1308_v21 = vpop.permute.xlu0 %1307  ;;  %v10634_v19 = vpop.permute.xlu2 %1784  ;;  %v624_v60 = vmul.f32 %v14326_v1, %v14319_v48 }
 0x3a2   : > { %v1773_v13 = vpop.permute.xlu1 %1772 }
 0x3a3   : > { %v885_v6 = vadd.f32 %v14317_v62, %v624_v60  ;;  %v2263_v62 = vsel %vm2246_vm12, %v14271_v26, %v2229_v4  ;;  %v1806_v60 = vsel %vm1788_vm10, %v1771_v61, %v1773_v13  ;;  %v2264_v61 = vsel %vm2246_vm12, %v2229_v4, %v2231_v18  ;;  %v14328_v13 = vld [vmem:[#allocation67_spill] sm:$0xff] }
 0x3a4   : > { %v2318_v52 = vadd.f32 %v2263_v62, %v2100_v39  ;;  %v14331_v62 = vld [vmem:[#allocation69_spill] sm:$0xff] }
 0x3a5   : > { %v1126_v0 = vadd.f32 %v10360_v32, %v885_v6  ;;  %v1077_v4 = vsel %vm1053_vm8, %v14331_v62, %v10617_v50  ;;  %vm5411_vm8 = vcmask 1043456  }
 0x3a7   : > { %v1388_v48 = vadd.f32 %v1332_v36, %v1126_v0  ;;  %v14329_v0 = vld [vmem:[#allocation66_spill] sm:$0xff] }
 0x3a8   : > { %v836_v36 = vsel %vm13869_vm3, %v14329_v0, %v14328_v13 }
 0x3a9   : > { %v1310_v38 = vpop.permute.xlu0 %1309  ;;  %v2025_v8 = vpop.permute.xlu2 %2024  ;;  %v1621_v22 = vadd.f32 %v1566_v55, %v1388_v48 }
 0x3aa   : > { %v2013_v41 = vpop.permute.xlu1 %2012 }
 0x3ab   : > { %v2046_v47 = vsel %vm2028_vm11, %v10547_v2, %v2013_v41  ;;  %v1861_v6 = vadd.f32 %v1806_v60, %v1621_v22  ;;  %v14330_v41 = vld [vmem:[#allocation33_spill] sm:$0xff] }
 0x3ac   : > { %v630_v39 = vmul.f32 %v14320_v51, %v14330_v41  ;;  %v631_v60 = vmul.f32 %v14326_v1, %v14330_v41 }
 0x3ad   : > { %v2101_v20 = vadd.f32 %v2046_v47, %v1861_v6 }
 0x3ae   : > { %v891_v22 = vadd.f32 %v836_v36, %v630_v39  ;;  %v892_v51 = vadd.f32 %v14328_v13, %v631_v60 }
 0x3af   : > { %v2319_v2 = vadd.f32 %v2264_v61, %v2101_v20 }
 0x3b0   : > { %v1133_v20 = vadd.f32 %v10617_v50, %v892_v51  ;;  %v1811_v50 = vsel %vm1788_vm10, %v14305_v40, %v10634_v19 }
 0x3b1   : > { %v2469_v32 = vpop.permute.xlu0 %2468  ;;  %v2245_v53 = vpop.permute.xlu2 %2244 }
 0x3b2   : > { %v2503_v35 = vsel %vm2486_vm13, %v14295_v5, %v2469_v32  ;;  %v1546_v17 = vpop.permute.xlu1 %1545 }
 0x3b3   : > { %v2558_v10 = vadd.f32 %v2503_v35, %v2318_v52  ;;  %v1338_v52 = vsel %vm13870_vm9, %v14277_v23, %v1308_v21  ;;  %v1132_v35 = vadd.f32 %v1077_v4, %v891_v22  ;;  %v1571_v6 = vsel %vm561_vm7, %v14286_v3, %v1546_v17 }
 0x3b5   : > { %v10664_v44 = vadd.f32 %v9831_v27, %v2558_v10  ;;  %v1394_v1 = vadd.f32 %v1338_v52, %v1132_v35 }
 0x3b7   : > { %v13861_v26 = vmax.f32 %v10664_v44, 0.0  ;;  %v1627_v13 = vadd.f32 %v1571_v6, %v1394_v1 }
 0x3b9   : > { %v2471_v15 = vpop.permute.xlu0 %2470  ;;  %2717 = vrot.lane.b32.xlu2 %v13861_v26, %s8109_s30  ;;  %v2682_v5 = vpop.permute.xlu2 %2681 }
 0x3ba   : > { %v2504_v55 = vsel %vm2486_vm13, %v2469_v32, %v2471_v15  ;;  %v1548_v48 = vpop.permute.xlu1 %1547  ;;  %v1339_v32 = vsel %vm13870_vm9, %v1308_v21, %v1310_v38  ;;  %v1867_v21 = vadd.f32 %v1811_v50, %v1627_v13 }
 0x3bb   : > { %v2559_v18 = vadd.f32 %v2504_v55, %v2319_v2  ;;  %v1572_v61 = vsel %vm561_vm7, %v1546_v17, %v1548_v48  ;;  %v2051_v17 = vsel %vm2028_vm11, %v14308_v58, %v2025_v8  ;;  %vm4142_vm7 = vcmask 121856  }
 0x3bc   : > { %v2107_v62 = vadd.f32 %v2051_v17, %v1867_v21 }
 0x3bd   : > { %v10685_v47 = vadd.f32 %v9831_v27, %v2559_v18  ;;  %v1395_v27 = vadd.f32 %v1339_v32, %v1133_v20 }
 0x3bf   : > { %14332 = vst [vmem:[#allocation79_spill] sm:$0xff] %v10685_v47  ;;  %v13860_v10 = vmax.f32 %v10685_v47, 0.0  ;;  %v1628_v3 = vadd.f32 %v1572_v61, %v1395_v27 }
 0x3c1   : > { %v2027_v0 = vpop.permute.xlu0 %2026  ;;  %v2485_v23 = vpop.permute.xlu2 %2484  ;;  %2719 = vrot.lane.b32.xlu0 %v13860_v10, %s8109_s30 }
 0x3c2   : > { %v1787_v36 = vpop.permute.xlu1 %1786  ;;  %v2052_v2 = vsel %vm2028_vm11, %v2025_v8, %v2027_v0 }
 0x3c3   : > { %v1812_v38 = vsel %vm1788_vm10, %v10634_v19, %v1787_v36 }
 0x3c4   : > { %v1868_v15 = vadd.f32 %v1812_v38, %v1628_v3 }
 0x3c6   : > { %v2108_v55 = vadd.f32 %v2052_v2, %v1868_v15 }
 0x3c9   : > { %v2483_v41 = vpop.permute.xlu0 %2482  ;;  %v2696_v39 = vpop.permute.xlu2 %2695 }
 0x3ca   : > { %v2243_v48 = vpop.permute.xlu1 %2242  ;;  %v2509_v40 = vsel %vm2486_vm13, %v10419_v9, %v2483_v41  ;;  %v2510_v19 = vsel %vm2486_vm13, %v2483_v41, %v2485_v23 }
 0x3cb   : > { %v2269_v4 = vsel %vm2246_vm12, %v10222_v56, %v2243_v48  ;;  %v2270_v18 = vsel %vm2246_vm12, %v2243_v48, %v2245_v53 }
 0x3cc   : > { %v2325_v60 = vadd.f32 %v2269_v4, %v2107_v62  ;;  %v2326_v22 = vadd.f32 %v2270_v18, %v2108_v55 }
 0x3ce   : > { %v2565_v58 = vadd.f32 %v2509_v40, %v2325_v60  ;;  %v2566_v52 = vadd.f32 %v2510_v19, %v2326_v22 }
 0x3d0   : > { %v10712_v8 = vadd.f32 %v10497_v11, %v2566_v52  ;;  %v10715_v51 = vadd.f32 %v10497_v11, %v2565_v58 }
 0x3d1   : > { %v2684_v35 = vpop.permute.xlu0 %2683  ;;  %v2702_v32 = vpop.permute.xlu2 %2701 }
 0x3d2   : > { %14333 = vst [vmem:[#allocation73_spill] sm:$0xff] %v10712_v8  ;;  %v10718_v56 = vsel %vm2330_vm6, %v2682_v5, %v2684_v35  ;;  %v2680_v53 = vpop.permute.xlu1 %2679  ;;  %v13858_v6 = vmax.f32 %v10712_v8, 0.0  ;;  %v13859_v9 = vmax.f32 %v10715_v51, 0.0 }
 0x3d3   : > { %14334 = vst [vmem:[#allocation85_spill] sm:$0xff] %v10715_v51  ;;  %v10723_v20 = vsel %vm2330_vm6, %v2680_v53, %v2682_v5 }
 0x3d4   : > { %2733 = vrot.lane.b32.xlu2 %v13858_v6, %s8109_s30  ;;  %2731 = vrot.lane.b32.xlu1 %v13859_v9, %s8109_s30  ;;  %v7593_v11 = vpack.i.bf16 %v10718_v56, %v10723_v20 }
 0x3d6   : > { %7594 = vrot.lane.b32.xlu0 %v7593_v11, %s8105_s18 }
 0x3d9   : > { %v2688_v1 = vpop.permute.xlu0 %2687  ;;  %v2712_v61 = vpop.permute.xlu2 %2711 }
 0x3db   : > { %v2686_v0 = vpop.permute.xlu1 %2685 }
 0x3dc   : > { %v10735_v23 = vsel %vm2330_vm6, %v2684_v35, %v2686_v0  ;;  %v10738_v5 = vsel %vm2330_vm6, %v2686_v0, %v2688_v1 }
 0x3dd   : > { %v7598_v27 = vpack.i.bf16 %v10738_v5, %v10735_v23 }
 0x3df   : > { %7599 = vrot.lane.b32.xlu1 %v7598_v27, %s8105_s18 }
 0x3e1   : > { %v2698_v13 = vpop.permute.xlu0 %2697  ;;  %v2690_v36 = vpop.permute.xlu2 %2689 }
 0x3e2   : > { %v10744_v38 = vsel %vm2330_vm6, %v2696_v39, %v2698_v13  ;;  %v10747_v3 = vsel %vm2330_vm6, %v2688_v1, %v2690_v36 }
 0x3e3   : > { %v2694_v50 = vpop.permute.xlu1 %2693 }
 0x3e4   : > { %v10750_v21 = vsel %vm2330_vm6, %v2694_v50, %v2696_v39 }
 0x3e5   : > { %v7603_v15 = vpack.i.bf16 %v10744_v38, %v10750_v21 }
 0x3e7   : > { %7604 = vrot.lane.b32.xlu2 %v7603_v15, %s8105_s18 }
 0x3e9   : > { %v2708_v17 = vpop.permute.xlu0 %2707  ;;  %v2724_v53 = vpop.permute.xlu2 %2723 }
 0x3eb   : > { %v2700_v2 = vpop.permute.xlu1 %2699 }
 0x3ec   : > { %v10756_v41 = vsel %vm2330_vm6, %v2698_v13, %v2700_v2  ;;  %v10759_v55 = vsel %vm2330_vm6, %v2700_v2, %v2702_v32 }
 0x3ed   : > { %v7608_v48 = vpack.i.bf16 %v10759_v55, %v10756_v41 }
 0x3ef   : > { %7609 = vrot.lane.b32.xlu0 %v7608_v48, %s8105_s18 }
 0x3f1   : > { %v2714_v39 = vpop.permute.xlu0 %2713  ;;  %v2730_v15 = vpop.permute.xlu2 %2729 }
 0x3f2   : > { %v10765_v62 = vsel %vm2330_vm6, %v2712_v61, %v2714_v39 }
 0x3f3   : > { %v2710_v4 = vpop.permute.xlu1 %2709 }
 0x3f4   : > { %v10768_v18 = vsel %vm2330_vm6, %v2708_v17, %v2710_v4  ;;  %v10771_v60 = vsel %vm2330_vm6, %v2710_v4, %v2712_v61 }
 0x3f5   : > { %v10775_v22 = vpack.i.bf16 %v10771_v60, %v10768_v18 }
 0x3f7   : > { %7614 = vrot.lane.b32.xlu1 %v10775_v22, %s8105_s18 }
 0x3f9   : > { %v2692_v40 = vpop.permute.xlu0 %2691 }
 0x3fa   : > { %v10780_v19 = vsel %vm2330_vm6, %v2690_v36, %v2692_v40  ;;  %2794 = vst.msk [vmem:[#allocation3 + $0x30] sm:$0xff] %vm2793_vm14, %v2692_v40 }
 0x3fb   : > { %v2716_v58 = vpop.permute.xlu1 %2715 }
 0x3fc   : > { %v10784_v52 = vsel %vm2330_vm6, %v2714_v39, %v2716_v58 }
 0x3fd   : > { %v7618_v35 = vpack.i.bf16 %v10784_v52, %v10765_v62 }
 0x3ff   : > { %3018 = vrot.lane.b32.xlu1 %v10780_v19, %s8105_s18  ;;  %7619 = vrot.lane.b32.xlu2 %v7618_v35, %s8105_s18 }
 0x401   : > { %v2726_v1 = vpop.permute.xlu0 %2725  ;;  %v10801_v36 = vld [vmem:[#allocation3 + $0x30] sm:$0xff] }
 0x402   : > { %v10792_v61 = vsel %vm2330_vm6, %v2724_v53, %v2726_v1 }
 0x403   : > { %v2722_v0 = vpop.permute.xlu1 %2721 }
 0x404   : > { %v10795_v27 = vsel %vm2330_vm6, %v2722_v0, %v2724_v53  ;;  %v7648_v0 = vpack.i.bf16 %v10750_v21, %v10735_v23 }
 0x405   : > { %v10799_v13 = vpack.i.bf16 %v10795_v27, %v10747_v3 }
 0x407   : > { %3020 = vrot.lane.b32.xlu1 %v10801_v36, %s8105_s18  ;;  %7624 = vrot.lane.b32.xlu0 %v10799_v13, %s8105_s18 }
 0x409   : > { %v2704_v50 = vpop.permute.xlu0 %2703 }
 0x40a   : > { %v10808_v17 = vsel %vm2330_vm6, %v2702_v32, %v2704_v50 }
 0x40b   : > { %v2728_v2 = vpop.permute.xlu1 %2727 }
 0x40c   : > { %v10811_v48 = vsel %vm2330_vm6, %v2726_v1, %v2728_v2  ;;  %v10814_v39 = vsel %vm2330_vm6, %v2728_v2, %v2730_v15 }
 0x40d   : > { %v7633_v4 = vpack.i.bf16 %v10808_v17, %v10814_v39  ;;  %v10820_v40 = vpack.i.bf16 %v10811_v48, %v10792_v61 }
 0x40f   : > { %7644 = vrot.lane.b32.xlu1 %v7593_v11, %s8112_s24  ;;  %7634 = vrot.lane.b32.xlu0 %v7633_v4, %s8105_s18  ;;  %v7663_v11 = vpack.i.bf16 %v10756_v41, %v10744_v38 }
 0x410   : > { %7629 = vrot.lane.b32.xlu2 %v10820_v40, %s8105_s18 }
 0x413   : > { %v2706_v32 = vpop.permute.xlu1 %2705  ;;  %v2718_v53 = vpop.permute.xlu2 %2717 }
 0x414   : > { %v10827_v35 = vsel %vm2330_vm6, %v2704_v50, %v2706_v32  ;;  %2801 = vst.msk [vmem:[#allocation3 + $0x68] sm:$0xff] %vm2793_vm14, %v2706_v32  ;;  %v10831_v1 = vsel %vm2330_vm6, %v2716_v58, %v2718_v53 }
 0x417   : > { %7649 = vrot.lane.b32.xlu1 %v7648_v0, %s8112_s24 }
 0x418   : > { %3032 = vrot.lane.b32.xlu2 %v10827_v35, %s8105_s18 }
 0x41b   : > { %v10841_v50 = vld [vmem:[#allocation3 + $0x68] sm:$0xff] }
 0x41f   : > { %7664 = vrot.lane.b32.xlu1 %v7663_v11, %s8112_s24 }
 0x420   : > { %3034 = vrot.lane.b32.xlu2 %v10841_v50, %s8105_s18 }
 0x42e   : > { %v2734_v58 = vpop.permute.xlu2 %2733 }
 0x42f   : > { %2815 = vst.msk [vmem:[#allocation3 + $0xd8] sm:$0xff] %vm2793_vm14, %v2734_v58 }
 0x433   : > { %v2720_v2 = vpop.permute.xlu0 %2719 }
 0x434   : > { %v10847_v4 = vsel %vm2330_vm6, %v2718_v53, %v2720_v2  ;;  %2808 = vst.msk [vmem:[#allocation3 + $0xa0] sm:$0xff] %vm2793_vm14, %v2720_v2 }
 0x43b   : > { %v10871_v47 = vld [vmem:[#allocation3 + $0xa0] sm:$0xff] }
 0x441   : > { %v7605_v10 = vpop.permute.xlu2 %7604 }
 0x442   : > { %v7607_v53 = vunpack.i.h.bf16 %v7605_v10  ;;  %v7606_v34 = vunpack.i.l.bf16 %v7605_v10 }
 0x446   : > { %v2732_v32 = vpop.permute.xlu1 %2731 }
 0x447   : > { %v10851_v0 = vsel %vm2330_vm6, %v2730_v15, %v2732_v32  ;;  %v10854_v11 = vsel %vm2330_vm6, %v2732_v32, %v2734_v58  ;;  %v3070_v58 = vsel %vm13869_vm3, %v7606_v34, %v7607_v53 }
 0x448   : > { %v7638_v6 = vpack.i.bf16 %v10851_v0, %v10831_v1  ;;  %v7595_v9 = vpop.permute.xlu0 %7594  ;;  %v3123_v51 = vmax.f32 %v10750_v21, %v3070_v58 }
 0x449   : > { %v7597_v26 = vunpack.i.h.bf16 %v7595_v9  ;;  %v7596_v30 = vunpack.i.l.bf16 %v7595_v9 }
 0x44a   : > { %7639 = vrot.lane.b32.xlu0 %v7638_v6, %s8105_s18 }
 0x44b   : > { %v3064_v2 = vsel %vm13869_vm3, %v7596_v30, %v7597_v26 }
 0x44c   : > { %v3116_v6 = vmax.f32 %v10723_v20, %v3064_v2 }
 0x451   : > { %v7600_v45 = vpop.permute.xlu1 %7599 }
 0x452   : > { %v7602_v33 = vunpack.i.h.bf16 %v7600_v45  ;;  %v7601_v15 = vunpack.i.l.bf16 %v7600_v45  ;;  %3046 = vrot.lane.b32.xlu0 %v10847_v4, %s8105_s18 }
 0x454   : > { %v3065_v32 = vsel %vm13869_vm3, %v7597_v26, %v7601_v15  ;;  %v3066_v8 = vsel %vm13869_vm3, %v7601_v15, %v7602_v33 }
 0x455   : > { %v3117_v9 = vmax.f32 %v10718_v56, %v3065_v32  ;;  %v3118_v10 = vmax.f32 %v10735_v23, %v3066_v8 }
 0x457   : > { %v7653_v30 = vpack.i.bf16 %v3117_v9, %v3116_v6  ;;  %v7658_v45 = vpack.i.bf16 %v3123_v51, %v3118_v10 }
 0x459   : > { %7654 = vrot.lane.b32.xlu2 %v7653_v30, %s8114_s16  ;;  %v10881_v21 = vpop.permute.xlu2 %7619 }
 0x45a   : > { %7659 = vrot.lane.b32.xlu0 %v7658_v45, %s8114_s16  ;;  %v7621_v58 = vunpack.i.l.bf16 %v10881_v21  ;;  %v7622_v45 = vunpack.i.h.bf16 %v10881_v21 }
 0x461   : > { %v7610_v34 = vpop.permute.xlu0 %7609  ;;  %3048 = vrot.lane.b32.xlu2 %v10871_v47, %s8105_s18 }
 0x462   : > { %v7612_v26 = vunpack.i.h.bf16 %v7610_v34  ;;  %v7611_v20 = vunpack.i.l.bf16 %v7610_v34  ;;  %3060 = vrot.lane.b32.xlu0 %v10854_v11, %s8105_s18 }
 0x464   : > { %v3071_v8 = vsel %vm13869_vm3, %v7607_v53, %v7611_v20  ;;  %v3072_v56 = vsel %vm13869_vm3, %v7611_v20, %v7612_v26  ;;  %v10887_v53 = vld [vmem:[#allocation3 + $0xd8] sm:$0xff] }
 0x465   : > { %v3124_v23 = vmax.f32 %v10744_v38, %v3071_v8  ;;  %v3125_v51 = vmax.f32 %v10756_v41, %v3072_v56 }
 0x467   : > { %v7668_v2 = vpack.i.bf16 %v3125_v51, %v3124_v23 }
 0x469   : > { %7669 = vrot.lane.b32.xlu1 %v7668_v2, %s8114_s16  ;;  %v7615_v15 = vpop.permute.xlu1 %7614  ;;  %7674 = vrot.lane.b32.xlu2 %v10775_v22, %s8112_s24  ;;  %v7678_v22 = vpack.i.bf16 %v10738_v5, %v10765_v62 }
 0x46a   : > { %v7617_v32 = vunpack.i.h.bf16 %v7615_v15  ;;  %v7616_v6 = vunpack.i.l.bf16 %v7615_v15  ;;  %3062 = vrot.lane.b32.xlu0 %v10887_v53, %s8105_s18  ;;  %v7630_v20 = vpop.permute.xlu2 %7629 }
 0x46b   : > { %v7632_v2 = vunpack.i.h.bf16 %v7630_v20  ;;  %v7631_v15 = vunpack.i.l.bf16 %v7630_v20 }
 0x46c   : > { %v3077_v38 = vsel %vm13869_vm3, %v7617_v32, %v7621_v58  ;;  %v3076_v41 = vsel %vm13869_vm3, %v7616_v6, %v7617_v32 }
 0x46d   : > { %v3131_v9 = vmax.f32 %v10771_v60, %v3077_v38  ;;  %v3130_v10 = vmax.f32 %v10768_v18, %v3076_v41  ;;  %v3078_v18 = vsel %vm13869_vm3, %v7621_v58, %v7622_v45 }
 0x46e   : > { %v3132_v23 = vmax.f32 %v10765_v62, %v3078_v18 }
 0x46f   : > { %v7683_v30 = vpack.i.bf16 %v3131_v9, %v3130_v10 }
 0x471   : > { %7679 = vrot.lane.b32.xlu1 %v7678_v22, %s8112_s24  ;;  %7684 = vrot.lane.b32.xlu2 %v7683_v30, %s8114_s16 }
 0x479   : > { %7694 = vrot.lane.b32.xlu1 %v10799_v13, %s8112_s24  ;;  %v7625_v34 = vpop.permute.xlu0 %7624  ;;  %7699 = vrot.lane.b32.xlu2 %v10820_v40, %s8112_s24  ;;  %v3019_v13 = vpop.permute.xlu1 %3018  ;;  %v7713_v40 = vpack.i.bf16 %v10808_v17, %v10759_v55 }
 0x47a   : > { %v7626_v60 = vunpack.i.l.bf16 %v7625_v34  ;;  %v7627_v8 = vunpack.i.h.bf16 %v7625_v34  ;;  %v3033_v34 = vpop.permute.xlu2 %3032 }
 0x47c   : > { %v3067_v56 = vsel %vm13869_vm3, %v7602_v33, %v7626_v60  ;;  %v3068_v6 = vsel %vm13869_vm3, %v7626_v60, %v3019_v13  ;;  %v3082_v58 = vsel %vm13869_vm3, %v7627_v8, %v7631_v15  ;;  %v3083_v33 = vsel %vm13869_vm3, %v7631_v15, %v7632_v2 }
 0x47d   : > { %v3119_v51 = vmax.f32 %v10738_v5, %v3067_v56  ;;  %v3120_v62 = vmax.f32 %v10747_v3, %v3068_v6  ;;  %v3137_v41 = vmax.f32 %v10795_v27, %v3082_v58  ;;  %v3138_v22 = vmax.f32 %v10792_v61, %v3083_v33  ;;  %v14335_v6 = vld [vmem:[#allocation59_spill] sm:$0xff] }
 0x47e   : > { %v14336_v58 = vmax.f32 %v14335_v6, 0.0 }
 0x47f   : > { %v7688_v32 = vpack.i.bf16 %v3119_v51, %v3132_v23  ;;  %v7703_v60 = vpack.i.bf16 %v3137_v41, %v3120_v62 }
 0x481   : > { %v10914_v38 = vpop.permute.xlu0 %7634  ;;  %7689 = vrot.lane.b32.xlu0 %v7688_v32, %s8114_s16  ;;  %7714 = vrot.lane.b32.xlu2 %v7713_v40, %s8112_s24  ;;  %v3021_v56 = vpop.permute.xlu1 %3020 }
 0x482   : > { %v7636_v5 = vunpack.i.l.bf16 %v10914_v38  ;;  %v7637_v9 = vunpack.i.h.bf16 %v10914_v38 }
 0x484   : > { %v3084_v10 = vsel %vm13869_vm3, %v7632_v2, %v7636_v5  ;;  %v3073_v20 = vsel %vm13869_vm3, %v7612_v26, %v7637_v9  ;;  %v3074_v8 = vsel %vm13869_vm3, %v7637_v9, %v3033_v34  ;;  %v3069_v26 = vsel %vm13869_vm3, %v3019_v13, %v3021_v56  ;;  %v14337_v9 = vld [vmem:[#allocation57_spill] sm:$0xff] }
 0x485   : > { %v3139_v30 = vmax.f32 %v10811_v48, %v3084_v10  ;;  %v3126_v3 = vmax.f32 %v10759_v55, %v3073_v20  ;;  %v3127_v61 = vmax.f32 %v10808_v17, %v3074_v8  ;;  %v7723_v48 = vpack.i.bf16 %v10831_v1, %v10784_v52  ;;  %v3035_v17 = vpop.permute.xlu2 %3034 }
 0x486   : > { %v3121_v23 = vmax.f32 %v10780_v19, %v3069_v26  ;;  %v3122_v55 = vmax.f32 %v10801_v36, %v3021_v56  ;;  %v3075_v51 = vsel %vm13869_vm3, %v3033_v34, %v3035_v17  ;;  %v7738_v13 = vpack.i.bf16 %v10851_v0, %v10814_v39 }
 0x487   : > { %v7708_v18 = vpack.i.bf16 %v3139_v30, %v3138_v22  ;;  %v7718_v27 = vpack.i.bf16 %v3127_v61, %v3126_v3  ;;  %v3128_v2 = vmax.f32 %v10827_v35, %v3075_v51 }
 0x489   : > { %7709 = vrot.lane.b32.xlu1 %v7708_v18, %s8114_s16  ;;  %7704 = vrot.lane.b32.xlu0 %v7703_v60, %s8114_s16 }
 0x48a   : > { %2884 = vrot.lane.b32.xlu2 %v10801_v36, %s8112_s24 }
 0x491   : > { %7719 = vrot.lane.b32.xlu1 %v7718_v27, %s8114_s16  ;;  %2882 = vrot.lane.b32.xlu0 %v10780_v19, %s8112_s24  ;;  %v7645_v19 = vpop.permute.xlu1 %7644 }
 0x492   : > { %7724 = vrot.lane.b32.xlu2 %v7723_v48, %s8112_s24  ;;  %v7647_v15 = vunpack.i.h.bf16 %v7645_v19  ;;  %v7646_v36 = vunpack.i.l.bf16 %v7645_v19 }
 0x494   : > { %v2928_v32 = vsel %vm1788_vm10, %v7646_v36, %v7647_v15  ;;  %v2980_v33 = vmax.f32 %v14336_v58, %v7646_v36  ;;  %v14340_v58 = vld [vmem:[#allocation49_spill] sm:$0xff] }
 0x499   : > { %3184 = vrot.lane.b32.xlu1 %v3122_v55, %s8114_s16  ;;  %3182 = vrot.lane.b32.xlu0 %v3121_v23, %s8114_s16  ;;  %v10973_v23 = vpop.permute.xlu1 %7649 }
 0x49a   : > { %2898 = vrot.lane.b32.xlu2 %v10841_v50, %s8112_s24  ;;  %v7651_v21 = vunpack.i.l.bf16 %v10973_v23  ;;  %v7652_v19 = vunpack.i.h.bf16 %v10973_v23 }
 0x4a1   : > { %2896 = vrot.lane.b32.xlu0 %v10827_v35, %s8112_s24  ;;  %v14338_v35 = vmax.f32 %v14337_v9, 0.0  ;;  %v10997_v9 = vpop.permute.xlu1 %7664 }
 0x4a2   : > { %v7667_v38 = vunpack.i.h.bf16 %v10997_v9 }
 0x4a3   : > { %v2981_v10 = vmax.f32 %v14338_v35, %v2928_v32 }
 0x4a9   : > { %3196 = vrot.lane.b32.xlu0 %v3128_v2, %s8114_s16 }
 0x4b1   : > { %7739 = vrot.lane.b32.xlu0 %v7738_v13, %s8112_s24 }
 0x4b3   : > { %v7655_v40 = vpop.permute.xlu2 %7654 }
 0x4b4   : > { %v7657_v62 = vunpack.i.h.bf16 %v7655_v40  ;;  %v7656_v41 = vunpack.i.l.bf16 %v7655_v40  ;;  %v14339_v40 = vmax.f32 %v10238_v49, 0.0 }
 0x4b6   : > { %v3228_v22 = vsel %vm2246_vm12, %v7656_v41, %v7657_v62  ;;  %v3280_v30 = vmax.f32 %v2980_v33, %v7656_v41  ;;  %v2987_v6 = vmax.f32 %v14339_v40, %v7652_v19  ;;  %v14341_v33 = vmax.f32 %v14340_v58, 0.0 }
 0x4b7   : > { %v3281_v34 = vmax.f32 %v2981_v10, %v3228_v22  ;;  %v3338_v22 = vld [vmem:[#allocation13 + $0xf0] sm:$0xff] }
 0x4b8   : > { %3644 = vmatpush.msra.mxu0 %v3338_v22  ;;  %v14345_v22 = vmax.f32 %v10365_v12, 0.0 }
 0x4b9   : > { %v7733_v18 = vpack.i.bf16 %v3281_v34, %v3280_v30 }
 0x4bb   : > { %7734 = vrot.lane.b32.xlu2 %v7733_v18, %s8109_s30  ;;  %v3049_v3 = vpop.permute.xlu2 %3048 }
 0x4bc   : > { %v7640_v60 = vpop.permute.xlu0 %7639 }
 0x4bd   : > { %v7641_v20 = vunpack.i.l.bf16 %v7640_v60 }
 0x4bf   : > { %v3079_v8 = vsel %vm13869_vm3, %v7622_v45, %v7641_v20 }
 0x4c0   : > { %v3133_v56 = vmax.f32 %v10784_v52, %v3079_v8  ;;  %v2929_v52 = vsel %vm1788_vm10, %v7647_v15, %v7651_v21  ;;  %v3336_v8 = vld [vmem:[#allocation13 + $0xe0] sm:$0xff] }
 0x4c1   : > { %v2982_v41 = vmax.f32 %v14341_v33, %v2929_v52  ;;  %3645 = vmatpush.msra.mxu0 %v3336_v8 }
 0x4c3   : > { %2910 = vrot.lane.b32.xlu2 %v10847_v4, %s8112_s24  ;;  %v10986_v36 = vpop.permute.xlu2 %7674 }
 0x4c4   : > { %v3047_v61 = vpop.permute.xlu0 %3046 }
 0x4c5   : > { %v3080_v27 = vsel %vm13869_vm3, %v7641_v20, %v3047_v61  ;;  %v3081_v48 = vsel %vm13869_vm3, %v3047_v61, %v3049_v3  ;;  %v3334_v61 = vld [vmem:[#allocation13 + $0xd0] sm:$0xff] }
 0x4c6   : > { %v3134_v26 = vmax.f32 %v10831_v1, %v3080_v27  ;;  %v3135_v51 = vmax.f32 %v10847_v4, %v3081_v48  ;;  %v7642_v1 = vunpack.i.h.bf16 %v7640_v60  ;;  %v3129_v4 = vmax.f32 %v10841_v50, %v3035_v17  ;;  %3646 = vmatpush.msra.mxu0 %v3334_v61 }
 0x4c8   : > { %v7728_v55 = vpack.i.bf16 %v3134_v26, %v3133_v56  ;;  %v3085_v50 = vsel %vm13869_vm3, %v7636_v5, %v7642_v1  ;;  %v7666_v5 = vunpack.i.l.bf16 %v10997_v9  ;;  %v3136_v26 = vmax.f32 %v10871_v47, %v3049_v3  ;;  %v3330_v3 = vld [vmem:[#allocation13 + $0xb0] sm:$0xff] }
 0x4c9   : > { %v3140_v35 = vmax.f32 %v10814_v39, %v3085_v50  ;;  %v14357_v9 = vmax.f32 %v10486_v24, 0.0  ;;  %v3366_v24 = vld [vmem:[#allocation13 + $0x1d0] sm:$0xff] }
 0x4ca   : > { %7729 = vrot.lane.b32.xlu1 %v7728_v55, %s8114_s16  ;;  %v2934_v27 = vsel %vm1788_vm10, %v7652_v19, %v7666_v5  ;;  %v2935_v48 = vsel %vm1788_vm10, %v7666_v5, %v7667_v38  ;;  %v3332_v55 = vld [vmem:[#allocation13 + $0xc0] sm:$0xff]  ;;  %v14342_v19 = vmax.f32 %v10235_v43, 0.0 }
 0x4cb   : > { %3210 = vrot.lane.b32.xlu2 %v3135_v51, %s8114_s16  ;;  %v11008_v18 = vpop.permute.xlu2 %7684  ;;  %3647 = vmatpush.msra.mxu0 %v3332_v55  ;;  %v3316_v55 = vld [vmem:[#allocation13 + $0x40] sm:$0xff] }
 0x4cc   : > { %v10979_v45 = vpop.permute.xlu0 %7659  ;;  %v7687_v43 = vunpack.i.h.bf16 %v11008_v18  ;;  %v7686_v50 = vunpack.i.l.bf16 %v11008_v18  ;;  %v3322_v18 = vld [vmem:[#allocation13 + $0x70] sm:$0xff] }
 0x4cd   : > { %v7661_v2 = vunpack.i.l.bf16 %v10979_v45  ;;  %v7662_v13 = vunpack.i.h.bf16 %v10979_v45  ;;  %3648 = vmatpush.msra.mxu0 %v3330_v3  ;;  %v14349_v3 = vmax.f32 %v10424_v54, 0.0  ;;  %v3308_v54 = vld [vmem:[#allocation13] sm:$0xff] }
 0x4cf   : > { %v3229_v32 = vsel %vm2246_vm12, %v7657_v62, %v7661_v2  ;;  %v3287_v17 = vmax.f32 %v2987_v6, %v7662_v13  ;;  %v7676_v6 = vunpack.i.l.bf16 %v10986_v36 }
 0x4d0   : > { %v3282_v15 = vmax.f32 %v2982_v41, %v3229_v32 }
 0x4d2   : > { %3198 = vrot.lane.b32.xlu1 %v3129_v4, %s8114_s16  ;;  %v7743_v34 = vpack.i.bf16 %v3287_v17, %v3282_v15  ;;  %v14343_v4 = vld [vmem:[#allocation65_spill] sm:$0xff]  ;;  %v3328_v17 = vld [vmem:[#allocation13 + $0xa0] sm:$0xff] }
 0x4d3   : > { %2924 = vrot.lane.b32.xlu2 %v10854_v11, %s8112_s24  ;;  %v14344_v32 = vmax.f32 %v14343_v4, 0.0  ;;  %v11038_v58 = vpop.permute.xlu2 %7699  ;;  %v3326_v15 = vld [vmem:[#allocation13 + $0x90] sm:$0xff]  ;;  %3649 = vmatpush.msra.mxu0 %v3328_v17 }
 0x4d4   : > { %v3061_v62 = vpop.permute.xlu0 %3060  ;;  %v7702_v23 = vunpack.i.h.bf16 %v11038_v58  ;;  %v14347_v4 = vld [vmem:[#allocation62_spill] sm:$0xff] }
 0x4d5   : > { %v3086_v49 = vsel %vm13869_vm3, %v7642_v1, %v3061_v62  ;;  %v2988_v1 = vmax.f32 %v14342_v19, %v2934_v27  ;;  %v2989_v40 = vmax.f32 %v14344_v32, %v2935_v48  ;;  %3650 = vmatpush.msra.mxu0 %v3326_v15  ;;  %v3314_v19 = vld [vmem:[#allocation13 + $0x30] sm:$0xff]  ;;  %v14348_v32 = vmax.f32 %v14347_v4, 0.0 }
 0x4d6   : > { %v3141_v10 = vmax.f32 %v10851_v0, %v3086_v49 }
 0x4d8   : > { %v7748_v30 = vpack.i.bf16 %v3141_v10, %v3140_v35  ;;  %v3324_v10 = vld [vmem:[#allocation13 + $0x80] sm:$0xff] }
 0x4d9   : > { %3651 = vmatpush.msra.mxu0 %v3324_v10 }
 0x4da   : > { %7749 = vrot.lane.b32.xlu0 %v7748_v30, %s8114_s16  ;;  %7744 = vrot.lane.b32.xlu1 %v7743_v34, %s8109_s30  ;;  %v2994_v30 = vmax.f32 %v14345_v22, %v7676_v6  ;;  %v14346_v34 = vmax.f32 %v10438_v7, 0.0  ;;  %v3320_v7 = vld [vmem:[#allocation13 + $0x60] sm:$0xff] }
 0x4db   : > { %v11010_v60 = vpop.permute.xlu1 %7669  ;;  %v11053_v61 = vpop.permute.xlu2 %7714  ;;  %3652 = vmatpush.msra.mxu0 %v3322_v18 }
 0x4dc   : > { %v3063_v20 = vpop.permute.xlu0 %3062  ;;  %v7672_v39 = vunpack.i.h.bf16 %v11010_v60  ;;  %v7671_v0 = vunpack.i.l.bf16 %v11010_v60 }
 0x4dd   : > { %v3143_v56 = vmax.f32 %v10887_v53, %v3063_v20  ;;  %v3087_v27 = vsel %vm13869_vm3, %v3061_v62, %v3063_v20  ;;  %3653 = vmatpush.msra.mxu0 %v3320_v7 }
 0x4de   : > { %v3234_v51 = vsel %vm2246_vm12, %v7662_v13, %v7671_v0  ;;  %v3235_v52 = vsel %vm2246_vm12, %v7671_v0, %v7672_v39  ;;  %v7677_v13 = vunpack.i.h.bf16 %v10986_v36  ;;  %v3240_v36 = vsel %vm2246_vm12, %v7686_v50, %v7687_v43 }
 0x4df   : > { %3226 = vrot.lane.b32.xlu2 %v3143_v56, %s8114_s16  ;;  %v3288_v33 = vmax.f32 %v2988_v1, %v3234_v51  ;;  %v3289_v41 = vmax.f32 %v2989_v40, %v3235_v52  ;;  %v3294_v0 = vmax.f32 %v2994_v30, %v7686_v50  ;;  %v3318_v56 = vld [vmem:[#allocation13 + $0x50] sm:$0xff]  ;;  %v14350_v30 = vmax.f32 %v10556_v57, 0.0 }
 0x4e0   : > { %v2940_v49 = vsel %vm1788_vm10, %v7676_v6, %v7677_v13  ;;  %3654 = vmatpush.msra.mxu0 %v3318_v56  ;;  %v3312_v6 = vld [vmem:[#allocation13 + $0x20] sm:$0xff]  ;;  %v14354_v57 = vmax.f32 %v10550_v37, 0.0 }
 0x4e1   : > { %v7753_v35 = vpack.i.bf16 %v3289_v41, %v3288_v33  ;;  %v2995_v5 = vmax.f32 %v14346_v34, %v2940_v49  ;;  %v14352_v56 = vld [vmem:[#allocation55_spill] sm:$0xff] }
 0x4e2   : > { %3212 = vrot.lane.b32.xlu0 %v3136_v26, %s8114_s16  ;;  %2912 = vrot.lane.b32.xlu1 %v10871_v47, %s8112_s24 }
 0x4e3   : > { %v11043_v47 = vpop.permute.xlu1 %7679  ;;  %v3295_v8 = vmax.f32 %v2995_v5, %v3240_v36  ;;  %3655 = vmatpush.msra.mxu0 %v3316_v55 }
 0x4e4   : > { %v7682_v48 = vunpack.i.h.bf16 %v11043_v47  ;;  %v7681_v12 = vunpack.i.l.bf16 %v11043_v47  ;;  %v2885_v10 = vpop.permute.xlu2 %2884 }
 0x4e5   : > { %v7758_v26 = vpack.i.bf16 %v3295_v8, %v3294_v0  ;;  %3656 = vmatpush.msra.mxu0 %v3314_v19 }
 0x4e6   : > { %v2930_v51 = vsel %vm1788_vm10, %v7651_v21, %v7682_v48  ;;  %v2941_v62 = vsel %vm1788_vm10, %v7677_v13, %v7681_v12  ;;  %v7701_v21 = vunpack.i.l.bf16 %v11038_v58  ;;  %v3408_v58 = vld [vmem:[#allocation13 + $0x320] sm:$0xff] }
 0x4e7   : > { %v2983_v40 = vmax.f32 %v14348_v32, %v2930_v51  ;;  %v2996_v13 = vmax.f32 %v14349_v3, %v2941_v62  ;;  %3657 = vmatpush.msra.mxu0 %v3312_v6  ;;  %v7716_v6 = vunpack.i.l.bf16 %v11053_v61 }
 0x4e8   : > { %v2947_v22 = vsel %vm1788_vm10, %v7701_v21, %v7702_v23 }
 0x4ea   : > { %2926 = vrot.lane.b32.xlu0 %v10887_v53, %s8112_s24  ;;  %7754 = vrot.lane.b32.xlu1 %v7753_v35, %s8109_s30  ;;  %v3142_v53 = vmax.f32 %v10854_v11, %v3087_v27  ;;  %v3310_v35 = vld [vmem:[#allocation13 + $0x10] sm:$0xff] }
 0x4eb   : > { %v7695_v20 = vpop.permute.xlu1 %7694  ;;  %3658 = vmatpush.msra.mxu0 %v3310_v35 }
 0x4ec   : > { %v7697_v33 = vunpack.i.h.bf16 %v7695_v20  ;;  %v7696_v41 = vunpack.i.l.bf16 %v7695_v20  ;;  %v11106_v3 = vpop.permute.xlu2 %7724 }
 0x4ed   : > { %3659 = vmatpush.msra.mxu0 %v3308_v54 }
 0x4ee   : > { %v2931_v45 = vsel %vm1788_vm10, %v7682_v48, %v7696_v41  ;;  %v14351_v48 = vmax.f32 %v10553_v28, 0.0 }
 0x4f0   : > { %v3003_v7 = vmax.f32 %v14351_v48, %v2947_v22 }
 0x4f2   : > { %7759 = vrot.lane.b32.xlu0 %v7758_v26, %s8109_s30  ;;  %3224 = vrot.lane.b32.xlu1 %v3142_v53, %s8114_s16  ;;  %v14353_v53 = vmax.f32 %v14352_v56, 0.0  ;;  %v3360_v56 = vld [vmem:[#allocation13 + $0x1a0] sm:$0xff]  ;;  %s8119_s16 = smov 114  }
 0x4f3   : > { %v11065_v52 = vpop.permute.xlu0 %7689 }
 0x4f4   : > { %v7692_v11 = vunpack.i.h.bf16 %v11065_v52  ;;  %v7691_v1 = vunpack.i.l.bf16 %v11065_v52  ;;  %v2984_v26 = vmax.f32 %v14353_v53, %v2931_v45  ;;  %v3358_v53 = vld [vmem:[#allocation13 + $0x190] sm:$0xff] }
 0x4f6   : > { %v3230_v50 = vsel %vm2246_vm12, %v7661_v2, %v7692_v11  ;;  %v3241_v17 = vsel %vm2246_vm12, %v7687_v43, %v7691_v1  ;;  %v2946_v2 = vsel %vm1788_vm10, %v7697_v33, %v7701_v21  ;;  %v3001_v43 = vmax.f32 %v14350_v30, %v7697_v33 }
 0x4f7   : > { %v3283_v15 = vmax.f32 %v2983_v40, %v3230_v50  ;;  %v3296_v49 = vmax.f32 %v2996_v13, %v3241_v17  ;;  %v3002_v55 = vmax.f32 %v14354_v57, %v2946_v2  ;;  %v11134_v2 = vpop.permute.xlu2 %2898  ;;  %v3354_v57 = vld [vmem:[#allocation13 + $0x170] sm:$0xff] }
 0x4f9   : > { %v7763_v36 = vpack.i.bf16 %v3283_v15, %v3296_v49  ;;  %v14355_v49 = vmax.f32 %v10252_v14, 0.0  ;;  %v3370_v14 = vld [vmem:[#allocation13 + $0x1f0] sm:$0xff] }
 0x4fa   : > { %3673 = vmatpush.msra.mxu1 %v3370_v14 }
 0x4fb   : > { %v11090_v34 = vpop.permute.xlu1 %7709  ;;  %v7705_v5 = vpop.permute.xlu0 %7704  ;;  %7764 = vrot.lane.b32.xlu1 %v7763_v36, %s8109_s30  ;;  %v14356_v36 = vmax.f32 %v10483_v29, 0.0  ;;  %v3368_v29 = vld [vmem:[#allocation13 + $0x1e0] sm:$0xff] }
 0x4fc   : > { %v7712_v18 = vunpack.i.h.bf16 %v11090_v34  ;;  %v7711_v0 = vunpack.i.l.bf16 %v11090_v34  ;;  %v7707_v8 = vunpack.i.h.bf16 %v7705_v5  ;;  %v7706_v27 = vunpack.i.l.bf16 %v7705_v5  ;;  %3674 = vmatpush.msra.mxu1 %v3368_v29  ;;  %v3364_v5 = vld [vmem:[#allocation13 + $0x1c0] sm:$0xff] }
 0x4fd   : > { %v14358_v29 = vmax.f32 %v10245_v46, 0.0 }
 0x4fe   : > { %v3247_v51 = vsel %vm2246_vm12, %v7711_v0, %v7712_v18  ;;  %v3246_v62 = vsel %vm2246_vm12, %v7707_v8, %v7711_v0  ;;  %v3301_v20 = vmax.f32 %v3001_v43, %v7707_v8  ;;  %v3231_v19 = vsel %vm2246_vm12, %v7692_v11, %v7706_v27  ;;  %3675 = vmatpush.msra.mxu1 %v3366_v24  ;;  %v3362_v8 = vld [vmem:[#allocation13 + $0x1b0] sm:$0xff] }
 0x4ff   : > { %v3303_v21 = vmax.f32 %v3003_v7, %v3247_v51  ;;  %v3284_v4 = vmax.f32 %v2984_v26, %v3231_v19  ;;  %v3302_v32 = vmax.f32 %v3002_v55, %v3246_v62  ;;  %v2936_v11 = vsel %vm1788_vm10, %v7667_v38, %v7716_v6  ;;  %v3356_v26 = vld [vmem:[#allocation13 + $0x180] sm:$0xff]  ;;  %v3350_v51 = vld [vmem:[#allocation13 + $0x150] sm:$0xff] }
 0x500   : > { %v2990_v35 = vmax.f32 %v14355_v49, %v2936_v11  ;;  %3676 = vmatpush.msra.mxu1 %v3364_v5  ;;  %v3352_v55 = vld [vmem:[#allocation13 + $0x160] sm:$0xff]  ;;  %v3398_v49 = vld [vmem:[#allocation13 + $0x2d0] sm:$0xff]  ;;  %v14359_v5 = vmax.f32 %v10427_v25, 0.0 }
 0x501   : > { %v7773_v28 = vpack.i.bf16 %v3303_v21, %v3302_v32  ;;  %v7768_v40 = vpack.i.bf16 %v3301_v20, %v3284_v4  ;;  %v3348_v62 = vld [vmem:[#allocation13 + $0x140] sm:$0xff]  ;;  %v3346_v20 = vld [vmem:[#allocation13 + $0x130] sm:$0xff] }
 0x502   : > { %3677 = vmatpush.msra.mxu1 %v3362_v8  ;;  %v3344_v19 = vld [vmem:[#allocation13 + $0x120] sm:$0xff]  ;;  %v3342_v4 = vld [vmem:[#allocation13 + $0x110] sm:$0xff] }
 0x503   : > { %v11108_v13 = vpop.permute.xlu1 %7719  ;;  %v2883_v37 = vpop.permute.xlu0 %2882  ;;  %7774 = vrot.lane.b32.xlu0 %v7773_v28, %s8109_s30  ;;  %7769 = vrot.lane.b32.xlu2 %v7768_v40, %s8109_s30  ;;  %v3340_v32 = vld [vmem:[#allocation13 + $0x100] sm:$0xff]  ;;  %v3402_v28 = vld [vmem:[#allocation13 + $0x2f0] sm:$0xff] }
 0x504   : > { %v7721_v33 = vunpack.i.l.bf16 %v11108_v13  ;;  %v2932_v50 = vsel %vm1788_vm10, %v7696_v41, %v2883_v37  ;;  %v2933_v17 = vsel %vm1788_vm10, %v2883_v37, %v2885_v10  ;;  %3678 = vmatpush.msra.mxu1 %v3360_v56  ;;  %3702 = vmatpush.msra.mxu2 %v3402_v28  ;;  %v3434_v40 = vld [vmem:[#allocation13 + $0x3f0] sm:$0xff]  ;;  %v3400_v37 = vld [vmem:[#allocation13 + $0x2e0] sm:$0xff] }
 0x505   : > { %v2985_v54 = vmax.f32 %v14356_v36, %v2932_v50  ;;  %v2986_v22 = vmax.f32 %v14357_v9, %v2933_v17  ;;  %3731 = vmatpush.msra.mxu3 %v3434_v40  ;;  %v3432_v11 = vld [vmem:[#allocation13 + $0x3e0] sm:$0xff]  ;;  %v7717_v50 = vunpack.i.h.bf16 %v11053_v61  ;;  %v7727_v17 = vunpack.i.h.bf16 %v11106_v3 }
 0x506   : > { %v3236_v15 = vsel %vm2246_vm12, %v7672_v39, %v7721_v33  ;;  %3679 = vmatpush.msra.mxu1 %v3358_v53  ;;  %3703 = vmatpush.msra.mxu2 %v3400_v37  ;;  %v3396_v36 = vld [vmem:[#allocation13 + $0x2c0] sm:$0xff]  ;;  %v3390_v53 = vld [vmem:[#allocation13 + $0x290] sm:$0xff] }
 0x507   : > { %v3290_v39 = vmax.f32 %v2990_v35, %v3236_v15  ;;  %3732 = vmatpush.msra.mxu3 %v3432_v11  ;;  %v7726_v15 = vunpack.i.l.bf16 %v11106_v3  ;;  %v3430_v35 = vld [vmem:[#allocation13 + $0x3d0] sm:$0xff]  ;;  %v3428_v9 = vld [vmem:[#allocation13 + $0x3c0] sm:$0xff] }
 0x508   : > { %3680 = vmatpush.msra.mxu1 %v3356_v26  ;;  %3704 = vmatpush.msra.mxu2 %v3398_v49  ;;  %v3392_v61 = vld [vmem:[#allocation13 + $0x2a0] sm:$0xff]  ;;  %v3422_v26 = vld [vmem:[#allocation13 + $0x390] sm:$0xff] }
 0x509   : > { %3733 = vmatpush.msra.mxu3 %v3430_v35  ;;  %v3384_v40 = vld [vmem:[#allocation13 + $0x260] sm:$0xff] }
 0x50a   : > { %3681 = vmatpush.msra.mxu1 %v3354_v57  ;;  %3705 = vmatpush.msra.mxu2 %v3396_v36  ;;  %v3416_v37 = vld [vmem:[#allocation13 + $0x360] sm:$0xff] }
 0x50b   : > { %v3185_v38 = vpop.permute.xlu1 %3184  ;;  %v3183_v45 = vpop.permute.xlu0 %3182  ;;  %3734 = vmatpush.msra.mxu3 %v3428_v9  ;;  %v3498_v9 = vld [vmem:[#allocation13 + $0x5f0] sm:$0xff]  ;;  %v3376_v3 = vld [vmem:[#allocation13 + $0x220] sm:$0xff] }
 0x50c   : > { %v3232_v41 = vsel %vm2246_vm12, %v7706_v27, %v3183_v45  ;;  %v3233_v10 = vsel %vm2246_vm12, %v3183_v45, %v3185_v38  ;;  %3682 = vmatpush.msra.mxu1 %v3352_v55  ;;  %v3394_v45 = vld [vmem:[#allocation13 + $0x2b0] sm:$0xff] }
 0x50d   : > { %v3285_v60 = vmax.f32 %v2985_v54, %v3232_v41  ;;  %v3286_v30 = vmax.f32 %v2986_v22, %v3233_v10  ;;  %v7722_v54 = vunpack.i.h.bf16 %v11108_v13  ;;  %v2937_v22 = vsel %vm1788_vm10, %v7716_v6, %v7717_v50  ;;  %v3426_v41 = vld [vmem:[#allocation13 + $0x3b0] sm:$0xff]  ;;  %v3424_v6 = vld [vmem:[#allocation13 + $0x3a0] sm:$0xff]  ;;  %3706 = vmatpush.msra.mxu2 %v3394_v45 }
 0x50e   : > { %3683 = vmatpush.msra.mxu1 %v3350_v51  ;;  %v2942_v10 = vsel %vm1788_vm10, %v7681_v12, %v7726_v15  ;;  %3735 = vmatpush.msra.mxu3 %v3426_v41  ;;  %v2991_v24 = vmax.f32 %v14358_v29, %v2937_v22  ;;  %v14361_v13 = vmax.f32 %v10596_v63, 0.0  ;;  %v14362_v22 = vmax.f32 %v10620_v59, 0.0  ;;  %v3380_v41 = vld [vmem:[#allocation13 + $0x240] sm:$0xff] }
 0x50f   : > { %v7778_v43 = vpack.i.bf16 %v3285_v60, %v3290_v39  ;;  %3544 = vrot.lane.b32.xlu0 %v3286_v30, %s8109_s30  ;;  %v2943_v60 = vsel %vm1788_vm10, %v7726_v15, %v7727_v17  ;;  %v2997_v8 = vmax.f32 %v14359_v5, %v2942_v10  ;;  %3707 = vmatpush.msra.mxu2 %v3392_v61  ;;  %v3414_v15 = vld [vmem:[#allocation13 + $0x350] sm:$0xff]  ;;  %v3412_v10 = vld [vmem:[#allocation13 + $0x340] sm:$0xff] }
 0x510   : > { %3684 = vmatpush.msra.mxu1 %v3348_v62  ;;  %3736 = vmatpush.msra.mxu3 %v3424_v6  ;;  %v3388_v62 = vld [vmem:[#allocation13 + $0x280] sm:$0xff] }
 0x511   : > { %7779 = vrot.lane.b32.xlu1 %v7778_v43, %s8109_s30  ;;  %v3237_v43 = vsel %vm2246_vm12, %v7721_v33, %v7722_v54  ;;  %3708 = vmatpush.msra.mxu2 %v3390_v53  ;;  %v3496_v61 = vld [vmem:[#allocation13 + $0x5e0] sm:$0xff] }
 0x512   : > { %3685 = vmatpush.msra.mxu1 %v3346_v20  ;;  %v3291_v25 = vmax.f32 %v2991_v24, %v3237_v43  ;;  %v3420_v20 = vld [vmem:[#allocation13 + $0x380] sm:$0xff]  ;;  %3737 = vmatpush.msra.mxu3 %v3422_v26  ;;  %v14365_v26 = vmax.f32 %v10593_v16, 0.0 }
 0x513   : > { %v11148_v21 = vpop.permute.xlu0 %2896  ;;  %3709 = vmatpush.msra.mxu2 %v3388_v62  ;;  %v3492_v16 = vld [vmem:[#allocation13 + $0x5c0] sm:$0xff] }
 0x514   : > { %3686 = vmatpush.msra.mxu1 %v3344_v19  ;;  %v2938_v30 = vsel %vm1788_vm10, %v7717_v50, %v11148_v21  ;;  %3738 = vmatpush.msra.mxu3 %v3420_v20  ;;  %v2939_v11 = vsel %vm1788_vm10, %v11148_v21, %v11134_v2  ;;  %v3382_v50 = vld [vmem:[#allocation13 + $0x250] sm:$0xff]  ;;  %v3464_v2 = vld [vmem:[#allocation13 + $0x4e0] sm:$0xff] }
 0x515   : > { %v11138_v0 = vpop.permute.xlu2 %7734  ;;  %v2992_v33 = vmax.f32 %v14361_v13, %v2938_v30  ;;  %v2993_v45 = vmax.f32 %v14362_v22, %v2939_v11  ;;  %v3410_v30 = vld [vmem:[#allocation13 + $0x330] sm:$0xff]  ;;  %v3456_v62 = vld [vmem:[#allocation13 + $0x4a0] sm:$0xff] }
 0x516   : > { %v7737_v27 = vunpack.i.h.bf16 %v11138_v0  ;;  %v7736_v48 = vunpack.i.l.bf16 %v11138_v0  ;;  %3687 = vmatpush.msra.mxu1 %v3342_v4  ;;  %v3386_v4 = vld [vmem:[#allocation13 + $0x270] sm:$0xff]  ;;  %v3448_v22 = vld [vmem:[#allocation13 + $0x460] sm:$0xff] }
 0x517   : > { %3710 = vmatpush.msra.mxu2 %v3386_v4  ;;  %v3486_v11 = vld [vmem:[#allocation13 + $0x590] sm:$0xff] }
 0x518   : > { %v11145_v7 = vsel %vm2330_vm6, %v7736_v48, %v7737_v27  ;;  %3688 = vmatpush.msra.mxu1 %v3340_v32  ;;  %v14360_v48 = vmax.f32 %v10500_v42, 0.0 }
 0x519   : > { %3660 = vmatmul.f32.vlgmr.msra.gmra.mxu0 %v11145_v7  ;;  %3711 = vmatpush.msra.mxu2 %v3384_v40 }
 0x51a   : > { %v2998_v56 = vmax.f32 %v14360_v48, %v2943_v60  ;;  %3789 = vmatpush.msrb.mxu1 %v3498_v9  ;;  %v3378_v60 = vld [vmem:[#allocation13 + $0x230] sm:$0xff]  ;;  %v3460_v48 = vld [vmem:[#allocation13 + $0x4c0] sm:$0xff] }
 0x51b   : > { %v3197_v38 = vpop.permute.xlu0 %3196  ;;  %3712 = vmatpush.msra.mxu2 %v3382_v50 }
 0x51c   : > { %v3238_v47 = vsel %vm2246_vm12, %v7722_v54, %v3197_v38  ;;  %v3466_v54 = vld [vmem:[#allocation13 + $0x4f0] sm:$0xff]  ;;  %3790 = vmatpush.msrb.mxu1 %v3496_v61 }
 0x51d   : > { %v3292_v55 = vmax.f32 %v2992_v33, %v3238_v47  ;;  %v11187_v63 = vpop.permute.xlu2 %2910  ;;  %3760 = vmatpush.msrb.mxu0 %v3466_v54  ;;  %3713 = vmatpush.msra.mxu2 %v3380_v41  ;;  %v3462_v47 = vld [vmem:[#allocation13 + $0x4d0] sm:$0xff]  ;;  %v14364_v33 = vmax.f32 %v10599_v31, 0.0 }
 0x51e   : > { %v3450_v54 = vld [vmem:[#allocation13 + $0x470] sm:$0xff] }
 0x51f   : > { %3761 = vmatpush.msrb.mxu0 %v3464_v2  ;;  %3714 = vmatpush.msra.mxu2 %v3378_v60  ;;  %v3478_v61 = vld [vmem:[#allocation13 + $0x550] sm:$0xff] }
 0x521   : > { %3762 = vmatpush.msrb.mxu0 %v3462_v47  ;;  %3715 = vmatpush.msra.mxu2 %v3376_v3 }
 0x523   : > { %v11189_v32 = vpop.permute.xlu0 %7739  ;;  %3763 = vmatpush.msrb.mxu0 %v3460_v48 }
 0x524   : > { %v7742_v49 = vunpack.i.h.bf16 %v11189_v32  ;;  %v7741_v35 = vunpack.i.l.bf16 %v11189_v32  ;;  %v3440_v32 = vld [vmem:[#allocation13 + $0x420] sm:$0xff] }
 0x525   : > { %v3211_v43 = vpop.permute.xlu2 %3210 }
 0x526   : > { %v2948_v59 = vsel %vm1788_vm10, %v7702_v23, %v7741_v35  ;;  %v2949_v6 = vsel %vm1788_vm10, %v7741_v35, %v7742_v49 }
 0x527   : > { %v3004_v53 = vmax.f32 %v14364_v33, %v2948_v59 }
 0x52d   : > { %v2925_v9 = vpop.permute.xlu2 %2924 }
 0x52e   : > { %v2950_v47 = vsel %vm1788_vm10, %v7742_v49, %v2925_v9 }
 0x539   : > { %v3227_v3 = vpop.permute.xlu2 %3226 }
 0x53c   : > { %v11165_v39 = vpop.permute.xlu1 %7729 }
 0x53d   : > { %v7732_v12 = vunpack.i.h.bf16 %v11165_v39  ;;  %v7731_v14 = vunpack.i.l.bf16 %v11165_v39  ;;  %v3005_v39 = vmax.f32 %v14365_v26, %v2949_v6  ;;  %v3444_v6 = vld [vmem:[#allocation13 + $0x440] sm:$0xff] }
 0x53f   : > { %v3242_v57 = vsel %vm2246_vm12, %v7691_v1, %v7731_v14  ;;  %v3243_v46 = vsel %vm2246_vm12, %v7731_v14, %v7732_v12  ;;  %v3418_v1 = vld [vmem:[#allocation13 + $0x370] sm:$0xff]  ;;  %v3244_v23 = vsel %vm2246_vm12, %v7732_v12, %v3211_v43 }
 0x540   : > { %v3297_v51 = vmax.f32 %v2997_v8, %v3242_v57  ;;  %v3298_v42 = vmax.f32 %v2998_v56, %v3243_v46  ;;  %3739 = vmatpush.msra.mxu3 %v3418_v1  ;;  %v3494_v14 = vld [vmem:[#allocation13 + $0x5d0] sm:$0xff]  ;;  %v14363_v56 = vmax.f32 %v10664_v44, 0.0 }
 0x541   : > { %3791 = vmatpush.msrb.mxu1 %v3494_v14  ;;  %v3374_v12 = vld [vmem:[#allocation13 + $0x210] sm:$0xff] }
 0x542   : > { %v7788_v19 = vpack.i.bf16 %v3298_v42, %v3292_v55  ;;  %v7783_v52 = vpack.i.bf16 %v3297_v51, %v3291_v25  ;;  %3740 = vmatpush.msra.mxu3 %v3416_v37  ;;  %v3406_v57 = vld [vmem:[#allocation13 + $0x310] sm:$0xff]  ;;  %v3404_v51 = vld [vmem:[#allocation13 + $0x300] sm:$0xff]  ;;  %3716 = vmatpush.msra.mxu2 %v3374_v12 }
 0x543   : > { %v3458_v42 = vld [vmem:[#allocation13 + $0x4b0] sm:$0xff]  ;;  %3792 = vmatpush.msrb.mxu1 %v3492_v16  ;;  %v3472_v12 = vld [vmem:[#allocation13 + $0x520] sm:$0xff] }
 0x544   : > { %v3199_v28 = vpop.permute.xlu1 %3198  ;;  %7789 = vrot.lane.b32.xlu1 %v7788_v19, %s8109_s30  ;;  %7784 = vrot.lane.b32.xlu2 %v7783_v52, %s8109_s30  ;;  %v3488_v52 = vld [vmem:[#allocation13 + $0x5a0] sm:$0xff]  ;;  %v3454_v1 = vld [vmem:[#allocation13 + $0x490] sm:$0xff] }
 0x545   : > { %v3239_v36 = vsel %vm2246_vm12, %v3197_v38, %v3199_v28  ;;  %3741 = vmatpush.msra.mxu3 %v3414_v15  ;;  %v2944_v38 = vsel %vm1788_vm10, %v7727_v17, %v11187_v63  ;;  %3764 = vmatpush.msrb.mxu0 %v3458_v42  ;;  %v14366_v28 = vld [vmem:[#allocation79_spill] sm:$0xff] }
 0x546   : > { %v3293_v21 = vmax.f32 %v2993_v45, %v3239_v36  ;;  %v2999_v13 = vmax.f32 %v14363_v56, %v2944_v38  ;;  %v14367_v40 = vmax.f32 %v14366_v28, 0.0  ;;  %v3452_v15 = vld [vmem:[#allocation13 + $0x480] sm:$0xff] }
 0x547   : > { %3742 = vmatpush.msra.mxu3 %v3412_v10  ;;  %3765 = vmatpush.msrb.mxu0 %v3456_v62  ;;  %v3484_v36 = vld [vmem:[#allocation13 + $0x580] sm:$0xff] }
 0x548   : > { %v3299_v44 = vmax.f32 %v2999_v13, %v3244_v23  ;;  %v3480_v10 = vld [vmem:[#allocation13 + $0x560] sm:$0xff]  ;;  %v3474_v23 = vld [vmem:[#allocation13 + $0x530] sm:$0xff] }
 0x549   : > { %3743 = vmatpush.msra.mxu3 %v3410_v30  ;;  %3766 = vmatpush.msrb.mxu0 %v3454_v1  ;;  %v3446_v30 = vld [vmem:[#allocation13 + $0x450] sm:$0xff] }
 0x54a   : > { %v14370_v13 = vld [vmem:[#allocation73_spill] sm:$0xff] }
 0x54b   : > { %3744 = vmatpush.msra.mxu3 %v3408_v58  ;;  %3767 = vmatpush.msrb.mxu0 %v3452_v15  ;;  %v3442_v58 = vld [vmem:[#allocation13 + $0x430] sm:$0xff]  ;;  %v14371_v33 = vmax.f32 %v14370_v13, 0.0  ;;  %v3367_v13 = vld [vmem:[#allocation13 + $0x1d8] sm:$0xff] }
 0x54c   : > { %v11211_v29 = vpop.permute.xlu0 %7749  ;;  %v11213_v24 = vpop.permute.xlu1 %7744  ;;  %3558 = vrot.lane.b32.xlu2 %v3293_v21, %s8109_s30 }
 0x54d   : > { %v7752_v17 = vunpack.i.h.bf16 %v11211_v29  ;;  %v7751_v5 = vunpack.i.l.bf16 %v11211_v29  ;;  %v7746_v8 = vunpack.i.l.bf16 %v11213_v24  ;;  %3745 = vmatpush.msra.mxu3 %v3406_v57  ;;  %3768 = vmatpush.msrb.mxu0 %v3450_v54  ;;  %v7747_v2 = vunpack.i.h.bf16 %v11213_v24  ;;  %v3468_v29 = vld [vmem:[#allocation13 + $0x500] sm:$0xff] }
 0x54f   : > { %v3248_v46 = vsel %vm2246_vm12, %v7712_v18, %v7751_v5  ;;  %v3249_v25 = vsel %vm2246_vm12, %v7751_v5, %v7752_v17  ;;  %v11239_v31 = vsel %vm2330_vm6, %v7737_v27, %v7746_v8  ;;  %v3372_v18 = vld [vmem:[#allocation13 + $0x200] sm:$0xff]  ;;  %v3490_v27 = vld [vmem:[#allocation13 + $0x5b0] sm:$0xff]  ;;  %3746 = vmatpush.msra.mxu3 %v3404_v51  ;;  %3769 = vmatpush.msrb.mxu0 %v3448_v22  ;;  %v3335_v22 = vld [vmem:[#allocation13 + $0xd8] sm:$0xff] }
 0x550   : > { %v3304_v55 = vmax.f32 %v3004_v53, %v3248_v46  ;;  %3689 = vmatmul.f32.vlgmr.msra.gmra.mxu1 %v11239_v31  ;;  %v3305_v34 = vmax.f32 %v3005_v39, %v3249_v25  ;;  %3717 = vmatpush.msra.mxu2 %v3372_v18  ;;  %v14368_v5 = vld [vmem:[#allocation85_spill] sm:$0xff] }
 0x551   : > { %3793 = vmatpush.msrb.mxu1 %v3490_v27  ;;  %3770 = vmatpush.msrb.mxu0 %v3446_v30  ;;  %v14369_v48 = vmax.f32 %v14368_v5, 0.0  ;;  %v3438_v18 = vld [vmem:[#allocation13 + $0x410] sm:$0xff]  ;;  %v3369_v5 = vld [vmem:[#allocation13 + $0x1e8] sm:$0xff] }
 0x552   : > { %3582 = vrot.lane.b32.xlu1 %v3305_v34, %s8109_s30  ;;  %v7793_v0 = vpack.i.bf16 %v3299_v44, %v3304_v55  ;;  %v3470_v55 = vld [vmem:[#allocation13 + $0x510] sm:$0xff] }
 0x553   : > { %3794 = vmatpush.msrb.mxu1 %v3488_v52  ;;  %3771 = vmatpush.msrb.mxu0 %v3444_v6  ;;  %v3006_v56 = vmax.f32 %v14369_v48, %v2950_v47  ;;  %v3323_v47 = vld [vmem:[#allocation13 + $0x78] sm:$0xff]  ;;  %v3401_v48 = vld [vmem:[#allocation13 + $0x2e8] sm:$0xff] }
 0x554   : > { %v3213_v20 = vpop.permute.xlu0 %3212  ;;  %v2913_v19 = vpop.permute.xlu1 %2912  ;;  %7794 = vrot.lane.b32.xlu0 %v7793_v0, %s8109_s30 }
 0x555   : > { %v2945_v4 = vsel %vm1788_vm10, %v11187_v63, %v2913_v19  ;;  %v3245_v50 = vsel %vm2246_vm12, %v3211_v43, %v3213_v20  ;;  %3795 = vmatpush.msrb.mxu1 %v3486_v11  ;;  %v3482_v63 = vld [vmem:[#allocation13 + $0x570] sm:$0xff]  ;;  %v3476_v43 = vld [vmem:[#allocation13 + $0x540] sm:$0xff]  ;;  %3772 = vmatpush.msrb.mxu0 %v3442_v58  ;;  %v3403_v58 = vld [vmem:[#allocation13 + $0x2f8] sm:$0xff] }
 0x556   : > { %v3000_v37 = vmax.f32 %v14367_v40, %v2945_v4 }
 0x557   : > { %3796 = vmatpush.msrb.mxu1 %v3484_v36  ;;  %3773 = vmatpush.msrb.mxu0 %v3440_v32  ;;  %v3313_v32 = vld [vmem:[#allocation13 + $0x28] sm:$0xff] }
 0x558   : > { %v3300_v35 = vmax.f32 %v3000_v37, %v3245_v50 }
 0x559   : > { %3797 = vmatpush.msrb.mxu1 %v3482_v63  ;;  %3774 = vmatpush.msrb.mxu0 %v3438_v18  ;;  %v3337_v63 = vld [vmem:[#allocation13 + $0xe8] sm:$0xff]  ;;  %v3359_v18 = vld [vmem:[#allocation13 + $0x198] sm:$0xff] }
 0x55a   : > { %3572 = vrot.lane.b32.xlu2 %v3300_v35, %s8109_s30 }
 0x55b   : > { %3798 = vmatpush.msrb.mxu1 %v3480_v10  ;;  %v3329_v10 = vld [vmem:[#allocation13 + $0xa8] sm:$0xff] }
 0x55c   : > { %v2927_v45 = vpop.permute.xlu0 %2926  ;;  %v11250_v41 = vpop.permute.xlu1 %7754 }
 0x55d   : > { %v7757_v21 = vunpack.i.h.bf16 %v11250_v41  ;;  %v7756_v60 = vunpack.i.l.bf16 %v11250_v41  ;;  %v2951_v14 = vsel %vm1788_vm10, %v2925_v9, %v2927_v45  ;;  %3799 = vmatpush.msrb.mxu1 %v3478_v61  ;;  %v7770_v51 = vpop.permute.xlu2 %7769  ;;  %v3339_v9 = vld [vmem:[#allocation13 + $0xf8] sm:$0xff]  ;;  %v3333_v45 = vld [vmem:[#allocation13 + $0xc8] sm:$0xff] }
 0x55e   : > { %v3007_v53 = vmax.f32 %v14371_v33, %v2951_v14  ;;  %v7771_v0 = vunpack.i.l.bf16 %v7770_v51  ;;  %v7772_v1 = vunpack.i.h.bf16 %v7770_v51  ;;  %3847 = vmatpush.msrb.mxu3 %v3339_v9  ;;  %v3331_v41 = vld [vmem:[#allocation13 + $0xb8] sm:$0xff]  ;;  %v3325_v61 = vld [vmem:[#allocation13 + $0x88] sm:$0xff] }
 0x55f   : > { %v11256_v38 = vsel %vm2330_vm6, %v7747_v2, %v7756_v60  ;;  %v11261_v59 = vsel %vm2330_vm6, %v7756_v60, %v7757_v21  ;;  %3800 = vmatpush.msrb.mxu1 %v3476_v43  ;;  %v3327_v2 = vld [vmem:[#allocation13 + $0x98] sm:$0xff]  ;;  %v3321_v14 = vld [vmem:[#allocation13 + $0x68] sm:$0xff] }
 0x560   : > { %3663 = vmatmul.f32.gmra.mxu0 %v11256_v38  ;;  %3692 = vmatmul.f32.gmra.mxu1 %v11261_v59  ;;  %v3399_v33 = vld [vmem:[#allocation13 + $0x2d8] sm:$0xff] }
 0x561   : > { %3801 = vmatpush.msrb.mxu1 %v3474_v23  ;;  %3848 = vmatpush.msrb.mxu3 %v3337_v63  ;;  %v3319_v23 = vld [vmem:[#allocation13 + $0x58] sm:$0xff] }
 0x562   : > { %v3435_v51 = vld [vmem:[#allocation13 + $0x3f8] sm:$0xff] }
 0x563   : > { %3802 = vmatpush.msrb.mxu1 %v3472_v12  ;;  %3849 = vmatpush.msrb.mxu3 %v3335_v22  ;;  %v3363_v12 = vld [vmem:[#allocation13 + $0x1b8] sm:$0xff] }
 0x564   : > { %v7760_v26 = vpop.permute.xlu0 %7759  ;;  %v3225_v39 = vpop.permute.xlu1 %3224  ;;  %v3463_v9 = vld [vmem:[#allocation13 + $0x4d8] sm:$0xff] }
 0x565   : > { %v7762_v49 = vunpack.i.h.bf16 %v7760_v26  ;;  %v7761_v57 = vunpack.i.l.bf16 %v7760_v26  ;;  %v3250_v46 = vsel %vm2246_vm12, %v7752_v17, %v3225_v39  ;;  %v3251_v25 = vsel %vm2246_vm12, %v3225_v39, %v3227_v3  ;;  %3803 = vmatpush.msrb.mxu1 %v3470_v55  ;;  %v3436_v17 = vld [vmem:[#allocation13 + $0x400] sm:$0xff]  ;;  %3850 = vmatpush.msrb.mxu3 %v3333_v45  ;;  %v3371_v3 = vld [vmem:[#allocation13 + $0x1f8] sm:$0xff]  ;;  %v3365_v26 = vld [vmem:[#allocation13 + $0x1c8] sm:$0xff] }
 0x566   : > { %v3306_v16 = vmax.f32 %v3006_v56, %v3250_v46  ;;  %v3307_v44 = vmax.f32 %v3007_v53, %v3251_v25  ;;  %3775 = vmatpush.msrb.mxu0 %v3436_v17  ;;  %v3317_v56 = vld [vmem:[#allocation13 + $0x48] sm:$0xff]  ;;  %v3315_v53 = vld [vmem:[#allocation13 + $0x38] sm:$0xff] }
 0x567   : > { %v11278_v34 = vsel %vm2330_vm6, %v7761_v57, %v7762_v49  ;;  %3804 = vmatpush.msrb.mxu1 %v3468_v29  ;;  %3851 = vmatpush.msrb.mxu3 %v3331_v41  ;;  %v3397_v39 = vld [vmem:[#allocation13 + $0x2c8] sm:$0xff]  ;;  %v3502_v57 = vld [vmem:[#allocation13 + $0x610] sm:$0xff]  ;;  %v3311_v46 = vld [vmem:[#allocation13 + $0x18] sm:$0xff] }
 0x568   : > { %3584 = vrot.lane.b32.xlu0 %v3306_v16, %s8109_s30  ;;  %3586 = vrot.lane.b32.xlu1 %v3307_v44, %s8109_s30  ;;  %v3361_v25 = vld [vmem:[#allocation13 + $0x1a8] sm:$0xff]  ;;  %v3500_v44 = vld [vmem:[#allocation13 + $0x600] sm:$0xff]  ;;  %v3391_v29 = vld [vmem:[#allocation13 + $0x298] sm:$0xff] }
 0x569   : > { %3666 = vmatmul.f32.gmra.mxu0 %v11278_v34  ;;  %3852 = vmatpush.msrb.mxu3 %v3329_v10  ;;  %v3393_v16 = vld [vmem:[#allocation13 + $0x2a8] sm:$0xff]  ;;  %v3351_v41 = vld [vmem:[#allocation13 + $0x158] sm:$0xff] }
 0x56a   : > { %3876 = vmatpush.msra.mxu0 %v3371_v3  ;;  %3905 = vmatpush.msra.mxu1 %v3403_v58  ;;  %v3309_v55 = vld [vmem:[#allocation13 + $0x8] sm:$0xff]  ;;  %v11369_v58 = vld [vmem:[#allocation11 + $0x1] ss:$2 sm:$0x3] }
 0x56b   : > { %3853 = vmatpush.msrb.mxu3 %v3327_v2  ;;  %3832 = vmatpush.msrb.mxu2 %v3502_v57  ;;  %v3357_v17 = vld [vmem:[#allocation13 + $0x188] sm:$0xff] }
 0x56c   : > { %3877 = vmatpush.msra.mxu0 %v3369_v5  ;;  %3906 = vmatpush.msra.mxu1 %v3401_v48  ;;  %v3461_v3 = vld [vmem:[#allocation13 + $0x4c8] sm:$0xff]  ;;  %v11372_v5 = vperm.slane %v11369_v58, 0 }
 0x56d   : > { %v7765_v42 = vpop.permute.xlu1 %7764  ;;  %3854 = vmatpush.msrb.mxu3 %v3325_v61  ;;  %3833 = vmatpush.msrb.mxu2 %v3500_v44  ;;  %v3381_v48 = vld [vmem:[#allocation13 + $0x248] sm:$0xff]  ;;  %v4067_v44 = vld [vmem:[#allocation11] ss:$2 sm:$0x3] }
 0x56e   : > { %v7767_v27 = vunpack.i.h.bf16 %v7765_v42  ;;  %v7766_v62 = vunpack.i.l.bf16 %v7765_v42  ;;  %3878 = vmatpush.msra.mxu0 %v3367_v13  ;;  %3907 = vmatpush.msra.mxu1 %v3399_v33  ;;  %v3389_v42 = vld [vmem:[#allocation13 + $0x288] sm:$0xff]  ;;  %v3379_v33 = vld [vmem:[#allocation13 + $0x238] sm:$0xff] }
 0x56f   : > { %3855 = vmatpush.msrb.mxu3 %v3323_v47  ;;  %v3385_v47 = vld [vmem:[#allocation13 + $0x268] sm:$0xff] }
 0x570   : > { %v11284_v20 = vsel %vm2330_vm6, %v7762_v49, %v7766_v62  ;;  %v11289_v19 = vsel %vm2330_vm6, %v7746_v8, %v7767_v27  ;;  %v11292_v52 = vsel %vm2330_vm6, %v7767_v27, %v7771_v0  ;;  %3879 = vmatpush.msra.mxu0 %v3365_v26  ;;  %3908 = vmatpush.msra.mxu1 %v3397_v39  ;;  %v3395_v49 = vld [vmem:[#allocation13 + $0x2b8] sm:$0xff]  ;;  %v3425_v13 = vld [vmem:[#allocation13 + $0x3a8] sm:$0xff] }
 0x571   : > { %3695 = vmatmul.f32.gmra.mxu1 %v11284_v20  ;;  %3718 = vmatmul.f32.vlgmr.msra.gmra.mxu2 %v11289_v19  ;;  %v3355_v27 = vld [vmem:[#allocation13 + $0x178] sm:$0xff]  ;;  %v3345_v26 = vld [vmem:[#allocation13 + $0x128] sm:$0xff] }
 0x572   : > { %3747 = vmatmul.f32.vlgmr.msra.gmra.mxu3 %v11292_v52  ;;  %3880 = vmatpush.msra.mxu0 %v3363_v12  ;;  %v3423_v39 = vld [vmem:[#allocation13 + $0x398] sm:$0xff]  ;;  %v3377_v12 = vld [vmem:[#allocation13 + $0x228] sm:$0xff] }
 0x573   : > { %3856 = vmatpush.msrb.mxu3 %v3321_v14  ;;  %3909 = vmatpush.msra.mxu1 %v3395_v49  ;;  %v3429_v14 = vld [vmem:[#allocation13 + $0x3c8] sm:$0xff]  ;;  %v3343_v49 = vld [vmem:[#allocation13 + $0x118] sm:$0xff] }
 0x574   : > { %3881 = vmatpush.msra.mxu0 %v3361_v25  ;;  %3934 = vmatpush.msra.mxu2 %v3435_v51  ;;  %v3421_v57 = vld [vmem:[#allocation13 + $0x388] sm:$0xff]  ;;  %v3375_v25 = vld [vmem:[#allocation13 + $0x218] sm:$0xff] }
 0x575   : > { %v11297_v4 = vpop.permute.xlu0 %7774  ;;  %3857 = vmatpush.msrb.mxu3 %v3319_v23  ;;  %3910 = vmatpush.msra.mxu1 %v3393_v16  ;;  %v3459_v23 = vld [vmem:[#allocation13 + $0x4b8] sm:$0xff]  ;;  %v3341_v16 = vld [vmem:[#allocation13 + $0x108] sm:$0xff] }
 0x576   : > { %v7777_v28 = vunpack.i.h.bf16 %v11297_v4  ;;  %v7776_v40 = vunpack.i.l.bf16 %v11297_v4  ;;  %3882 = vmatpush.msra.mxu0 %v3359_v18  ;;  %4255 = vrot.lane.b32.xlu1 %v11372_v5, %s8116_s22  ;;  %v3451_v18 = vld [vmem:[#allocation13 + $0x478] sm:$0xff] }
 0x577   : > { %3858 = vmatpush.msrb.mxu3 %v3317_v56  ;;  %3911 = vmatpush.msra.mxu1 %v3391_v29  ;;  %v3347_v56 = vld [vmem:[#allocation13 + $0x138] sm:$0xff]  ;;  %v11376_v29 = vperm.slane %v4067_v44, 1 }
 0x578   : > { %v11302_v24 = vsel %vm2330_vm6, %v7772_v1, %v7776_v40  ;;  %v11307_v8 = vsel %vm2330_vm6, %v7776_v40, %v7777_v28  ;;  %v3465_v1 = vld [vmem:[#allocation13 + $0x4e8] sm:$0xff]  ;;  %3883 = vmatpush.msra.mxu0 %v3357_v17  ;;  %v3387_v40 = vld [vmem:[#allocation13 + $0x278] sm:$0xff] }
 0x579   : > { %3669 = vmatmul.f32.gmra.mxu0 %v11302_v24  ;;  %3698 = vmatmul.f32.gmra.mxu1 %v11307_v8  ;;  %v3373_v17 = vld [vmem:[#allocation13 + $0x208] sm:$0xff]  ;;  %v3499_v4 = vld [vmem:[#allocation13 + $0x5f8] sm:$0xff] }
 0x57a   : > { %3859 = vmatpush.msrb.mxu3 %v3315_v53  ;;  %3912 = vmatpush.msra.mxu1 %v3389_v42  ;;  %v3457_v53 = vld [vmem:[#allocation13 + $0x4a8] sm:$0xff] }
 0x57b   : > { %3884 = vmatpush.msra.mxu0 %v3355_v27  ;;  %v3417_v42 = vld [vmem:[#allocation13 + $0x368] sm:$0xff]  ;;  %4351 = vrot.lane.b32.xlu0 %v11376_v29, %s8105_s18 }
 0x57c   : > { %3860 = vmatpush.msrb.mxu3 %v3313_v32  ;;  %3913 = vmatpush.msra.mxu1 %v3387_v40  ;;  %v3455_v32 = vld [vmem:[#allocation13 + $0x498] sm:$0xff] }
 0x57e   : > { %3861 = vmatpush.msrb.mxu3 %v3311_v46  ;;  %3914 = vmatpush.msra.mxu1 %v3385_v47  ;;  %v3453_v46 = vld [vmem:[#allocation13 + $0x488] sm:$0xff] }
 0x57f   : > { %4522 = vrot.lane.b32.xlu1 %v11376_v29, %s8117_s27  ;;  %v3413_v47 = vld [vmem:[#allocation13 + $0x348] sm:$0xff] }
 0x580   : > { %3862 = vmatpush.msrb.mxu3 %v3309_v55  ;;  %v3419_v55 = vld [vmem:[#allocation13 + $0x378] sm:$0xff] }
 0x581   : > { %v11311_v15 = vpop.permute.xlu0 %3544 }
 0x583   : > { %v7780_v37 = vpop.permute.xlu1 %7779 }
 0x584   : > { %v7782_v11 = vunpack.i.h.bf16 %v7780_v37  ;;  %v7781_v50 = vunpack.i.l.bf16 %v7780_v37  ;;  %v3431_v37 = vld [vmem:[#allocation13 + $0x3d8] sm:$0xff] }
 0x586   : > { %v11316_v35 = vsel %vm2330_vm6, %v7757_v21, %v7781_v50  ;;  %v11319_v36 = vsel %vm2330_vm6, %v7771_v0, %v7782_v11  ;;  %v11323_v54 = vsel %vm2330_vm6, %v7782_v11, %v11311_v15  ;;  %v3467_v0 = vld [vmem:[#allocation13 + $0x4f8] sm:$0xff] }
 0x587   : > { %3721 = vmatmul.f32.gmra.mxu2 %v11316_v35  ;;  %3776 = vmatmul.f32.vlgmr.msrb.gmra.mxu0 %v11319_v36 }
 0x588   : > { %3805 = vmatmul.f32.vlgmr.msrb.gmra.mxu1 %v11323_v54  ;;  %3963 = vmatpush.msra.mxu3 %v3467_v0 }
 0x58a   : > { %3964 = vmatpush.msra.mxu3 %v3465_v1 }
 0x58c   : > { %3965 = vmatpush.msra.mxu3 %v3463_v9 }
 0x58e   : > { %3966 = vmatpush.msra.mxu3 %v3461_v3  ;;  %v3495_v3 = vld [vmem:[#allocation13 + $0x5d8] sm:$0xff] }
 0x590   : > { %3967 = vmatpush.msra.mxu3 %v3459_v23  ;;  %v3409_v23 = vld [vmem:[#allocation13 + $0x328] sm:$0xff] }
 0x592   : > { %3968 = vmatpush.msra.mxu3 %v3457_v53  ;;  %v3489_v53 = vld [vmem:[#allocation13 + $0x5a8] sm:$0xff] }
 0x594   : > { %3969 = vmatpush.msra.mxu3 %v3455_v32  ;;  %v3437_v32 = vld [vmem:[#allocation13 + $0x408] sm:$0xff] }
 0x596   : > { %3970 = vmatpush.msra.mxu3 %v3453_v46 }
 0x598   : > { %3971 = vmatpush.msra.mxu3 %v3451_v18  ;;  %v3477_v18 = vld [vmem:[#allocation13 + $0x548] sm:$0xff] }
 0x59e   : > { %v11328_v21 = vpop.permute.xlu2 %7784 }
 0x59f   : > { %v7787_v60 = vunpack.i.h.bf16 %v11328_v21  ;;  %v7786_v30 = vunpack.i.l.bf16 %v11328_v21  ;;  %v3383_v21 = vld [vmem:[#allocation13 + $0x258] sm:$0xff] }
 0x5a0   : > { %3915 = vmatpush.msra.mxu1 %v3383_v21  ;;  %v3443_v21 = vld [vmem:[#allocation13 + $0x438] sm:$0xff] }
 0x5a1   : > { %v11335_v6 = vsel %vm2330_vm6, %v7766_v62, %v7787_v60  ;;  %v11340_v43 = vsel %vm2330_vm6, %v7781_v50, %v7786_v30  ;;  %v3433_v62 = vld [vmem:[#allocation13 + $0x3e8] sm:$0xff] }
 0x5a2   : > { %3724 = vmatmul.f32.gmra.mxu2 %v11335_v6  ;;  %3750 = vmatmul.f32.gmra.mxu3 %v11340_v43  ;;  %v3353_v50 = vld [vmem:[#allocation13 + $0x168] sm:$0xff] }
 0x5a3   : > { %3935 = vmatpush.msra.mxu2 %v3433_v62  ;;  %3885 = vmatpush.msra.mxu0 %v3353_v50 }
 0x5a4   : > { %3916 = vmatpush.msra.mxu1 %v3381_v48  ;;  %v3441_v48 = vld [vmem:[#allocation13 + $0x428] sm:$0xff] }
 0x5a5   : > { %3936 = vmatpush.msra.mxu2 %v3431_v37  ;;  %3886 = vmatpush.msra.mxu0 %v3351_v41  ;;  %v4083_v41 = vperm.slane %v4067_v44, 0  ;;  %v3503_v44 = vld [vmem:[#allocation13 + $0x618] sm:$0xff] }
 0x5a6   : > { %v11348_v45 = vpop.permute.xlu2 %3558  ;;  %3917 = vmatpush.msra.mxu1 %v3379_v33  ;;  %v3439_v33 = vld [vmem:[#allocation13 + $0x418] sm:$0xff] }
 0x5a7   : > { %3937 = vmatpush.msra.mxu2 %v3429_v14  ;;  %v3445_v14 = vld [vmem:[#allocation13 + $0x448] sm:$0xff]  ;;  %4349 = vrot.lane.b32.xlu2 %v4083_v41, %s8105_s18 }
 0x5a8   : > { %3918 = vmatpush.msra.mxu1 %v3377_v12  ;;  %4085 = vrot.lane.b32.xlu1 %v4083_v41, %s8118_s15  ;;  %v3487_v12 = vld [vmem:[#allocation13 + $0x598] sm:$0xff] }
 0x5a9   : > { %4520 = vrot.lane.b32.xlu0 %v4083_v41, %s8117_s27 }
 0x5aa   : > { %3919 = vmatpush.msra.mxu1 %v3375_v25 }
 0x5ac   : > { %3920 = vmatpush.msra.mxu1 %v3373_v17  ;;  %v3473_v17 = vld [vmem:[#allocation13 + $0x528] sm:$0xff] }
 0x5ae   : > { %4035 = vmatpush.msrb.mxu1 %v3503_v44 }
 0x5b4   : > { %v11378_v62 = vpop.permute.xlu2 %3572 }
 0x5b6   : > { %v11344_v11 = vpop.permute.xlu1 %7789 }
 0x5b7   : > { %v7792_v63 = vunpack.i.h.bf16 %v11344_v11  ;;  %v7791_v22 = vunpack.i.l.bf16 %v11344_v11  ;;  %v3447_v11 = vld [vmem:[#allocation13 + $0x458] sm:$0xff] }
 0x5b9   : > { %v11355_v10 = vsel %vm2330_vm6, %v7787_v60, %v7792_v63  ;;  %v11360_v2 = vsel %vm2330_vm6, %v7786_v30, %v7791_v22  ;;  %v11364_v61 = vsel %vm2330_vm6, %v7791_v22, %v11348_v45  ;;  %v3349_v60 = vld [vmem:[#allocation13 + $0x148] sm:$0xff]  ;;  %v3427_v30 = vld [vmem:[#allocation13 + $0x3b8] sm:$0xff] }
 0x5ba   : > { %3753 = vmatmul.f32.gmra.mxu3 %v11355_v10  ;;  %3779 = vmatmul.f32.gmra.mxu0 %v11360_v2  ;;  %v3449_v22 = vld [vmem:[#allocation13 + $0x468] sm:$0xff] }
 0x5bb   : > { %3808 = vmatmul.f32.gmra.mxu1 %v11364_v61  ;;  %3887 = vmatpush.msra.mxu0 %v3349_v60  ;;  %v3411_v60 = vld [vmem:[#allocation13 + $0x338] sm:$0xff] }
 0x5bc   : > { %3938 = vmatpush.msra.mxu2 %v3427_v30  ;;  %3972 = vmatpush.msra.mxu3 %v3449_v22  ;;  %v3493_v30 = vld [vmem:[#allocation13 + $0x5c8] sm:$0xff] }
 0x5bd   : > { %3888 = vmatpush.msra.mxu0 %v3347_v56  ;;  %v3491_v56 = vld [vmem:[#allocation13 + $0x5b8] sm:$0xff] }
 0x5be   : > { %3939 = vmatpush.msra.mxu2 %v3425_v13  ;;  %3973 = vmatpush.msra.mxu3 %v3447_v11  ;;  %v3407_v13 = vld [vmem:[#allocation13 + $0x318] sm:$0xff] }
 0x5bf   : > { %3889 = vmatpush.msra.mxu0 %v3345_v26  ;;  %v3405_v26 = vld [vmem:[#allocation13 + $0x308] sm:$0xff] }
 0x5c0   : > { %3940 = vmatpush.msra.mxu2 %v3423_v39  ;;  %3974 = vmatpush.msra.mxu3 %v3445_v14  ;;  %v11415_v39 = vperm.slane %v11369_v58, 1  ;;  %v3483_v58 = vld [vmem:[#allocation13 + $0x578] sm:$0xff] }
 0x5c1   : > { %3890 = vmatpush.msra.mxu0 %v3343_v49 }
 0x5c2   : > { %3941 = vmatpush.msra.mxu2 %v3421_v57  ;;  %3975 = vmatpush.msra.mxu3 %v3443_v21 }
 0x5c3   : > { %3891 = vmatpush.msra.mxu0 %v3341_v16  ;;  %4257 = vrot.lane.b32.xlu2 %v11415_v39, %s8116_s22  ;;  %v3481_v16 = vld [vmem:[#allocation13 + $0x568] sm:$0xff] }
 0x5c4   : > { %3942 = vmatpush.msra.mxu2 %v3419_v55  ;;  %v11380_v1 = vpop.permute.xlu1 %3582  ;;  %3976 = vmatpush.msra.mxu3 %v3441_v48  ;;  %v3479_v55 = vld [vmem:[#allocation13 + $0x558] sm:$0xff] }
 0x5c5   : > { %3992 = vmatpush.msrb.mxu0 %v3499_v4  ;;  %4455 = vrot.lane.b32.xlu0 %v11415_v39, %s8106_s28 }
 0x5c6   : > { %v7795_v51 = vpop.permute.xlu0 %7794  ;;  %3943 = vmatpush.msra.mxu2 %v3417_v42  ;;  %3977 = vmatpush.msra.mxu3 %v3439_v33  ;;  %v3501_v42 = vld [vmem:[#allocation13 + $0x608] sm:$0xff] }
 0x5c7   : > { %v7797_v0 = vunpack.i.h.bf16 %v7795_v51  ;;  %v7796_v27 = vunpack.i.l.bf16 %v7795_v51  ;;  %v3471_v51 = vld [vmem:[#allocation13 + $0x518] sm:$0xff]  ;;  %4036 = vmatpush.msrb.mxu1 %v3501_v42 }
 0x5c8   : > { %3978 = vmatpush.msra.mxu3 %v3437_v32 }
 0x5c9   : > { %v11387_v40 = vsel %vm2330_vm6, %v7777_v28, %v7796_v27  ;;  %v11391_v37 = vsel %vm2330_vm6, %v7796_v27, %v11380_v1  ;;  %v11396_v50 = vsel %vm2330_vm6, %v7792_v63, %v7797_v0  ;;  %v11400_v9 = vsel %vm2330_vm6, %v7797_v0, %v11378_v62  ;;  %v3415_v28 = vld [vmem:[#allocation13 + $0x358] sm:$0xff]  ;;  %v3497_v63 = vld [vmem:[#allocation13 + $0x5e8] sm:$0xff] }
 0x5ca   : > { %3727 = vmatmul.f32.gmra.mxu2 %v11387_v40  ;;  %3756 = vmatmul.f32.gmra.mxu3 %v11391_v37  ;;  %v3469_v0 = vld [vmem:[#allocation13 + $0x508] sm:$0xff] }
 0x5cb   : > { %3782 = vmatmul.f32.gmra.mxu0 %v11396_v50  ;;  %3811 = vmatmul.f32.gmra.mxu1 %v11400_v9 }
 0x5cc   : > { %3944 = vmatpush.msra.mxu2 %v3415_v28  ;;  %3993 = vmatpush.msrb.mxu0 %v3497_v63 }
 0x5cd   : > { %4453 = vrot.lane.b32.xlu2 %v11372_v5, %s8106_s28 }
 0x5ce   : > { %3945 = vmatpush.msra.mxu2 %v3413_v47  ;;  %3994 = vmatpush.msrb.mxu0 %v3495_v3 }
 0x5d0   : > { %3946 = vmatpush.msra.mxu2 %v3411_v60  ;;  %3995 = vmatpush.msrb.mxu0 %v3493_v30 }
 0x5d2   : > { %7365 = vmatmul.msk.f32.vlgmr.msrb.gmra.mxu2 %vm2793_vm14, %v11311_v15  ;;  %3863 = vmatmul.f32.vlgmr.msrb.gmra.mxu3 %v11145_v7  ;;  %v3485_v7 = vld [vmem:[#allocation13 + $0x588] sm:$0xff] }
 0x5d3   : > { %3947 = vmatpush.msra.mxu2 %v3409_v23  ;;  %3996 = vmatpush.msrb.mxu0 %v3491_v56 }
 0x5d5   : > { %3948 = vmatpush.msra.mxu2 %v3407_v13  ;;  %3997 = vmatpush.msrb.mxu0 %v3489_v53 }
 0x5d6   : > { %4087 = vrot.lane.b32.xlu2 %v11376_v29, %s8118_s15 }
 0x5d7   : > { %3949 = vmatpush.msra.mxu2 %v3405_v26  ;;  %3998 = vmatpush.msrb.mxu0 %v3487_v12 }
 0x5d9   : > { %3999 = vmatpush.msrb.mxu0 %v3485_v7 }
 0x5da   : > { %v3585_v49 = vpop.permute.xlu0 %3584  ;;  %v3587_v57 = vpop.permute.xlu1 %3586  ;;  %7366 = vmatmul.msk.f32.gmra.mxu2 %vm2793_vm14, %v11348_v45  ;;  %3866 = vmatmul.f32.gmra.mxu3 %v11256_v38  ;;  %v3475_v38 = vld [vmem:[#allocation13 + $0x538] sm:$0xff] }
 0x5db   : > { %v3610_v46 = vsel %vm2330_vm6, %v11380_v1, %v3585_v49  ;;  %v3611_v25 = vsel %vm2330_vm6, %v3585_v49, %v3587_v57  ;;  %4000 = vmatpush.msrb.mxu0 %v3483_v58  ;;  %v11461_v1 = vld [vmem:[#allocation4] sm:$0xff]  ;;  %vm4215_vm6 = vcmask 113664  }
 0x5dc   : > { %3785 = vmatmul.f32.gmra.mxu0 %v3610_v46  ;;  %3814 = vmatmul.f32.gmra.mxu1 %v3611_v25 }
 0x5dd   : > { %4001 = vmatpush.msrb.mxu0 %v3481_v16 }
 0x5df   : > { %4002 = vmatpush.msrb.mxu0 %v3479_v55 }
 0x5e1   : > { %4003 = vmatpush.msrb.mxu0 %v3477_v18 }
 0x5e2   : > { %7367 = vmatmul.msk.f32.gmra.mxu2 %vm2793_vm14, %v11378_v62  ;;  %3869 = vmatmul.f32.gmra.mxu3 %v11278_v34 }
 0x5e3   : > { %4004 = vmatpush.msrb.mxu0 %v3475_v38 }
 0x5e4   : > { %3892 = vmatmul.f32.vlgmr.msra.gmra.mxu0 %v11239_v31  ;;  %3921 = vmatmul.f32.vlgmr.msra.gmra.mxu1 %v11289_v19  ;;  %v3661_v31 = vpop.f32.mrf.mxu0 }
 0x5e5   : > { %4005 = vmatpush.msrb.mxu0 %v3473_v17 }
 0x5e7   : > { %4006 = vmatpush.msrb.mxu0 %v3471_v51 }
 0x5e9   : > { %4007 = vmatpush.msrb.mxu0 %v3469_v0 }
 0x5ea   : > { %7368 = vmatmul.msk.f32.gmra.mxu2 %vm2793_vm14, %v3587_v57  ;;  %3872 = vmatmul.f32.gmra.mxu3 %v11302_v24 }
 0x5ec   : > { %3895 = vmatmul.f32.gmra.mxu0 %v11261_v59  ;;  %3924 = vmatmul.f32.gmra.mxu1 %v11316_v35  ;;  %v3690_v59 = vpop.f32.mrf.mxu1  ;;  %v3664_v34 = vpop.f32.mrf.mxu0 }
 0x5ed   : > { %v11476_v55 = vpop.permute.xlu0 %4351 }
 0x5f2   : > { %3950 = vmatmul.f32.vlgmr.msra.gmra.mxu2 %v11292_v52  ;;  %3979 = vmatmul.f32.vlgmr.msra.gmra.mxu3 %v11319_v36 }
 0x5f4   : > { %3898 = vmatmul.f32.gmra.mxu0 %v11284_v20  ;;  %3927 = vmatmul.f32.gmra.mxu1 %v11335_v6  ;;  %v3693_v20 = vpop.f32.mrf.mxu1  ;;  %v3667_v52 = vpop.f32.mrf.mxu0 }
 0x5f5   : > { %v3719_v24 = vpop.f32.mrf.mxu2  ;;  %v3694_v41 = vadd.f32 %v3693_v20, %v3664_v34 }
 0x5fa   : > { %3953 = vmatmul.f32.gmra.mxu2 %v11340_v43  ;;  %3982 = vmatmul.f32.gmra.mxu3 %v11360_v2  ;;  %v3691_v2 = vadd.f32 %v3690_v59, %v3661_v31 }
 0x5fc   : > { %3901 = vmatmul.f32.gmra.mxu0 %v11307_v8  ;;  %3930 = vmatmul.f32.gmra.mxu1 %v11387_v40  ;;  %v3696_v19 = vpop.f32.mrf.mxu1  ;;  %v3748_v8 = vpop.f32.mrf.mxu3  ;;  %v3720_v27 = vadd.f32 %v3719_v24, %v3691_v2 }
 0x5fd   : > { %v3697_v48 = vadd.f32 %v3696_v19, %v3667_v52 }
 0x602   : > { %3956 = vmatmul.f32.gmra.mxu2 %v11355_v10  ;;  %3985 = vmatmul.f32.gmra.mxu3 %v11396_v50 }
 0x604   : > { %4008 = vmatmul.f32.vlgmr.msrb.gmra.mxu0 %v11323_v54  ;;  %7369 = vmatmul.msk.f32.vlgmr.msrb.gmra.mxu1 %vm2793_vm14, %v11311_v15  ;;  %v3670_v15 = vpop.f32.mrf.mxu0  ;;  %v3699_v35 = vpop.f32.mrf.mxu1 }
 0x605   : > { %v3700_v12 = vadd.f32 %v3699_v35, %v3670_v15 }
 0x60a   : > { %3959 = vmatmul.f32.gmra.mxu2 %v11391_v37  ;;  %3988 = vmatmul.f32.gmra.mxu3 %v3610_v46  ;;  %v3722_v36 = vpop.f32.mrf.mxu2 }
 0x60b   : > { %v3723_v63 = vadd.f32 %v3722_v36, %v3694_v41 }
 0x60c   : > { %4011 = vmatmul.f32.gmra.mxu0 %v11364_v61  ;;  %7370 = vmatmul.msk.f32.gmra.mxu1 %vm2793_vm14, %v11348_v45  ;;  %v3777_v6 = vpop.f32.mrf.mxu0  ;;  %v3806_v43 = vpop.f32.mrf.mxu1 }
 0x614   : > { %4014 = vmatmul.f32.gmra.mxu0 %v11400_v9  ;;  %7371 = vmatmul.msk.f32.gmra.mxu1 %vm2793_vm14, %v11378_v62  ;;  %v4350_v62 = vpop.permute.xlu2 %4349  ;;  %v3749_v9 = vadd.f32 %v3748_v8, %v3720_v27 }
 0x615   : > { %v11464_v40 = vmul.f32 %v11461_v1, %v4350_v62  ;;  %v11482_v38 = vsel %vm13869_vm3, %v4350_v62, %v11476_v55 }
 0x616   : > { %v3778_v22 = vadd.f32 %v3777_v6, %v3749_v9 }
 0x617   : > { %4399 = vrot.lane.b32.xlu0 %v11464_v40, %s8106_s28  ;;  %4393 = vrot.lane.b32.xlu2 %v11464_v40, %s8106_s28 }
 0x618   : > { %v3807_v11 = vadd.f32 %v3806_v43, %v3778_v22 }
 0x61c   : > { %4017 = vmatmul.f32.gmra.mxu0 %v3611_v25  ;;  %7372 = vmatmul.msk.f32.gmra.mxu1 %vm2793_vm14, %v3587_v57 }
 0x625   : > { %v3751_v54 = vpop.f32.mrf.mxu3  ;;  %v3725_v45 = vpop.f32.mrf.mxu2 }
 0x626   : > { %v3752_v3 = vadd.f32 %v3751_v54, %v3723_v63  ;;  %v3726_v56 = vadd.f32 %v3725_v45, %v3697_v48 }
 0x637   : > { %v3780_v61 = vpop.f32.mrf.mxu0 }
 0x638   : > { %v3809_v29 = vpop.f32.mrf.mxu1  ;;  %v3781_v21 = vadd.f32 %v3780_v61, %v3752_v3 }
 0x63a   : > { %v3810_v13 = vadd.f32 %v3809_v29, %v3781_v21 }
 0x63d   : > { %v3754_v10 = vpop.f32.mrf.mxu3 }
 0x63e   : > { %v3755_v26 = vadd.f32 %v3754_v10, %v3726_v56 }
 0x648   : > { %v3783_v4 = vpop.f32.mrf.mxu0  ;;  %v3812_v28 = vpop.f32.mrf.mxu1 }
 0x649   : > { %v3784_v7 = vadd.f32 %v3783_v4, %v3755_v26 }
 0x64b   : > { %v3813_v46 = vadd.f32 %v3812_v28, %v3784_v7 }
 0x64d   : > { %v3728_v37 = vpop.f32.mrf.mxu2  ;;  %v3757_v50 = vpop.f32.mrf.mxu3 }
 0x64e   : > { %v3729_v58 = vadd.f32 %v3728_v37, %v3700_v12 }
 0x650   : > { %v3758_v44 = vadd.f32 %v3757_v50, %v3729_v58 }
 0x655   : > { %v3835_v47 = vpop.f32.mrf.mxu2  ;;  %v3864_v14 = vpop.f32.mrf.mxu3 }
 0x656   : > { %v11470_v60 = vadd.f32 %v3835_v47, %v3807_v11 }
 0x658   : > { %4058 = vst [vmem:[#allocation4 + $0x8] sm:$0xff] %v11470_v60 }
 0x659   : > { %v3786_v30 = vpop.f32.mrf.mxu0  ;;  %v3815_v23 = vpop.f32.mrf.mxu1 }
 0x65a   : > { %v3787_v17 = vadd.f32 %v3786_v30, %v3758_v44 }
 0x65c   : > { %v3816_v31 = vadd.f32 %v3815_v23, %v3787_v17 }
 0x65d   : > { %v3838_v33 = vpop.f32.mrf.mxu2  ;;  %v3867_v53 = vpop.f32.mrf.mxu3 }
 0x65e   : > { %v11473_v32 = vadd.f32 %v3838_v33, %v3810_v13 }
 0x660   : > { %4061 = vst [vmem:[#allocation4 + $0x20] sm:$0xff] %v11473_v32  ;;  %v4361_v61 = vmul.f32 %v11482_v38, %v11473_v32 }
 0x661   : > { %v3893_v49 = vpop.f32.mrf.mxu0  ;;  %v3922_v57 = vpop.f32.mrf.mxu1 }
 0x662   : > { %v3894_v15 = vadd.f32 %v3893_v49, %v3864_v14 }
 0x664   : > { %v3923_v6 = vadd.f32 %v3922_v57, %v3894_v15  ;;  %v4358_v15 = vmul.f32 %v11482_v38, %v11470_v60 }
 0x665   : > { %v3841_v25 = vpop.f32.mrf.mxu2  ;;  %v3870_v16 = vpop.f32.mrf.mxu3 }
 0x666   : > { %v11478_v18 = vadd.f32 %v3841_v25, %v3813_v46 }
 0x668   : > { %4063 = vst [vmem:[#allocation4 + $0x38] sm:$0xff] %v11478_v18  ;;  %v4364_v51 = vmul.f32 %v11482_v38, %v11478_v18 }
 0x669   : > { %v3896_v42 = vpop.f32.mrf.mxu0  ;;  %v3925_v0 = vpop.f32.mrf.mxu1 }
 0x66a   : > { %4395 = vrot.lane.b32.xlu0 %v4364_v51, %s8106_s28  ;;  %v3897_v10 = vadd.f32 %v3896_v42, %v3867_v53  ;;  %v4256_v42 = vpop.permute.xlu1 %4255 }
 0x66c   : > { %v3926_v62 = vadd.f32 %v3925_v0, %v3897_v10  ;;  %v11521_v0 = vpop.permute.xlu2 %4257 }
 0x66d   : > { %v3844_v59 = vpop.f32.mrf.mxu2  ;;  %v3873_v20 = vpop.f32.mrf.mxu3 }
 0x66e   : > { %v11488_v34 = vadd.f32 %v3844_v59, %v3816_v31  ;;  %v4260_v31 = vsel %vm4259_vm0, %v4256_v42, %v11521_v0 }
 0x670   : > { %4065 = vst [vmem:[#allocation4 + $0x50] sm:$0xff] %v11488_v34  ;;  %v4367_v19 = vmul.f32 %v11482_v38, %v11488_v34 }
 0x671   : > { %v3899_v52 = vpop.f32.mrf.mxu0  ;;  %v3928_v24 = vpop.f32.mrf.mxu1 }
 0x672   : > { %4401 = vrot.lane.b32.xlu1 %v4367_v19, %s8106_s28  ;;  %4387 = vrot.lane.b32.xlu0 %v11464_v40, %s8106_s28  ;;  %v3900_v4 = vadd.f32 %v3899_v52, %v3870_v16  ;;  %v4267_v19 = vmul.f32 %v11461_v1, %v4256_v42  ;;  %v4274_v52 = vmul.f32 %v4260_v31, %v11488_v34 }
 0x674   : > { %v3929_v47 = vadd.f32 %v3928_v24, %v3900_v4  ;;  %v4523_v24 = vpop.permute.xlu1 %4522 }
 0x675   : > { %v3951_v8 = vpop.f32.mrf.mxu2  ;;  %v3980_v35 = vpop.f32.mrf.mxu3 }
 0x676   : > { %v3952_v43 = vadd.f32 %v3951_v8, %v3923_v6  ;;  %v4521_v8 = vpop.permute.xlu0 %4520 }
 0x677   : > { %v4529_v6 = vmul.f32 %v4521_v8, %v11473_v32  ;;  %v4531_v38 = vmul.f32 %v4521_v8, %v11478_v18 }
 0x678   : > { %v3981_v2 = vadd.f32 %v3980_v35, %v3952_v43  ;;  %v4524_v35 = vsel %vm4312_vm1, %v4521_v8, %v4523_v24 }
 0x679   : > { %v3902_v36 = vpop.f32.mrf.mxu0  ;;  %v3931_v54 = vpop.f32.mrf.mxu1 }
 0x67a   : > { %4607 = vrot.lane.b32.xlu1 %v11488_v34, %s8119_s16  ;;  %v3903_v48 = vadd.f32 %v3902_v36, %v3873_v20  ;;  %v4271_v20 = vmul.f32 %v4260_v31, %v11478_v18 }
 0x67c   : > { %v3932_v26 = vadd.f32 %v3931_v54, %v3903_v48 }
 0x67d   : > { %v3954_v45 = vpop.f32.mrf.mxu2  ;;  %v3983_v50 = vpop.f32.mrf.mxu3 }
 0x67e   : > { %v3955_v9 = vadd.f32 %v3954_v45, %v3926_v62  ;;  %v11561_v45 = vpop.permute.xlu2 %4453  ;;  %v4456_v10 = vpop.permute.xlu0 %4455 }
 0x67f   : > { %v4457_v62 = vsel %vm1632_vm4, %v11561_v45, %v4456_v10 }
 0x680   : > { %v3984_v41 = vadd.f32 %v3983_v50, %v3955_v9 }
 0x681   : > { %v4009_v29 = vpop.f32.mrf.mxu0  ;;  %v4038_v27 = vpop.f32.mrf.mxu1 }
 0x682   : > { %v4010_v37 = vadd.f32 %v4009_v29, %v3981_v2  ;;  %4389 = vrot.lane.b32.xlu1 %v4361_v61, %s8106_s28  ;;  %v4533_v2 = vmul.f32 %v4521_v8, %v11488_v34  ;;  %v4265_v61 = vmul.f32 %v4260_v31, %v11470_v60 }
 0x684   : > { %v4039_v22 = vadd.f32 %v4038_v27, %v4010_v37  ;;  %v4268_v37 = vmul.f32 %v4260_v31, %v11473_v32 }
 0x685   : > { %v3957_v28 = vpop.f32.mrf.mxu2  ;;  %v3986_v30 = vpop.f32.mrf.mxu3 }
 0x686   : > { %4060 = vst.msk [vmem:[#allocation4 + $0x10] sm:$0xff] %vm4059_vm15, %v4039_v22  ;;  %v3958_v3 = vadd.f32 %v3957_v28, %v3929_v47  ;;  %v11569_v29 = vpop.permute.xlu2 %4087  ;;  %v4086_v22 = vpop.permute.xlu1 %4085  ;;  %v4466_v47 = vmul.f32 %v11561_v45, %v11488_v34 }
 0x688   : > { %v3987_v56 = vadd.f32 %v3986_v30, %v3958_v3  ;;  %v4527_v30 = vmul.f32 %v4521_v8, %v11470_v60 }
 0x689   : > { %v4012_v11 = vpop.f32.mrf.mxu0  ;;  %v4041_v63 = vpop.f32.mrf.mxu1 }
 0x68a   : > { %v4013_v14 = vadd.f32 %v4012_v11, %v3984_v41  ;;  %4381 = vrot.lane.b32.xlu1 %v11464_v40, %s8106_s28  ;;  %v4400_v27 = vpop.permute.xlu0 %4399  ;;  %v4464_v41 = vmul.f32 %v11561_v45, %v11478_v18 }
 0x68c   : > { %v4042_v21 = vadd.f32 %v4041_v63, %v4013_v14 }
 0x68d   : > { %v4430_v23 = vld [vmem:[#allocation4 + $0x10] sm:$0xff]  ;;  %v3960_v13 = vpop.f32.mrf.mxu2  ;;  %v3989_v58 = vpop.f32.mrf.mxu3 }
 0x68e   : > { %4062 = vst.msk [vmem:[#allocation4 + $0x28] sm:$0xff] %vm4059_vm15, %v4042_v21  ;;  %v3961_v7 = vadd.f32 %v3960_v13, %v3932_v26  ;;  %v11554_v43 = vld [vmem:[#allocation4 + $0x10] sm:$0xff]  ;;  %v4394_v9 = vpop.permute.xlu2 %4393  ;;  %v4103_v21 = vmul.f32 %v11461_v1, %v4086_v22 }
 0x68f   : > { %4438 = vst.msk [vmem:[#allocation5 + $0x108] sm:$0xff] %vm4059_vm15, %v4430_v23  ;;  %v4528_v4 = vmul.f32 %v4524_v35, %v11554_v43  ;;  %v4461_v13 = vmul.f32 %v4457_v62, %v11554_v43  ;;  %v4359_v8 = vmul.f32 %v11554_v43, %v11476_v55 }
 0x690   : > { %v3990_v46 = vadd.f32 %v3989_v58, %v3961_v7 }
 0x691   : > { %v4015_v33 = vpop.f32.mrf.mxu0  ;;  %v4044_v53 = vpop.f32.mrf.mxu1 }
 0x692   : > { %v4016_v12 = vadd.f32 %v4015_v33, %v3987_v56 }
 0x694   : > { %v4045_v49 = vadd.f32 %v4044_v53, %v4016_v12 }
 0x695   : > { %v11506_v57 = vld [vmem:[#allocation4 + $0x28] sm:$0xff] }
 0x696   : > { %v4432_v40 = vld [vmem:[#allocation4 + $0x28] sm:$0xff]  ;;  %4064 = vst.msk [vmem:[#allocation4 + $0x40] sm:$0xff] %vm4059_vm15, %v4045_v49  ;;  %4601 = vrot.lane.b32.xlu1 %v11506_v57, %s8119_s16  ;;  %v4530_v63 = vmul.f32 %v4524_v35, %v11506_v57  ;;  %v4463_v53 = vmul.f32 %v4457_v62, %v11506_v57  ;;  %v4090_v49 = vsel %vm4089_vm5, %v4086_v22, %v11569_v29 }
 0x697   : > { %4440 = vst.msk [vmem:[#allocation5 + $0x118] sm:$0xff] %vm4059_vm15, %v4432_v40  ;;  %v4095_v58 = vmul.f32 %v4090_v49, %v11470_v60  ;;  %v4104_v24 = vmul.f32 %v4090_v49, %v11488_v34 }
 0x699   : > { %v4018_v25 = vpop.f32.mrf.mxu0  ;;  %v4047_v44 = vpop.f32.mrf.mxu1 }
 0x69a   : > { %v4019_v16 = vadd.f32 %v4018_v25, %v3990_v46 }
 0x69c   : > { %v4048_v17 = vadd.f32 %v4047_v44, %v4019_v16  ;;  %v4462_v16 = vmul.f32 %v11561_v45, %v11473_v32  ;;  %v4101_v44 = vmul.f32 %v4090_v49, %v11478_v18 }
 0x69d   : > { %v11512_v51 = vld [vmem:[#allocation4 + $0x40] sm:$0xff] }
 0x69e   : > { %4066 = vst.msk [vmem:[#allocation4 + $0x58] sm:$0xff] %vm4059_vm15, %v4048_v17  ;;  %4605 = vrot.lane.b32.xlu0 %v11512_v51, %s8119_s16  ;;  %4595 = vrot.lane.b32.xlu1 %v11470_v60, %s8119_s16  ;;  %v4532_v36 = vmul.f32 %v11512_v51, %v4524_v35  ;;  %v4465_v40 = vmul.f32 %v11512_v51, %v4457_v62 }
 0x69f   : > { %4442 = vst.msk [vmem:[#allocation5 + $0x128] sm:$0xff] %vm4059_vm15, %v11512_v51  ;;  %v4272_v22 = vmul.f32 %v11512_v51, %v11521_v0 }
 0x6a5   : > { %v11525_v59 = vld [vmem:[#allocation4 + $0x58] sm:$0xff] }
 0x6a6   : > { %4609 = vrot.lane.b32.xlu2 %v11525_v59, %s8119_s16  ;;  %4599 = vrot.lane.b32.xlu0 %v11473_v32, %s8119_s16  ;;  %4444 = vst.msk [vmem:[#allocation5 + $0x138] sm:$0xff] %vm4059_vm15, %v11525_v59  ;;  %v4534_v54 = vmul.f32 %v11525_v59, %v4524_v35  ;;  %v4467_v50 = vmul.f32 %v11525_v59, %v4457_v62 }
 0x6a7   : > { %4302 = vrot.lane.b32.xlu1 %v4271_v20, %s8117_s27  ;;  %v4368_v17 = vmul.f32 %v11525_v59, %v11476_v55 }
 0x6ae   : > { %4603 = vrot.lane.b32.xlu2 %v11478_v18, %s8119_s16  ;;  %4308 = vrot.lane.b32.xlu0 %v4274_v52, %s8117_s27 }
 0x6af   : > { %4294 = vrot.lane.b32.xlu1 %v4267_v19, %s8117_s27 }
 0x6b6   : > { %4383 = vrot.lane.b32.xlu2 %v4358_v15, %s8106_s28  ;;  %4300 = vrot.lane.b32.xlu0 %v4267_v19, %s8117_s27 }
 0x6b7   : > { %4553 = vrot.lane.b32.xlu1 %v4532_v36, %s8116_s22 }
 0x6be   : > { %4306 = vrot.lane.b32.xlu2 %v4267_v19, %s8117_s27  ;;  %4557 = vrot.lane.b32.xlu0 %v4534_v54, %s8116_s22 }
 0x6bf   : > { %4547 = vrot.lane.b32.xlu1 %v4529_v6, %s8116_s22  ;;  %v4269_v6 = vmul.f32 %v11506_v57, %v11521_v0 }
 0x6c6   : > { %4597 = vrot.lane.b32.xlu2 %v11554_v43, %s8119_s16  ;;  %4551 = vrot.lane.b32.xlu0 %v4531_v38, %s8116_s22 }
 0x6c7   : > { %4211 = vrot.lane.b32.xlu1 %v11488_v34, %s8120_s17 }
 0x6ce   : > { %4555 = vrot.lane.b32.xlu2 %v4533_v2, %s8116_s22  ;;  %4290 = vrot.lane.b32.xlu0 %v4265_v61, %s8117_s27 }
 0x6cf   : > { %4203 = vrot.lane.b32.xlu1 %v11461_v1, %s8120_s17 }
 0x6d6   : > { %4296 = vrot.lane.b32.xlu2 %v4268_v37, %s8117_s27  ;;  %4209 = vrot.lane.b32.xlu0 %v11461_v1, %s8120_s17 }
 0x6d7   : > { %4490 = vrot.lane.b32.xlu1 %v4467_v50, %s8105_s18 }
 0x6dc   : > { %v11580_v28 = vpop.permute.xlu0 %4395 }
 0x6dd   : > { %v4409_v11 = vsel %vm1632_vm4, %v4394_v9, %v11580_v28 }
 0x6de   : > { %4288 = vrot.lane.b32.xlu2 %v4267_v19, %s8117_s27  ;;  %4545 = vrot.lane.b32.xlu0 %v4528_v4, %s8116_s22 }
 0x6df   : > { %4484 = vrot.lane.b32.xlu1 %v4464_v41, %s8105_s18 }
 0x6e4   : > { %v11592_v14 = vpop.permute.xlu1 %4401  ;;  %v4388_v48 = vpop.permute.xlu0 %4387 }
 0x6e5   : > { %v4411_v3 = vsel %vm1632_vm4, %v4400_v27, %v11592_v14  ;;  %v4098_v27 = vmul.f32 %v4090_v49, %v11473_v32 }
 0x6e6   : > { %4549 = vrot.lane.b32.xlu2 %v4530_v63, %s8116_s22  ;;  %4488 = vrot.lane.b32.xlu0 %v4466_v47, %s8105_s18 }
 0x6e7   : > { %4193 = vrot.lane.b32.xlu1 %v11470_v60, %s8120_s17  ;;  %4868 = vmatpush.msrb.mxu2 %v4411_v3  ;;  %v4365_v3 = vmul.f32 %v11512_v51, %v11476_v55 }
 0x6e9   : > { %4869 = vmatpush.msrb.mxu2 %v4409_v11 }
 0x6ec   : > { %v4608_v23 = vpop.permute.xlu1 %4607 }
 0x6ee   : > { %4543 = vrot.lane.b32.xlu2 %v4527_v30, %s8116_s22  ;;  %4199 = vrot.lane.b32.xlu0 %v11473_v32, %s8120_s17  ;;  %s8128_s22 = smov 49  }
 0x6ef   : > { %4136 = vrot.lane.b32.xlu1 %v4103_v21, %s8121_s14 }
 0x6f4   : > { %v11606_v56 = vpop.permute.xlu1 %4389 }
 0x6f5   : > { %v4407_v33 = vsel %vm1632_vm4, %v4388_v48, %v11606_v56  ;;  %v4275_v48 = vmul.f32 %v11525_v59, %v11521_v0 }
 0x6f6   : > { %4205 = vrot.lane.b32.xlu2 %v11478_v18, %s8120_s17  ;;  %4191 = vrot.lane.b32.xlu0 %v11461_v1, %s8120_s17 }
 0x6f7   : > { %4478 = vrot.lane.b32.xlu1 %v4461_v13, %s8105_s18  ;;  %4870 = vmatpush.msrb.mxu2 %v4407_v33 }
 0x6fc   : > { %v4382_v12 = vpop.permute.xlu1 %4381 }
 0x6fe   : > { %4197 = vrot.lane.b32.xlu2 %v11461_v1, %s8120_s17  ;;  %4482 = vrot.lane.b32.xlu0 %v4463_v53, %s8105_s18  ;;  %v4460_v1 = vmul.f32 %v11561_v45, %v11470_v60 }
 0x6ff   : > { %4124 = vrot.lane.b32.xlu1 %v4103_v21, %s8121_s14 }
 0x700   : > { %v4610_v26 = vpop.permute.xlu2 %4609 }
 0x701   : > { %v4615_v7 = vsel %vm4611_vm2, %v4608_v23, %v4610_v26  ;;  %4631 = vst.msk [vmem:[#allocation5 + $0x1f8] sm:$0xff] %vm4059_vm15, %v4610_v26 }
 0x702   : > { %4909 = vmatpush.msrb.mxu3 %v4615_v7 }
 0x706   : > { %4486 = vrot.lane.b32.xlu2 %v4465_v40, %s8105_s18  ;;  %4476 = vrot.lane.b32.xlu0 %v4460_v1, %s8105_s18 }
 0x707   : > { %4120 = vrot.lane.b32.xlu1 %v4095_v58, %s8121_s14 }
 0x708   : > { %v4604_v46 = vpop.permute.xlu2 %4603  ;;  %v4602_v25 = vpop.permute.xlu1 %4601 }
 0x709   : > { %4627 = vst.msk [vmem:[#allocation5 + $0x1d8] sm:$0xff] %vm4059_vm15, %v4602_v25 }
 0x70e   : > { %4480 = vrot.lane.b32.xlu2 %v4462_v16, %s8105_s18  ;;  %4132 = vrot.lane.b32.xlu0 %v4101_v44, %s8121_s14  ;;  %v4105_v44 = vmul.f32 %v11525_v59, %v11569_v29 }
 0x70f   : > { %4403 = vrot.lane.b32.xlu1 %v4368_v17, %s8106_s28 }
 0x710   : > { %v4606_v42 = vpop.permute.xlu0 %4605  ;;  %v11641_v31 = vpop.permute.xlu2 %4383 }
 0x711   : > { %v4614_v20 = vsel %vm4611_vm2, %v4604_v46, %v4606_v42  ;;  %4629 = vst.msk [vmem:[#allocation5 + $0x1e8] sm:$0xff] %vm4059_vm15, %v4606_v42  ;;  %v4405_v19 = vsel %vm1632_vm4, %v4382_v12, %v11641_v31  ;;  %v4596_v52 = vpop.permute.xlu1 %4595  ;;  %v4266_v12 = vmul.f32 %v11554_v43, %v11521_v0 }
 0x712   : > { %4871 = vmatpush.msrb.mxu2 %v4405_v19  ;;  %4910 = vmatpush.msrb.mxu3 %v4614_v20 }
 0x716   : > { %4118 = vrot.lane.b32.xlu0 %v4103_v21, %s8121_s14  ;;  %4138 = vrot.lane.b32.xlu2 %v4104_v24, %s8121_s14 }
 0x717   : > { %4385 = vrot.lane.b32.xlu1 %v4359_v8, %s8106_s28 }
 0x718   : > { %v4600_v15 = vpop.permute.xlu0 %4599  ;;  %v4307_v35 = vpop.permute.xlu2 %4306 }
 0x719   : > { %v4613_v36 = vsel %vm4611_vm2, %v4600_v15, %v4602_v25  ;;  %v11654_v54 = vpop.permute.xlu1 %4302 }
 0x71a   : > { %4911 = vmatpush.msrb.mxu3 %v4613_v36 }
 0x71e   : > { %4642 = vrot.lane.b32.xlu0 %v11415_v39, %s8121_s14  ;;  %4130 = vrot.lane.b32.xlu2 %v4103_v21, %s8121_s14  ;;  %v4362_v39 = vmul.f32 %v11506_v57, %v11476_v55 }
 0x71f   : > { %4298 = vrot.lane.b32.xlu1 %v4269_v6, %s8117_s27 }
 0x720   : > { %v4598_v38 = vpop.permute.xlu2 %4597  ;;  %v11662_v45 = vpop.permute.xlu0 %4308 }
 0x721   : > { %v4612_v10 = vsel %vm4611_vm2, %v4596_v52, %v4598_v38  ;;  %4625 = vst.msk [vmem:[#allocation5 + $0x1c8] sm:$0xff] %vm4059_vm15, %v4598_v38  ;;  %v4319_v2 = vsel %vm4312_vm1, %v4307_v35, %v11662_v45  ;;  %v4295_v61 = vpop.permute.xlu1 %4294 }
 0x722   : > { %4872 = vmatpush.msrb.mxu2 %v4319_v2  ;;  %4912 = vmatpush.msrb.mxu3 %v4612_v10 }
 0x726   : > { %4391 = vrot.lane.b32.xlu0 %v4362_v39, %s8106_s28  ;;  %4126 = vrot.lane.b32.xlu2 %v4098_v27, %s8121_s14 }
 0x727   : > { %4207 = vrot.lane.b32.xlu1 %v11512_v51, %s8120_s17 }
 0x728   : > { %v4556_v62 = vpop.permute.xlu2 %4555  ;;  %v4301_v37 = vpop.permute.xlu0 %4300 }
 0x729   : > { %v4317_v50 = vsel %vm4312_vm1, %v4301_v37, %v11654_v54  ;;  %v4554_v9 = vpop.permute.xlu1 %4553 }
 0x72a   : > { %4873 = vmatpush.msrb.mxu2 %v4317_v50  ;;  %4576 = vst.msk [vmem:[#allocation5 + $0x1a8] sm:$0xff] %vm4059_vm15, %v4554_v9 }
 0x72e   : > { %4304 = vrot.lane.b32.xlu0 %v4272_v22, %s8117_s27  ;;  %4640 = vrot.lane.b32.xlu2 %v11372_v5, %s8121_s14 }
 0x730   : > { %v11683_v4 = vpop.permute.xlu2 %4296  ;;  %v4558_v41 = vpop.permute.xlu0 %4557 }
 0x731   : > { %v4315_v11 = vsel %vm4312_vm1, %v4295_v61, %v11683_v4  ;;  %v4562_v63 = vsel %vm4259_vm0, %v4556_v62, %v4558_v41  ;;  %4578 = vst.msk [vmem:[#allocation5 + $0x1b8] sm:$0xff] %vm4059_vm15, %v4558_v41  ;;  %v4548_v47 = vpop.permute.xlu1 %4547 }
 0x732   : > { %4874 = vmatpush.msrb.mxu2 %v4315_v11  ;;  %4913 = vmatpush.msrb.mxu3 %v4562_v63 }
 0x736   : > { %4213 = vrot.lane.b32.xlu0 %v11525_v59, %s8120_s17  ;;  %4397 = vrot.lane.b32.xlu2 %v4365_v3, %s8106_s28  ;;  %s8130_s28 = smov 16  }
 0x738   : > { %v4289_v5 = vpop.permute.xlu2 %4288  ;;  %v4552_v21 = vpop.permute.xlu0 %4551 }
 0x739   : > { %v4561_v30 = vsel %vm4259_vm0, %v4552_v21, %v4554_v9  ;;  %v11695_v23 = vpop.permute.xlu1 %4211 }
 0x73a   : > { %4914 = vmatpush.msrb.mxu3 %v4561_v30 }
 0x73e   : > { %4195 = vrot.lane.b32.xlu0 %v11554_v43, %s8120_s17  ;;  %4310 = vrot.lane.b32.xlu2 %v4275_v48, %s8117_s27  ;;  %v4786_v48 = vld [vmem:[#allocation5 + $0x1f8] sm:$0xff] }
 0x740   : > { %v4550_v55 = vpop.permute.xlu2 %4549  ;;  %v11702_v13 = vpop.permute.xlu0 %4290 }
 0x741   : > { %v4560_v33 = vsel %vm4259_vm0, %v4548_v47, %v4550_v55  ;;  %4574 = vst.msk [vmem:[#allocation5 + $0x198] sm:$0xff] %vm4059_vm15, %v4550_v55  ;;  %v4313_v53 = vsel %vm4312_vm1, %v4289_v5, %v11702_v13  ;;  %v4204_v26 = vpop.permute.xlu1 %4203 }
 0x742   : > { %4875 = vmatpush.msrb.mxu2 %v4313_v53  ;;  %4915 = vmatpush.msrb.mxu3 %v4560_v33  ;;  %v4784_v33 = vld [vmem:[#allocation5 + $0x1e8] sm:$0xff]  ;;  %v11783_v53 = vld [vmem:[%s13621_s4 + $0x20] sm:$0xff] }
 0x746   : > { %4292 = vrot.lane.b32.xlu2 %v4266_v12, %s8117_s27 }
 0x748   : > { %v4544_v7 = vpop.permute.xlu2 %4543  ;;  %v4210_v49 = vpop.permute.xlu0 %4209 }
 0x749   : > { %v4222_v40 = vsel %vm4215_vm6, %v4210_v49, %v11695_v23  ;;  %v4491_v1 = vpop.permute.xlu1 %4490 }
 0x74a   : > { %4876 = vmatpush.msrb.mxu2 %v4222_v40  ;;  %4511 = vst.msk [vmem:[#allocation5 + $0x178] sm:$0xff] %vm4059_vm15, %v4491_v1 }
 0x74e   : > { %4201 = vrot.lane.b32.xlu2 %v11506_v57, %s8120_s17  ;;  %s8129_s17 = smov 87  }
 0x750   : > { %v11716_v58 = vpop.permute.xlu2 %4205  ;;  %v4546_v46 = vpop.permute.xlu0 %4545 }
 0x751   : > { %v4220_v0 = vsel %vm4215_vm6, %v4204_v26, %v11716_v58  ;;  %v4559_v25 = vsel %vm4259_vm0, %v4544_v7, %v4546_v46  ;;  %4572 = vst.msk [vmem:[#allocation5 + $0x188] sm:$0xff] %vm4059_vm15, %v4546_v46  ;;  %v4485_v16 = vpop.permute.xlu1 %4484  ;;  %v4782_v26 = vld [vmem:[#allocation5 + $0x1d8] sm:$0xff]  ;;  %v4780_v7 = vld [vmem:[#allocation5 + $0x1c8] sm:$0xff] }
 0x752   : > { %4877 = vmatpush.msrb.mxu2 %v4220_v0  ;;  %4916 = vmatpush.msrb.mxu3 %v4559_v25 }
 0x756   : > { %4140 = vrot.lane.b32.xlu2 %v4105_v44, %s8121_s14 }
 0x758   : > { %v4198_v17 = vpop.permute.xlu2 %4197  ;;  %v4489_v42 = vpop.permute.xlu0 %4488 }
 0x759   : > { %v4495_v20 = vsel %vm13869_vm3, %v4489_v42, %v4491_v1  ;;  %v11726_v19 = vpop.permute.xlu1 %4193 }
 0x75a   : > { %4917 = vmatpush.msrb.mxu3 %v4495_v20  ;;  %v4772_v20 = vld [vmem:[#allocation5 + $0x188] sm:$0xff] }
 0x760   : > { %v4487_v52 = vpop.permute.xlu2 %4486  ;;  %v11728_v24 = vpop.permute.xlu0 %4199 }
 0x761   : > { %v4494_v8 = vsel %vm13869_vm3, %v4485_v16, %v4487_v52  ;;  %4509 = vst.msk [vmem:[#allocation5 + $0x168] sm:$0xff] %vm4059_vm15, %v4487_v52  ;;  %v4218_v15 = vsel %vm4215_vm6, %v4198_v17, %v11728_v24  ;;  %v4137_v35 = vpop.permute.xlu1 %4136  ;;  %v4778_v16 = vld [vmem:[#allocation5 + $0x1b8] sm:$0xff]  ;;  %v11799_v17 = vld [vmem:[%s13621_s4 + $0x18] sm:$0xff] }
 0x762   : > { %4878 = vmatpush.msrb.mxu2 %v4218_v15  ;;  %4918 = vmatpush.msrb.mxu3 %v4494_v8 }
 0x768   : > { %v4481_v36 = vpop.permute.xlu2 %4480  ;;  %v4192_v6 = vpop.permute.xlu0 %4191 }
 0x769   : > { %v4216_v38 = vsel %vm4215_vm6, %v4192_v6, %v11726_v19  ;;  %v4479_v10 = vpop.permute.xlu1 %4478  ;;  %v4102_v6 = vmul.f32 %v11512_v51, %v11569_v29 }
 0x76a   : > { %4879 = vmatpush.msrb.mxu2 %v4216_v38  ;;  %4505 = vst.msk [vmem:[#allocation5 + $0x148] sm:$0xff] %vm4059_vm15, %v4479_v10  ;;  %v4099_v38 = vmul.f32 %v11506_v57, %v11569_v29 }
 0x770   : > { %v4483_v2 = vpop.permute.xlu0 %4482  ;;  %v11737_v61 = vpop.permute.xlu2 %4138 }
 0x771   : > { %v4493_v39 = vsel %vm13869_vm3, %v4481_v36, %v4483_v2  ;;  %4507 = vst.msk [vmem:[#allocation5 + $0x158] sm:$0xff] %vm4059_vm15, %v4483_v2  ;;  %v4149_v27 = vsel %vm4142_vm7, %v4137_v35, %v11737_v61  ;;  %v4125_v62 = vpop.permute.xlu1 %4124 }
 0x772   : > { %4880 = vmatpush.msrb.mxu2 %v4149_v27  ;;  %4919 = vmatpush.msrb.mxu3 %v4493_v39  ;;  %v4764_v39 = vld [vmem:[#allocation5 + $0x148] sm:$0xff] }
 0x778   : > { %v4477_v37 = vpop.permute.xlu0 %4476  ;;  %v4131_v50 = vpop.permute.xlu2 %4130 }
 0x779   : > { %v4492_v9 = vsel %vm13869_vm3, %v4477_v37, %v4479_v10  ;;  %v11744_v22 = vpop.permute.xlu1 %4120  ;;  %v4770_v10 = vld [vmem:[#allocation5 + $0x178] sm:$0xff] }
 0x77a   : > { %4920 = vmatpush.msrb.mxu3 %v4492_v9 }
 0x77c   : > { %4921 = vmatpush.msrb.mxu3 %v11488_v34 }
 0x77e   : > { %4922 = vmatpush.msrb.mxu3 %v11478_v18 }
 0x780   : > { %v11748_v41 = vpop.permute.xlu0 %4132  ;;  %v11750_v11 = vpop.permute.xlu2 %4126  ;;  %4923 = vmatpush.msrb.mxu3 %v11473_v32  ;;  %v11764_v32 = vld [vmem:[%s13621_s4 + $0x8] sm:$0xff] }
 0x781   : > { %v4147_v63 = vsel %vm4142_vm7, %v4131_v50, %v11748_v41  ;;  %v4145_v47 = vsel %vm4142_vm7, %v4125_v62, %v11750_v11  ;;  %v4404_v3 = vpop.permute.xlu1 %4403  ;;  %v4638_v50 = vld [vmem:[#allocation4 + $0x50] sm:$0xff] }
 0x782   : > { %v4412_v5 = vsel %vm1632_vm4, %v11592_v14, %v4404_v3  ;;  %4881 = vmatpush.msrb.mxu2 %v4147_v63  ;;  %4924 = vmatpush.msrb.mxu3 %v11470_v60  ;;  %v11774_v60 = vld [vmem:[%s13621_s4] sm:$0xff]  ;;  %v4096_v63 = vmul.f32 %v11554_v43, %v11569_v29  ;;  %v4762_v3 = vld [vmem:[#allocation5 + $0x138] sm:$0xff] }
 0x783   : > { %4428 = vst.msk [vmem:[#allocation5 + $0xf8] sm:$0xff] %vm4059_vm15, %v4412_v5  ;;  %4925 = vmatmul.f32.vlgmr.msrb.gmra.mxu3 %v11764_v32  ;;  %v4760_v5 = vld [vmem:[#allocation5 + $0x128] sm:$0xff] }
 0x784   : > { %4882 = vmatpush.msrb.mxu2 %v4145_v47  ;;  %v4634_v47 = vld [vmem:[#allocation4 + $0x20] sm:$0xff] }
 0x788   : > { %v4119_v18 = vpop.permute.xlu0 %4118  ;;  %v11767_v34 = vpop.permute.xlu2 %4640 }
 0x789   : > { %v4143_v21 = vsel %vm4142_vm7, %v4119_v18, %v11744_v22  ;;  %v4386_v14 = vpop.permute.xlu1 %4385  ;;  %v4653_v9 = vmul.f32 %v11767_v34, %v4638_v50 }
 0x78a   : > { %v4406_v30 = vsel %vm1632_vm4, %v11641_v31, %v4386_v14  ;;  %4883 = vmatpush.msrb.mxu2 %v4143_v21  ;;  %v4754_v55 = vld [vmem:[#allocation5 + $0xf8] sm:$0xff]  ;;  %v4632_v14 = vld [vmem:[#allocation4 + $0x8] sm:$0xff] }
 0x78b   : > { %4422 = vst.msk [vmem:[#allocation5 + $0xc8] sm:$0xff] %vm4059_vm15, %v4406_v30  ;;  %4991 = vmatpush.msra.mxu1 %v4754_v55  ;;  %4884 = vmatmul.f32.vlgmr.msrb.gmra.mxu2 %v11774_v60 }
 0x78c   : > { %5032 = vmatpush.msra.mxu2 %v4786_v48  ;;  %4928 = vmatmul.f32.gmra.mxu3 %v11783_v53 }
 0x78e   : > { %5033 = vmatpush.msra.mxu2 %v4784_v33  ;;  %v4636_v33 = vld [vmem:[#allocation4 + $0x38] sm:$0xff] }
 0x790   : > { %5034 = vmatpush.msra.mxu2 %v4782_v26  ;;  %v4643_v31 = vpop.permute.xlu0 %4642  ;;  %v4398_v12 = vpop.permute.xlu2 %4397  ;;  %v4756_v26 = vld [vmem:[#allocation5 + $0x108] sm:$0xff] }
 0x791   : > { %v4644_v49 = vsel %vm4142_vm7, %v11767_v34, %v4643_v31  ;;  %v4410_v40 = vsel %vm1632_vm4, %v11580_v28, %v4398_v12  ;;  %v4299_v1 = vpop.permute.xlu1 %4298  ;;  %v4776_v28 = vld [vmem:[#allocation5 + $0x1a8] sm:$0xff]  ;;  %v4651_v31 = vmul.f32 %v11767_v34, %v4636_v33  ;;  %v4647_v12 = vmul.f32 %v11767_v34, %v4632_v14 }
 0x792   : > { %5035 = vmatpush.msra.mxu2 %v4780_v7  ;;  %v4650_v46 = vmul.f32 %v4644_v49, %v11506_v57  ;;  %v4652_v0 = vmul.f32 %v4644_v49, %v11512_v51  ;;  %v4654_v25 = vmul.f32 %v4644_v49, %v11525_v59  ;;  %4426 = vst.msk [vmem:[#allocation5 + $0xe8] sm:$0xff] %vm4059_vm15, %v4410_v40  ;;  %v4774_v59 = vld [vmem:[#allocation5 + $0x198] sm:$0xff]  ;;  %v11825_v51 = vld [vmem:[%s13621_s4 + $0x30] sm:$0xff] }
 0x793   : > { %v4316_v44 = vsel %vm4312_vm1, %v11683_v4, %v4299_v1  ;;  %4887 = vmatmul.f32.gmra.mxu2 %v11799_v17  ;;  %v4766_v57 = vld [vmem:[#allocation5 + $0x158] sm:$0xff] }
 0x794   : > { %5036 = vmatpush.msra.mxu2 %v4778_v16  ;;  %4332 = vst.msk [vmem:[#allocation5 + $0x98] sm:$0xff] %vm4059_vm15, %v4316_v44  ;;  %4677 = vrot.lane.b32.xlu1 %v4654_v25, %s8118_s15  ;;  %v4706_v44 = vld [vmem:[%s13621_s4 + $0x38] sm:$0xff] }
 0x795   : > { %4673 = vrot.lane.b32.xlu0 %v4652_v0, %s8118_s15  ;;  %4669 = vrot.lane.b32.xlu2 %v4650_v46, %s8118_s15  ;;  %v4795_v46 = vld [vmem:[%s13622_s5] sm:$0xff] }
 0x796   : > { %5037 = vmatpush.msra.mxu2 %v4776_v28  ;;  %v11870_v28 = vld [vmem:[%s13621_s4 + $0x48] sm:$0xff]  ;;  %4931 = vmatmul.f32.gmra.mxu3 %v4706_v44 }
 0x798   : > { %5038 = vmatpush.msra.mxu2 %v4774_v59  ;;  %v4392_v4 = vpop.permute.xlu0 %4391  ;;  %v4311_v42 = vpop.permute.xlu2 %4310  ;;  %v4709_v59 = vld [vmem:[%s13621_s4 + $0x50] sm:$0xff] }
 0x799   : > { %v4408_v52 = vsel %vm1632_vm4, %v11606_v56, %v4392_v4  ;;  %v4320_v8 = vsel %vm4312_vm1, %v11662_v45, %v4311_v42  ;;  %v4752_v15 = vld [vmem:[#allocation5 + $0xe8] sm:$0xff]  ;;  %v4208_v35 = vpop.permute.xlu1 %4207  ;;  %v4648_v56 = vmul.f32 %v4644_v49, %v11554_v43  ;;  %v4758_v43 = vld [vmem:[#allocation5 + $0x118] sm:$0xff]  ;;  %v11879_v4 = vld [vmem:[%s13621_s4 + $0x60] sm:$0xff]  ;;  %vm4843_vm4 = vcmask 261120  }
 0x79a   : > { %5039 = vmatpush.msra.mxu2 %v4772_v20  ;;  %4424 = vst.msk [vmem:[#allocation5 + $0xd8] sm:$0xff] %vm4059_vm15, %v4408_v52  ;;  %4992 = vmatpush.msra.mxu1 %v4752_v15  ;;  %v4221_v36 = vsel %vm4215_vm6, %v11716_v58, %v4208_v35  ;;  %v4768_v45 = vld [vmem:[#allocation5 + $0x168] sm:$0xff]  ;;  %v4712_v42 = vld [vmem:[%s13621_s4 + $0x68] sm:$0xff]  ;;  %v11894_v52 = vld [vmem:[%s13621_s4 + $0x80] sm:$0xff] }
 0x79b   : > { %4336 = vst.msk [vmem:[#allocation5 + $0xb8] sm:$0xff] %vm4059_vm15, %v4320_v8  ;;  %4890 = vmatmul.f32.gmra.mxu2 %v11825_v51  ;;  %v11888_v20 = vld [vmem:[%s13621_s4 + $0x78] sm:$0xff]  ;;  %v11899_v8 = vld [vmem:[%s13621_s4 + $0x90] sm:$0xff] }
 0x79c   : > { %5040 = vmatpush.msra.mxu2 %v4770_v10  ;;  %4237 = vst.msk [vmem:[#allocation5 + $0x68] sm:$0xff] %vm4059_vm15, %v4221_v36  ;;  %4134 = vrot.lane.b32.xlu1 %v4102_v6, %s8121_s14  ;;  %v4718_v35 = vld [vmem:[%s13621_s4 + $0x98] sm:$0xff]  ;;  %v11910_v36 = vld [vmem:[%s13621_s4 + $0xa8] sm:$0xff] }
 0x79d   : > { %4128 = vrot.lane.b32.xlu0 %v4099_v38, %s8121_s14  ;;  %4665 = vrot.lane.b32.xlu2 %v4648_v56, %s8118_s15  ;;  %v4721_v38 = vld [vmem:[%s13621_s4 + $0xb0] sm:$0xff] }
 0x79e   : > { %5041 = vmatpush.msra.mxu2 %v4768_v45  ;;  %4934 = vmatmul.f32.gmra.mxu3 %v4709_v59 }
 0x7a0   : > { %5042 = vmatpush.msra.mxu2 %v4766_v57  ;;  %v4305_v58 = vpop.permute.xlu0 %4304  ;;  %v4293_v2 = vpop.permute.xlu2 %4292 }
 0x7a1   : > { %v4318_v27 = vsel %vm4312_vm1, %v11654_v54, %v4305_v58  ;;  %v4314_v62 = vsel %vm4312_vm1, %v11702_v13, %v4293_v2  ;;  %v4750_v37 = vld [vmem:[#allocation5 + $0xd8] sm:$0xff]  ;;  %v4649_v54 = vmul.f32 %v11767_v34, %v4634_v47  ;;  %v4748_v13 = vld [vmem:[#allocation5 + $0xc8] sm:$0xff] }
 0x7a2   : > { %5043 = vmatpush.msra.mxu2 %v4764_v39  ;;  %4334 = vst.msk [vmem:[#allocation5 + $0xa8] sm:$0xff] %vm4059_vm15, %v4318_v27  ;;  %4993 = vmatpush.msra.mxu1 %v4750_v37  ;;  %v4746_v18 = vld [vmem:[#allocation5 + $0xb8] sm:$0xff]  ;;  %v4701_v37 = vld [vmem:[%s13621_s4 + $0x10] sm:$0xff] }
 0x7a3   : > { %4330 = vst.msk [vmem:[#allocation5 + $0x88] sm:$0xff] %vm4059_vm15, %v4314_v62  ;;  %v4736_v0 = vld [vmem:[#allocation5 + $0x68] sm:$0xff]  ;;  %4893 = vmatmul.f32.gmra.mxu2 %v11870_v28 }
 0x7a4   : > { %5044 = vmatpush.msra.mxu2 %v4762_v3  ;;  %4675 = vrot.lane.b32.xlu1 %v4653_v9, %s8118_s15 }
 0x7a5   : > { %4122 = vrot.lane.b32.xlu0 %v4096_v63, %s8121_s14  ;;  %4667 = vrot.lane.b32.xlu2 %v4649_v54, %s8118_s15  ;;  %v4704_v54 = vld [vmem:[%s13621_s4 + $0x28] sm:$0xff] }
 0x7a6   : > { %4994 = vmatpush.msra.mxu1 %v4748_v13  ;;  %5045 = vmatpush.msra.mxu2 %v4760_v5 }
 0x7a7   : > { %4937 = vmatmul.f32.gmra.mxu3 %v4712_v42 }
 0x7a8   : > { %4995 = vmatpush.msra.mxu1 %v4746_v18  ;;  %v4214_v29 = vpop.permute.xlu0 %4213  ;;  %v4202_v21 = vpop.permute.xlu2 %4201  ;;  %5046 = vmatpush.msra.mxu2 %v4758_v43 }
 0x7a9   : > { %v4223_v30 = vsel %vm4215_vm6, %v11695_v23, %v4214_v29  ;;  %v4219_v48 = vsel %vm4215_vm6, %v11728_v24, %v4202_v21  ;;  %v4744_v55 = vld [vmem:[#allocation5 + $0xa8] sm:$0xff]  ;;  %v4742_v23 = vld [vmem:[#allocation5 + $0x98] sm:$0xff] }
 0x7aa   : > { %4239 = vst.msk [vmem:[#allocation5 + $0x78] sm:$0xff] %vm4059_vm15, %v4223_v30  ;;  %4996 = vmatpush.msra.mxu1 %v4744_v55  ;;  %5047 = vmatpush.msra.mxu2 %v4756_v26  ;;  %v4740_v24 = vld [vmem:[#allocation5 + $0x88] sm:$0xff] }
 0x7ab   : > { %4235 = vst.msk [vmem:[#allocation5 + $0x58] sm:$0xff] %vm4059_vm15, %v4219_v48  ;;  %4896 = vmatmul.f32.gmra.mxu2 %v11879_v4 }
 0x7ac   : > { %4671 = vrot.lane.b32.xlu1 %v4651_v31, %s8118_s15  ;;  %4997 = vmatpush.msra.mxu1 %v4742_v23 }
 0x7ad   : > { %4663 = vrot.lane.b32.xlu0 %v4647_v12, %s8118_s15  ;;  %s8127_s15 = smov 117  }
 0x7ae   : > { %4998 = vmatpush.msra.mxu1 %v4740_v24 }
 0x7af   : > { %4940 = vmatmul.f32.gmra.mxu3 %v11894_v52 }
 0x7b0   : > { %v4196_v7 = vpop.permute.xlu0 %4195  ;;  %v4141_v49 = vpop.permute.xlu2 %4140 }
 0x7b1   : > { %v4217_v40 = vsel %vm4215_vm6, %v11726_v19, %v4196_v7  ;;  %v4150_v1 = vsel %vm4142_vm7, %v11737_v61, %v4141_v49  ;;  %v4738_v34 = vld [vmem:[#allocation5 + $0x78] sm:$0xff] }
 0x7b2   : > { %4233 = vst.msk [vmem:[#allocation5 + $0x48] sm:$0xff] %vm4059_vm15, %v4217_v40  ;;  %4999 = vmatpush.msra.mxu1 %v4738_v34  ;;  %v4734_v25 = vld [vmem:[#allocation5 + $0x58] sm:$0xff] }
 0x7b3   : > { %4166 = vst.msk [vmem:[#allocation5 + $0x38] sm:$0xff] %vm4059_vm15, %v4150_v1  ;;  %v4796_v19 = vld [vmem:[%s13622_s5 + $0x8] sm:$0xff]  ;;  %4899 = vmatmul.f32.gmra.mxu2 %v11888_v20 }
 0x7b4   : > { %4805 = vperm.xlu1 %7591, %v4795_v46   ;;  %5000 = vmatpush.msra.mxu1 %v4736_v0 }
 0x7b6   : > { %5001 = vmatpush.msra.mxu1 %v4734_v25 }
 0x7b7   : > { %4943 = vmatmul.f32.gmra.mxu3 %v4718_v35 }
 0x7b9   : > { %v4732_v16 = vld [vmem:[#allocation5 + $0x48] sm:$0xff] }
 0x7ba   : > { %5002 = vmatpush.msra.mxu1 %v4732_v16  ;;  %v4730_v61 = vld [vmem:[#allocation5 + $0x38] sm:$0xff] }
 0x7bb   : > { %4902 = vmatmul.f32.gmra.mxu2 %v11899_v8 }
 0x7bc   : > { %4810 = vperm.xlu1 %7591, %v4796_v19   ;;  %5003 = vmatpush.msra.mxu1 %v4730_v61 }
 0x7bf   : > { %4946 = vmatmul.f32.gmra.mxu3 %v4721_v38 }
 0x7c3   : > { %4905 = vmatmul.f32.gmra.mxu2 %v11910_v36 }
 0x7cb   : > { %5048 = vmatmul.f32.vlgmr.msra.gmra.mxu2 %v11764_v32 }
 0x7d3   : > { %5051 = vmatmul.f32.gmra.mxu2 %v11783_v53 }
 0x7db   : > { %5054 = vmatmul.f32.gmra.mxu2 %v4706_v44 }
 0x7e3   : > { %5057 = vmatmul.f32.gmra.mxu2 %v4709_v59 }
 0x7eb   : > { %5060 = vmatmul.f32.gmra.mxu2 %v4712_v42 }
 0x7ef   : > { %v4670_v15 = vpop.permute.xlu2 %4669 }
 0x7f0   : > { %4694 = vst.msk [vmem:[#allocation5 + $0x218] sm:$0xff] %vm4059_vm15, %v4670_v15 }
 0x7f3   : > { %5063 = vmatmul.f32.gmra.mxu2 %v11894_v52 }
 0x7f7   : > { %v4666_v6 = vpop.permute.xlu2 %4665  ;;  %v4790_v62 = vld [vmem:[#allocation5 + $0x218] sm:$0xff] }
 0x7f8   : > { %4692 = vst.msk [vmem:[#allocation5 + $0x208] sm:$0xff] %vm4059_vm15, %v4666_v6 }
 0x7fb   : > { %5066 = vmatmul.f32.gmra.mxu2 %v4718_v35 }
 0x7ff   : > { %v4668_v10 = vpop.permute.xlu2 %4667  ;;  %v4788_v50 = vld [vmem:[#allocation5 + $0x208] sm:$0xff] }
 0x800   : > { %v4680_v56 = vsel %vm4089_vm5, %v4668_v10, %v4670_v15 }
 0x803   : > { %5069 = vmatmul.f32.gmra.mxu2 %v4721_v38 }
 0x806   : > { %v4678_v45 = vpop.permute.xlu1 %4677  ;;  %v4926_v29 = vpop.f32.mrf.mxu3 }
 0x807   : > { %v4674_v57 = vpop.permute.xlu0 %4673  ;;  %4698 = vst.msk [vmem:[#allocation5 + $0x238] sm:$0xff] %vm4059_vm15, %v4678_v45 }
 0x808   : > { %4696 = vst.msk [vmem:[#allocation5 + $0x228] sm:$0xff] %vm4059_vm15, %v4674_v57 }
 0x80e   : > { %v4135_v58 = vpop.permute.xlu1 %4134  ;;  %v4794_v39 = vld [vmem:[#allocation5 + $0x238] sm:$0xff] }
 0x80f   : > { %v4129_v2 = vpop.permute.xlu0 %4128  ;;  %v4148_v27 = vsel %vm4142_vm7, %v11748_v41, %v4135_v58  ;;  %5085 = vmatpush.msra.mxu3 %v4794_v39  ;;  %v4792_v53 = vld [vmem:[#allocation5 + $0x228] sm:$0xff]  ;;  %v4707_v58 = vld [vmem:[%s13621_s4 + $0x40] sm:$0xff] }
 0x810   : > { %v4146_v32 = vsel %vm4142_vm7, %v11750_v11, %v4129_v2  ;;  %4164 = vst.msk [vmem:[#allocation5 + $0x28] sm:$0xff] %vm4059_vm15, %v4148_v27  ;;  %v4710_v2 = vld [vmem:[%s13621_s4 + $0x58] sm:$0xff]  ;;  %v5376_v27 = vld [vmem:[#allocation14 + $0x70] sm:$0xff] }
 0x811   : > { %4162 = vst.msk [vmem:[#allocation5 + $0x18] sm:$0xff] %vm4059_vm15, %v4146_v32  ;;  %5086 = vmatpush.msra.mxu3 %v4792_v53  ;;  %v5377_v39 = vld [vmem:[#allocation14 + $0x78] sm:$0xff]  ;;  %v5375_v32 = vld [vmem:[#allocation14 + $0x68] sm:$0xff] }
 0x812   : > { %v4713_v53 = vld [vmem:[%s13621_s4 + $0x70] sm:$0xff] }
 0x813   : > { %5087 = vmatpush.msra.mxu3 %v4790_v62 }
 0x815   : > { %5088 = vmatpush.msra.mxu3 %v4788_v50 }
 0x816   : > { %v4676_v41 = vpop.permute.xlu1 %4675  ;;  %7381 = vmatmul.msk.f32.vlgmr.msra.gmra.mxu3 %vm4843_vm4, %v4701_v37 }
 0x817   : > { %v4123_v9 = vpop.permute.xlu0 %4122  ;;  %v4682_v11 = vsel %vm4089_vm5, %v4676_v41, %v4678_v45  ;;  %v4728_v47 = vld [vmem:[#allocation5 + $0x28] sm:$0xff] }
 0x818   : > { %v4144_v63 = vsel %vm4142_vm7, %v11744_v22, %v4123_v9  ;;  %5004 = vmatpush.msra.mxu1 %v4728_v47  ;;  %4962 = vmatpush.msra.mxu0 %v4682_v11  ;;  %v4726_v3 = vld [vmem:[#allocation5 + $0x18] sm:$0xff]  ;;  %v4797_v11 = vld [vmem:[%s13622_s5 + $0x10] sm:$0xff]  ;;  %v5374_v47 = vld [vmem:[#allocation14 + $0x60] sm:$0xff] }
 0x819   : > { %4160 = vst.msk [vmem:[#allocation5 + $0x8] sm:$0xff] %vm4059_vm15, %v4144_v63 }
 0x81a   : > { %5005 = vmatpush.msra.mxu1 %v4726_v3  ;;  %v4716_v3 = vld [vmem:[%s13621_s4 + $0x88] sm:$0xff] }
 0x81e   : > { %v4672_v13 = vpop.permute.xlu1 %4671  ;;  %7382 = vmatmul.msk.f32.gmra.mxu3 %vm4843_vm4, %v4704_v54 }
 0x81f   : > { %v4664_v5 = vpop.permute.xlu0 %4663  ;;  %v4681_v18 = vsel %vm4089_vm5, %v4672_v13, %v4674_v57  ;;  %v5372_v13 = vld [vmem:[#allocation14 + $0x50] sm:$0xff] }
 0x820   : > { %v4679_v22 = vsel %vm4089_vm5, %v4664_v5, %v4666_v6  ;;  %v4724_v43 = vld [vmem:[#allocation5 + $0x8] sm:$0xff]  ;;  %4963 = vmatpush.msra.mxu0 %v4681_v18  ;;  %v5371_v5 = vld [vmem:[#allocation14 + $0x48] sm:$0xff] }
 0x821   : > { %5006 = vmatpush.msra.mxu1 %v4724_v43  ;;  %v5386_v18 = vld [vmem:[#allocation14 + $0xc0] sm:$0xf]  ;;  %v4719_v43 = vld [vmem:[%s13621_s4 + $0xa0] sm:$0xff] }
 0x822   : > { %5007 = vmatmul.f32.vlgmr.msra.gmra.mxu1 %v11774_v60  ;;  %4964 = vmatpush.msra.mxu0 %v4680_v56  ;;  %v4885_v60 = vpop.f32.mrf.mxu2 }
 0x823   : > { %7389 = vmatpush.msk.msrb.mxu1 %vm5411_vm8, %v5386_v18 }
 0x824   : > { %4965 = vmatpush.msra.mxu0 %v4679_v22  ;;  %v5370_v22 = vld [vmem:[#allocation14 + $0x40] sm:$0xff] }
 0x825   : > { %7373 = vmatmul.msk.f32.vlgmr.msra.gmra.mxu0 %vm4843_vm4, %v4701_v37 }
 0x826   : > { %v4806_v49 = vpop.permute.xlu1 %4805  ;;  %7383 = vmatmul.msk.f32.gmra.mxu3 %vm4843_vm4, %v4707_v58  ;;  %5415 = vmatpush.msrb.mxu0 %v5377_v39 }
 0x827   : > { %v4886_v40 = vadd.f32 %v4885_v60, %v4806_v49  ;;  %v5385_v60 = vld [vmem:[#allocation14 + $0xb8] sm:$0xff] }
 0x828   : > { %5416 = vmatpush.msrb.mxu0 %v5376_v27  ;;  %5464 = vmatpush.msrb.mxu1 %v5385_v60 }
 0x829   : > { %v4927_v25 = vadd.f32 %v4926_v29, %v4886_v40  ;;  %v5369_v29 = vld [vmem:[#allocation14 + $0x38] sm:$0xff]  ;;  %v5367_v40 = vld [vmem:[#allocation14 + $0x28] sm:$0xff] }
 0x82a   : > { %5010 = vmatmul.f32.gmra.mxu1 %v11799_v17  ;;  %v4888_v21 = vpop.f32.mrf.mxu2  ;;  %v4929_v17 = vpop.f32.mrf.mxu3  ;;  %5417 = vmatpush.msrb.mxu0 %v5375_v32 }
 0x82c   : > { %5418 = vmatpush.msrb.mxu0 %v5374_v47 }
 0x82d   : > { %7374 = vmatmul.msk.f32.gmra.mxu0 %vm4843_vm4, %v4704_v54  ;;  %v5373_v54 = vld [vmem:[#allocation14 + $0x58] sm:$0xff] }
 0x82e   : > { %v4811_v16 = vpop.permute.xlu1 %4810  ;;  %7384 = vmatmul.msk.f32.gmra.mxu3 %vm4843_vm4, %v4710_v2  ;;  %5419 = vmatpush.msrb.mxu0 %v5373_v54 }
 0x82f   : > { %v4889_v59 = vadd.f32 %v4888_v21, %v4811_v16  ;;  %v5384_v21 = vld [vmem:[#allocation14 + $0xb0] sm:$0xff] }
 0x830   : > { %5420 = vmatpush.msrb.mxu0 %v5372_v13  ;;  %5465 = vmatpush.msrb.mxu1 %v5384_v21 }
 0x831   : > { %v4930_v15 = vadd.f32 %v4929_v17, %v4889_v59  ;;  %v5368_v17 = vld [vmem:[#allocation14 + $0x30] sm:$0xff]  ;;  %v5378_v59 = vld [vmem:[#allocation14 + $0x80] sm:$0xff] }
 0x832   : > { %5013 = vmatmul.f32.gmra.mxu1 %v11825_v51  ;;  %v11953_v14 = vpop.f32.mrf.mxu2  ;;  %v11955_v30 = vpop.f32.mrf.mxu3  ;;  %5421 = vmatpush.msrb.mxu0 %v5371_v5 }
 0x834   : > { %5422 = vmatpush.msrb.mxu0 %v5370_v22 }
 0x835   : > { %7375 = vmatmul.msk.f32.gmra.mxu0 %vm4843_vm4, %v4707_v58 }
 0x836   : > { %7385 = vmatmul.msk.f32.gmra.mxu3 %vm4843_vm4, %v4713_v53  ;;  %5423 = vmatpush.msrb.mxu0 %v5369_v29 }
 0x838   : > { %5424 = vmatpush.msrb.mxu0 %v5368_v17 }
 0x83a   : > { %5016 = vmatmul.f32.gmra.mxu1 %v11870_v28  ;;  %v11957_v51 = vpop.f32.mrf.mxu2  ;;  %v11959_v48 = vpop.f32.mrf.mxu3  ;;  %5425 = vmatpush.msrb.mxu0 %v5367_v40 }
 0x83d   : > { %7376 = vmatmul.msk.f32.gmra.mxu0 %vm4843_vm4, %v4710_v2 }
 0x83e   : > { %7386 = vmatmul.msk.f32.gmra.mxu3 %vm4843_vm4, %v4716_v3 }
 0x842   : > { %5019 = vmatmul.f32.gmra.mxu1 %v11879_v4  ;;  %v11961_v55 = vpop.f32.mrf.mxu2  ;;  %v11963_v33 = vpop.f32.mrf.mxu3 }
 0x845   : > { %7377 = vmatmul.msk.f32.gmra.mxu0 %vm4843_vm4, %v4713_v53 }
 0x846   : > { %7387 = vmatmul.msk.f32.gmra.mxu3 %vm4843_vm4, %v4719_v43 }
 0x84a   : > { %5022 = vmatmul.f32.gmra.mxu1 %v11888_v20  ;;  %v11965_v26 = vpop.f32.mrf.mxu2  ;;  %v11967_v31 = vpop.f32.mrf.mxu3 }
 0x84d   : > { %7378 = vmatmul.msk.f32.gmra.mxu0 %vm4843_vm4, %v4716_v3 }
 0x852   : > { %5025 = vmatmul.f32.gmra.mxu1 %v11899_v8  ;;  %v11969_v12 = vpop.f32.mrf.mxu2  ;;  %v11971_v23 = vpop.f32.mrf.mxu3 }
 0x855   : > { %7379 = vmatmul.msk.f32.gmra.mxu0 %vm4843_vm4, %v4719_v43 }
 0x85a   : > { %5028 = vmatmul.f32.gmra.mxu1 %v11910_v36  ;;  %v11973_v24 = vpop.f32.mrf.mxu2  ;;  %v11975_v7 = vpop.f32.mrf.mxu3 }
 0x862   : > { %v5049_v1 = vpop.f32.mrf.mxu2 }
 0x86a   : > { %v5052_v52 = vpop.f32.mrf.mxu2 }
 0x872   : > { %v5055_v32 = vpop.f32.mrf.mxu2 }
 0x87a   : > { %v5058_v18 = vpop.f32.mrf.mxu2 }
 0x899   : > { %v5090_v46 = vpop.f32.mrf.mxu3 }
 0x89f   : > { %v5008_v34 = vpop.f32.mrf.mxu1 }
 0x8a0   : > { %v5009_v0 = vadd.f32 %v5008_v34, %v4806_v49  ;;  %v5383_v49 = vld [vmem:[#allocation14 + $0xa8] sm:$0xff]  ;;  %v5366_v34 = vld [vmem:[#allocation14 + $0x20] sm:$0xff] }
 0x8a1   : > { %v5093_v35 = vpop.f32.mrf.mxu3  ;;  %5466 = vmatpush.msrb.mxu1 %v5383_v49  ;;  %5426 = vmatpush.msrb.mxu0 %v5366_v34 }
 0x8a2   : > { %v5050_v19 = vadd.f32 %v5049_v1, %v5009_v0  ;;  %v4967_v61 = vpop.f32.mrf.mxu0  ;;  %v5382_v1 = vld [vmem:[#allocation14 + $0xa0] sm:$0xff]  ;;  %v5381_v0 = vld [vmem:[#allocation14 + $0x98] sm:$0xff] }
 0x8a3   : > { %v4968_v44 = vadd.f32 %v4967_v61, %v4927_v25  ;;  %5467 = vmatpush.msrb.mxu1 %v5382_v1  ;;  %v5365_v25 = vld [vmem:[#allocation14 + $0x18] sm:$0xff]  ;;  %v5379_v61 = vld [vmem:[#allocation14 + $0x88] sm:$0xff] }
 0x8a4   : > { %v11977_v28 = vadd.f32 %v5090_v46, %v5050_v19  ;;  %v4722_v46 = vld [vmem:[%s13621_s4 + $0xb8] sm:$0xff]  ;;  %v5364_v19 = vld [vmem:[#allocation14 + $0x10] sm:$0xff]  ;;  %5427 = vmatpush.msrb.mxu0 %v5365_v25 }
 0x8a5   : > { %v5114_v4 = vmax.f32 %v4968_v44, 0.0  ;;  %7380 = vmatmul.msk.f32.gmra.mxu0 %vm4843_vm4, %v4722_v46  ;;  %7388 = vmatmul.msk.f32.gmra.mxu3 %vm4843_vm4, %v4722_v46  ;;  %v5363_v44 = vld [vmem:[#allocation14 + $0x8] sm:$0xff] }
 0x8a6   : > { %v5115_v42 = vmax.f32 %v11977_v28, 0.0  ;;  %5468 = vmatpush.msrb.mxu1 %v5381_v0  ;;  %5428 = vmatpush.msrb.mxu0 %v5364_v19 }
 0x8a7   : > { %v5011_v20 = vpop.f32.mrf.mxu1  ;;  %5186 = vrot.lane.b32.xlu2 %v5114_v4, %s8105_s18 }
 0x8a8   : > { %5139 = vst.msk [vmem:[#allocation6 + $0x8] sm:$0xff] %vm4059_vm15, %v5115_v42  ;;  %v5012_v8 = vadd.f32 %v5011_v20, %v4811_v16  ;;  %v5380_v16 = vld [vmem:[#allocation14 + $0x90] sm:$0xff]  ;;  %5429 = vmatpush.msrb.mxu0 %v5363_v44 }
 0x8a9   : > { %5469 = vmatpush.msrb.mxu1 %v5380_v16 }
 0x8aa   : > { %v5053_v36 = vadd.f32 %v5052_v52, %v5012_v8  ;;  %v4970_v6 = vpop.f32.mrf.mxu0 }
 0x8ab   : > { %v11984_v38 = vadd.f32 %v4970_v6, %v4930_v15  ;;  %5470 = vmatpush.msrb.mxu1 %v5379_v61  ;;  %v4798_v6 = vld [vmem:[%s13622_s5 + $0x18] sm:$0xff] }
 0x8ac   : > { %v11986_v10 = vadd.f32 %v5093_v35, %v5053_v36 }
 0x8ad   : > { %v5116_v56 = vmax.f32 %v11984_v38, 0.0  ;;  %5471 = vmatpush.msrb.mxu1 %v5378_v59 }
 0x8ae   : > { %v5117_v45 = vmax.f32 %v11986_v10, 0.0 }
 0x8af   : > { %v5155_v57 = vld [vmem:[#allocation6 + $0x8] sm:$0xff]  ;;  %5190 = vrot.lane.b32.xlu1 %v5116_v56, %s8105_s18 }
 0x8b0   : > { %5141 = vst.msk [vmem:[#allocation6 + $0x18] sm:$0xff] %vm4059_vm15, %v5117_v45  ;;  %5188 = vrot.lane.b32.xlu0 %v5155_v57, %s8105_s18 }
 0x8b7   : > { %v5157_v63 = vld [vmem:[#allocation6 + $0x18] sm:$0xff] }
 0x901   : > { %v5187_v62 = vpop.permute.xlu2 %5186 }
 0x921   : > { %v5191_v52 = vpop.permute.xlu1 %5190 }
 0x922   : > { %v12012_v37 = vpop.permute.xlu0 %5188 }
 0x923   : > { %v5218_v50 = vsel %vm13869_vm3, %v5187_v62, %v12012_v37  ;;  %v5259_v41 = vmax.f32 %v5155_v57, %v12012_v37  ;;  %v5243_v57 = vmax.f32 %v5115_v42, %v12012_v37 }
 0x924   : > { %v12017_v9 = vmax.f32 %v5114_v4, %v5218_v50  ;;  %v5362_v4 = vld [vmem:[#allocation14] sm:$0xff]  ;;  %v4973_v50 = vpop.f32.mrf.mxu0 }
 0x925   : > { %5292 = vrot.lane.b32.xlu0 %v5259_v41, %s8119_s16  ;;  %5430 = vmatpush.msrb.mxu0 %v5362_v4  ;;  %v5096_v41 = vpop.f32.mrf.mxu3 }
 0x926   : > { %5290 = vrot.lane.b32.xlu2 %v12017_v9, %s8119_s16 }
 0x92c   : > { %v4976_v54 = vpop.f32.mrf.mxu0 }
 0x92d   : > { %4815 = vperm.xlu0 %7590, %v4797_v11   ;;  %v5099_v60 = vpop.f32.mrf.mxu3 }
 0x92e   : > { %5192 = vrot.lane.b32.xlu2 %v5157_v63, %s8105_s18 }
 0x934   : > { %v12072_v49 = vpop.f32.mrf.mxu0 }
 0x980   : > { %v5291_v20 = vpop.permute.xlu2 %5290 }
 0x988   : > { %v5193_v8 = vpop.permute.xlu2 %5192 }
 0x989   : > { %v5219_v15 = vsel %vm13869_vm3, %v5191_v52, %v5193_v8  ;;  %v5261_v35 = vmax.f32 %v5157_v63, %v5193_v8 }
 0x98a   : > { %v5244_v36 = vmax.f32 %v5116_v56, %v5219_v15  ;;  %v5014_v56 = vpop.f32.mrf.mxu1 }
 0x98b   : > { %5296 = vrot.lane.b32.xlu2 %v5261_v35, %s8119_s16 }
 0x98c   : > { %5294 = vrot.lane.b32.xlu1 %v5244_v36, %s8119_s16 }
 0x992   : > { %v5017_v13 = vpop.f32.mrf.mxu1 }
 0x993   : > { %4820 = vperm.xlu2 %7592, %v4798_v6  }
 0x997   : > { %v5293_v58 = vpop.permute.xlu0 %5292 }
 0x998   : > { %v5322_v2 = vsel %vm4611_vm2, %v5291_v20, %v5293_v58  ;;  %v5347_v39 = vmax.f32 %v5243_v57, %v5293_v58  ;;  %v14372_v20 = vlaneseq  ;;  %v4799_v58 = vld [vmem:[%s13622_s5 + $0x20] sm:$0xff] }
 0x999   : > { %v5346_v38 = vmax.f32 %v12017_v9, %v5322_v2 }
 0x99a   : > { %7390 = vmatmul.msk.f32.vlgmr.msrb.gmra.mxu1 %vm4059_vm15, %v5347_v39  ;;  %v12069_v29 = vpop.f32.mrf.mxu1  ;;  %vm5497_vm11 = vcmp.lt.s32.totalorder %v14372_v20, 49  ;;  %vm12350_vm12 = vcmp.ge.s32.totalorder %v14372_v20, 49  ;;  %vm12355_vm13 = vcmp.lt.s32.totalorder %v14372_v20, 98  ;;  %vm12360_vm14 = vcmp.ge.s32.totalorder %v14372_v20, 98 }
 0x99b   : > { %5431 = vmatmul.f32.vlgmr.msrb.gmra.mxu0 %v5346_v38  ;;  %vm5509_vm0 = vmand %vm12350_vm12, %vm12355_vm13  ;;  %vm12374_vm1 = vcmp.ge.s32.totalorder %v14372_v20, 19  ;;  %vm5530_vm5 = vcmp.lt.s32.totalorder %v14372_v20, 68  ;;  %vm12406_vm4 = vcmp.lt.s32.totalorder %v14372_v20, 117  ;;  %vm12411_vm8 = vcmp.ge.s32.totalorder %v14372_v20, 117 }
 0x99c   : > { %vm5531_vm7 = vmand %vm12374_vm1, %vm5530_vm5  ;;  %vm5549_vm12 = vcmask 957440   ;;  %vm12439_vm1 = vcmp.ge.s32.totalorder %v14372_v20, 87  ;;  %vm12444_vm5 = vcmp.lt.s32.totalorder %v14372_v20, 136  ;;  %vm12895_vm9 = vcmp.lt.s32.totalorder %v14372_v20, 51 }
 0x99f   : > { %v4816_v27 = vpop.permute.xlu0 %4815 }
 0x9a0   : > { %v4892_v53 = vadd.f32 %v11953_v14, %v4816_v27  ;;  %v5015_v62 = vadd.f32 %v5014_v56, %v4816_v27  ;;  %v5245_v14 = vmax.f32 %v5117_v45, %v5193_v8 }
 0x9a2   : > { %v5056_v11 = vadd.f32 %v5055_v32, %v5015_v62  ;;  %v4933_v28 = vadd.f32 %v11955_v30, %v4892_v53 }
 0x9a4   : > { %v4974_v42 = vadd.f32 %v4973_v50, %v4933_v28  ;;  %v12057_v37 = vadd.f32 %v5096_v41, %v5056_v11 }
 0x9a6   : > { %v5118_v63 = vmax.f32 %v4974_v42, 0.0  ;;  %v5119_v9 = vmax.f32 %v12057_v37, 0.0 }
 0x9a8   : > { %5194 = vrot.lane.b32.xlu0 %v5118_v63, %s8105_s18  ;;  %5143 = vst.msk [vmem:[#allocation6 + $0x28] sm:$0xff] %vm4059_vm15, %v5119_v9 }
 0x9af   : > { %v5159_v47 = vld [vmem:[#allocation6 + $0x28] sm:$0xff] }
 0x9b0   : > { %5196 = vrot.lane.b32.xlu1 %v5159_v47, %s8105_s18 }
 0x9e5   : > { %v5297_v3 = vpop.permute.xlu2 %5296 }
 0x9e6   : > { %v5349_v30 = vmax.f32 %v5245_v14, %v5297_v3 }
 0x9e8   : > { %7391 = vmatmul.msk.f32.gmra.mxu1 %vm4059_vm15, %v5349_v30 }
 0x9ed   : > { %v4821_v5 = vpop.permute.xlu2 %4820 }
 0x9ee   : > { %v4895_v22 = vadd.f32 %v11957_v51, %v4821_v5  ;;  %v5018_v43 = vadd.f32 %v5017_v13, %v4821_v5  ;;  %v12086_v51 = vpop.f32.mrf.mxu1  ;;  %v5061_v13 = vpop.f32.mrf.mxu2 }
 0x9f0   : > { %v5059_v21 = vadd.f32 %v5058_v18, %v5018_v43  ;;  %v4936_v17 = vadd.f32 %v11959_v48, %v4895_v22  ;;  %v12088_v48 = vpop.f32.mrf.mxu0 }
 0x9f2   : > { %v12074_v10 = vadd.f32 %v4976_v54, %v4936_v17  ;;  %v12076_v45 = vadd.f32 %v5099_v60, %v5059_v21  ;;  %v5102_v21 = vpop.f32.mrf.mxu3 }
 0x9f4   : > { %v5120_v40 = vmax.f32 %v12074_v10, 0.0  ;;  %v5121_v1 = vmax.f32 %v12076_v45, 0.0 }
 0x9f6   : > { %5198 = vrot.lane.b32.xlu2 %v5120_v40, %s8105_s18  ;;  %5145 = vst.msk [vmem:[#allocation6 + $0x38] sm:$0xff] %vm4059_vm15, %v5121_v1  ;;  %v12091_v25 = vpop.f32.mrf.mxu1 }
 0x9f8   : > { %v12093_v16 = vpop.f32.mrf.mxu0 }
 0x9fd   : > { %v5161_v2 = vld [vmem:[#allocation6 + $0x38] sm:$0xff] }
 0x9fe   : > { %v5295_v34 = vpop.permute.xlu1 %5294  ;;  %v12095_v19 = vpop.f32.mrf.mxu1 }
 0x9ff   : > { %v5323_v46 = vsel %vm4611_vm2, %v5295_v34, %v5297_v3 }
 0xa00   : > { %v5348_v0 = vmax.f32 %v5244_v36, %v5323_v46  ;;  %v12097_v61 = vpop.f32.mrf.mxu0 }
 0xa02   : > { %5434 = vmatmul.f32.gmra.mxu0 %v5348_v0 }
 0xa17   : > { %v5473_v44 = vpop.f32.mrf.mxu1 }
 0xa18   : > { %v5432_v59 = vpop.f32.mrf.mxu0 }
 0xa19   : > { %v5474_v4 = vadd.f32 %v5473_v44, %v5432_v59 }
 0xa1a   : > { %v5195_v8 = vpop.permute.xlu0 %5194 }
 0xa1b   : > { %5501 = vst [vmem:[#allocation1] sm:$0xff] %v5474_v4 }
 0xa1c   : > { %5499 = vst.msk [vmem:[#allocation7] sm:$0x1] %vm5497_vm11, %v5474_v4  ;;  %vm12416_vm11 = vcmp.lt.s32.totalorder %v14372_v20, 166 }
 0xa22   : > { %v12100_v52 = vld [vmem:[#allocation1 + $0x1] ss:$9 sm:$0xff]  ;;  %v5197_v15 = vpop.permute.xlu1 %5196 }
 0xa23   : > { %5511 = vst [vmem:[#allocation1] sm:$0xff] %v5474_v4  ;;  %v5220_v35 = vsel %vm13869_vm3, %v5195_v8, %v5197_v15  ;;  %v5263_v36 = vmax.f32 %v5159_v47, %v5197_v15  ;;  %v5247_v28 = vmax.f32 %v5119_v9, %v5197_v15 }
 0xa24   : > { %v5246_v6 = vmax.f32 %v5118_v63, %v5220_v35  ;;  %v4801_v35 = vld [vmem:[%s13622_s5 + $0x30] sm:$0xff] }
 0xa25   : > { %5300 = vrot.lane.b32.xlu1 %v5263_v36, %s8119_s16 }
 0xa26   : > { %5298 = vrot.lane.b32.xlu0 %v5246_v6, %s8119_s16 }
 0xa2a   : > { %v12105_v57 = vld [vmem:[#allocation1 + $0x2] ss:$9 sm:$0xff] }
 0xa2b   : > { %5523 = vst [vmem:[#allocation1] sm:$0xff] %v5474_v4 }
 0xa2d   : > { %4825 = vperm.xlu1 %7591, %v4799_v58  }
 0xa2e   : > { %5200 = vrot.lane.b32.xlu0 %v5161_v2, %s8105_s18 }
 0xa32   : > { %v12111_v39 = vld [vmem:[#allocation1 + $0x3] ss:$9 sm:$0xff] }
 0xa33   : > { %5533 = vst [vmem:[#allocation1] sm:$0xff] %v5474_v4 }
 0xa3a   : > { %v12113_v38 = vld [vmem:[#allocation1 + $0x4] ss:$9 sm:$0xff] }
 0xa3b   : > { %5543 = vst [vmem:[#allocation1] sm:$0xff] %v5474_v4 }
 0xa42   : > { %v12115_v56 = vld [vmem:[#allocation1 + $0x5] ss:$9 sm:$0xff] }
 0xa43   : > { %5556 = vst [vmem:[#allocation1] sm:$0xff] %v5474_v4 }
 0xa4a   : > { %v12117_v27 = vld [vmem:[#allocation1 + $0x6] ss:$9 sm:$0xff] }
 0xa4b   : > { %5566 = vst [vmem:[#allocation1] sm:$0xff] %v5474_v4 }
 0xa50   : > { %v5199_v5 = vpop.permute.xlu2 %5198 }
 0xa52   : > { %v12121_v50 = vld [vmem:[#allocation1 + $0x7] ss:$9 sm:$0xff] }
 0xa65   : > { %v5476_v32 = vpop.f32.mrf.mxu1 }
 0xa7f   : > { %v5435_v53 = vpop.f32.mrf.mxu0 }
 0xa80   : > { %v12119_v62 = vadd.f32 %v5476_v32, %v5435_v53 }
 0xa82   : > { %5587 = vst [vmem:[#allocation1] sm:$0xff] %v12119_v62 }
 0xa89   : > { %v12124_v41 = vld [vmem:[#allocation1 + $0x1] ss:$9 sm:$0xff] }
 0xa8a   : > { %5597 = vst [vmem:[#allocation1] sm:$0xff] %v12119_v62 }
 0xa91   : > { %v12127_v11 = vld [vmem:[#allocation1 + $0x2] ss:$9 sm:$0xff] }
 0xa92   : > { %5610 = vst [vmem:[#allocation1] sm:$0xff] %v12119_v62 }
 0xa97   : > { %v5301_v42 = vpop.permute.xlu1 %5300 }
 0xa98   : > { %v5351_v47 = vmax.f32 %v5247_v28, %v5301_v42  ;;  %v5299_v14 = vpop.permute.xlu0 %5298 }
 0xa99   : > { %v12132_v63 = vld [vmem:[#allocation1 + $0x3] ss:$9 sm:$0xff]  ;;  %v5324_v3 = vsel %vm4611_vm2, %v5299_v14, %v5301_v42 }
 0xa9a   : > { %5620 = vst [vmem:[#allocation1] sm:$0xff] %v12119_v62  ;;  %v5350_v30 = vmax.f32 %v5246_v6, %v5324_v3  ;;  %7392 = vmatmul.msk.f32.gmra.mxu1 %vm4059_vm15, %v5351_v47  ;;  %v5064_v3 = vpop.f32.mrf.mxu2 }
 0xa9c   : > { %5437 = vmatmul.f32.gmra.mxu0 %v5350_v30 }
 0xa9f   : > { %v4826_v54 = vpop.permute.xlu1 %4825 }
 0xaa0   : > { %v4898_v37 = vadd.f32 %v11961_v55, %v4826_v54  ;;  %v5021_v9 = vadd.f32 %v12069_v29, %v4826_v54  ;;  %v5201_v22 = vpop.permute.xlu0 %5200 }
 0xaa1   : > { %v12137_v18 = vld [vmem:[#allocation1 + $0x4] ss:$9 sm:$0xff]  ;;  %v5221_v43 = vsel %vm13869_vm3, %v5199_v5, %v5201_v22  ;;  %v5265_v60 = vmax.f32 %v5161_v2, %v5201_v22  ;;  %v5249_v15 = vmax.f32 %v5121_v1, %v5201_v22 }
 0xaa2   : > { %5630 = vst [vmem:[#allocation1] sm:$0xff] %v12119_v62  ;;  %v4939_v17 = vadd.f32 %v11963_v33, %v4898_v37  ;;  %v5248_v34 = vmax.f32 %v5120_v40, %v5221_v43  ;;  %v5062_v46 = vadd.f32 %v5061_v13, %v5021_v9  ;;  %v4800_v33 = vld [vmem:[%s13622_s5 + $0x28] sm:$0xff]  ;;  %v5105_v13 = vpop.f32.mrf.mxu3 }
 0xaa3   : > { %5304 = vrot.lane.b32.xlu0 %v5265_v60, %s8119_s16 }
 0xaa4   : > { %v4980_v0 = vadd.f32 %v12072_v49, %v4939_v17  ;;  %v12148_v55 = vadd.f32 %v5102_v21, %v5062_v46  ;;  %5302 = vrot.lane.b32.xlu2 %v5248_v34, %s8119_s16 }
 0xaa6   : > { %v5122_v29 = vmax.f32 %v4980_v0, 0.0  ;;  %v5123_v44 = vmax.f32 %v12148_v55, 0.0 }
 0xaa8   : > { %5202 = vrot.lane.b32.xlu1 %v5122_v29, %s8105_s18  ;;  %5147 = vst.msk [vmem:[#allocation6 + $0x48] sm:$0xff] %vm4059_vm15, %v5123_v44 }
 0xaa9   : > { %v12152_v59 = vld [vmem:[#allocation1 + $0x5] ss:$9 sm:$0xff] }
 0xaaa   : > { %5643 = vst [vmem:[#allocation1] sm:$0xff] %v12119_v62 }
 0xaab   : > { %4830 = vperm.xlu0 %7590, %v4800_v33   ;;  %v5067_v33 = vpop.f32.mrf.mxu2 }
 0xaaf   : > { %v5163_v10 = vld [vmem:[#allocation6 + $0x48] sm:$0xff] }
 0xab0   : > { %5204 = vrot.lane.b32.xlu2 %v5163_v10, %s8105_s18 }
 0xab1   : > { %v12160_v49 = vld [vmem:[#allocation1 + $0x6] ss:$9 sm:$0xff] }
 0xab2   : > { %5653 = vst [vmem:[#allocation1] sm:$0xff] %v12119_v62 }
 0xab9   : > { %v12174_v45 = vld [vmem:[#allocation1 + $0x7] ss:$9 sm:$0xff] }
 0xafe   : > { %v5303_v40 = vpop.permute.xlu2 %5302 }
 0xb0a   : > { %v5205_v4 = vpop.permute.xlu2 %5204 }
 0xb0b   : > { %v5267_v8 = vmax.f32 %v5163_v10, %v5205_v4  ;;  %v5251_v46 = vmax.f32 %v5123_v44, %v5205_v4 }
 0xb0d   : > { %5308 = vrot.lane.b32.xlu2 %v5267_v8, %s8119_s16  ;;  %v5108_v8 = vpop.f32.mrf.mxu3 }
 0xb15   : > { %v5305_v36 = vpop.permute.xlu0 %5304  ;;  %4835 = vperm.xlu2 %7592, %v4801_v35  }
 0xb16   : > { %v5325_v6 = vsel %vm4611_vm2, %v5303_v40, %v5305_v36  ;;  %v5353_v58 = vmax.f32 %v5249_v15, %v5305_v36 }
 0xb17   : > { %v5352_v2 = vmax.f32 %v5248_v34, %v5325_v6  ;;  %v5479_v32 = vpop.f32.mrf.mxu1 }
 0xb18   : > { %7393 = vmatmul.msk.f32.gmra.mxu1 %vm4059_vm15, %v5353_v58 }
 0xb19   : > { %v5438_v53 = vpop.f32.mrf.mxu0  ;;  %5440 = vmatmul.f32.gmra.mxu0 %v5352_v2 }
 0xb1a   : > { %v12172_v28 = vadd.f32 %v5479_v32, %v5438_v53  ;;  %v5203_v42 = vpop.permute.xlu1 %5202 }
 0xb1b   : > { %v5222_v1 = vsel %vm13869_vm3, %v5203_v42, %v5205_v4 }
 0xb1c   : > { %5674 = vst [vmem:[#allocation1] sm:$0xff] %v12172_v28  ;;  %v5250_v47 = vmax.f32 %v5122_v29, %v5222_v1 }
 0xb1d   : > { %v4831_v14 = vpop.permute.xlu0 %4830 }
 0xb1e   : > { %v4901_v30 = vadd.f32 %v11965_v26, %v4831_v14  ;;  %v5024_v54 = vadd.f32 %v12086_v51, %v4831_v14  ;;  %5306 = vrot.lane.b32.xlu1 %v5250_v47, %s8119_s16 }
 0xb20   : > { %v4942_v5 = vadd.f32 %v11967_v31, %v4901_v30  ;;  %v5065_v37 = vadd.f32 %v5064_v3, %v5024_v54  ;;  %v4802_v54 = vld [vmem:[%s13622_s5 + $0x38] sm:$0xff] }
 0xb22   : > { %v4983_v9 = vadd.f32 %v12088_v48, %v4942_v5  ;;  %v12183_v22 = vadd.f32 %v5105_v13, %v5065_v37 }
 0xb23   : > { %v12185_v43 = vld [vmem:[#allocation1 + $0x1] ss:$9 sm:$0xff] }
 0xb24   : > { %5684 = vst [vmem:[#allocation1] sm:$0xff] %v12172_v28  ;;  %v5124_v60 = vmax.f32 %v4983_v9, 0.0  ;;  %v5125_v21 = vmax.f32 %v12183_v22, 0.0 }
 0xb26   : > { %5206 = vrot.lane.b32.xlu0 %v5124_v60, %s8105_s18  ;;  %5149 = vst.msk [vmem:[#allocation6 + $0x58] sm:$0xff] %vm4059_vm15, %v5125_v21 }
 0xb2b   : > { %v12193_v26 = vld [vmem:[#allocation1 + $0x2] ss:$9 sm:$0xff] }
 0xb2c   : > { %5696 = vst [vmem:[#allocation1] sm:$0xff] %v12172_v28 }
 0xb2d   : > { %v5165_v31 = vld [vmem:[#allocation6 + $0x58] sm:$0xff] }
 0xb2e   : > { %5208 = vrot.lane.b32.xlu1 %v5165_v31, %s8105_s18 }
 0xb33   : > { %v12197_v51 = vld [vmem:[#allocation1 + $0x3] ss:$9 sm:$0xff] }
 0xb34   : > { %5706 = vst [vmem:[#allocation1] sm:$0xff] %v12172_v28 }
 0xb3b   : > { %v12200_v48 = vld [vmem:[#allocation1 + $0x4] ss:$9 sm:$0xff] }
 0xb3c   : > { %5719 = vst [vmem:[#allocation1] sm:$0xff] %v12172_v28 }
 0xb43   : > { %v12203_v17 = vld [vmem:[#allocation1 + $0x5] ss:$9 sm:$0xff] }
 0xb44   : > { %5729 = vst [vmem:[#allocation1] sm:$0xff] %v12172_v28 }
 0xb4b   : > { %v12206_v34 = vld [vmem:[#allocation1 + $0x6] ss:$9 sm:$0xff] }
 0xb4c   : > { %5739 = vst [vmem:[#allocation1] sm:$0xff] %v12172_v28 }
 0xb53   : > { %v12227_v32 = vld [vmem:[#allocation1 + $0x7] ss:$9 sm:$0xff] }
 0xb67   : > { %v5309_v0 = vpop.permute.xlu2 %5308 }
 0xb68   : > { %v5355_v55 = vmax.f32 %v5251_v46, %v5309_v0 }
 0xb6a   : > { %7394 = vmatmul.msk.f32.gmra.mxu1 %vm4059_vm15, %v5355_v55 }
 0xb6f   : > { %v4836_v29 = vpop.permute.xlu2 %4835 }
 0xb70   : > { %v4904_v10 = vadd.f32 %v11969_v12, %v4836_v29  ;;  %v5027_v40 = vadd.f32 %v12091_v25, %v4836_v29 }
 0xb72   : > { %v4945_v15 = vadd.f32 %v11971_v23, %v4904_v10  ;;  %v5068_v35 = vadd.f32 %v5067_v33, %v5027_v40 }
 0xb74   : > { %v12214_v36 = vadd.f32 %v12093_v16, %v4945_v15  ;;  %v12216_v6 = vadd.f32 %v5108_v8, %v5068_v35 }
 0xb76   : > { %v5126_v44 = vmax.f32 %v12214_v36, 0.0  ;;  %v5127_v4 = vmax.f32 %v12216_v6, 0.0 }
 0xb78   : > { %5210 = vrot.lane.b32.xlu2 %v5126_v44, %s8105_s18  ;;  %5151 = vst.msk [vmem:[#allocation6 + $0x68] sm:$0xff] %vm4059_vm15, %v5127_v4 }
 0xb7f   : > { %v5167_v13 = vld [vmem:[#allocation6 + $0x68] sm:$0xff] }
 0xb90   : > { %v5307_v12 = vpop.permute.xlu1 %5306 }
 0xb91   : > { %v5326_v25 = vsel %vm4611_vm2, %v5307_v12, %v5309_v0  ;;  %v5070_v12 = vpop.f32.mrf.mxu2 }
 0xb92   : > { %v5354_v23 = vmax.f32 %v5250_v47, %v5326_v25 }
 0xb94   : > { %5443 = vmatmul.f32.gmra.mxu0 %v5354_v23 }
 0xb95   : > { %v5482_v58 = vpop.f32.mrf.mxu1 }
 0xb96   : > { %v5441_v16 = vpop.f32.mrf.mxu0 }
 0xb97   : > { %v12225_v2 = vadd.f32 %v5482_v58, %v5441_v16 }
 0xb98   : > { %v5207_v42 = vpop.permute.xlu0 %5206 }
 0xb99   : > { %5760 = vst [vmem:[#allocation1] sm:$0xff] %v12225_v2 }
 0xba0   : > { %v12230_v53 = vld [vmem:[#allocation1 + $0x1] ss:$9 sm:$0xff]  ;;  %v5209_v1 = vpop.permute.xlu1 %5208 }
 0xba1   : > { %5770 = vst [vmem:[#allocation1] sm:$0xff] %v12225_v2  ;;  %v5223_v14 = vsel %vm13869_vm3, %v5207_v42, %v5209_v1  ;;  %v5269_v3 = vmax.f32 %v5165_v31, %v5209_v1  ;;  %v5253_v29 = vmax.f32 %v5125_v21, %v5209_v1  ;;  %v5111_v42 = vpop.f32.mrf.mxu3 }
 0xba2   : > { %v5252_v30 = vmax.f32 %v5124_v60, %v5223_v14 }
 0xba3   : > { %5312 = vrot.lane.b32.xlu1 %v5269_v3, %s8119_s16 }
 0xba4   : > { %5310 = vrot.lane.b32.xlu0 %v5252_v30, %s8119_s16 }
 0xba8   : > { %v12236_v47 = vld [vmem:[#allocation1 + $0x2] ss:$9 sm:$0xff] }
 0xba9   : > { %5783 = vst [vmem:[#allocation1] sm:$0xff] %v12225_v2 }
 0xbab   : > { %4840 = vperm.xlu1 %7591, %v4802_v54  }
 0xbac   : > { %5212 = vrot.lane.b32.xlu0 %v5167_v13, %s8105_s18 }
 0xbb0   : > { %v12243_v5 = vld [vmem:[#allocation1 + $0x3] ss:$9 sm:$0xff] }
 0xbb1   : > { %5793 = vst [vmem:[#allocation1] sm:$0xff] %v12225_v2 }
 0xbb8   : > { %v12246_v37 = vld [vmem:[#allocation1 + $0x4] ss:$9 sm:$0xff] }
 0xbb9   : > { %5806 = vst [vmem:[#allocation1] sm:$0xff] %v12225_v2 }
 0xbc0   : > { %v12249_v9 = vld [vmem:[#allocation1 + $0x5] ss:$9 sm:$0xff] }
 0xbc1   : > { %5816 = vst [vmem:[#allocation1] sm:$0xff] %v12225_v2 }
 0xbc8   : > { %v12252_v60 = vld [vmem:[#allocation1 + $0x6] ss:$9 sm:$0xff] }
 0xbc9   : > { %5826 = vst [vmem:[#allocation1] sm:$0xff] %v12225_v2 }
 0xbd0   : > { %v12257_v55 = vld [vmem:[#allocation1 + $0x7] ss:$9 sm:$0xff] }
 0xbd2   : > { %v5211_v25 = vpop.permute.xlu2 %5210 }
 0xbe7   : > { %v5485_v31 = vpop.f32.mrf.mxu1 }
 0xc11   : > { %v5444_v46 = vpop.f32.mrf.mxu0 }
 0xc12   : > { %v12255_v0 = vadd.f32 %v5485_v31, %v5444_v46 }
 0xc14   : > { %5847 = vst [vmem:[#allocation1] sm:$0xff] %v12255_v0 }
 0xc15   : > { %v5313_v33 = vpop.permute.xlu1 %5312 }
 0xc16   : > { %v5357_v10 = vmax.f32 %v5253_v29, %v5313_v33  ;;  %v5311_v40 = vpop.permute.xlu0 %5310 }
 0xc17   : > { %v5327_v8 = vsel %vm4611_vm2, %v5311_v40, %v5313_v33 }
 0xc18   : > { %v5356_v15 = vmax.f32 %v5252_v30, %v5327_v8  ;;  %7395 = vmatmul.msk.f32.gmra.mxu1 %vm4059_vm15, %v5357_v10 }
 0xc1a   : > { %5446 = vmatmul.f32.gmra.mxu0 %v5356_v15 }
 0xc1b   : > { %v12264_v35 = vld [vmem:[#allocation1 + $0x1] ss:$9 sm:$0xff] }
 0xc1c   : > { %5860 = vst [vmem:[#allocation1] sm:$0xff] %v12255_v0 }
 0xc1d   : > { %v4841_v36 = vpop.permute.xlu1 %4840 }
 0xc1e   : > { %v4907_v23 = vadd.f32 %v11973_v24, %v4841_v36  ;;  %v5030_v22 = vadd.f32 %v12095_v19, %v4841_v36  ;;  %v5213_v21 = vpop.permute.xlu0 %5212 }
 0xc1f   : > { %v5224_v58 = vsel %vm13869_vm3, %v5211_v25, %v5213_v21  ;;  %v5271_v16 = vmax.f32 %v5167_v13, %v5213_v21 }
 0xc20   : > { %v4948_v1 = vadd.f32 %v11975_v7, %v4907_v23  ;;  %v5254_v14 = vmax.f32 %v5126_v44, %v5224_v58  ;;  %v5071_v3 = vadd.f32 %v5070_v12, %v5030_v22  ;;  %v6219_v58 = vld [vmem:[#allocation16 + $0xf0] sm:$0xff] }
 0xc21   : > { %5316 = vrot.lane.b32.xlu0 %v5271_v16, %s8119_s16 }
 0xc22   : > { %v4989_v30 = vadd.f32 %v12097_v61, %v4948_v1  ;;  %v12273_v54 = vadd.f32 %v5111_v42, %v5071_v3  ;;  %5314 = vrot.lane.b32.xlu2 %v5254_v14, %s8119_s16 }
 0xc23   : > { %v12276_v24 = vld [vmem:[#allocation1 + $0x2] ss:$9 sm:$0xff] }
 0xc24   : > { %5870 = vst [vmem:[#allocation1] sm:$0xff] %v12255_v0  ;;  %v5128_v19 = vmax.f32 %v4989_v30, 0.0  ;;  %v5129_v13 = vmax.f32 %v12273_v54, 0.0 }
 0xc26   : > { %5214 = vrot.lane.b32.xlu1 %v5128_v19, %s8105_s18  ;;  %5153 = vst.msk [vmem:[#allocation6 + $0x78] sm:$0xff] %vm4059_vm15, %v5129_v13 }
 0xc2b   : > { %v12284_v7 = vld [vmem:[#allocation1 + $0x3] ss:$9 sm:$0xff] }
 0xc2c   : > { %5880 = vst [vmem:[#allocation1] sm:$0xff] %v12255_v0 }
 0xc2d   : > { %v5169_v61 = vld [vmem:[#allocation6 + $0x78] sm:$0xff] }
 0xc2e   : > { %5216 = vrot.lane.b32.xlu2 %v5169_v61, %s8105_s18 }
 0xc33   : > { %v12288_v44 = vld [vmem:[#allocation1 + $0x4] ss:$9 sm:$0xff] }
 0xc34   : > { %5892 = vst [vmem:[#allocation1] sm:$0xff] %v12255_v0 }
 0xc36   : > { %5514 = vrot.lane.b32.xlu2 %v12105_v57, %s8112_s24  ;;  %s8125_s24 = smov 8  }
 0xc3b   : > { %v12293_v31 = vld [vmem:[#allocation1 + $0x5] ss:$9 sm:$0xff] }
 0xc3c   : > { %5902 = vst [vmem:[#allocation1] sm:$0xff] %v12255_v0 }
 0xc3e   : > { %5526 = vrot.lane.b32.xlu2 %v12111_v39, %s8122_s25  ;;  %v5255_v39 = vmax.f32 %v5127_v4, %v5213_v21  ;;  %s8131_s25 = smov 68   ;;  %v6252_v21 = vld [vmem:[#allocation16 + $0x1f8] sm:$0xff] }
 0xc3f   : > { %6698 = vmatpush.msra.mxu1 %v6252_v21  ;;  %v6190_v21 = vld [vmem:[#allocation16 + $0x8] sm:$0xff] }
 0xc43   : > { %v12297_v46 = vld [vmem:[#allocation1 + $0x6] ss:$9 sm:$0xff] }
 0xc44   : > { %5912 = vst [vmem:[#allocation1] sm:$0xff] %v12255_v0 }
 0xc46   : > { %5753 = vrot.lane.b32.xlu2 %v12225_v2, %s8123_s6  ;;  %s8132_s6 = smov 40  }
 0xc4b   : > { %v12313_v6 = vld [vmem:[#allocation1 + $0x7] ss:$9 sm:$0xff] }
 0xc4e   : > { %5559 = vrot.lane.b32.xlu2 %v12117_v27, %s8124_s19  ;;  %s8133_s19 = smov 106  }
 0xc7c   : > { %v5315_v29 = vpop.permute.xlu2 %5314 }
 0xc88   : > { %v12302_v33 = vpop.permute.xlu2 %5216 }
 0xc89   : > { %v5273_v57 = vmax.f32 %v5169_v61, %v12302_v33 }
 0xc8b   : > { %5320 = vrot.lane.b32.xlu1 %v5273_v57, %s8119_s16  ;;  %v6232_v57 = vld [vmem:[#allocation16 + $0x158] sm:$0xff] }
 0xc93   : > { %v5317_v10 = vpop.permute.xlu0 %5316  ;;  %5580 = vrot.lane.b32.xlu1 %v12119_v62, %s8125_s24  ;;  %s8134_s24 = smov 125  }
 0xc94   : > { %v5328_v40 = vsel %vm4611_vm2, %v5315_v29, %v5317_v10  ;;  %v5359_v8 = vmax.f32 %v5255_v39, %v5317_v10  ;;  %v6248_v39 = vld [vmem:[#allocation16 + $0x1d8] sm:$0xff] }
 0xc95   : > { %v5358_v2 = vmax.f32 %v5254_v14, %v5328_v40  ;;  %v5488_v27 = vpop.f32.mrf.mxu1  ;;  %v6234_v14 = vld [vmem:[#allocation16 + $0x168] sm:$0xff] }
 0xc96   : > { %7396 = vmatmul.msk.f32.gmra.mxu1 %vm4059_vm15, %v5359_v8  ;;  %v6247_v8 = vld [vmem:[#allocation16 + $0x1d0] sm:$0xff] }
 0xc97   : > { %v5447_v15 = vpop.f32.mrf.mxu0  ;;  %5449 = vmatmul.f32.gmra.mxu0 %v5358_v2  ;;  %v6198_v2 = vld [vmem:[#allocation16 + $0x48] sm:$0xff] }
 0xc98   : > { %v5489_v36 = vadd.f32 %v5488_v27, %v5447_v15  ;;  %v5215_v12 = vpop.permute.xlu1 %5214  ;;  %v6214_v27 = vld [vmem:[#allocation16 + $0xc8] sm:$0xff] }
 0xc99   : > { %v5225_v25 = vsel %vm13869_vm3, %v5215_v12, %v12302_v33  ;;  %v6246_v15 = vld [vmem:[#allocation16 + $0x1c8] sm:$0xff]  ;;  %vm12890_vm3 = vcmp.ge.s32.totalorder %v14372_v20, 2 }
 0xc9a   : > { %v5256_v4 = vmax.f32 %v5128_v19, %v5225_v25  ;;  %5933 = vst [vmem:[#allocation1] sm:$0xff] %v5489_v36  ;;  %v6229_v25 = vld [vmem:[#allocation16 + $0x140] sm:$0xff] }
 0xc9b   : > { %5840 = vrot.lane.b32.xlu1 %v12255_v0, %s8126_s21  ;;  %s8135_s21 = smov 95  }
 0xc9c   : > { %5318 = vrot.lane.b32.xlu0 %v5256_v4, %s8119_s16 }
 0xca1   : > { %v12317_v62 = vld [vmem:[#allocation1 + $0x1] ss:$9 sm:$0xff] }
 0xca2   : > { %5946 = vst [vmem:[#allocation1] sm:$0xff] %v5489_v36 }
 0xca3   : > { %5546 = vrot.lane.b32.xlu1 %v12115_v56, %s8127_s15  ;;  %s8136_s15 = smov 35  }
 0xca4   : > { %5504 = vrot.lane.b32.xlu0 %v12100_v52, %s8128_s22  ;;  %s8137_s22 = smov 54  }
 0xca9   : > { %v12321_v23 = vld [vmem:[#allocation1 + $0x2] ss:$9 sm:$0xff] }
 0xcaa   : > { %5956 = vst [vmem:[#allocation1] sm:$0xff] %v5489_v36 }
 0xcab   : > { %5569 = vrot.lane.b32.xlu1 %v12121_v50, %s8129_s17  ;;  %s8138_s17 = smov 73  }
 0xcac   : > { %5667 = vrot.lane.b32.xlu0 %v12172_v28, %s8130_s28  ;;  %s8139_s28 = smov 111   ;;  %v5515_v28 = vpop.permute.xlu2 %5514 }
 0xcad   : > { %v5516_v16 = vrot.slane %v5515_v28, 7 }
 0xcb1   : > { %v5958_v0 = vld [vmem:[#allocation1 + $0x3] ss:$9 sm:$0xff] }
 0xcb2   : > { %5966 = vst [vmem:[#allocation1] sm:$0xff] %v5489_v36 }
 0xcb4   : > { %5536 = vrot.lane.b32.xlu0 %v12113_v38, %s8131_s25  ;;  %s8140_s25 = smov 81   ;;  %v5257_v38 = vmax.f32 %v5129_v13, %v12302_v33  ;;  %v5527_v3 = vpop.permute.xlu2 %5526  ;;  %v6216_v33 = vld [vmem:[#allocation16 + $0xd8] sm:$0xff] }
 0xcb9   : > { %v12326_v22 = vld [vmem:[#allocation1 + $0x4] ss:$9 sm:$0xff] }
 0xcba   : > { %5979 = vst [vmem:[#allocation1] sm:$0xff] %v5489_v36 }
 0xcbc   : > { %5926 = vrot.lane.b32.xlu0 %v5489_v36, %s8132_s6  ;;  %s8141_s6 = smov 2  }
 0xcc1   : > { %v12328_v52 = vld [vmem:[#allocation1 + $0x5] ss:$9 sm:$0xff] }
 0xcc2   : > { %5989 = vst [vmem:[#allocation1] sm:$0xff] %v5489_v36 }
 0xcc4   : > { %5600 = vrot.lane.b32.xlu0 %v12127_v11, %s8133_s19  ;;  %s8142_s19 = smov 21  }
 0xcc9   : > { %v5991_v56 = vld [vmem:[#allocation1 + $0x6] ss:$9 sm:$0xff] }
 0xcca   : > { %5999 = vst [vmem:[#allocation1] sm:$0xff] %v5489_v36 }
 0xccc   : > { %5633 = vrot.lane.b32.xlu0 %v12152_v59, %s8134_s24  ;;  %s8143_s24 = smov 59  }
 0xcd1   : > { %v12389_v19 = vld [vmem:[#allocation1 + $0x7] ss:$9 sm:$0xff] }
 0xcd4   : > { %5656 = vrot.lane.b32.xlu0 %v12174_v45, %s8135_s21  ;;  %s8144_s21 = smov 48  }
 0xcdc   : > { %5699 = vrot.lane.b32.xlu0 %v12197_v51, %s8136_s15  ;;  %s8145_s15 = smov 78  }
 0xce4   : > { %5732 = vrot.lane.b32.xlu0 %v12206_v34, %s8137_s22  ;;  %s8146_s22 = smov 57  }
 0xcec   : > { %5763 = vrot.lane.b32.xlu0 %v12230_v53, %s8138_s17  ;;  %s8147_s17 = smov 76  }
 0xcf4   : > { %5829 = vrot.lane.b32.xlu0 %v12257_v55, %s8139_s28  ;;  %s8148_s28 = smov 84  }
 0xcfc   : > { %5850 = vrot.lane.b32.xlu0 %v12264_v35, %s8140_s25  ;;  %s8149_s25 = smov 116   ;;  %v6236_v35 = vld [vmem:[#allocation16 + $0x178] sm:$0xff] }
 0xcfd   : > { %v5321_v50 = vpop.permute.xlu1 %5320  ;;  %6678 = vmatpush.msra.mxu0 %v6236_v35  ;;  %v6239_v35 = vld [vmem:[#allocation16 + $0x190] sm:$0xff] }
 0xcfe   : > { %v5361_v11 = vmax.f32 %v5257_v38, %v5321_v50 }
 0xd00   : > { %7397 = vmatmul.msk.f32.gmra.mxu1 %vm4059_vm15, %v5361_v11  ;;  %vm12365_vm15 = vcmp.lt.s32.totalorder %v14372_v20, 147 }
 0xd01   : > { %vm5521_vm6 = vmand %vm12360_vm14, %vm12365_vm15  ;;  %vm12425_vm14 = vcmp.ge.s32.totalorder %v14372_v20, 38  ;;  %vm12430_vm15 = vcmp.lt.s32.totalorder %v14372_v20, 87 }
 0xd04   : > { %5863 = vrot.lane.b32.xlu0 %v12276_v24, %s8141_s6  ;;  %v5517_v24 = vsel %vm1788_vm10, %v5516_v16, %v5515_v28  ;;  %vm12401_vm10 = vcmp.ge.s32.totalorder %v14372_v20, 68  ;;  %s8150_s6 = smov 5   ;;  %v6235_v16 = vld [vmem:[#allocation16 + $0x170] sm:$0xff] }
 0xd05   : > { %v12343_v59 = vpop.permute.xlu1 %5580  ;;  %vm5541_vm13 = vmand %vm12401_vm10, %vm12406_vm4  ;;  %vm5593_vm10 = vcmp.ge.s32.totalorder %v14372_v20, 57  ;;  %vm5594_vm4 = vcmp.lt.s32.totalorder %v14372_v20, 106  ;;  %6679 = vmatpush.msra.mxu0 %v6235_v16  ;;  %v6238_v16 = vld [vmem:[#allocation16 + $0x188] sm:$0xff] }
 0xd07   : > { %6680 = vmatpush.msra.mxu0 %v6234_v14  ;;  %v6237_v14 = vld [vmem:[#allocation16 + $0x180] sm:$0xff] }
 0xd0c   : > { %5895 = vrot.lane.b32.xlu0 %v12293_v31, %s8142_s19  ;;  %v12394_v31 = vpop.permute.xlu2 %5753  ;;  %s8151_s19 = smov 43  }
 0xd0d   : > { %v12346_v51 = vpop.permute.xlu1 %5840 }
 0xd0e   : > { %v5319_v45 = vpop.permute.xlu0 %5318 }
 0xd0f   : > { %v5329_v34 = vsel %vm4611_vm2, %v5319_v45, %v5321_v50 }
 0xd10   : > { %v5360_v53 = vmax.f32 %v5256_v4, %v5329_v34  ;;  %v6245_v4 = vld [vmem:[#allocation16 + $0x1c0] sm:$0xff] }
 0xd12   : > { %5452 = vmatmul.f32.gmra.mxu0 %v5360_v53 }
 0xd13   : > { %v5491_v42 = vpop.f32.mrf.mxu1 }
 0xd14   : > { %v5450_v1 = vpop.f32.mrf.mxu0  ;;  %5959 = vrot.lane.b32.xlu0 %v5958_v0, %s8143_s24  ;;  %s8153_s24 = smov 62  }
 0xd15   : > { %v12379_v30 = vadd.f32 %v5491_v42, %v5450_v1  ;;  %v5547_v13 = vpop.permute.xlu1 %5546  ;;  %v6251_v42 = vld [vmem:[#allocation16 + $0x1f0] sm:$0xff]  ;;  %v6202_v1 = vld [vmem:[#allocation16 + $0x68] sm:$0xff] }
 0xd16   : > { %v5505_v54 = vpop.permute.xlu0 %5504  ;;  %v5548_v10 = vrot.slane %v5547_v13, 7  ;;  %6699 = vmatpush.msra.mxu1 %v6251_v42  ;;  %v6189_v42 = vld [vmem:[#allocation16] sm:$0xff] }
 0xd17   : > { %6012 = vrot.lane.b32.xlu2 %v12379_v30, %s8144_s21  ;;  %5510 = vst.msk [vmem:[#allocation7] sm:$0x1] %vm5509_vm0, %v5505_v54  ;;  %vm5554_vm0 = vmand %vm12411_vm8, %vm12416_vm11  ;;  %vm5572_vm8 = vcmask 711680   ;;  %s8154_s21 = smov 7   ;;  %v6233_v54 = vld [vmem:[#allocation16 + $0x160] sm:$0xff] }
 0xd18   : > { %5522 = vst.msk [vmem:[#allocation7] sm:$0x3] %vm5521_vm6, %v5517_v24  ;;  %vm12449_vm6 = vcmp.ge.s32.totalorder %v14372_v20, 8  ;;  %v5550_v0 = vsel %vm5549_vm12, %v5548_v10, %v5547_v13  ;;  %vm5564_vm11 = vmand %vm12425_vm14, %vm12430_vm15  ;;  %vm5607_vm15 = vcmp.lt.s32.totalorder %v14372_v20, 155  ;;  %v6249_v24 = vld [vmem:[#allocation16 + $0x1e0] sm:$0xff]  ;;  %6681 = vmatpush.msra.mxu0 %v6233_v54  ;;  %v6200_v13 = vld [vmem:[#allocation16 + $0x58] sm:$0xff] }
 0xd19   : > { %6019 = vst [vmem:[#allocation1] sm:$0xff] %v12379_v30  ;;  %vm5577_vm12 = vmand %vm12439_vm1, %vm12444_vm5  ;;  %v6215_v10 = vld [vmem:[#allocation16 + $0xd0] sm:$0xff]  ;;  %v6316_v54 = vld [vmem:[#allocation16 + $0x3f8] sm:$0xff] }
 0xd1a   : > { %5532 = vst.msk [vmem:[#allocation7 + $0x1] sm:$0x1] %vm5531_vm7, %v5527_v3  ;;  %vm12454_vm7 = vcmp.lt.s32.totalorder %v14372_v20, 57  ;;  %vm5595_vm1 = vmand %vm5593_vm10, %vm5594_vm4  ;;  %v6250_v3 = vld [vmem:[#allocation16 + $0x1e8] sm:$0xff]  ;;  %6682 = vmatpush.msra.mxu0 %v6232_v57  ;;  %v6315_v57 = vld [vmem:[#allocation16 + $0x3f0] sm:$0xff]  ;;  %vm5636_vm4 = vcmask 1022976  }
 0xd1b   : > { %vm5585_vm14 = vmand %vm12449_vm6, %vm12454_vm7  ;;  %6700 = vmatpush.msra.mxu1 %v6250_v3  ;;  %v6268_v3 = vld [vmem:[#allocation16 + $0x278] sm:$0xff]  ;;  %vm12542_vm6 = vcmp.ge.s32.totalorder %v14372_v20, 27  ;;  %vm12547_vm7 = vcmp.lt.s32.totalorder %v14372_v20, 76 }
 0xd1c   : > { %5992 = vrot.lane.b32.xlu0 %v5991_v56, %s8145_s15  ;;  %s8155_s15 = smov 119   ;;  %vm5618_vm10 = vmand %vm12542_vm6, %vm12547_vm7  ;;  %vm12619_vm6 = vcmp.lt.s32.totalorder %v14372_v20, 144  ;;  %vm5670_vm7 = vcmp.ge.s32.totalorder %v14372_v20, 16 }
 0xd1d   : > { %v5570_v40 = vpop.permute.xlu1 %5569  ;;  %6701 = vmatpush.msra.mxu1 %v6249_v24  ;;  %v6283_v24 = vld [vmem:[#allocation16 + $0x2f0] sm:$0xff] }
 0xd1e   : > { %v12392_v61 = vpop.permute.xlu0 %5667  ;;  %v5571_v36 = vrot.slane %v5570_v40, 7 }
 0xd1f   : > { %5590 = vrot.lane.b32.xlu2 %v12124_v41, %s8146_s22  ;;  %s8156_s22 = smov 89   ;;  %6702 = vmatpush.msra.mxu1 %v6248_v39  ;;  %v6199_v41 = vld [vmem:[#allocation16 + $0x50] sm:$0xff]  ;;  %v6266_v39 = vld [vmem:[#allocation16 + $0x268] sm:$0xff] }
 0xd20   : > { %v12397_v29 = vld [vmem:[#allocation1 + $0x1] ss:$9 sm:$0xff]  ;;  %v5573_v38 = vsel %vm5572_vm8, %v5571_v36, %v5570_v40  ;;  %vm12552_vm8 = vcmp.ge.s32.totalorder %v14372_v20, 76 }
 0xd21   : > { %6032 = vst [vmem:[#allocation1] sm:$0xff] %v12379_v30  ;;  %v6231_v40 = vld [vmem:[#allocation16 + $0x150] sm:$0xff]  ;;  %6703 = vmatpush.msra.mxu1 %v6247_v8  ;;  %v6197_v36 = vld [vmem:[#allocation16 + $0x40] sm:$0xff]  ;;  %v6314_v8 = vld [vmem:[#allocation16 + $0x3e8] sm:$0xff] }
 0xd22   : > { %6683 = vmatpush.msra.mxu0 %v6231_v40  ;;  %v6298_v40 = vld [vmem:[#allocation16 + $0x368] sm:$0xff] }
 0xd23   : > { %6704 = vmatpush.msra.mxu1 %v6246_v15  ;;  %v6313_v15 = vld [vmem:[#allocation16 + $0x3e0] sm:$0xff] }
 0xd25   : > { %6705 = vmatpush.msra.mxu1 %v6245_v4  ;;  %v6312_v4 = vld [vmem:[#allocation16 + $0x3d8] sm:$0xff] }
 0xd26   : > { %v5537_v12 = vpop.permute.xlu0 %5536 }
 0xd27   : > { %5623 = vrot.lane.b32.xlu2 %v12137_v18, %s8147_s17  ;;  %5542 = vst.msk [vmem:[#allocation7 + $0x1] sm:$0x1] %vm5541_vm13, %v5537_v12  ;;  %v5560_v18 = vpop.permute.xlu2 %5559  ;;  %s8157_s17 = smov 10   ;;  %vm5606_vm13 = vcmp.ge.s32.totalorder %v14372_v20, 106  ;;  %v6213_v12 = vld [vmem:[#allocation16 + $0xc0] sm:$0xff] }
 0xd28   : > { %v12468_v56 = vld [vmem:[#allocation1 + $0x2] ss:$9 sm:$0xff]  ;;  %5555 = vst.msk [vmem:[#allocation7 + $0x1] sm:$0x3] %vm5554_vm0, %v5550_v0  ;;  %vm5603_vm0 = vcmask 867328   ;;  %vm5608_vm5 = vmand %vm5606_vm13, %vm5607_vm15 }
 0xd29   : > { %6042 = vst [vmem:[#allocation1] sm:$0xff] %v12379_v30  ;;  %v6196_v0 = vld [vmem:[#allocation16 + $0x38] sm:$0xff] }
 0xd2a   : > { %5565 = vst.msk [vmem:[#allocation7 + $0x2] sm:$0x1] %vm5564_vm11, %v5560_v18  ;;  %v6212_v18 = vld [vmem:[#allocation16 + $0xb8] sm:$0xff]  ;;  %vm12557_vm11 = vcmp.lt.s32.totalorder %v14372_v20, 125 }
 0xd2b   : > { %5578 = vst.msk [vmem:[#allocation7 + $0x2] sm:$0x3] %vm5577_vm12, %v5573_v38  ;;  %v6228_v38 = vld [vmem:[#allocation16 + $0x138] sm:$0xff]  ;;  %vm12562_vm12 = vcmp.ge.s32.totalorder %v14372_v20, 125  ;;  %vm5628_vm13 = vmand %vm12552_vm8, %vm12557_vm11  ;;  %vm5671_vm8 = vcmp.lt.s32.totalorder %v14372_v20, 65  ;;  %vm5659_vm11 = vcmask 777216  }
 0xd2c   : > { %5586 = vst.msk [vmem:[#allocation7 + $0x3] sm:$0x1] %vm5585_vm14, %v12343_v59  ;;  %vm12567_vm14 = vcmp.lt.s32.totalorder %v14372_v20, 174 }
 0xd2d   : > { %vm5641_vm15 = vmand %vm12562_vm12, %vm12567_vm14 }
 0xd2f   : > { %5687 = vrot.lane.b32.xlu2 %v12193_v26, %s8119_s16  ;;  %s8152_s16 = smov 86  }
 0xd30   : > { %v6044_v50 = vld [vmem:[#allocation1 + $0x3] ss:$9 sm:$0xff] }
 0xd31   : > { %6052 = vst [vmem:[#allocation1] sm:$0xff] %v12379_v30 }
 0xd37   : > { %5709 = vrot.lane.b32.xlu2 %v12200_v48, %s8148_s28  ;;  %s8159_s28 = smov 56  }
 0xd38   : > { %v6054_v11 = vld [vmem:[#allocation1 + $0x4] ss:$9 sm:$0xff] }
 0xd39   : > { %6055 = vrot.lane.b32.xlu0 %v6054_v11, %s8149_s25  ;;  %6065 = vst [vmem:[#allocation1] sm:$0xff] %v12379_v30  ;;  %s8160_s25 = smov 105   ;;  %v6195_v11 = vld [vmem:[#allocation16 + $0x30] sm:$0xff] }
 0xd3f   : > { %5722 = vrot.lane.b32.xlu2 %v12203_v17, %s8150_s6  ;;  %v12496_v17 = vpop.permute.xlu0 %5926  ;;  %s8162_s6 = smov 26  }
 0xd40   : > { %v12486_v28 = vld [vmem:[#allocation1 + $0x5] ss:$9 sm:$0xff] }
 0xd41   : > { %6075 = vst [vmem:[#allocation1] sm:$0xff] %v12379_v30 }
 0xd47   : > { %5786 = vrot.lane.b32.xlu2 %v12243_v5, %s8151_s19  ;;  %s8163_s19 = smov 65  }
 0xd48   : > { %v6077_v26 = vld [vmem:[#allocation1 + $0x6] ss:$9 sm:$0xff] }
 0xd49   : > { %6078 = vrot.lane.b32.xlu0 %v6077_v26, %s8152_s16  ;;  %6088 = vst [vmem:[#allocation1] sm:$0xff] %v12379_v30  ;;  %s8164_s16 = smov 103   ;;  %v6217_v30 = vld [vmem:[#allocation16 + $0xe0] sm:$0xff]  ;;  %v6211_v26 = vld [vmem:[#allocation16 + $0xb0] sm:$0xff] }
 0xd4f   : > { %5819 = vrot.lane.b32.xlu2 %v12252_v60, %s8153_s24  ;;  %v5601_v60 = vpop.permute.xlu0 %5600  ;;  %s8166_s24 = smov 122  }
 0xd50   : > { %v6090_v48 = vld [vmem:[#allocation1 + $0x7] ss:$9 sm:$0xff] }
 0xd51   : > { %6091 = vrot.lane.b32.xlu0 %v6090_v48, %s8154_s21  ;;  %s8167_s21 = smov 45   ;;  %v6227_v48 = vld [vmem:[#allocation16 + $0x130] sm:$0xff] }
 0xd57   : > { %5883 = vrot.lane.b32.xlu2 %v12288_v44, %s8111_s20  ;;  %v5602_v44 = vrot.slane %v5601_v60, 7  ;;  %s8158_s20 = smov 67  }
 0xd5f   : > { %5915 = vrot.lane.b32.xlu2 %v12313_v6, %s8155_s15  ;;  %s8168_s15 = smov 92  }
 0xd67   : > { %5936 = vrot.lane.b32.xlu2 %v12317_v62, %s8156_s22  ;;  %v5604_v62 = vsel %vm5603_vm0, %v5602_v44, %v5601_v60  ;;  %s8169_s22 = smov 94   ;;  %v6194_v60 = vld [vmem:[#allocation16 + $0x28] sm:$0xff]  ;;  %vm12604_vm0 = vcmp.ge.s32.totalorder %v14372_v20, 46 }
 0xd68   : > { %v6210_v44 = vld [vmem:[#allocation16 + $0xa8] sm:$0xff] }
 0xd6f   : > { %5949 = vrot.lane.b32.xlu2 %v12321_v23, %s8157_s17  ;;  %s8173_s17 = smov 18  }
 0xd71   : > { %v12499_v5 = vpop.permute.xlu2 %6012 }
 0xd77   : > { %5982 = vrot.lane.b32.xlu2 %v12328_v52, %s8109_s30  ;;  %s8161_s30 = smov 46  }
 0xd79   : > { %v5591_v6 = vpop.permute.xlu2 %5590 }
 0xd7a   : > { %5596 = vst.msk [vmem:[#allocation7 + $0x3] sm:$0x1] %vm5595_vm1, %v5591_v6  ;;  %v6226_v6 = vld [vmem:[#allocation16 + $0x128] sm:$0xff]  ;;  %vm12609_vm1 = vcmp.lt.s32.totalorder %v14372_v20, 95 }
 0xd7b   : > { %5609 = vst.msk [vmem:[#allocation7 + $0x3] sm:$0x3] %vm5608_vm5, %v5604_v62  ;;  %v6242_v62 = vld [vmem:[#allocation16 + $0x1a8] sm:$0xff]  ;;  %vm12614_vm5 = vcmp.ge.s32.totalorder %v14372_v20, 95  ;;  %vm5651_vm12 = vmand %vm12604_vm0, %vm12609_vm1  ;;  %vm12653_vm0 = vcmp.lt.s32.totalorder %v14372_v20, 163  ;;  %vm12659_vm1 = vcmp.ge.s32.totalorder %v14372_v20, 35 }
 0xd7c   : > { %vm5664_vm14 = vmand %vm12614_vm5, %vm12619_vm6  ;;  %vm12664_vm5 = vcmp.lt.s32.totalorder %v14372_v20, 84 }
 0xd7d   : > { %v5494_v23 = vpop.f32.mrf.mxu1 }
 0xd7f   : > { %6045 = vrot.lane.b32.xlu2 %v6044_v50, %s8158_s20  ;;  %v6244_v50 = vld [vmem:[#allocation16 + $0x1b8] sm:$0xff]  ;;  %s8174_s20 = smov 37  }
 0xd80   : > { %6706 = vmatpush.msra.mxu1 %v6244_v50  ;;  %v6262_v50 = vld [vmem:[#allocation16 + $0x248] sm:$0xff] }
 0xd8f   : > { %v5453_v59 = vpop.f32.mrf.mxu0 }
 0xd90   : > { %v5495_v45 = vadd.f32 %v5494_v23, %v5453_v59  ;;  %v6193_v23 = vld [vmem:[#allocation16 + $0x20] sm:$0xff] }
 0xd91   : > { %v6209_v59 = vld [vmem:[#allocation16 + $0xa0] sm:$0xff] }
 0xd92   : > { %6106 = vst [vmem:[#allocation1] sm:$0xff] %v5495_v45  ;;  %6099 = vrot.lane.b32.xlu1 %v5495_v45, %s8159_s28  ;;  %s8175_s28 = smov 75  }
 0xd99   : > { %v6108_v34 = vld [vmem:[#allocation1 + $0x1] ss:$9 sm:$0xff] }
 0xd9a   : > { %5613 = vrot.lane.b32.xlu1 %v12132_v63, %s8107_s23  ;;  %6109 = vrot.lane.b32.xlu2 %v6108_v34, %s8160_s25  ;;  %6119 = vst [vmem:[#allocation1] sm:$0xff] %v5495_v45  ;;  %s8165_s23 = smov 124   ;;  %v6241_v34 = vld [vmem:[#allocation16 + $0x1a0] sm:$0xff]  ;;  %s7187_s25 = scalar_lea.hbm %s13630_s13, %s8267_s29 }
 0xda1   : > { %v6121_v52 = vld [vmem:[#allocation1 + $0x2] ss:$9 sm:$0xff] }
 0xda2   : > { %5646 = vrot.lane.b32.xlu1 %v12160_v49, %s8161_s30  ;;  %6122 = vrot.lane.b32.xlu0 %v6121_v52, %s8162_s6  ;;  %6129 = vst [vmem:[#allocation1] sm:$0xff] %v5495_v45  ;;  %v6192_v52 = vld [vmem:[#allocation16 + $0x18] sm:$0xff] }
 0xda9   : > { %v12510_v53 = vld [vmem:[#allocation1 + $0x3] ss:$9 sm:$0xff] }
 0xdaa   : > { %6139 = vst [vmem:[#allocation1] sm:$0xff] %v5495_v45  ;;  %5677 = vrot.lane.b32.xlu1 %v12185_v43, %s8163_s19  ;;  %v6204_v43 = vld [vmem:[#allocation16 + $0x78] sm:$0xff] }
 0xdab   : > { %6638 = vmatpush.msrb.mxu2 %v6204_v43  ;;  %v6191_v43 = vld [vmem:[#allocation16 + $0x10] sm:$0xff] }
 0xdb1   : > { %v6141_v55 = vld [vmem:[#allocation1 + $0x4] ss:$9 sm:$0xff] }
 0xdb2   : > { %5742 = vrot.lane.b32.xlu1 %v12227_v32, %s8164_s16  ;;  %6142 = vrot.lane.b32.xlu2 %v6141_v55, %s8165_s23  ;;  %6152 = vst [vmem:[#allocation1] sm:$0xff] %v5495_v45  ;;  %v6220_v32 = vld [vmem:[#allocation16 + $0xf8] sm:$0xff]  ;;  %s7191_s16 = sshll.u32 %s7187_s25, 4  ;;  %s7192_s16 = int_to_ptr.hbm [resolvable:$true] %s7191_s16 }
 0xdb3   : > { %6658 = vmatpush.msrb.mxu3 %v6220_v32  ;;  %v6208_v55 = vld [vmem:[#allocation16 + $0x98] sm:$0xff]  ;;  %v6207_v32 = vld [vmem:[#allocation16 + $0x90] sm:$0xff] }
 0xdb5   : > { %6659 = vmatpush.msrb.mxu3 %v6219_v58  ;;  %v6222_v58 = vld [vmem:[#allocation16 + $0x108] sm:$0xff] }
 0xdb9   : > { %v6154_v63 = vld [vmem:[#allocation1 + $0x5] ss:$9 sm:$0xff] }
 0xdba   : > { %5773 = vrot.lane.b32.xlu1 %v12236_v47, %s8166_s24  ;;  %6155 = vrot.lane.b32.xlu0 %v6154_v63, %s8167_s21  ;;  %6162 = vst [vmem:[#allocation1] sm:$0xff] %v5495_v45  ;;  %v6203_v47 = vld [vmem:[#allocation16 + $0x70] sm:$0xff]  ;;  %v6224_v63 = vld [vmem:[#allocation16 + $0x118] sm:$0xff]  ;;  %s8025_s24 = sshra.s32 %s7192_s16, 4  ;;  %s8026_s24 = int_to_ptr.hbm [resolvable:$true] %s8025_s24 }
 0xdbb   : > { %6639 = vmatpush.msrb.mxu2 %v6203_v47  ;;  %v6206_v47 = vld [vmem:[#allocation16 + $0x88] sm:$0xff]  ;;  %s8027_s21 = scalar_lea.hbm %s8026_s24, 1  ;;  %p8032_p3 = scmp.lt.s32.totalorder %s8026_s24, %s13630_s13 }
 0xdbc   : > { %p8028_p0 = scmp.ne.s32.totalorder %s8026_s24, %s8027_s21 }
 0xdbd   : > { %6640 = vmatpush.msrb.mxu2 %v6202_v1  ;;  %v6205_v1 = vld [vmem:[#allocation16 + $0x80] sm:$0xff] }
 0xdbe   : > { %p8029_p1 = pnand %p8028_p0, %p8284_p5 }
 0xdc0   : > { %p8030_p2 = pneg %p8029_p1 }
 0xdc1   : > { %v6164_v49 = vld [vmem:[#allocation1 + $0x6] ss:$9 sm:$0xff] }
 0xdc2   : > { %5796 = vrot.lane.b32.xlu1 %v12246_v37, %s8168_s15  ;;  %6165 = vrot.lane.b32.xlu2 %v6164_v49, %s8169_s22  ;;  %6175 = vst [vmem:[#allocation1] sm:$0xff] %v5495_v45  ;;  %v6218_v37 = vld [vmem:[#allocation16 + $0xe8] sm:$0xff]  ;;  %v6225_v45 = vld [vmem:[#allocation16 + $0x120] sm:$0xff]  ;;  %v6240_v49 = vld [vmem:[#allocation16 + $0x198] sm:$0xff]  ;;  %s8031_s22 = scalar_lea.hbm %s13630_s13, 2 }
 0xdc3   : > { %6660 = vmatpush.msrb.mxu3 %v6218_v37  ;;  %v6221_v37 = vld [vmem:[#allocation16 + $0x100] sm:$0xff]  ;;  %p8033_p4 = scmp.lt.s32.totalorder %s8031_s22, %s8027_s21 }
 0xdc5   : > { %6661 = vmatpush.msrb.mxu3 %v6217_v30  ;;  %v6300_v30 = vld [vmem:[#allocation16 + $0x378] sm:$0xff]  ;;  %p8034_p7 = por %p8033_p4, %p8032_p3 }
 0xdc7   : > { %6662 = vmatpush.msrb.mxu3 %v6216_v33  ;;  %v6299_v33 = vld [vmem:[#allocation16 + $0x370] sm:$0xff]  ;;  %p8035_p8 = pnand %p8034_p7, %p8030_p2 }
 0xdc9   : > { %6663 = vmatpush.msrb.mxu3 %v6215_v10  ;;  %v12526_v10 = vpop.permute.xlu2 %5623 }
 0xdca   : > { %5809 = vrot.lane.b32.xlu1 %v12249_v9, %s8117_s27  ;;  %v6201_v9 = vld [vmem:[#allocation16 + $0x60] sm:$0xff]  ;;  %s8170_s27 = smov 51  }
 0xdcb   : > { %6641 = vmatpush.msrb.mxu2 %v6201_v9  ;;  %6664 = vmatpush.msrb.mxu3 %v6214_v27  ;;  %v6284_v9 = vld [vmem:[#allocation16 + $0x2f8] sm:$0xff]  ;;  %v6281_v27 = vld [vmem:[#allocation16 + $0x2e0] sm:$0xff] }
 0xdcd   : > { %6642 = vmatpush.msrb.mxu2 %v6200_v13  ;;  %6665 = vmatpush.msrb.mxu3 %v6213_v12  ;;  %v12524_v13 = vpop.permute.xlu0 %5633  ;;  %v6280_v12 = vld [vmem:[#allocation16 + $0x2d8] sm:$0xff] }
 0xdcf   : > { %6643 = vmatpush.msrb.mxu2 %v6199_v41  ;;  %6666 = vmatpush.msrb.mxu3 %v6212_v18  ;;  %v6282_v41 = vld [vmem:[#allocation16 + $0x2e8] sm:$0xff]  ;;  %v6295_v18 = vld [vmem:[#allocation16 + $0x350] sm:$0xff] }
 0xdd1   : > { %6644 = vmatpush.msrb.mxu2 %v6198_v2  ;;  %6667 = vmatpush.msrb.mxu3 %v6211_v26  ;;  %v6265_v2 = vld [vmem:[#allocation16 + $0x260] sm:$0xff]  ;;  %v6278_v26 = vld [vmem:[#allocation16 + $0x2c8] sm:$0xff] }
 0xdd2   : > { %5873 = vrot.lane.b32.xlu1 %v12284_v7, %s8170_s27  ;;  %v6230_v7 = vld [vmem:[#allocation16 + $0x148] sm:$0xff] }
 0xdd3   : > { %6684 = vmatpush.msra.mxu0 %v6230_v7  ;;  %6645 = vmatpush.msrb.mxu2 %v6197_v36  ;;  %v6297_v7 = vld [vmem:[#allocation16 + $0x360] sm:$0xff]  ;;  %v6264_v36 = vld [vmem:[#allocation16 + $0x258] sm:$0xff] }
 0xdd4   : > { %6668 = vmatpush.msrb.mxu3 %v6210_v44  ;;  %v12532_v44 = vpop.permute.xlu2 %5687 }
 0xdd5   : > { %6685 = vmatpush.msra.mxu0 %v6229_v25  ;;  %6646 = vmatpush.msrb.mxu2 %v6196_v0  ;;  %v6296_v25 = vld [vmem:[#allocation16 + $0x358] sm:$0xff]  ;;  %v6279_v0 = vld [vmem:[#allocation16 + $0x2d0] sm:$0xff] }
 0xdd6   : > { %6669 = vmatpush.msrb.mxu3 %v6209_v59  ;;  %v6260_v59 = vld [vmem:[#allocation16 + $0x238] sm:$0xff] }
 0xdd7   : > { %6686 = vmatpush.msra.mxu0 %v6228_v38  ;;  %6647 = vmatpush.msrb.mxu2 %v6195_v11  ;;  %v6311_v38 = vld [vmem:[#allocation16 + $0x3d0] sm:$0xff]  ;;  %v12529_v11 = vpop.permute.xlu0 %5656 }
 0xdd8   : > { %6670 = vmatpush.msrb.mxu3 %v6208_v55  ;;  %v6275_v55 = vld [vmem:[#allocation16 + $0x2b0] sm:$0xff] }
 0xdd9   : > { %6687 = vmatpush.msra.mxu0 %v6227_v48  ;;  %6648 = vmatpush.msrb.mxu2 %v6194_v60  ;;  %v6294_v48 = vld [vmem:[#allocation16 + $0x348] sm:$0xff]  ;;  %v6261_v60 = vld [vmem:[#allocation16 + $0x240] sm:$0xff] }
 0xdda   : > { %5905 = vrot.lane.b32.xlu1 %v12297_v46, %s8115_s8  ;;  %v6243_v46 = vld [vmem:[#allocation16 + $0x1b0] sm:$0xff]  ;;  %s8171_s8 = smov 108   ;;  %6671 = vmatpush.msrb.mxu3 %v6207_v32  ;;  %v6274_v32 = vld [vmem:[#allocation16 + $0x2a8] sm:$0xff] }
 0xddb   : > { %6707 = vmatpush.msra.mxu1 %v6243_v46  ;;  %6688 = vmatpush.msra.mxu0 %v6226_v6  ;;  %v6310_v46 = vld [vmem:[#allocation16 + $0x3c8] sm:$0xff]  ;;  %v6277_v6 = vld [vmem:[#allocation16 + $0x2c0] sm:$0xff] }
 0xddc   : > { %6649 = vmatpush.msrb.mxu2 %v6193_v23  ;;  %6672 = vmatpush.msrb.mxu3 %v6206_v47  ;;  %v6309_v23 = vld [vmem:[#allocation16 + $0x3c0] sm:$0xff] }
 0xddd   : > { %6708 = vmatpush.msra.mxu1 %v6242_v62  ;;  %6689 = vmatpush.msra.mxu0 %v6225_v45  ;;  %v6293_v62 = vld [vmem:[#allocation16 + $0x340] sm:$0xff]  ;;  %v6292_v45 = vld [vmem:[#allocation16 + $0x338] sm:$0xff] }
 0xdde   : > { %6650 = vmatpush.msrb.mxu2 %v6192_v52  ;;  %6673 = vmatpush.msrb.mxu3 %v6205_v1  ;;  %v6259_v52 = vld [vmem:[#allocation16 + $0x230] sm:$0xff]  ;;  %v6305_v1 = vld [vmem:[#allocation16 + $0x3a0] sm:$0xff] }
 0xddf   : > { %6709 = vmatpush.msra.mxu1 %v6241_v34  ;;  %6690 = vmatpush.msra.mxu0 %v6224_v63  ;;  %v6308_v34 = vld [vmem:[#allocation16 + $0x3b8] sm:$0xff]  ;;  %v6291_v63 = vld [vmem:[#allocation16 + $0x330] sm:$0xff] }
 0xde0   : > { %6651 = vmatpush.msrb.mxu2 %v6191_v43  ;;  %6738 = vmatpush.msra.mxu3 %v6284_v9  ;;  %v6258_v43 = vld [vmem:[#allocation16 + $0x228] sm:$0xff] }
 0xde1   : > { %6710 = vmatpush.msra.mxu1 %v6240_v49  ;;  %v6307_v49 = vld [vmem:[#allocation16 + $0x3b0] sm:$0xff] }
 0xde2   : > { %5969 = vrot.lane.b32.xlu1 %v12326_v22, %s8171_s8  ;;  %v6223_v22 = vld [vmem:[#allocation16 + $0x110] sm:$0xff]  ;;  %6652 = vmatpush.msrb.mxu2 %v6190_v21  ;;  %v12535_v21 = vpop.permute.xlu0 %5699 }
 0xde3   : > { %6691 = vmatpush.msra.mxu0 %v6223_v22  ;;  %6711 = vmatpush.msra.mxu1 %v6239_v35  ;;  %v6290_v22 = vld [vmem:[#allocation16 + $0x328] sm:$0xff] }
 0xde4   : > { %6653 = vmatpush.msrb.mxu2 %v6189_v42  ;;  %6739 = vmatpush.msra.mxu3 %v6283_v24  ;;  %v6306_v35 = vld [vmem:[#allocation16 + $0x3a8] sm:$0xff]  ;;  %v6289_v42 = vld [vmem:[#allocation16 + $0x320] sm:$0xff]  ;;  %v6304_v24 = vld [vmem:[#allocation16 + $0x398] sm:$0xff] }
 0xde5   : > { %6692 = vmatpush.msra.mxu0 %v6222_v58  ;;  %6712 = vmatpush.msra.mxu1 %v6238_v16  ;;  %v6257_v58 = vld [vmem:[#allocation16 + $0x220] sm:$0xff] }
 0xde6   : > { %6718 = vmatpush.msra.mxu2 %v6268_v3  ;;  %6740 = vmatpush.msra.mxu3 %v6282_v41  ;;  %v6273_v16 = vld [vmem:[#allocation16 + $0x2a0] sm:$0xff]  ;;  %v6271_v41 = vld [vmem:[#allocation16 + $0x290] sm:$0xff] }
 0xde7   : > { %6693 = vmatpush.msra.mxu0 %v6221_v37  ;;  %6713 = vmatpush.msra.mxu1 %v6237_v14  ;;  %v6256_v37 = vld [vmem:[#allocation16 + $0x218] sm:$0xff] }
 0xde8   : > { %6741 = vmatpush.msra.mxu3 %v6281_v27  ;;  %v6272_v14 = vld [vmem:[#allocation16 + $0x298] sm:$0xff]  ;;  %v6254_v27 = vld [vmem:[#allocation16 + $0x208] sm:$0xff] }
 0xde9   : > { %6758 = vmatpush.msrb.mxu0 %v6300_v30  ;;  %6778 = vmatpush.msrb.mxu1 %v6316_v54  ;;  %v6288_v30 = vld [vmem:[#allocation16 + $0x318] sm:$0xff] }
 0xdea   : > { %6002 = vrot.lane.b32.xlu1 %v12389_v19, %s8105_s18  ;;  %v6267_v19 = vld [vmem:[#allocation16 + $0x270] sm:$0xff]  ;;  %s8172_s18 = smov 97   ;;  %6742 = vmatpush.msra.mxu3 %v6280_v12  ;;  %v6253_v12 = vld [vmem:[#allocation16 + $0x200] sm:$0xff] }
 0xdeb   : > { %6719 = vmatpush.msra.mxu2 %v6267_v19  ;;  %6759 = vmatpush.msrb.mxu0 %v6299_v33 }
 0xdec   : > { %6779 = vmatpush.msrb.mxu1 %v6315_v57  ;;  %6743 = vmatpush.msra.mxu3 %v6279_v0  ;;  %v5733_v0 = vpop.permute.xlu0 %5732  ;;  %v6332_v57 = vld [vmem:[#allocation16 + $0x478] sm:$0xff] }
 0xded   : > { %6720 = vmatpush.msra.mxu2 %v6266_v39  ;;  %6760 = vmatpush.msrb.mxu0 %v6298_v40  ;;  %v6255_v39 = vld [vmem:[#allocation16 + $0x210] sm:$0xff] }
 0xdee   : > { %6780 = vmatpush.msrb.mxu1 %v6314_v8  ;;  %6744 = vmatpush.msra.mxu3 %v6278_v26  ;;  %v6287_v40 = vld [vmem:[#allocation16 + $0x310] sm:$0xff]  ;;  %v5635_v8 = vrot.slane %v12524_v13, 7  ;;  %v6345_v26 = vld [vmem:[#allocation16 + $0x4e0] sm:$0xff] }
 0xdef   : > { %6721 = vmatpush.msra.mxu2 %v6265_v2  ;;  %6761 = vmatpush.msrb.mxu0 %v6297_v7  ;;  %v6303_v2 = vld [vmem:[#allocation16 + $0x390] sm:$0xff]  ;;  %v6270_v7 = vld [vmem:[#allocation16 + $0x288] sm:$0xff] }
 0xdf0   : > { %6781 = vmatpush.msrb.mxu1 %v6313_v15  ;;  %6745 = vmatpush.msra.mxu3 %v6277_v6  ;;  %v6286_v15 = vld [vmem:[#allocation16 + $0x308] sm:$0xff] }
 0xdf1   : > { %6722 = vmatpush.msra.mxu2 %v6264_v36  ;;  %6762 = vmatpush.msrb.mxu0 %v6296_v25  ;;  %v6269_v25 = vld [vmem:[#allocation16 + $0x280] sm:$0xff] }
 0xdf2   : > { %6022 = vrot.lane.b32.xlu1 %v12397_v29, %s8172_s18  ;;  %v6263_v29 = vld [vmem:[#allocation16 + $0x250] sm:$0xff]  ;;  %6782 = vmatpush.msrb.mxu1 %v6312_v4  ;;  %v6285_v4 = vld [vmem:[#allocation16 + $0x300] sm:$0xff] }
 0xdf3   : > { %6723 = vmatpush.msra.mxu2 %v6263_v29  ;;  %6763 = vmatpush.msrb.mxu0 %v6295_v18  ;;  %v5637_v29 = vsel %vm5636_vm4, %v5635_v8, %v12524_v13  ;;  %v6301_v18 = vld [vmem:[#allocation16 + $0x380] sm:$0xff]  ;;  %vm12638_vm4 = vcmp.ge.s32.totalorder %v14372_v20, 65  ;;  %v6362_v13 = vld [vmem:[#allocation16 + $0x568] sm:$0xff]  ;;  %v6324_v8 = vld [vmem:[#allocation16 + $0x438] sm:$0xff] }
 0xdf4   : > { %6783 = vmatpush.msrb.mxu1 %v6311_v38  ;;  %v6378_v38 = vld [vmem:[#allocation16 + $0x5e8] sm:$0xff] }
 0xdf5   : > { %6724 = vmatpush.msra.mxu2 %v6262_v50  ;;  %6764 = vmatpush.msrb.mxu0 %v6294_v48  ;;  %v5658_v48 = vrot.slane %v12529_v11, 7  ;;  %v6329_v50 = vld [vmem:[#allocation16 + $0x460] sm:$0xff] }
 0xdf6   : > { %6784 = vmatpush.msrb.mxu1 %v6310_v46  ;;  %v6177_v46 = vld [vmem:[#allocation1 + $0x7] ss:$9 sm:$0xff] }
 0xdf7   : > { %6725 = vmatpush.msra.mxu2 %v6261_v60  ;;  %6765 = vmatpush.msrb.mxu0 %v6293_v62  ;;  %v5660_v6 = vsel %vm5659_vm11, %v5658_v48, %v12529_v11  ;;  %v6361_v48 = vld [vmem:[#allocation16 + $0x560] sm:$0xff]  ;;  %v6328_v11 = vld [vmem:[#allocation16 + $0x458] sm:$0xff]  ;;  %v6370_v62 = vld [vmem:[#allocation16 + $0x5a8] sm:$0xff] }
 0xdf8   : > { %6785 = vmatpush.msrb.mxu1 %v6309_v23  ;;  %v6441_v23 = vld [vmem:[#allocation16 + $0x7e0] sm:$0xff] }
 0xdf9   : > { %6726 = vmatpush.msra.mxu2 %v6260_v59  ;;  %6766 = vmatpush.msrb.mxu0 %v6292_v45  ;;  %v5764_v59 = vpop.permute.xlu0 %5763  ;;  %v6360_v45 = vld [vmem:[#allocation16 + $0x558] sm:$0xff] }
 0xdfa   : > { %6035 = vrot.lane.b32.xlu1 %v12468_v56, %s8173_s17  ;;  %v6276_v56 = vld [vmem:[#allocation16 + $0x2b8] sm:$0xff]  ;;  %6786 = vmatpush.msrb.mxu1 %v6308_v34 }
 0xdfb   : > { %6746 = vmatpush.msra.mxu3 %v6276_v56  ;;  %6727 = vmatpush.msra.mxu2 %v6259_v52  ;;  %v6376_v34 = vld [vmem:[#allocation16 + $0x5d8] sm:$0xff] }
 0xdfc   : > { %6767 = vmatpush.msrb.mxu0 %v6291_v63  ;;  %6787 = vmatpush.msrb.mxu1 %v6307_v49  ;;  %v6343_v63 = vld [vmem:[#allocation16 + $0x4d0] sm:$0xff] }
 0xdfd   : > { %6747 = vmatpush.msra.mxu3 %v6275_v55  ;;  %6728 = vmatpush.msra.mxu2 %v6258_v43  ;;  %v6327_v55 = vld [vmem:[#allocation16 + $0x450] sm:$0xff] }
 0xdfe   : > { %6768 = vmatpush.msrb.mxu0 %v6290_v22  ;;  %6788 = vmatpush.msrb.mxu1 %v6306_v35 }
 0xdff   : > { %6748 = vmatpush.msra.mxu3 %v6274_v32  ;;  %6729 = vmatpush.msra.mxu2 %v6257_v58  ;;  %v6359_v32 = vld [vmem:[#allocation16 + $0x550] sm:$0xff] }
 0xe00   : > { %6769 = vmatpush.msrb.mxu0 %v6289_v42  ;;  %6789 = vmatpush.msrb.mxu1 %v6305_v1  ;;  %v6334_v42 = vld [vmem:[#allocation16 + $0x488] sm:$0xff] }
 0xe01   : > { %6749 = vmatpush.msra.mxu3 %v6273_v16  ;;  %6730 = vmatpush.msra.mxu2 %v6256_v37  ;;  %v6342_v16 = vld [vmem:[#allocation16 + $0x4c8] sm:$0xff] }
 0xe02   : > { %6068 = vrot.lane.b32.xlu1 %v12486_v28, %s8174_s20  ;;  %v12539_v28 = vpop.permute.xlu2 %5709  ;;  %6770 = vmatpush.msrb.mxu0 %v6288_v30  ;;  %v6358_v37 = vld [vmem:[#allocation16 + $0x548] sm:$0xff]  ;;  %s537_s20 = sand.u32 1, %s8081_s26  }
 0xe03   : > { %6750 = vmatpush.msra.mxu3 %v6272_v14  ;;  %6790 = vmatpush.msrb.mxu1 %v6304_v24  ;;  %v5711_v49 = vrot.slane %v12539_v28, 7  ;;  %v6374_v14 = vld [vmem:[#allocation16 + $0x5c8] sm:$0xff]  ;;  %s538_s6 = scalar_lea.vmem [#allocation20], %s537_s20  ;;  %s7179_s23 = scalar_lea.sflag [#allocation10], %s537_s20 }
 0xe04   : > { %v12537_v47 = vpop.permute.xlu1 %6099  ;;  %6731 = vmatpush.msra.mxu2 %v6255_v39  ;;  %6771 = vmatpush.msrb.mxu0 %v6287_v40  ;;  %v6348_v39 = vld [vmem:[#allocation16 + $0x4f8] sm:$0xff]  ;;  %s7189_s19 = sshll.u32 %s538_s6, 4  ;;  %s7190_s19 = int_to_ptr.vmem [resolvable:$true] %s7189_s19 }
 0xe05   : > { %6751 = vmatpush.msra.mxu3 %v6271_v41  ;;  %6791 = vmatpush.msrb.mxu1 %v6303_v2  ;;  %v6364_v41 = vld [vmem:[#allocation16 + $0x578] sm:$0xff] }
 0xe06   : > { %6732 = vmatpush.msra.mxu2 %v6254_v27  ;;  %6772 = vmatpush.msrb.mxu0 %v6286_v15  ;;  %v6380_v40 = vld [vmem:[#allocation16 + $0x5f8] sm:$0xff]  ;;  %v6347_v27 = vld [vmem:[#allocation16 + $0x4f0] sm:$0xff] }
 0xe07   : > { %6752 = vmatpush.msra.mxu3 %v6270_v7  ;;  %v6340_v2 = vld [vmem:[#allocation16 + $0x4b8] sm:$0xff] }
 0xe08   : > { %6733 = vmatpush.msra.mxu2 %v6253_v12  ;;  %6773 = vmatpush.msrb.mxu0 %v6285_v4  ;;  %v6379_v12 = vld [vmem:[#allocation16 + $0x5f0] sm:$0xff]  ;;  %v6356_v15 = vld [vmem:[#allocation16 + $0x538] sm:$0xff] }
 0xe09   : > { %6753 = vmatpush.msra.mxu3 %v6269_v25 }
 0xe0a   : > { %6132 = vrot.lane.b32.xlu1 %v12510_v53, %s8175_s28  ;;  %v6302_v53 = vld [vmem:[#allocation16 + $0x388] sm:$0xff] }
 0xe0b   : > { %6792 = vmatpush.msrb.mxu1 %v6302_v53  ;;  %v6363_v53 = vld [vmem:[#allocation16 + $0x570] sm:$0xff] }
 0xe0c   : > { %v5614_v36 = vpop.permute.xlu1 %5613 }
 0xe0d   : > { %5619 = vst.msk [vmem:[#allocation7 + $0x4] sm:$0x1] %vm5618_vm10, %v5614_v36  ;;  %6793 = vmatpush.msrb.mxu1 %v6301_v18  ;;  %vm5672_vm10 = vmand %vm5670_vm7, %vm5671_vm8  ;;  %vm12675_vm7 = vcmp.ge.s32.totalorder %v14372_v20, 84  ;;  %vm12680_vm8 = vcmp.lt.s32.totalorder %v14372_v20, 133 }
 0xe0e   : > { %5629 = vst.msk [vmem:[#allocation7 + $0x4] sm:$0x1] %vm5628_vm13, %v12526_v10  ;;  %v5723_v10 = vpop.permute.xlu2 %5722  ;;  %vm12643_vm13 = vcmp.lt.s32.totalorder %v14372_v20, 114 }
 0xe0f   : > { %5642 = vst.msk [vmem:[#allocation7 + $0x4] sm:$0x3] %vm5641_vm15, %v5637_v29  ;;  %vm12648_vm15 = vcmp.ge.s32.totalorder %v14372_v20, 114  ;;  %vm5682_vm6 = vmand %vm12638_vm4, %vm12643_vm13  ;;  %vm5735_vm13 = vcmp.ge.s32.totalorder %v14372_v20, 54  ;;  %v6330_v29 = vld [vmem:[#allocation16 + $0x468] sm:$0xff] }
 0xe10   : > { %vm5694_vm11 = vmand %vm12648_vm15, %vm12653_vm0  ;;  %vm5736_vm15 = vcmp.lt.s32.totalorder %v14372_v20, 103 }
 0xe11   : > { %vm5704_vm4 = vmand %vm12659_vm1, %vm12664_vm5 }
 0xe12   : > { %6178 = vrot.lane.b32.xlu1 %v6177_v46, %s8121_s14  ;;  %vm5717_vm0 = vmand %vm12675_vm7, %vm12680_vm8  ;;  %vm12726_vm7 = vcmp.ge.s32.totalorder %v14372_v20, 24  ;;  %vm12731_vm8 = vcmp.lt.s32.totalorder %v14372_v20, 73  ;;  %v6377_v46 = vld [vmem:[#allocation16 + $0x5e0] sm:$0xff] }
 0xe13   : > { %vm5737_vm5 = vmand %vm5735_vm13, %vm5736_vm15  ;;  %vm12765_vm15 = vcmp.ge.s32.totalorder %v14372_v20, 122 }
 0xe14   : > { %v5647_v60 = vpop.permute.xlu1 %5646 }
 0xe15   : > { %5652 = vst.msk [vmem:[#allocation7 + $0x5] sm:$0x1] %vm5651_vm12, %v5647_v60  ;;  %vm12690_vm12 = vcmp.ge.s32.totalorder %v14372_v20, 5 }
 0xe16   : > { %5665 = vst.msk [vmem:[#allocation7 + $0x5] sm:$0x3] %vm5664_vm14, %v5660_v6  ;;  %v12668_v52 = vpop.permute.xlu2 %5786  ;;  %vm12695_vm14 = vcmp.lt.s32.totalorder %v14372_v20, 54 }
 0xe17   : > { %5673 = vst.msk [vmem:[#allocation7 + $0x6] sm:$0x1] %vm5672_vm10, %v12392_v61  ;;  %v5689_v61 = vrot.slane %v12532_v44, 7  ;;  %vm5712_vm10 = vcmask 687104   ;;  %vm5727_vm1 = vmand %vm12690_vm12, %vm12695_vm14  ;;  %vm12738_vm12 = vcmp.ge.s32.totalorder %v14372_v20, 73  ;;  %vm12743_vm14 = vcmp.lt.s32.totalorder %v14372_v20, 122 }
 0xe18   : > { %v5713_v58 = vsel %vm5712_vm10, %v5711_v49, %v12539_v28  ;;  %vm5768_vm13 = vmand %vm12738_vm12, %vm12743_vm14  ;;  %vm5799_vm12 = vcmask 752640  }
 0xe19   : > { %v5690_v35 = vsel %vm4611_vm2, %v5689_v61, %v12532_v44  ;;  %v12717_v44 = vpop.permute.xlu0 %5829  ;;  %vm12720_vm2 = vcmp.ge.s32.totalorder %v14372_v20, 103  ;;  %v6344_v61 = vld [vmem:[#allocation16 + $0x4d8] sm:$0xff] }
 0xe1c   : > { %v5678_v22 = vpop.permute.xlu1 %5677 }
 0xe1d   : > { %5683 = vst.msk [vmem:[#allocation7 + $0x6] sm:$0x1] %vm5682_vm6, %v5678_v22  ;;  %vm5749_vm6 = vcmp.lt.s32.totalorder %v14372_v20, 152  ;;  %v6375_v22 = vld [vmem:[#allocation16 + $0x5d0] sm:$0xff] }
 0xe1e   : > { %5695 = vst.msk [vmem:[#allocation7 + $0x6] sm:$0x3] %vm5694_vm11, %v5690_v35  ;;  %v12735_v1 = vpop.permute.xlu2 %5819  ;;  %vm5745_vm11 = vcmask 842752   ;;  %vm5750_vm10 = vmand %vm12720_vm2, %vm5749_vm6  ;;  %vm5776_vm2 = vcmask 998400  }
 0xe1f   : > { %5705 = vst.msk [vmem:[#allocation7 + $0x7] sm:$0x1] %vm5704_vm4, %v12535_v21  ;;  %vm5758_vm4 = vmand %vm12726_vm7, %vm12731_vm8  ;;  %vm12801_vm8 = vcmp.ge.s32.totalorder %v14372_v20, 92  ;;  %v6406_v21 = vld [vmem:[#allocation16 + $0x6c8] sm:$0xff] }
 0xe20   : > { %5718 = vst.msk [vmem:[#allocation7 + $0x7] sm:$0x3] %vm5717_vm0, %v5713_v58  ;;  %vm12770_vm0 = vcmp.lt.s32.totalorder %v14372_v20, 171  ;;  %v6326_v58 = vld [vmem:[#allocation16 + $0x448] sm:$0xff] }
 0xe21   : > { %5728 = vst.msk [vmem:[#allocation7 + $0x8] sm:$0x1] %vm5727_vm1, %v5723_v10  ;;  %vm12775_vm1 = vcmp.ge.s32.totalorder %v14372_v20, 43  ;;  %v12784_v36 = vpop.permute.xlu0 %5850  ;;  %vm5781_vm6 = vmand %vm12765_vm15, %vm12770_vm0  ;;  %vm12841_vm15 = vcmp.lt.s32.totalorder %v14372_v20, 111  ;;  %vm12846_vm0 = vcmp.ge.s32.totalorder %v14372_v20, 111 }
 0xe22   : > { %5738 = vst.msk [vmem:[#allocation7 + $0x8] sm:$0x1] %vm5737_vm5, %v5733_v0  ;;  %vm12780_vm5 = vcmp.lt.s32.totalorder %v14372_v20, 92  ;;  %v6346_v0 = vld [vmem:[#allocation16 + $0x4e8] sm:$0xff]  ;;  %v5852_v7 = vrot.slane %v12784_v36, 7 }
 0xe23   : > { %vm5791_vm7 = vmand %vm12775_vm1, %vm12780_vm5  ;;  %vm12851_vm1 = vcmp.lt.s32.totalorder %v14372_v20, 160 }
 0xe24   : > { %v5743_v28 = vpop.permute.xlu1 %5742 }
 0xe25   : > { %v5744_v3 = vrot.slane %v5743_v28, 7 }
 0xe26   : > { %v12790_v18 = vpop.permute.xlu2 %5883 }
 0xe27   : > { %v5746_v9 = vsel %vm5745_vm11, %v5744_v3, %v5743_v28  ;;  %v12753_v30 = vld [vmem:[#allocation7] sm:$0xff]  ;;  %vm12806_vm11 = vcmp.lt.s32.totalorder %v14372_v20, 141 }
 0xe28   : > { %5751 = vst.msk [vmem:[#allocation7 + $0x8] sm:$0x3] %vm5750_vm10, %v5746_v9  ;;  %v6586_v54 = vperm.slane %v12753_v30, 0  ;;  %v6587_v19 = vperm.slane %v12753_v30, 1  ;;  %v6588_v24 = vperm.slane %v12753_v30, 2  ;;  %v6589_v33 = vperm.slane %v12753_v30, 3  ;;  %vm5804_vm14 = vmand %vm12801_vm8, %vm12806_vm11 }
 0xe29   : > { %5759 = vst.msk [vmem:[#allocation7 + $0x9] sm:$0x1] %vm5758_vm4, %v12394_v31  ;;  %v6331_v31 = vld [vmem:[#allocation16 + $0x470] sm:$0xff]  ;;  %v6590_v60 = vperm.slane %v12753_v30, 4  ;;  %v6591_v6 = vperm.slane %v12753_v30, 5  ;;  %v6593_v56 = vperm.slane %v12753_v30, 7  ;;  %v12816_v43 = vpop.permute.xlu0 %5863 }
 0xe2a   : > { %6654 = vmatmul.f32.vlgmr.msrb.gmra.mxu2 %v6586_v54  ;;  %6674 = vmatmul.f32.vlgmr.msrb.gmra.mxu3 %v6587_v19  ;;  %5769 = vst.msk [vmem:[#allocation7 + $0x9] sm:$0x1] %vm5768_vm13, %v5764_v59  ;;  %v6592_v59 = vperm.slane %v12753_v30, 6  ;;  %vm12819_vm10 = vcmp.ge.s32.totalorder %v14372_v20, 13  ;;  %vm12824_vm4 = vcmp.lt.s32.totalorder %v14372_v20, 62  ;;  %vm12836_vm13 = vcmp.ge.s32.totalorder %v14372_v20, 62 }
 0xe2b   : > { %6694 = vmatmul.f32.vlgmr.msra.gmra.mxu0 %v6588_v24  ;;  %6714 = vmatmul.f32.vlgmr.msra.gmra.mxu1 %v6589_v33  ;;  %v6325_v30 = vld [vmem:[#allocation16 + $0x440] sm:$0xff]  ;;  %v5831_v33 = vrot.slane %v12717_v44, 7  ;;  %vm5814_vm5 = vmand %vm12819_vm10, %vm12824_vm4  ;;  %vm12875_vm11 = vcmp.ge.s32.totalorder %v14372_v20, 81  ;;  %vm5853_vm8 = vcmask 662528   ;;  %v6366_v3 = vld [vmem:[#allocation16 + $0x588] sm:$0xff] }
 0xe2c   : > { %6798 = vmatpush.msrb.mxu2 %v6332_v57  ;;  %6818 = vmatpush.msrb.mxu3 %v6348_v39  ;;  %v5774_v25 = vpop.permute.xlu1 %5773  ;;  %v6341_v54 = vld [vmem:[#allocation16 + $0x4c0] sm:$0xff]  ;;  %vm14489_vm10 = vmand %vm12836_vm13, %vm12841_vm15  ;;  %vm12931_vm15 = vcmp.ge.s32.totalorder %v14372_v20, 51 }
 0xe2d   : > { %6838 = vmatpush.msra.mxu0 %v6364_v41  ;;  %6858 = vmatpush.msra.mxu1 %v6380_v40  ;;  %v5775_v4 = vrot.slane %v5774_v25, 7  ;;  %v6357_v57 = vld [vmem:[#allocation16 + $0x540] sm:$0xff]  ;;  %vm5868_vm13 = vmand %vm12890_vm3, %vm12895_vm9  ;;  %vm14503_vm9 = vcmask 818176  }
 0xe2e   : > { %6799 = vmatpush.msrb.mxu2 %v6331_v31  ;;  %6819 = vmatpush.msrb.mxu3 %v6347_v27  ;;  %v12828_v28 = vpop.permute.xlu2 %5915  ;;  %v6373_v39 = vld [vmem:[#allocation16 + $0x5c0] sm:$0xff]  ;;  %v6396_v27 = vld [vmem:[#allocation16 + $0x678] sm:$0xff] }
 0xe2f   : > { %6839 = vmatpush.msra.mxu0 %v6363_v53  ;;  %6859 = vmatpush.msra.mxu1 %v6379_v12  ;;  %v5777_v10 = vsel %vm5776_vm2, %v5775_v4, %v5774_v25  ;;  %vm12861_vm2 = vcmp.ge.s32.totalorder %v14372_v20, 32  ;;  %v6372_v53 = vld [vmem:[#allocation16 + $0x5b8] sm:$0xff]  ;;  %v6317_v19 = vld [vmem:[#allocation16 + $0x400] sm:$0xff] }
 0xe30   : > { %5782 = vst.msk [vmem:[#allocation7 + $0x9] sm:$0x3] %vm5781_vm6, %v5777_v10  ;;  %6800 = vmatpush.msrb.mxu2 %v6330_v29  ;;  %6820 = vmatpush.msrb.mxu3 %v6346_v0  ;;  %vm12866_vm6 = vcmp.lt.s32.totalorder %v14372_v20, 81  ;;  %v6323_v29 = vld [vmem:[#allocation16 + $0x430] sm:$0xff]  ;;  %v6333_v24 = vld [vmem:[#allocation16 + $0x480] sm:$0xff]  ;;  %v6428_v25 = vld [vmem:[#allocation16 + $0x778] sm:$0xff] }
 0xe31   : > { %6840 = vmatpush.msra.mxu0 %v6362_v13  ;;  %6860 = vmatpush.msra.mxu1 %v6378_v38  ;;  %5792 = vst.msk [vmem:[#allocation7 + $0xa] sm:$0x1] %vm5791_vm7, %v12668_v52  ;;  %vm5832_vm7 = vcmask 908288   ;;  %v6339_v0 = vld [vmem:[#allocation16 + $0x4b0] sm:$0xff]  ;;  %v5885_v38 = vrot.slane %v12790_v18, 7  ;;  %v6349_v41 = vld [vmem:[#allocation16 + $0x500] sm:$0xff] }
 0xe32   : > { %6801 = vmatpush.msrb.mxu2 %v6329_v50  ;;  %6821 = vmatpush.msrb.mxu3 %v6345_v26  ;;  %v5833_v13 = vsel %vm5832_vm7, %v5831_v33, %v12717_v44  ;;  %v6355_v10 = vld [vmem:[#allocation16 + $0x530] sm:$0xff]  ;;  %v6322_v44 = vld [vmem:[#allocation16 + $0x428] sm:$0xff]  ;;  %vm12936_vm7 = vcmp.lt.s32.totalorder %v14372_v20, 100  ;;  %v6365_v40 = vld [vmem:[#allocation16 + $0x580] sm:$0xff] }
 0xe33   : > { %6841 = vmatpush.msra.mxu0 %v6361_v48  ;;  %6861 = vmatpush.msra.mxu1 %v6377_v46  ;;  %v6371_v50 = vld [vmem:[#allocation16 + $0x5b0] sm:$0xff]  ;;  %v6338_v26 = vld [vmem:[#allocation16 + $0x4a8] sm:$0xff]  ;;  %v5854_v46 = vsel %vm5853_vm8, %v5852_v7, %v12784_v36  ;;  %vm5878_vm8 = vmand %vm12931_vm15, %vm12936_vm7  ;;  %vm5918_vm15 = vcmask 973824  }
 0xe34   : > { %6734 = vmatmul.f32.vlgmr.msra.gmra.mxu2 %v6590_v60  ;;  %6754 = vmatmul.f32.vlgmr.msra.gmra.mxu3 %v6591_v6  ;;  %v5797_v52 = vpop.permute.xlu1 %5796  ;;  %v5896_v60 = vpop.permute.xlu0 %5895  ;;  %v6354_v6 = vld [vmem:[#allocation16 + $0x528] sm:$0xff]  ;;  %v6412_v7 = vld [vmem:[#allocation16 + $0x6f8] sm:$0xff]  ;;  %v6405_v9 = vld [vmem:[#allocation16 + $0x6c0] sm:$0xff] }
 0xe35   : > { %6774 = vmatmul.f32.vlgmr.msrb.gmra.mxu0 %v6592_v59  ;;  %6794 = vmatmul.f32.vlgmr.msrb.gmra.mxu1 %v6593_v56  ;;  %v5798_v49 = vrot.slane %v5797_v52, 7  ;;  %v6321_v59 = vld [vmem:[#allocation16 + $0x420] sm:$0xff]  ;;  %v6444_v4 = vld [vmem:[#allocation16 + $0x7f8] sm:$0xff]  ;;  %v6410_v48 = vld [vmem:[#allocation16 + $0x6e8] sm:$0xff] }
 0xe36   : > { %6802 = vmatpush.msrb.mxu2 %v6328_v11  ;;  %6822 = vmatpush.msrb.mxu3 %v6344_v61  ;;  %v6337_v56 = vld [vmem:[#allocation16 + $0x4a0] sm:$0xff]  ;;  %v12973_v61 = vpop.permute.xlu2 %5936  ;;  %v6400_v36 = vld [vmem:[#allocation16 + $0x698] sm:$0xff]  ;;  %v6383_v11 = vld [vmem:[#allocation16 + $0x610] sm:$0xff] }
 0xe37   : > { %6842 = vmatpush.msra.mxu0 %v6360_v45  ;;  %6862 = vmatpush.msra.mxu1 %v6376_v34  ;;  %v5800_v35 = vsel %vm5799_vm12, %v5798_v49, %v5797_v52  ;;  %vm12880_vm12 = vcmp.lt.s32.totalorder %v14372_v20, 130  ;;  %v6353_v45 = vld [vmem:[#allocation16 + $0x520] sm:$0xff]  ;;  %v6320_v52 = vld [vmem:[#allocation16 + $0x418] sm:$0xff]  ;;  %v5938_v31 = vrot.slane %v12973_v61, 7 }
 0xe38   : > { %6803 = vmatpush.msrb.mxu2 %v6327_v55  ;;  %6823 = vmatpush.msrb.mxu3 %v6343_v63  ;;  %5805 = vst.msk [vmem:[#allocation7 + $0xa] sm:$0x3] %vm5804_vm14, %v5800_v35  ;;  %vm5845_vm14 = vmand %vm12861_vm2, %vm12866_vm6  ;;  %vm12964_vm2 = vcmp.ge.s32.totalorder %v14372_v20, 21  ;;  %vm12969_vm6 = vcmp.lt.s32.totalorder %v14372_v20, 70  ;;  %v6369_v34 = vld [vmem:[#allocation16 + $0x5a0] sm:$0xff]  ;;  %v6336_v55 = vld [vmem:[#allocation16 + $0x498] sm:$0xff] }
 0xe39   : > { %6843 = vmatpush.msra.mxu0 %v6359_v32  ;;  %6863 = vmatpush.msra.mxu1 %v6375_v22  ;;  %vm5858_vm4 = vmand %vm12875_vm11, %vm12880_vm12  ;;  %v6352_v63 = vld [vmem:[#allocation16 + $0x518] sm:$0xff]  ;;  %v6319_v22 = vld [vmem:[#allocation16 + $0x410] sm:$0xff]  ;;  %vm13011_vm12 = vcmp.ge.s32.totalorder %v14372_v20, 70 }
 0xe3a   : > { %6804 = vmatpush.msrb.mxu2 %v6326_v58  ;;  %6824 = vmatpush.msrb.mxu3 %v6342_v16  ;;  %v6368_v49 = vld [vmem:[#allocation16 + $0x598] sm:$0xff]  ;;  %vm5900_vm3 = vmand %vm12964_vm2, %vm12969_vm6  ;;  %v6335_v35 = vld [vmem:[#allocation16 + $0x490] sm:$0xff]  ;;  %vm13061_vm6 = vcmp.ge.s32.totalorder %v14372_v20, 10  ;;  %vm13080_vm2 = vcmp.lt.s32.totalorder %v14372_v20, 108 }
 0xe3b   : > { %6844 = vmatpush.msra.mxu0 %v6358_v37  ;;  %6864 = vmatpush.msra.mxu1 %v6374_v14  ;;  %v6351_v58 = vld [vmem:[#allocation16 + $0x510] sm:$0xff]  ;;  %v6350_v14 = vld [vmem:[#allocation16 + $0x508] sm:$0xff] }
 0xe3c   : > { %6805 = vmatpush.msrb.mxu2 %v6325_v30  ;;  %6825 = vmatpush.msrb.mxu3 %v6341_v54  ;;  %v5810_v12 = vpop.permute.xlu1 %5809  ;;  %v6367_v16 = vld [vmem:[#allocation16 + $0x590] sm:$0xff]  ;;  %v5917_v54 = vrot.slane %v12828_v28, 7  ;;  %v6422_v37 = vld [vmem:[#allocation16 + $0x748] sm:$0xff] }
 0xe3d   : > { %6845 = vmatpush.msra.mxu0 %v6357_v57  ;;  %6865 = vmatpush.msra.mxu1 %v6373_v39  ;;  %5815 = vst.msk [vmem:[#allocation7 + $0xb] sm:$0x1] %vm5814_vm5, %v5810_v12  ;;  %vm14490_vm5 = vmand %vm12846_vm0, %vm12851_vm1  ;;  %vm12949_vm0 = vcmp.ge.s32.totalorder %v14372_v20, 100  ;;  %vm12954_vm1 = vcmp.lt.s32.totalorder %v14372_v20, 149  ;;  %v5960_v39 = vpop.permute.xlu0 %5959  ;;  %v6388_v57 = vld [vmem:[#allocation16 + $0x638] sm:$0xff] }
 0xe3e   : > { %6806 = vmatpush.msrb.mxu2 %v6324_v8  ;;  %6826 = vmatpush.msrb.mxu3 %v6340_v2  ;;  %5825 = vst.msk [vmem:[#allocation7 + $0xb] sm:$0x1] %vm14489_vm10, %v12735_v1  ;;  %vm5890_vm11 = vmand %vm12949_vm0, %vm12954_vm1  ;;  %vm13021_vm10 = vcmp.ge.s32.totalorder %v14372_v20, 119  ;;  %vm13046_vm0 = vcmp.ge.s32.totalorder %v14372_v20, 89  ;;  %vm13051_vm1 = vcmp.lt.s32.totalorder %v14372_v20, 138  ;;  %v5950_v12 = vpop.permute.xlu2 %5949  ;;  %v6394_v1 = vld [vmem:[#allocation16 + $0x668] sm:$0xff] }
 0xe3f   : > { %6846 = vmatpush.msra.mxu0 %v6356_v15  ;;  %6866 = vmatpush.msra.mxu1 %v6372_v53  ;;  %5838 = vst.msk [vmem:[#allocation7 + $0xb] sm:$0x3] %vm14490_vm5, %v5833_v13  ;;  %vm13032_vm5 = vcmp.ge.s32.totalorder %v14372_v20, 40  ;;  %v6420_v2 = vld [vmem:[#allocation16 + $0x738] sm:$0xff] }
 0xe40   : > { %6807 = vmatpush.msrb.mxu2 %v6323_v29  ;;  %6827 = vmatpush.msrb.mxu3 %v6339_v0  ;;  %5846 = vst.msk [vmem:[#allocation7 + $0xc] sm:$0x1] %vm5845_vm14, %v12346_v51  ;;  %vm13016_vm14 = vcmp.lt.s32.totalorder %v14372_v20, 119  ;;  %v6408_v51 = vld [vmem:[#allocation16 + $0x6d8] sm:$0xff] }
 0xe41   : > { %6847 = vmatpush.msra.mxu0 %v6355_v10  ;;  %6867 = vmatpush.msra.mxu1 %v6371_v50  ;;  %5859 = vst.msk [vmem:[#allocation7 + $0xc] sm:$0x3] %vm5858_vm4, %v5854_v46  ;;  %vm13026_vm4 = vcmp.lt.s32.totalorder %v14372_v20, 168  ;;  %vm5910_vm7 = vmand %vm13011_vm12, %vm13016_vm14  ;;  %v6395_v10 = vld [vmem:[#allocation16 + $0x670] sm:$0xff]  ;;  %v6426_v46 = vld [vmem:[#allocation16 + $0x768] sm:$0xff] }
 0xe42   : > { %6808 = vmatpush.msrb.mxu2 %v6322_v44  ;;  %6828 = vmatpush.msrb.mxu3 %v6338_v26  ;;  %5869 = vst.msk [vmem:[#allocation7 + $0xd] sm:$0x1] %vm5868_vm13, %v12816_v43  ;;  %v5886_v43 = vsel %vm14503_vm9, %v5885_v38, %v12790_v18  ;;  %v6318_v18 = vld [vmem:[#allocation16 + $0x408] sm:$0xff]  ;;  %vm13037_vm13 = vcmp.lt.s32.totalorder %v14372_v20, 89  ;;  %vm13075_vm9 = vcmp.ge.s32.totalorder %v14372_v20, 59  ;;  %v5919_v38 = vsel %vm5918_vm15, %v5917_v54, %v12828_v28  ;;  %v6411_v50 = vld [vmem:[#allocation16 + $0x6f0] sm:$0xff]  ;;  %vm14528_vm15 = vmand %vm13021_vm10, %vm13026_vm4 }
 0xe43   : > { %6848 = vmatpush.msra.mxu0 %v6354_v6  ;;  %6868 = vmatpush.msra.mxu1 %v6370_v62  ;;  %v6427_v44 = vld [vmem:[#allocation16 + $0x770] sm:$0xff]  ;;  %vm14529_vm12 = vmand %vm13032_vm5, %vm13037_vm13  ;;  %v6409_v6 = vld [vmem:[#allocation16 + $0x6e0] sm:$0xff]  ;;  %vm13127_vm4 = vcmp.ge.s32.totalorder %v14372_v20, 108  ;;  %vm13132_vm5 = vcmp.lt.s32.totalorder %v14372_v20, 157  ;;  %vm13137_vm13 = vcmp.ge.s32.totalorder %v14372_v20, 29 }
 0xe44   : > { %6809 = vmatpush.msrb.mxu2 %v6321_v59  ;;  %6829 = vmatpush.msrb.mxu3 %v6337_v56  ;;  %v5874_v32 = vpop.permute.xlu1 %5873  ;;  %v6443_v26 = vld [vmem:[#allocation16 + $0x7f0] sm:$0xff]  ;;  %vm5964_vm14 = vmand %vm13075_vm9, %vm13080_vm2  ;;  %v6425_v62 = vld [vmem:[#allocation16 + $0x760] sm:$0xff]  ;;  %vm13152_vm2 = vcmp.lt.s32.totalorder %v14372_v20, 127  ;;  %vm13187_vm9 = vcmp.lt.s32.totalorder %v14372_v20, 176 }
 0xe45   : > { %6849 = vmatpush.msra.mxu0 %v6353_v45  ;;  %6869 = vmatpush.msra.mxu1 %v6369_v34  ;;  %5879 = vst.msk [vmem:[#allocation7 + $0xd] sm:$0x1] %vm5878_vm8, %v5874_v32  ;;  %vm13066_vm8 = vcmp.lt.s32.totalorder %v14372_v20, 59  ;;  %vm14530_vm10 = vmand %vm13046_vm0, %vm13051_vm1  ;;  %v6392_v56 = vld [vmem:[#allocation16 + $0x658] sm:$0xff]  ;;  %v5993_v45 = vpop.permute.xlu0 %5992  ;;  %vm5972_vm0 = vcmask 883712   ;;  %vm13147_vm1 = vcmp.ge.s32.totalorder %v14372_v20, 78 }
 0xe46   : > { %6810 = vmatpush.msrb.mxu2 %v6320_v52  ;;  %6830 = vmatpush.msrb.mxu3 %v6336_v55  ;;  %5891 = vst.msk [vmem:[#allocation7 + $0xd] sm:$0x3] %vm5890_vm11, %v5886_v43  ;;  %vm5939_vm11 = vcmask 728064   ;;  %v6424_v34 = vld [vmem:[#allocation16 + $0x758] sm:$0xff]  ;;  %v6391_v32 = vld [vmem:[#allocation16 + $0x650] sm:$0xff]  ;;  %v6421_v54 = vld [vmem:[#allocation16 + $0x740] sm:$0xff] }
 0xe47   : > { %6850 = vmatpush.msra.mxu0 %v6352_v63  ;;  %6870 = vmatpush.msra.mxu1 %v6368_v49  ;;  %5901 = vst.msk [vmem:[#allocation7 + $0xe] sm:$0x1] %vm5900_vm3, %v5896_v60  ;;  %vm5954_vm3 = vmand %vm13061_vm6, %vm13066_vm8  ;;  %v5940_v28 = vsel %vm5939_vm11, %v5938_v31, %v12973_v61  ;;  %v6442_v60 = vld [vmem:[#allocation16 + $0x7e8] sm:$0xff]  ;;  %v6440_v52 = vld [vmem:[#allocation16 + $0x7d8] sm:$0xff] }
 0xe48   : > { %6811 = vmatpush.msrb.mxu2 %v6319_v22  ;;  %6831 = vmatpush.msrb.mxu3 %v6335_v35  ;;  %v6407_v43 = vld [vmem:[#allocation16 + $0x6d0] sm:$0xff]  ;;  %vm5977_vm6 = vmand %vm13127_vm4, %vm13132_vm5  ;;  %v5983_v35 = vpop.permute.xlu2 %5982  ;;  %v6436_v31 = vld [vmem:[#allocation16 + $0x7b8] sm:$0xff]  ;;  %vm14551_vm4 = vcmask 1039360   ;;  %vm13225_vm5 = vcmp.ge.s32.totalorder %v14372_v20, 97 }
 0xe49   : > { %6851 = vmatpush.msra.mxu0 %v6351_v58  ;;  %6871 = vmatpush.msra.mxu1 %v6367_v16  ;;  %v6423_v58 = vld [vmem:[#allocation16 + $0x750] sm:$0xff]  ;;  %vm5997_vm11 = vmand %vm13147_vm1, %vm13152_vm2  ;;  %vm13242_vm1 = vcmp.ge.s32.totalorder %v14372_v20, 18  ;;  %vm13247_vm2 = vcmp.lt.s32.totalorder %v14372_v20, 67 }
 0xe4a   : > { %6812 = vmatpush.msrb.mxu2 %v6318_v18  ;;  %6832 = vmatpush.msrb.mxu3 %v6334_v42  ;;  %v6439_v16 = vld [vmem:[#allocation16 + $0x7d0] sm:$0xff]  ;;  %v6390_v42 = vld [vmem:[#allocation16 + $0x648] sm:$0xff] }
 0xe4b   : > { %6852 = vmatpush.msra.mxu0 %v6350_v14  ;;  %6872 = vmatpush.msra.mxu1 %v6366_v3  ;;  %v6438_v14 = vld [vmem:[#allocation16 + $0x7c8] sm:$0xff]  ;;  %v6389_v3 = vld [vmem:[#allocation16 + $0x640] sm:$0xff]  ;;  %v6399_v61 = vld [vmem:[#allocation16 + $0x690] sm:$0xff] }
 0xe4c   : > { %6813 = vmatpush.msrb.mxu2 %v6317_v19  ;;  %6833 = vmatpush.msrb.mxu3 %v6333_v24  ;;  %v5906_v29 = vpop.permute.xlu1 %5905  ;;  %v6437_v19 = vld [vmem:[#allocation16 + $0x7c0] sm:$0xff]  ;;  %v6415_v63 = vld [vmem:[#allocation16 + $0x710] sm:$0xff] }
 0xe4d   : > { %6853 = vmatpush.msra.mxu0 %v6349_v41  ;;  %6873 = vmatpush.msra.mxu1 %v6365_v40  ;;  %5911 = vst.msk [vmem:[#allocation7 + $0xe] sm:$0x1] %vm5910_vm7, %v5906_v29  ;;  %vm13142_vm7 = vcmp.lt.s32.totalorder %v14372_v20, 78  ;;  %v13201_v8 = vpop.permute.xlu0 %6055  ;;  %v6403_v29 = vld [vmem:[#allocation16 + $0x6b0] sm:$0xff]  ;;  %v6476_v41 = vld [vmem:[#allocation16 + $0x8f8] sm:$0xff] }
 0xe4e   : > { %6878 = vmatpush.msra.mxu2 %v6396_v27  ;;  %6898 = vmatpush.msra.mxu3 %v6412_v7  ;;  %5924 = vst.msk [vmem:[#allocation7 + $0xe] sm:$0x3] %vm14528_vm15, %v5919_v38  ;;  %vm5987_vm8 = vmand %vm13137_vm13, %vm13142_vm7  ;;  %vm13192_vm15 = vcmp.ge.s32.totalorder %v14372_v20, 48  ;;  %v6419_v38 = vld [vmem:[#allocation16 + $0x730] sm:$0xff]  ;;  %vm13230_vm13 = vcmp.lt.s32.totalorder %v14372_v20, 146  ;;  %vm6025_vm7 = vcmask 793600  }
 0xe4f   : > { %6918 = vmatpush.msrb.mxu0 %v6428_v25  ;;  %6938 = vmatpush.msrb.mxu1 %v6444_v4  ;;  %5932 = vst.msk [vmem:[#allocation7 + $0xf] sm:$0x1] %vm14529_vm12, %v12496_v17  ;;  %v6393_v17 = vld [vmem:[#allocation16 + $0x660] sm:$0xff]  ;;  %vm13197_vm12 = vcmp.lt.s32.totalorder %v14372_v20, 97  ;;  %v6387_v4 = vld [vmem:[#allocation16 + $0x630] sm:$0xff] }
 0xe50   : > { %6879 = vmatpush.msra.mxu2 %v6395_v10  ;;  %6899 = vmatpush.msra.mxu3 %v6411_v50  ;;  %5945 = vst.msk [vmem:[#allocation7 + $0xf] sm:$0x3] %vm14530_vm10, %v5940_v28  ;;  %vm6017_vm10 = vmand %vm13192_vm15, %vm13197_vm12  ;;  %v13216_v13 = vpop.permute.xlu2 %6045  ;;  %v6435_v10 = vld [vmem:[#allocation16 + $0x7b0] sm:$0xff]  ;;  %v6386_v50 = vld [vmem:[#allocation16 + $0x628] sm:$0xff]  ;;  %vm6058_vm15 = vcmask 949248  }
 0xe51   : > { %6919 = vmatpush.msrb.mxu0 %v6427_v44  ;;  %6939 = vmatpush.msrb.mxu1 %v6443_v26  ;;  %5955 = vst.msk [vmem:[#allocation7 + $0x10] sm:$0x1] %vm5954_vm3, %v5950_v12  ;;  %vm13182_vm3 = vcmp.ge.s32.totalorder %v14372_v20, 127  ;;  %v6402_v44 = vld [vmem:[#allocation16 + $0x6a8] sm:$0xff]  ;;  %v6431_v49 = vld [vmem:[#allocation16 + $0x790] sm:$0xff] }
 0xe52   : > { %6880 = vmatpush.msra.mxu2 %v6394_v1  ;;  %6900 = vmatpush.msra.mxu3 %v6410_v48  ;;  %5965 = vst.msk [vmem:[#allocation7 + $0x10] sm:$0x1] %vm5964_vm14, %v5960_v39  ;;  %v6404_v39 = vld [vmem:[#allocation16 + $0x6b8] sm:$0xff]  ;;  %vm6009_vm14 = vmand %vm13182_vm3, %vm13187_vm9  ;;  %v6418_v26 = vld [vmem:[#allocation16 + $0x728] sm:$0xff]  ;;  %vm13274_vm3 = vcmp.lt.s32.totalorder %v14372_v20, 165 }
 0xe53   : > { %6920 = vmatpush.msrb.mxu0 %v6426_v46  ;;  %6940 = vmatpush.msrb.mxu1 %v6442_v60  ;;  %v6434_v28 = vld [vmem:[#allocation16 + $0x7a8] sm:$0xff]  ;;  %v6385_v46 = vld [vmem:[#allocation16 + $0x620] sm:$0xff]  ;;  %vm6040_vm9 = vmand %vm13242_vm1, %vm13247_vm2  ;;  %vm6081_vm1 = vcmask 703488  }
 0xe54   : > { %6881 = vmatpush.msra.mxu2 %v6393_v17  ;;  %6901 = vmatpush.msra.mxu3 %v6409_v6  ;;  %v5970_v55 = vpop.permute.xlu1 %5969  ;;  %v6401_v60 = vld [vmem:[#allocation16 + $0x6a0] sm:$0xff]  ;;  %v6448_v1 = vld [vmem:[#allocation16 + $0x818] sm:$0xff] }
 0xe55   : > { %6921 = vmatpush.msrb.mxu0 %v6425_v62  ;;  %6941 = vmatpush.msrb.mxu1 %v6441_v23  ;;  %v5971_v22 = vrot.slane %v5970_v55, 7  ;;  %v13234_v17 = vpop.permute.xlu0 %6078  ;;  %v6433_v6 = vld [vmem:[#allocation16 + $0x7a0] sm:$0xff]  ;;  %v6384_v23 = vld [vmem:[#allocation16 + $0x618] sm:$0xff] }
 0xe56   : > { %6882 = vmatpush.msra.mxu2 %v6392_v56  ;;  %6902 = vmatpush.msra.mxu3 %v6408_v51  ;;  %v6416_v56 = vld [vmem:[#allocation16 + $0x718] sm:$0xff] }
 0xe57   : > { %6922 = vmatpush.msrb.mxu0 %v6424_v34  ;;  %6942 = vmatpush.msrb.mxu1 %v6440_v52  ;;  %v5973_v18 = vsel %vm5972_vm0, %v5971_v22, %v5970_v55  ;;  %v13174_v30 = vld [vmem:[#allocation7 + $0x8] sm:$0xff]  ;;  %vm6030_vm0 = vmand %vm13225_vm5, %vm13230_vm13  ;;  %v6382_v22 = vld [vmem:[#allocation16 + $0x608] sm:$0xff]  ;;  %vm13322_vm5 = vcmp.ge.s32.totalorder %v14372_v20, 86  ;;  %vm13327_vm13 = vcmp.lt.s32.totalorder %v14372_v20, 135 }
 0xe58   : > { %6883 = vmatpush.msra.mxu2 %v6391_v32  ;;  %6903 = vmatpush.msra.mxu3 %v6407_v43  ;;  %5978 = vst.msk [vmem:[#allocation7 + $0x10] sm:$0x3] %vm5977_vm6, %v5973_v18  ;;  %v6594_v27 = vperm.slane %v13174_v30, 0  ;;  %v6595_v7 = vperm.slane %v13174_v30, 1  ;;  %v6596_v53 = vperm.slane %v13174_v30, 2  ;;  %v6597_v12 = vperm.slane %v13174_v30, 3  ;;  %v13251_v55 = vpop.permute.xlu2 %6109 }
 0xe59   : > { %6923 = vmatpush.msrb.mxu0 %v6423_v58  ;;  %6943 = vmatpush.msrb.mxu1 %v6439_v16  ;;  %5988 = vst.msk [vmem:[#allocation7 + $0x11] sm:$0x1] %vm5987_vm8, %v5983_v35  ;;  %v6432_v51 = vld [vmem:[#allocation16 + $0x798] sm:$0xff]  ;;  %vm13259_vm6 = vcmp.ge.s32.totalorder %v14372_v20, 67  ;;  %vm13264_vm8 = vcmp.lt.s32.totalorder %v14372_v20, 116  ;;  %v6398_v35 = vld [vmem:[#allocation16 + $0x688] sm:$0xff] }
 0xe5a   : > { %6884 = vmatpush.msra.mxu2 %v6390_v42  ;;  %6904 = vmatpush.msra.mxu3 %v6406_v21  ;;  %5998 = vst.msk [vmem:[#allocation7 + $0x11] sm:$0x1] %vm5997_vm11, %v5993_v45  ;;  %vm13269_vm11 = vcmp.ge.s32.totalorder %v14372_v20, 116  ;;  %v6057_v18 = vrot.slane %v13201_v8, 7  ;;  %v6414_v42 = vld [vmem:[#allocation16 + $0x708] sm:$0xff]  ;;  %vm6050_vm12 = vmand %vm13259_vm6, %vm13264_vm8  ;;  %v6598_v33 = vperm.slane %v13174_v30, 4 }
 0xe5b   : > { %6924 = vmatpush.msrb.mxu0 %v6422_v37  ;;  %6944 = vmatpush.msrb.mxu1 %v6438_v14  ;;  %v6430_v21 = vld [vmem:[#allocation16 + $0x788] sm:$0xff]  ;;  %v6381_v37 = vld [vmem:[#allocation16 + $0x600] sm:$0xff]  ;;  %v6600_v40 = vperm.slane %v13174_v30, 6  ;;  %vm13347_vm6 = vcmp.ge.s32.totalorder %v14372_v20, 56  ;;  %vm13352_vm8 = vcmp.lt.s32.totalorder %v14372_v20, 105  ;;  %v6111_v48 = vrot.slane %v13251_v55, 7 }
 0xe5c   : > { %6885 = vmatpush.msra.mxu2 %v6389_v3  ;;  %6905 = vmatpush.msra.mxu3 %v6405_v9  ;;  %v6003_v15 = vpop.permute.xlu1 %6002  ;;  %v6397_v14 = vld [vmem:[#allocation16 + $0x680] sm:$0xff]  ;;  %v6488_v32 = vld [vmem:[#allocation16 + $0x958] sm:$0xff]  ;;  %v6471_v58 = vld [vmem:[#allocation16 + $0x8d0] sm:$0xff] }
 0xe5d   : > { %6925 = vmatpush.msrb.mxu0 %v6421_v54  ;;  %6945 = vmatpush.msrb.mxu1 %v6437_v19  ;;  %v6004_v25 = vrot.slane %v6003_v15, 7  ;;  %v6413_v3 = vld [vmem:[#allocation16 + $0x700] sm:$0xff]  ;;  %v6059_v19 = vsel %vm6058_vm15, %v6057_v18, %v13201_v8  ;;  %v13292_v24 = vpop.permute.xlu0 %6091  ;;  %v6601_v8 = vperm.slane %v13174_v30, 7  ;;  %vm6104_vm15 = vmand %vm13347_vm6, %vm13352_vm8  ;;  %v6504_v43 = vld [vmem:[#allocation16 + $0x9d8] sm:$0xff]  ;;  %vm13450_vm6 = vcmp.ge.s32.totalorder %v14372_v20, 45 }
 0xe5e   : > { %6886 = vmatpush.msra.mxu2 %v6388_v57  ;;  %6906 = vmatpush.msra.mxu3 %v6404_v39  ;;  %v6429_v9 = vld [vmem:[#allocation16 + $0x780] sm:$0xff]  ;;  %v6599_v57 = vperm.slane %v13174_v30, 5  ;;  %v6460_v39 = vld [vmem:[#allocation16 + $0x878] sm:$0xff]  ;;  %vm13455_vm8 = vcmp.lt.s32.totalorder %v14372_v20, 94  ;;  %v6487_v18 = vld [vmem:[#allocation16 + $0x950] sm:$0xff] }
 0xe5f   : > { %6926 = vmatpush.msrb.mxu0 %v6420_v2  ;;  %6946 = vmatpush.msrb.mxu1 %v6436_v31  ;;  %v6005_v0 = vsel %vm14551_vm4, %v6004_v25, %v6003_v15  ;;  %vm13315_vm4 = vcmp.lt.s32.totalorder %v14372_v20, 86  ;;  %v6492_v30 = vld [vmem:[#allocation16 + $0x978] sm:$0xff]  ;;  %v6459_v25 = vld [vmem:[#allocation16 + $0x870] sm:$0xff] }
 0xe60   : > { %6814 = vmatmul.f32.vlgmr.msrb.gmra.mxu2 %v6594_v27  ;;  %6834 = vmatmul.f32.vlgmr.msrb.gmra.mxu3 %v6595_v7  ;;  %6010 = vst.msk [vmem:[#allocation7 + $0x11] sm:$0x3] %vm6009_vm14, %v6005_v0  ;;  %vm6063_vm14 = vmand %vm13269_vm11, %vm13274_vm3  ;;  %v13319_v27 = vpop.permute.xlu2 %6142  ;;  %v6508_v7 = vld [vmem:[#allocation16 + $0x9f8] sm:$0xff]  ;;  %vm13361_vm3 = vcmp.ge.s32.totalorder %v14372_v20, 105  ;;  %vm6112_vm11 = vcmask 859136   ;;  %v6466_v0 = vld [vmem:[#allocation16 + $0x8a8] sm:$0xff] }
 0xe61   : > { %6854 = vmatmul.f32.vlgmr.msra.gmra.mxu0 %v6596_v53  ;;  %6874 = vmatmul.f32.vlgmr.msra.gmra.mxu1 %v6597_v12  ;;  %6018 = vst.msk [vmem:[#allocation7 + $0x12] sm:$0x1] %vm6017_vm10, %v12499_v5  ;;  %v6417_v5 = vld [vmem:[#allocation16 + $0x720] sm:$0xff]  ;;  %vm13310_vm10 = vcmp.ge.s32.totalorder %v14372_v20, 37  ;;  %v6080_v12 = vrot.slane %v13234_v17, 7  ;;  %v6452_v31 = vld [vmem:[#allocation16 + $0x838] sm:$0xff] }
 0xe62   : > { %6887 = vmatpush.msra.mxu2 %v6387_v4  ;;  %6907 = vmatpush.msra.mxu3 %v6403_v29  ;;  %v6475_v4 = vld [vmem:[#allocation16 + $0x8f0] sm:$0xff]  ;;  %vm6073_vm2 = vmand %vm13310_vm10, %vm13315_vm4  ;;  %v6484_v15 = vld [vmem:[#allocation16 + $0x938] sm:$0xff] }
 0xe63   : > { %6927 = vmatpush.msrb.mxu0 %v6419_v38  ;;  %6947 = vmatpush.msrb.mxu1 %v6435_v10  ;;  %v6507_v38 = vld [vmem:[#allocation16 + $0x9f0] sm:$0xff]  ;;  %v6500_v53 = vld [vmem:[#allocation16 + $0x9b8] sm:$0xff]  ;;  %v6450_v29 = vld [vmem:[#allocation16 + $0x828] sm:$0xff] }
 0xe64   : > { %6888 = vmatpush.msra.mxu2 %v6386_v50  ;;  %6908 = vmatpush.msra.mxu3 %v6402_v44  ;;  %v6023_v62 = vpop.permute.xlu1 %6022  ;;  %v6458_v44 = vld [vmem:[#allocation16 + $0x868] sm:$0xff]  ;;  %v6449_v50 = vld [vmem:[#allocation16 + $0x820] sm:$0xff]  ;;  %v6524_v34 = vld [vmem:[#allocation16 + $0xa78] sm:$0xff] }
 0xe65   : > { %6928 = vmatpush.msrb.mxu0 %v6418_v26  ;;  %6948 = vmatpush.msrb.mxu1 %v6434_v28  ;;  %v6024_v59 = vrot.slane %v6023_v62, 7  ;;  %v6474_v26 = vld [vmem:[#allocation16 + $0x8e8] sm:$0xff]  ;;  %v6497_v28 = vld [vmem:[#allocation16 + $0x9a0] sm:$0xff]  ;;  %v6540_v52 = vld [vmem:[#allocation16 + $0xaf8] sm:$0xff] }
 0xe66   : > { %6889 = vmatpush.msra.mxu2 %v6385_v46  ;;  %6909 = vmatpush.msra.mxu3 %v6401_v60  ;;  %v6490_v46 = vld [vmem:[#allocation16 + $0x968] sm:$0xff] }
 0xe67   : > { %6929 = vmatpush.msrb.mxu0 %v6417_v5  ;;  %6949 = vmatpush.msrb.mxu1 %v6433_v6  ;;  %v6026_v45 = vsel %vm6025_vm7, %v6024_v59, %v6023_v62  ;;  %vm13333_vm7 = vcmp.ge.s32.totalorder %v14372_v20, 7  ;;  %v6506_v60 = vld [vmem:[#allocation16 + $0x9e8] sm:$0xff]  ;;  %v14588_v6 = vmov 0  ;;  %v6473_v59 = vld [vmem:[#allocation16 + $0x8e0] sm:$0xff]  ;;  %v6479_v62 = vld [vmem:[#allocation16 + $0x910] sm:$0xff] }
 0xe68   : > { %6890 = vmatpush.msra.mxu2 %v6384_v23  ;;  %6910 = vmatpush.msra.mxu3 %v6400_v36  ;;  %6031 = vst.msk [vmem:[#allocation7 + $0x12] sm:$0x3] %vm6030_vm0, %v6026_v45  ;;  %vm13338_vm0 = vcmp.lt.s32.totalorder %v14372_v20, 56  ;;  %v6082_v23 = vsel %vm6081_vm1, %v6080_v12, %v13234_v17  ;;  %v6457_v36 = vld [vmem:[#allocation16 + $0x860] sm:$0xff]  ;;  %v6123_v17 = vpop.permute.xlu0 %6122  ;;  %vm14592_vm1 = vmand %vm13322_vm5, %vm13327_vm13  ;;  %v6472_v45 = vld [vmem:[#allocation16 + $0x8d8] sm:$0xff] }
 0xe69   : > { %6930 = vmatpush.msrb.mxu0 %v6416_v56  ;;  %6950 = vmatpush.msrb.mxu1 %v6432_v51  ;;  %v6144_v56 = vrot.slane %v13319_v27, 7  ;;  %v6489_v51 = vld [vmem:[#allocation16 + $0x960] sm:$0xff]  ;;  %vm14593_vm4 = vmand %vm13333_vm7, %vm13338_vm0  ;;  %vm13435_vm7 = vcmp.ge.s32.totalorder %v14372_v20, 124  ;;  %vm13440_vm0 = vcmp.lt.s32.totalorder %v14372_v20, 173  ;;  %v6451_v12 = vld [vmem:[#allocation16 + $0x830] sm:$0xff] }
 0xe6a   : > { %6891 = vmatpush.msra.mxu2 %v6383_v11  ;;  %6911 = vmatpush.msra.mxu3 %v6399_v61  ;;  %v6505_v11 = vld [vmem:[#allocation16 + $0x9e0] sm:$0xff]  ;;  %v6456_v61 = vld [vmem:[#allocation16 + $0x858] sm:$0xff] }
 0xe6b   : > { %6931 = vmatpush.msrb.mxu0 %v6415_v63  ;;  %6951 = vmatpush.msrb.mxu1 %v6431_v49  ;;  %v6113_v63 = vsel %vm6112_vm11, %v6111_v48, %v13251_v55  ;;  %v6166_v49 = vpop.permute.xlu2 %6165  ;;  %v6464_v48 = vld [vmem:[#allocation16 + $0x898] sm:$0xff]  ;;  %v6555_v55 = vld [vmem:[#allocation16 + $0xb70] sm:$0xff] }
 0xe6c   : > { %6892 = vmatpush.msra.mxu2 %v6382_v22  ;;  %6912 = vmatpush.msra.mxu3 %v6398_v35  ;;  %v6036_v54 = vpop.permute.xlu1 %6035  ;;  %v6455_v35 = vld [vmem:[#allocation16 + $0x850] sm:$0xff] }
 0xe6d   : > { %6932 = vmatpush.msrb.mxu0 %v6414_v42  ;;  %6952 = vmatpush.msrb.mxu1 %v6430_v21  ;;  %6041 = vst.msk [vmem:[#allocation7 + $0x13] sm:$0x1] %vm6040_vm9, %v6036_v54  ;;  %vm13366_vm9 = vcmp.lt.s32.totalorder %v14372_v20, 154  ;;  %v6503_v42 = vld [vmem:[#allocation16 + $0x9d0] sm:$0xff]  ;;  %v6486_v54 = vld [vmem:[#allocation16 + $0x948] sm:$0xff] }
 0xe6e   : > { %6893 = vmatpush.msra.mxu2 %v6381_v37  ;;  %6913 = vmatpush.msra.mxu3 %v6397_v14  ;;  %6051 = vst.msk [vmem:[#allocation7 + $0x13] sm:$0x1] %vm6050_vm12, %v13216_v13  ;;  %v6491_v13 = vld [vmem:[#allocation16 + $0x970] sm:$0xff]  ;;  %vm13376_vm12 = vcmp.ge.s32.totalorder %v14372_v20, 26  ;;  %vm6117_vm10 = vmand %vm13361_vm3, %vm13366_vm9  ;;  %vm13469_vm3 = vcmp.ge.s32.totalorder %v14372_v20, 94  ;;  %vm13474_vm9 = vcmp.lt.s32.totalorder %v14372_v20, 143 }
 0xe6f   : > { %6933 = vmatpush.msrb.mxu0 %v6413_v3  ;;  %6953 = vmatpush.msrb.mxu1 %v6429_v9  ;;  %6064 = vst.msk [vmem:[#allocation7 + $0x13] sm:$0x3] %vm6063_vm14, %v6059_v19  ;;  %v14589_v6 = vsel %vm13376_vm12, 4294967295, %v14588_v6  ;;  %vm13381_vm14 = vcmp.lt.s32.totalorder %v14372_v20, 75  ;;  %vm6145_vm12 = vcmask 1014784   ;;  %v6167_v14 = vrot.slane %v6166_v49, 7 }
 0xe70   : > { %6894 = vmatmul.f32.vlgmr.msra.gmra.mxu2 %v6598_v33  ;;  %6914 = vmatmul.f32.vlgmr.msra.gmra.mxu3 %v6599_v57  ;;  %vm14594_vm5 = vnez %v14589_v6  ;;  %v6454_v3 = vld [vmem:[#allocation16 + $0x848] sm:$0xff]  ;;  %v6146_v33 = vsel %vm6145_vm12, %v6144_v56, %v13319_v27  ;;  %v6453_v57 = vld [vmem:[#allocation16 + $0x840] sm:$0xff]  ;;  %v6468_v27 = vld [vmem:[#allocation16 + $0x8b8] sm:$0xff]  ;;  %vm13509_vm12 = vcmp.ge.s32.totalorder %v14372_v20, 15 }
 0xe71   : > { %6934 = vmatmul.f32.vlgmr.msrb.gmra.mxu0 %v6600_v40  ;;  %6954 = vmatmul.f32.vlgmr.msrb.gmra.mxu1 %v6601_v8  ;;  %vm6127_vm13 = vmand %vm14594_vm5, %vm13381_vm14  ;;  %v6470_v9 = vld [vmem:[#allocation16 + $0x8c8] sm:$0xff]  ;;  %vm6168_vm14 = vcmask 769024   ;;  %v6485_v40 = vld [vmem:[#allocation16 + $0x940] sm:$0xff]  ;;  %vm13514_vm5 = vcmp.lt.s32.totalorder %v14372_v20, 64 }
 0xe72   : > { %6958 = vmatpush.msrb.mxu2 %v6460_v39  ;;  %6978 = vmatpush.msrb.mxu3 %v6476_v41  ;;  %v6502_v19 = vld [vmem:[#allocation16 + $0x9c8] sm:$0xff]  ;;  %v6469_v39 = vld [vmem:[#allocation16 + $0x8c0] sm:$0xff]  ;;  %v6156_v41 = vpop.permute.xlu0 %6155  ;;  %v6169_v2 = vsel %vm6168_vm14, %v6167_v14, %v6166_v49  ;;  %v6463_v6 = vld [vmem:[#allocation16 + $0x890] sm:$0xff] }
 0xe73   : > { %6998 = vmatpush.msra.mxu0 %v6492_v30  ;;  %7018 = vmatpush.msra.mxu1 %v6508_v7  ;;  %v6501_v8 = vld [vmem:[#allocation16 + $0x9c0] sm:$0xff]  ;;  %v6478_v56 = vld [vmem:[#allocation16 + $0x908] sm:$0xff]  ;;  %v6556_v49 = vld [vmem:[#allocation16 + $0xb78] sm:$0xff] }
 0xe74   : > { %6959 = vmatpush.msrb.mxu2 %v6459_v25  ;;  %6979 = vmatpush.msrb.mxu3 %v6475_v4  ;;  %v6069_v5 = vpop.permute.xlu1 %6068  ;;  %v6467_v25 = vld [vmem:[#allocation16 + $0x8b0] sm:$0xff]  ;;  %v6538_v21 = vld [vmem:[#allocation16 + $0xae8] sm:$0xff] }
 0xe75   : > { %6999 = vmatpush.msra.mxu0 %v6491_v13  ;;  %7019 = vmatpush.msra.mxu1 %v6507_v38  ;;  %6074 = vst.msk [vmem:[#allocation7 + $0x14] sm:$0x1] %vm6073_vm2, %v6069_v5  ;;  %vm13417_vm2 = vcmp.ge.s32.totalorder %v14372_v20, 75  ;;  %v6499_v4 = vld [vmem:[#allocation16 + $0x9b0] sm:$0xff]  ;;  %v6482_v13 = vld [vmem:[#allocation16 + $0x928] sm:$0xff] }
 0xe76   : > { %6960 = vmatpush.msrb.mxu2 %v6458_v44  ;;  %6980 = vmatpush.msrb.mxu3 %v6474_v26  ;;  %6087 = vst.msk [vmem:[#allocation7 + $0x14] sm:$0x3] %vm14592_vm1, %v6082_v23  ;;  %vm13422_vm1 = vcmp.lt.s32.totalorder %v14372_v20, 124  ;;  %v6483_v20 = vld [vmem:[#allocation16 + $0x930] sm:$0xff]  ;;  %v6498_v38 = vld [vmem:[#allocation16 + $0x9a8] sm:$0xff]  ;;  %v6465_v44 = vld [vmem:[#allocation16 + $0x8a0] sm:$0xff] }
 0xe77   : > { %7000 = vmatpush.msra.mxu0 %v6490_v46  ;;  %7020 = vmatpush.msra.mxu1 %v6506_v60  ;;  %6097 = vst.msk [vmem:[#allocation7 + $0x15] sm:$0x1] %vm14593_vm4, %v13292_v24  ;;  %vm6137_vm11 = vmand %vm13417_vm2, %vm13422_vm1  ;;  %v6481_v26 = vld [vmem:[#allocation16 + $0x920] sm:$0xff]  ;;  %v6480_v46 = vld [vmem:[#allocation16 + $0x918] sm:$0xff]  ;;  %vm6635_vm2 = vcmask 523264   ;;  %vm7176_vm1 = vcmask 73728  }
 0xe78   : > { %6961 = vmatpush.msrb.mxu2 %v6457_v36  ;;  %6981 = vmatpush.msrb.mxu3 %v6473_v59  ;;  %6105 = vst.msk [vmem:[#allocation7 + $0x15] sm:$0x1] %vm6104_vm15, %v12537_v47  ;;  %vm6150_vm15 = vmand %vm13435_vm7, %vm13440_vm0  ;;  %v6496_v60 = vld [vmem:[#allocation16 + $0x998] sm:$0xff]  ;;  %v6447_v5 = vld [vmem:[#allocation16 + $0x810] sm:$0xff] }
 0xe79   : > { %7001 = vmatpush.msra.mxu0 %v6489_v51  ;;  %7021 = vmatpush.msra.mxu1 %v6505_v11  ;;  %6118 = vst.msk [vmem:[#allocation7 + $0x15] sm:$0x3] %vm6117_vm10, %v6113_v63  ;;  %vm6160_vm10 = vmand %vm13450_vm6, %vm13455_vm8  ;;  %v6495_v23 = vld [vmem:[#allocation16 + $0x990] sm:$0xff]  ;;  %v6446_v36 = vld [vmem:[#allocation16 + $0x808] sm:$0xff] }
 0xe7a   : > { %6962 = vmatpush.msrb.mxu2 %v6456_v61  ;;  %6982 = vmatpush.msrb.mxu3 %v6472_v45  ;;  %6128 = vst.msk [vmem:[#allocation7 + $0x16] sm:$0x1] %vm6127_vm13, %v6123_v17  ;;  %vm6173_vm4 = vmand %vm13469_vm3, %vm13474_vm9  ;;  %v6462_v59 = vld [vmem:[#allocation16 + $0x888] sm:$0xff]  ;;  %v6445_v51 = vld [vmem:[#allocation16 + $0x800] sm:$0xff] }
 0xe7b   : > { %7002 = vmatpush.msra.mxu0 %v6488_v32  ;;  %7022 = vmatpush.msra.mxu1 %v6504_v43  ;;  %vm6183_vm13 = vmand %vm13509_vm12, %vm13514_vm5  ;;  %v6494_v17 = vld [vmem:[#allocation16 + $0x988] sm:$0xff]  ;;  %v6461_v11 = vld [vmem:[#allocation16 + $0x880] sm:$0xff] }
 0xe7c   : > { %6963 = vmatpush.msrb.mxu2 %v6455_v35  ;;  %6983 = vmatpush.msrb.mxu3 %v6471_v58  ;;  %v6133_v24 = vpop.permute.xlu1 %6132  ;;  %v6477_v61 = vld [vmem:[#allocation16 + $0x900] sm:$0xff]  ;;  %v6572_v32 = vld [vmem:[#allocation16 + $0xbf8] sm:$0xff]  ;;  %v6523_v43 = vld [vmem:[#allocation16 + $0xa70] sm:$0xff] }
 0xe7d   : > { %7003 = vmatpush.msra.mxu0 %v6487_v18  ;;  %7023 = vmatpush.msra.mxu1 %v6503_v42  ;;  %6138 = vst.msk [vmem:[#allocation7 + $0x16] sm:$0x1] %vm6137_vm11, %v6133_v24  ;;  %v6493_v45 = vld [vmem:[#allocation16 + $0x980] sm:$0xff]  ;;  %v6539_v22 = vld [vmem:[#allocation16 + $0xaf0] sm:$0xff]  ;;  %v6522_v42 = vld [vmem:[#allocation16 + $0xa68] sm:$0xff] }
 0xe7e   : > { %6964 = vmatpush.msrb.mxu2 %v6454_v3  ;;  %6984 = vmatpush.msrb.mxu3 %v6470_v9  ;;  %6151 = vst.msk [vmem:[#allocation7 + $0x16] sm:$0x3] %vm6150_vm15, %v6146_v33  ;;  %v6571_v35 = vld [vmem:[#allocation16 + $0xbf0] sm:$0xff]  ;;  %v6554_v37 = vld [vmem:[#allocation16 + $0xb68] sm:$0xff]  ;;  %v6521_v3 = vld [vmem:[#allocation16 + $0xa60] sm:$0xff] }
 0xe7f   : > { %7004 = vmatpush.msra.mxu0 %v6486_v54  ;;  %7024 = vmatpush.msra.mxu1 %v6502_v19  ;;  %6161 = vst.msk [vmem:[#allocation7 + $0x17] sm:$0x1] %vm6160_vm10, %v6156_v41  ;;  %v6570_v14 = vld [vmem:[#allocation16 + $0xbe8] sm:$0xff]  ;;  %v6537_v9 = vld [vmem:[#allocation16 + $0xae0] sm:$0xff]  ;;  %v6520_v24 = vld [vmem:[#allocation16 + $0xa58] sm:$0xff] }
 0xe80   : > { %6965 = vmatpush.msrb.mxu2 %v6453_v57  ;;  %6985 = vmatpush.msrb.mxu3 %v6469_v39  ;;  %6174 = vst.msk [vmem:[#allocation7 + $0x17] sm:$0x3] %vm6173_vm4, %v6169_v2  ;;  %v6553_v54 = vld [vmem:[#allocation16 + $0xb60] sm:$0xff]  ;;  %v6536_v33 = vld [vmem:[#allocation16 + $0xad8] sm:$0xff]  ;;  %v6519_v41 = vld [vmem:[#allocation16 + $0xa50] sm:$0xff] }
 0xe81   : > { %7005 = vmatpush.msra.mxu0 %v6485_v40  ;;  %7025 = vmatpush.msra.mxu1 %v6501_v8  ;;  %v6569_v19 = vld [vmem:[#allocation16 + $0xbe0] sm:$0xff]  ;;  %v6552_v57 = vld [vmem:[#allocation16 + $0xb58] sm:$0xff]  ;;  %v6535_v40 = vld [vmem:[#allocation16 + $0xad0] sm:$0xff] }
 0xe82   : > { %6966 = vmatpush.msrb.mxu2 %v6452_v31  ;;  %6986 = vmatpush.msrb.mxu3 %v6468_v27  ;;  %v6568_v39 = vld [vmem:[#allocation16 + $0xbd8] sm:$0xff]  ;;  %v6551_v8 = vld [vmem:[#allocation16 + $0xb50] sm:$0xff]  ;;  %v6518_v31 = vld [vmem:[#allocation16 + $0xa48] sm:$0xff] }
 0xe83   : > { %7006 = vmatpush.msra.mxu0 %v6484_v15  ;;  %7026 = vmatpush.msra.mxu1 %v6500_v53  ;;  %v6567_v2 = vld [vmem:[#allocation16 + $0xbd0] sm:$0xff]  ;;  %v6534_v27 = vld [vmem:[#allocation16 + $0xac8] sm:$0xff]  ;;  %v6517_v15 = vld [vmem:[#allocation16 + $0xa40] sm:$0xff] }
 0xe84   : > { %6967 = vmatpush.msrb.mxu2 %v6451_v12  ;;  %6987 = vmatpush.msrb.mxu3 %v6467_v25  ;;  %v6179_v10 = vpop.permute.xlu1 %6178  ;;  %v6550_v30 = vld [vmem:[#allocation16 + $0xb48] sm:$0xff]  ;;  %v6533_v53 = vld [vmem:[#allocation16 + $0xac0] sm:$0xff] }
 0xe85   : > { %7007 = vmatpush.msra.mxu0 %v6483_v20  ;;  %7027 = vmatpush.msra.mxu1 %v6499_v4  ;;  %6184 = vst.msk [vmem:[#allocation7 + $0x18] sm:$0x1] %vm6183_vm13, %v6179_v10  ;;  %v6566_v7 = vld [vmem:[#allocation16 + $0xbc8] sm:$0xff]  ;;  %v6549_v12 = vld [vmem:[#allocation16 + $0xb40] sm:$0xff]  ;;  %v6516_v20 = vld [vmem:[#allocation16 + $0xa38] sm:$0xff] }
 0xe86   : > { %6968 = vmatpush.msrb.mxu2 %v6450_v29  ;;  %6988 = vmatpush.msrb.mxu3 %v6466_v0  ;;  %v6565_v25 = vld [vmem:[#allocation16 + $0xbc0] sm:$0xff]  ;;  %v6532_v4 = vld [vmem:[#allocation16 + $0xab8] sm:$0xff]  ;;  %v6547_v10 = vld [vmem:[#allocation16 + $0xb30] sm:$0xff] }
 0xe87   : > { %7008 = vmatpush.msra.mxu0 %v6482_v13  ;;  %7028 = vmatpush.msra.mxu1 %v6498_v38  ;;  %v13527_v63 = vld [vmem:[#allocation7 + $0x10] sm:$0xff]  ;;  %v6515_v13 = vld [vmem:[#allocation16 + $0xa30] sm:$0xff] }
 0xe88   : > { %6969 = vmatpush.msrb.mxu2 %v6449_v50  ;;  %6989 = vmatpush.msrb.mxu3 %v6465_v44  ;;  %v6602_v58 = vperm.slane %v13527_v63, 0  ;;  %v6603_v47 = vperm.slane %v13527_v63, 1  ;;  %v6604_v16 = vperm.slane %v13527_v63, 2  ;;  %v6605_v18 = vperm.slane %v13527_v63, 3  ;;  %v6548_v29 = vld [vmem:[#allocation16 + $0xb38] sm:$0xff]  ;;  %v6531_v38 = vld [vmem:[#allocation16 + $0xab0] sm:$0xff] }
 0xe89   : > { %7009 = vmatpush.msra.mxu0 %v6481_v26  ;;  %7029 = vmatpush.msra.mxu1 %v6497_v28  ;;  %v6564_v0 = vld [vmem:[#allocation16 + $0xbb8] sm:$0xff]  ;;  %v6563_v50 = vld [vmem:[#allocation16 + $0xbb0] sm:$0xff]  ;;  %v6514_v44 = vld [vmem:[#allocation16 + $0xa28] sm:$0xff] }
 0xe8a   : > { %6970 = vmatpush.msrb.mxu2 %v6448_v1  ;;  %6990 = vmatpush.msrb.mxu3 %v6464_v48  ;;  %v6530_v26 = vld [vmem:[#allocation16 + $0xaa8] sm:$0xff]  ;;  %v6513_v48 = vld [vmem:[#allocation16 + $0xa20] sm:$0xff] }
 0xe8b   : > { %7010 = vmatpush.msra.mxu0 %v6480_v46  ;;  %7030 = vmatpush.msra.mxu1 %v6496_v60  ;;  %v6546_v28 = vld [vmem:[#allocation16 + $0xb28] sm:$0xff]  ;;  %v6529_v46 = vld [vmem:[#allocation16 + $0xaa0] sm:$0xff] }
 0xe8c   : > { %6971 = vmatpush.msrb.mxu2 %v6447_v5  ;;  %6991 = vmatpush.msrb.mxu3 %v6463_v6  ;;  %v6562_v1 = vld [vmem:[#allocation16 + $0xba8] sm:$0xff]  ;;  %v6545_v60 = vld [vmem:[#allocation16 + $0xb20] sm:$0xff]  ;;  %v6512_v6 = vld [vmem:[#allocation16 + $0xa18] sm:$0xff] }
 0xe8d   : > { %7011 = vmatpush.msra.mxu0 %v6479_v62  ;;  %7031 = vmatpush.msra.mxu1 %v6495_v23  ;;  %v6561_v5 = vld [vmem:[#allocation16 + $0xba0] sm:$0xff]  ;;  %v6528_v62 = vld [vmem:[#allocation16 + $0xa98] sm:$0xff] }
 0xe8e   : > { %6972 = vmatpush.msrb.mxu2 %v6446_v36  ;;  %6992 = vmatpush.msrb.mxu3 %v6462_v59  ;;  %v6544_v23 = vld [vmem:[#allocation16 + $0xb18] sm:$0xff]  ;;  %v6511_v59 = vld [vmem:[#allocation16 + $0xa10] sm:$0xff] }
 0xe8f   : > { %7012 = vmatpush.msra.mxu0 %v6478_v56  ;;  %7032 = vmatpush.msra.mxu1 %v6494_v17  ;;  %v6560_v36 = vld [vmem:[#allocation16 + $0xb98] sm:$0xff]  ;;  %v6527_v56 = vld [vmem:[#allocation16 + $0xa90] sm:$0xff] }
 0xe90   : > { %6973 = vmatpush.msrb.mxu2 %v6445_v51  ;;  %6993 = vmatpush.msrb.mxu3 %v6461_v11  ;;  %v6543_v17 = vld [vmem:[#allocation16 + $0xb10] sm:$0xff]  ;;  %v6510_v11 = vld [vmem:[#allocation16 + $0xa08] sm:$0xff] }
 0xe91   : > { %7013 = vmatpush.msra.mxu0 %v6477_v61  ;;  %7033 = vmatpush.msra.mxu1 %v6493_v45  ;;  %v6559_v51 = vld [vmem:[#allocation16 + $0xb90] sm:$0xff]  ;;  %v6526_v61 = vld [vmem:[#allocation16 + $0xa88] sm:$0xff] }
 0xe92   : > { %7038 = vmatpush.msra.mxu2 %v6524_v34  ;;  %7058 = vmatpush.msra.mxu3 %v6540_v52  ;;  %v6542_v45 = vld [vmem:[#allocation16 + $0xb08] sm:$0xff]  ;;  %v6509_v52 = vld [vmem:[#allocation16 + $0xa00] sm:$0xff] }
 0xe93   : > { %7078 = vmatpush.msrb.mxu0 %v6556_v49  ;;  %7098 = vmatpush.msrb.mxu1 %v6572_v32  ;;  %v6558_v34 = vld [vmem:[#allocation16 + $0xb88] sm:$0xff]  ;;  %v6525_v49 = vld [vmem:[#allocation16 + $0xa80] sm:$0xff] }
 0xe94   : > { %7039 = vmatpush.msra.mxu2 %v6523_v43  ;;  %7059 = vmatpush.msra.mxu3 %v6539_v22  ;;  %v6541_v32 = vld [vmem:[#allocation16 + $0xb00] sm:$0xff]  ;;  %v6606_v22 = vperm.slane %v13527_v63, 4 }
 0xe95   : > { %7079 = vmatpush.msrb.mxu0 %v6555_v55  ;;  %7099 = vmatpush.msrb.mxu1 %v6571_v35  ;;  %v6557_v43 = vld [vmem:[#allocation16 + $0xb80] sm:$0xff]  ;;  %v6607_v55 = vperm.slane %v13527_v63, 5  ;;  %v6608_v35 = vperm.slane %v13527_v63, 6 }
 0xe96   : > { %6974 = vmatmul.f32.vlgmr.msrb.gmra.mxu2 %v6602_v58  ;;  %6994 = vmatmul.f32.vlgmr.msrb.gmra.mxu3 %v6603_v47  ;;  %v6609_v58 = vperm.slane %v13527_v63, 7  ;;  %v6580_v47 = vld [vmem:[#allocation16 + $0xc38] sm:$0xff]  ;;  %v7798_v63 = vld [vmem:[#allocation7 + $0x18] ss:$0 sm:$0xff] }
 0xe97   : > { %7014 = vmatmul.f32.vlgmr.msra.gmra.mxu0 %v6604_v16  ;;  %7034 = vmatmul.f32.vlgmr.msra.gmra.mxu1 %v6605_v18  ;;  %v6579_v16 = vld [vmem:[#allocation16 + $0xc30] sm:$0xff]  ;;  %v6578_v18 = vld [vmem:[#allocation16 + $0xc28] sm:$0xff] }
 0xe98   : > { %7040 = vmatpush.msra.mxu2 %v6522_v42  ;;  %7060 = vmatpush.msra.mxu3 %v6538_v21  ;;  %v6577_v42 = vld [vmem:[#allocation16 + $0xc20] sm:$0xff]  ;;  %v6576_v21 = vld [vmem:[#allocation16 + $0xc18] sm:$0xff] }
 0xe99   : > { %7080 = vmatpush.msrb.mxu0 %v6554_v37  ;;  %7100 = vmatpush.msrb.mxu1 %v6570_v14  ;;  %v6575_v37 = vld [vmem:[#allocation16 + $0xc10] sm:$0xff]  ;;  %v6574_v14 = vld [vmem:[#allocation16 + $0xc08] sm:$0xff] }
 0xe9a   : > { %7041 = vmatpush.msra.mxu2 %v6521_v3  ;;  %7061 = vmatpush.msra.mxu3 %v6537_v9  ;;  %v6573_v3 = vld [vmem:[#allocation16 + $0xc00] sm:$0xff] }
 0xe9b   : > { %7081 = vmatpush.msrb.mxu0 %v6553_v54  ;;  %7101 = vmatpush.msrb.mxu1 %v6569_v19  ;;  %v6581_v9 = vld [vmem:[#allocation17] sm:$0x1] }
 0xe9c   : > { %7042 = vmatpush.msra.mxu2 %v6520_v24  ;;  %7062 = vmatpush.msra.mxu3 %v6536_v33 }
 0xe9d   : > { %7082 = vmatpush.msrb.mxu0 %v6552_v57  ;;  %7102 = vmatpush.msrb.mxu1 %v6568_v39 }
 0xe9e   : > { %7043 = vmatpush.msra.mxu2 %v6519_v41  ;;  %7063 = vmatpush.msra.mxu3 %v6535_v40  ;;  %v7154_v40 = vld [vmem:[%s13628_s11 + $0x78] sm:$0xff] }
 0xe9f   : > { %7083 = vmatpush.msrb.mxu0 %v6551_v8  ;;  %7103 = vmatpush.msrb.mxu1 %v6567_v2  ;;  %v7153_v8 = vld [vmem:[%s13628_s11 + $0x70] sm:$0xff] }
 0xea0   : > { %7044 = vmatpush.msra.mxu2 %v6518_v31  ;;  %7064 = vmatpush.msra.mxu3 %v6534_v27  ;;  %v7152_v27 = vld [vmem:[%s13628_s11 + $0x68] sm:$0xff] }
 0xea1   : > { %7084 = vmatpush.msrb.mxu0 %v6550_v30  ;;  %7104 = vmatpush.msrb.mxu1 %v6566_v7 }
 0xea2   : > { %7045 = vmatpush.msra.mxu2 %v6517_v15  ;;  %7065 = vmatpush.msra.mxu3 %v6533_v53 }
 0xea3   : > { %7085 = vmatpush.msrb.mxu0 %v6549_v12  ;;  %7105 = vmatpush.msrb.mxu1 %v6565_v25 }
 0xea4   : > { %7046 = vmatpush.msra.mxu2 %v6516_v20  ;;  %7066 = vmatpush.msra.mxu3 %v6532_v4 }
 0xea5   : > { %7086 = vmatpush.msrb.mxu0 %v6548_v29  ;;  %7106 = vmatpush.msrb.mxu1 %v6564_v0  ;;  %v7151_v0 = vld [vmem:[%s13628_s11 + $0x60] sm:$0xff] }
 0xea6   : > { %7047 = vmatpush.msra.mxu2 %v6515_v13  ;;  %7067 = vmatpush.msra.mxu3 %v6531_v38  ;;  %v7150_v13 = vld [vmem:[%s13628_s11 + $0x58] sm:$0xff] }
 0xea7   : > { %7087 = vmatpush.msrb.mxu0 %v6547_v10  ;;  %7107 = vmatpush.msrb.mxu1 %v6563_v50  ;;  %v7149_v10 = vld [vmem:[%s13628_s11 + $0x50] sm:$0xff] }
 0xea8   : > { %7048 = vmatpush.msra.mxu2 %v6514_v44  ;;  %7068 = vmatpush.msra.mxu3 %v6530_v26  ;;  %v6695_v57 = vpop.f32.mrf.mxu0  ;;  %v6715_v41 = vpop.f32.mrf.mxu1 }
 0xea9   : > { %7088 = vmatpush.msrb.mxu0 %v6546_v28  ;;  %7108 = vmatpush.msrb.mxu1 %v6562_v1  ;;  %v7148_v28 = vld [vmem:[%s13628_s11 + $0x48] sm:$0xff]  ;;  %v7147_v1 = vld [vmem:[%s13628_s11 + $0x40] sm:$0xff] }
 0xeaa   : > { %7049 = vmatpush.msra.mxu2 %v6513_v48  ;;  %7069 = vmatpush.msra.mxu3 %v6529_v46 }
 0xeab   : > { %7089 = vmatpush.msrb.mxu0 %v6545_v60  ;;  %7109 = vmatpush.msrb.mxu1 %v6561_v5  ;;  %v7146_v60 = vld [vmem:[%s13628_s11 + $0x38] sm:$0xff] }
 0xeac   : > { %7050 = vmatpush.msra.mxu2 %v6512_v6  ;;  %7070 = vmatpush.msra.mxu3 %v6528_v62  ;;  %v7145_v6 = vld [vmem:[%s13628_s11 + $0x30] sm:$0xff] }
 0xead   : > { %7090 = vmatpush.msrb.mxu0 %v6544_v23  ;;  %7110 = vmatpush.msrb.mxu1 %v6560_v36  ;;  %v6655_v54 = vpop.f32.mrf.mxu2  ;;  %v6675_v24 = vpop.f32.mrf.mxu3  ;;  %v7144_v23 = vld [vmem:[%s13628_s11 + $0x28] sm:$0xff]  ;;  %v7143_v36 = vld [vmem:[%s13628_s11 + $0x20] sm:$0xff] }
 0xeae   : > { %7051 = vmatpush.msra.mxu2 %v6511_v59  ;;  %7071 = vmatpush.msra.mxu3 %v6527_v56  ;;  %v6656_v19 = vadd.f32 %v6655_v54, %v6581_v9 }
 0xeaf   : > { %7091 = vmatpush.msrb.mxu0 %v6543_v17  ;;  %7111 = vmatpush.msrb.mxu1 %v6559_v51  ;;  %v7142_v17 = vld [vmem:[%s13628_s11 + $0x18] sm:$0xff] }
 0xeb0   : > { %7052 = vmatpush.msra.mxu2 %v6510_v11  ;;  %7072 = vmatpush.msra.mxu3 %v6526_v61  ;;  %v6676_v33 = vadd.f32 %v6675_v24, %v6656_v19  ;;  %v7141_v61 = vld [vmem:[%s13628_s11 + $0x10] sm:$0xff] }
 0xeb1   : > { %7092 = vmatpush.msrb.mxu0 %v6542_v45  ;;  %7112 = vmatpush.msrb.mxu1 %v6558_v34  ;;  %v7140_v45 = vld [vmem:[%s13628_s11 + $0x8] sm:$0xff] }
 0xeb2   : > { %7053 = vmatpush.msra.mxu2 %v6509_v52  ;;  %7073 = vmatpush.msra.mxu3 %v6525_v49  ;;  %v6696_v39 = vadd.f32 %v6695_v57, %v6676_v33  ;;  %v6775_v53 = vpop.f32.mrf.mxu0  ;;  %v6795_v25 = vpop.f32.mrf.mxu1  ;;  %v7155_v33 = vld [vmem:[#allocation19] sm:$0x1] }
 0xeb3   : > { %7093 = vmatpush.msrb.mxu0 %v6541_v32  ;;  %7113 = vmatpush.msrb.mxu1 %v6557_v43  ;;  %v7139_v32 = vld [vmem:[%s13628_s11] sm:$0xff] }
 0xeb4   : > { %7054 = vmatmul.f32.vlgmr.msra.gmra.mxu2 %v6606_v22  ;;  %7074 = vmatmul.f32.vlgmr.msra.gmra.mxu3 %v6607_v55  ;;  %v6716_v2 = vadd.f32 %v6715_v41, %v6696_v39 }
 0xeb5   : > { %7094 = vmatmul.f32.vlgmr.msrb.gmra.mxu0 %v6608_v35  ;;  %7114 = vmatmul.f32.vlgmr.msrb.gmra.mxu1 %v6609_v58 }
 0xeb6   : > { %7126 = vmatpush.msrb.mxu2 %v6580_v47  ;;  %7156 = vmatpush.msrb.mxu3 %v7154_v40 }
 0xeb7   : > { %v6735_v31 = vpop.f32.mrf.mxu2  ;;  %v6755_v7 = vpop.f32.mrf.mxu3 }
 0xeb8   : > { %7127 = vmatpush.msrb.mxu2 %v6579_v16  ;;  %7157 = vmatpush.msrb.mxu3 %v7153_v8  ;;  %v6736_v30 = vadd.f32 %v6735_v31, %v6716_v2 }
 0xeba   : > { %7128 = vmatpush.msrb.mxu2 %v6578_v18  ;;  %7158 = vmatpush.msrb.mxu3 %v7152_v27  ;;  %v6756_v15 = vadd.f32 %v6755_v7, %v6736_v30 }
 0xebc   : > { %7129 = vmatpush.msrb.mxu2 %v6577_v42  ;;  %v6776_v12 = vadd.f32 %v6775_v53, %v6756_v15  ;;  %7159 = vmatpush.msrb.mxu3 %v7151_v0 }
 0xebe   : > { %7130 = vmatpush.msrb.mxu2 %v6576_v21  ;;  %v6796_v4 = vadd.f32 %v6795_v25, %v6776_v12  ;;  %7160 = vmatpush.msrb.mxu3 %v7150_v13 }
 0xec0   : > { %7131 = vmatpush.msrb.mxu2 %v6575_v37  ;;  %7161 = vmatpush.msrb.mxu3 %v7149_v10 }
 0xec2   : > { %7132 = vmatpush.msrb.mxu2 %v6574_v14  ;;  %7162 = vmatpush.msrb.mxu3 %v7148_v28 }
 0xec4   : > { %7133 = vmatpush.msrb.mxu2 %v6573_v3  ;;  %7163 = vmatpush.msrb.mxu3 %v7147_v1 }
 0xec5   : > { %7398 = vmatmul.msk.f32.vlgmr.msrb.gmra.mxu2 %vm6635_vm2, %v7798_v63 }
 0xec6   : > { %7164 = vmatpush.msrb.mxu3 %v7146_v60 }
 0xec8   : > { %7165 = vmatpush.msrb.mxu3 %v7145_v6 }
 0xeca   : > { %7166 = vmatpush.msrb.mxu3 %v7144_v23 }
 0xecc   : > { %7167 = vmatpush.msrb.mxu3 %v7143_v36 }
 0xece   : > { %7168 = vmatpush.msrb.mxu3 %v7142_v17 }
 0xed0   : > { %7169 = vmatpush.msrb.mxu3 %v7141_v61 }
 0xed2   : > { %7170 = vmatpush.msrb.mxu3 %v7140_v45 }
 0xed4   : > { %7171 = vmatpush.msrb.mxu3 %v7139_v32 }
 0xede   : > { %v6855_v44 = vpop.f32.mrf.mxu0  ;;  %v6875_v48 = vpop.f32.mrf.mxu1 }
 0xee3   : > { %v6815_v20 = vpop.f32.mrf.mxu2  ;;  %v6835_v38 = vpop.f32.mrf.mxu3 }
 0xee4   : > { %v6816_v29 = vadd.f32 %v6815_v20, %v6796_v4 }
 0xee6   : > { %v6836_v50 = vadd.f32 %v6835_v38, %v6816_v29 }
 0xee8   : > { %v6856_v26 = vadd.f32 %v6855_v44, %v6836_v50 }
 0xeea   : > { %v6876_v5 = vadd.f32 %v6875_v48, %v6856_v26 }
 0xeee   : > { %v6935_v51 = vpop.f32.mrf.mxu0  ;;  %v6955_v34 = vpop.f32.mrf.mxu1 }
 0xef3   : > { %v6895_v46 = vpop.f32.mrf.mxu2  ;;  %v6915_v59 = vpop.f32.mrf.mxu3 }
 0xef4   : > { %v6896_v62 = vadd.f32 %v6895_v46, %v6876_v5 }
 0xef6   : > { %v6916_v56 = vadd.f32 %v6915_v59, %v6896_v62 }
 0xef8   : > { %v6936_v11 = vadd.f32 %v6935_v51, %v6916_v56 }
 0xefa   : > { %v6956_v49 = vadd.f32 %v6955_v34, %v6936_v11 }
 0xf14   : > { %v7015_v35 = vpop.f32.mrf.mxu0  ;;  %v7035_v47 = vpop.f32.mrf.mxu1 }
 0xf19   : > { %v6975_v52 = vpop.f32.mrf.mxu2  ;;  %v6995_v22 = vpop.f32.mrf.mxu3 }
 0xf1a   : > { %v6976_v43 = vadd.f32 %v6975_v52, %v6956_v49 }
 0xf1c   : > { %v6996_v55 = vadd.f32 %v6995_v22, %v6976_v43 }
 0xf1e   : > { %v7016_v58 = vadd.f32 %v7015_v35, %v6996_v55 }
 0xf20   : > { %v7036_v18 = vadd.f32 %v7035_v47, %v7016_v58 }
 0xf32   : > { %v7095_v14 = vpop.f32.mrf.mxu0  ;;  %v7115_v63 = vpop.f32.mrf.mxu1 }
 0xf37   : > { %v7055_v16 = vpop.f32.mrf.mxu2  ;;  %v7075_v21 = vpop.f32.mrf.mxu3 }
 0xf38   : > { %v7056_v42 = vadd.f32 %v7055_v16, %v7036_v18 }
 0xf3a   : > { %v7076_v37 = vadd.f32 %v7075_v21, %v7056_v42 }
 0xf3c   : > { %v7096_v3 = vadd.f32 %v7095_v14, %v7076_v37 }
 0xf3e   : > { %v7116_v9 = vadd.f32 %v7115_v63, %v7096_v3 }
 0xf48   : > { %v7135_v54 = vpop.f32.mrf.mxu2 }
 0xf49   : > { %v7136_v19 = vadd.f32 %v7135_v54, %v7116_v9 }
 0xf4b   : > { %v7138_v24 = vmax.f32 %v7136_v19, 0.0 }
 0xf4d   : > { %7172 = vmatmul.f32.vlgmr.msrb.gmra.mxu3 %v7138_v24 }
 0xfd0   : > { %v7173_v57 = vpop.f32.mrf.mxu3 }
 0xfd1   : > { %v7174_v39 = vadd.f32 %v7173_v57, %v7155_v33 }
 0xfd3   : > { %7177 = vst.msk [vmem:[%s538_s6] sm:$0x1] %vm7176_vm1, %v7174_v39 }
 0xfd4   : > { %8038 = shalt.err (!%p8035_p8)
}
 0xfd5   : > { %7430 = dma.vmem_to_hbm [thread:$0]  (%p8284_p5), %s7190_s19, 16, %s7192_s16, %s7179_s23  }
 0xfd6 PF: > { %s14616_s18 = sld [smem:[#allocation28_spill]] }
 0xfd7   : > { %s14617_s17 = sld [smem:[#allocation26_spill]] }
 0xfdc   : > { %p7472_p9 = scmp.ge.s32.totalorder %s14616_s18, 2 }
 0xfdd   : > { %s7203_s28 = sand.u32 1, %s14617_s17  }
 0xfde   : > { %p7455_p10 = pnand %p7472_p9, %p8288_p6  ;;  %s7204_s14 = scalar_lea.sflag [#allocation10], %s7203_s28 }
 0xfe0   : > { %p7456_p11 = pneg %p7455_p10 }
 0xfe2   : > { %8072 = dma.done.wait (%p7456_p11), %s7204_s14, 16  }
 0xfe3   : > { %8074 = vsyncadd (%p7456_p11), %s7204_s14, 4294967280  ;;  %s14619_s28 = sld [smem:[#allocation29_spill]]  ;;  %s14622_s25 = smov %s8081_s26 }
 0xfe4   : > { %s14620_s6 = sld [smem:[#allocation27_spill]] }
 0xfe5   : > { %s14621_s27 = sld [smem:[#allocation30_spill]] }
 0xfe9   : > { %p27_p12 = scmp.ge.s32.totalorder %s14619_s28, 4  }
 0xfea   : > { %s14623_s26 = smov %s14620_s6 }
 0xfeb   :  { %29 = sbr.rel (!%p27_p12) target bundleno = 10 (0xa), region = 202 }
 0xff0   :  { %7209 = vsyncpa [#allocation9], 1 }
 0xff1   :  { %7211 = vsyncpa [#allocation9 + $0x1], 1 }
 0xff2   :  { %7212 = vsyncpa [#allocation12], 1 }
 0xff3   :  { %7213 = vsyncpa [#allocation15], 1 }
 0xff4   :  { %7214 = vsyncpa [#allocation18], 1 }
 0xff5   :  { %7215 = vsyncpa [#allocation10], 1 }
 0xff6   :  { %7217 = vsyncpa [#allocation10 + $0x1], 1 }

</bundles_post_ra>
